<compile_context>
chip_gen: v6e
topology: v6e:2x2x1
jax: 0.10.0
libtpu: 0.0.40
codegen_flags: <defaults>
</compile_context>

<pallas_src>
import functools

import jax
import jax.numpy as jnp
import numpy as np
from jax.experimental import pallas as pl
from jax.experimental.pallas import tpu as pltpu

NUM_CHANNELS = 4
NUM_CLASSES = 5
SEQ_LEN = 248            # 8 * ((248 - 4 - 2) // 2) == 968 == fc1 in_features
L1 = SEQ_LEN - 4         # 244 after conv1 (kernel 5, valid)
L2 = L1 - 2              # 242 after conv2 (kernel 3, valid)
L_POOL = L2 // 2         # 121 after MaxPool1d(2)
FEAT = 8 * L_POOL        # 968 flattened features
HIDDEN = 100
ME = L1 // 2             # 122 phase length after conv1
MP = L_POOL              # 121 phase length after conv2 == pooled length
LE_PAD = 128             # lane-dense padded even/odd input-phase length (>= 124)
CH_PAD = 128             # per-channel lane stride in the fused fc1 operand
OUT_PAD = 128            # lane-dense padded class dimension


def _round_up(x, m):
    return (x + m - 1) // m * m


def _default_conv_dtype():
    """bf16 conv math where the VPU supports it (v6e / v7x), else f32."""
    try:
        kind = jax.devices()[0].device_kind.lower()
    except Exception:
        return jnp.float32
    if "v6" in kind or "v7" in kind:
        return jnp.bfloat16
    return jnp.float32


def _choose_tile(n, block_n):
    """Pick batch tile nb and padded batch n_pad.

    Caps nb so the 'parallel' batch grid has >= 2 steps whenever the batch
    allows it, so both v7x TensorCores get work (no cost on v5e/v6e).
    """
    n_ceil = _round_up(max(n, 1), 8)
    nb = min(block_n, n_ceil)
    if n_ceil >= 16:
        nb = min(nb, _round_up((n_ceil + 1) // 2, 8))
    nb = max(8, _round_up(nb, 8))
    n_pad = _round_up(n_ceil, nb)
    return nb, n_pad


def simple_cnn_kernel(w1_s, b1_s, w2_s, b2_s,      # SMEM scalar tables (f32)
                      xp_ref,                      # (2C, NB, LE_PAD) even/odd phases
                      fw1_ref, fb1_ref,            # (8*128, 100) bf16, (1, 100) f32
                      fw2_ref, fb2_ref,            # (100, 128) bf16, (1, 128) f32
                      out_ref,                     # (NB, 128) f32
                      *, conv_dtype):
    cdt = conv_dtype
    C = xp_ref.shape[0] // 2
    NB = xp_ref.shape[1]
    OC1 = b1_s.shape[0]          # 8 conv channels

    def w1(o, i, k):
        return w1_s[(o * C + i) * 5 + k].astype(cdt)

    def w2(o, i, k):
        return w2_s[(o * OC1 + i) * 3 + k].astype(cdt)

    # Shifted even/odd phase windows of each input channel (hoisted; shared by
    # all conv1 output channels).
    xe_sh = [[xp_ref[2 * i, :, d:d + ME] for d in range(3)] for i in range(C)]
    xo_sh = [[xp_ref[2 * i + 1, :, d:d + ME] for d in range(3)] for i in range(C)]

    # ---- conv1 (k=5, valid) + ReLU, polyphase -> h1e/h1o: 8 x (NB, ME) ----
    h1e, h1o = [], []
    for o in range(OC1):
        te, to = [], []
        for i in range(C):
            E, O = xe_sh[i], xo_sh[i]
            c0, c1, c2, c3, c4 = (w1(o, i, 0), w1(o, i, 1), w1(o, i, 2),
                                  w1(o, i, 3), w1(o, i, 4))
            # even output positions 2m: xe[m], xo[m], xe[m+1], xo[m+1], xe[m+2]
            te += [(c0, E[0]), (c1, O[0]), (c2, E[1]), (c3, O[1]), (c4, E[2])]
            # odd output positions 2m+1: xo[m], xe[m+1], xo[m+1], xe[m+2], xo[m+2]
            to += [(c0, O[0]), (c1, E[1]), (c2, O[1]), (c3, E[2]), (c4, O[2])]
        ae = te[0][0] * te[0][1]
        for c, v in te[1:]:
            ae = ae + c * v
        ao = to[0][0] * to[0][1]
        for c, v in to[1:]:
            ao = ao + c * v
        b = b1_s[o].astype(cdt)
        h1e.append(jnp.maximum(ae + b, 0))
        h1o.append(jnp.maximum(ao + b, 0))

    h1e_sh = [[h1e[i][:, d:d + MP] for d in range(2)] for i in range(OC1)]
    h1o_sh = [[h1o[i][:, d:d + MP] for d in range(2)] for i in range(OC1)]

    # ---- conv2 (k=3, valid) + ReLU + MaxPool1d(2) -> pooled: 8 x (NB, MP) ----
    # Dropout(p=0.5) is identity in eval mode.
    # TODO(synk): training-mode dropout (random mask) not implemented.
    pooled = []
    for o in range(OC1):
        te, to = [], []
        for i in range(OC1):
            E, O = h1e_sh[i], h1o_sh[i]
            c0, c1, c2 = w2(o, i, 0), w2(o, i, 1), w2(o, i, 2)
            te += [(c0, E[0]), (c1, O[0]), (c2, E[1])]
            to += [(c0, O[0]), (c1, E[1]), (c2, O[1])]
        ae = te[0][0] * te[0][1]
        for c, v in te[1:]:
            ae = ae + c * v
        ao = to[0][0] * to[0][1]
        for c, v in to[1:]:
            ao = ao + c * v
        b = b2_s[o].astype(cdt)
        h2e = jnp.maximum(ae + b, 0)
        h2o = jnp.maximum(ao + b, 0)
        # MaxPool1d(2): max(h2[2l], h2[2l+1]) == max(even phase, odd phase).
        pooled.append(jnp.maximum(h2e, h2o).astype(jnp.bfloat16))

    # ---- fc1 as ONE MXU dot: (NB, 8*128) x (8*128, 100), bf16 -> f32 acc ----
    lane_pad = jnp.zeros((NB, CH_PAD - MP), jnp.bfloat16)
    pieces = []
    for c in range(OC1):
        pieces.append(pooled[c])
        pieces.append(lane_pad)
    flat = jnp.concatenate(pieces, axis=1)                       # (NB, 1024)
    acc = jnp.dot(flat, fw1_ref[...], preferred_element_type=jnp.float32)
    z1 = jnp.maximum(acc + fb1_ref[...], 0.0)

    # ---- fc2 (lane-dense, 128-wide padded classes) ----
    z2 = jnp.dot(z1.astype(jnp.bfloat16), fw2_ref[...],
                 preferred_element_type=jnp.float32) + fb2_ref[...]

    # One unmasked lane-dense store of the whole batch tile.
    out_ref[...] = z2.astype(out_ref.dtype)


def simple_cnn_forward(x, params, *, block_n=256, conv_dtype=None):
    N, C, L = x.shape
    assert L == SEQ_LEN, f"expected seq len {SEQ_LEN}, got {L}"
    num_classes = params["fw2"].shape[0]
    if conv_dtype is None:
        conv_dtype = _default_conv_dtype()

    nb, n_pad = _choose_tile(N, block_n)

    # ---- wrapper-side relayout (XLA): pack even/odd phases, pad to 128 lanes ----
    xt = jnp.transpose(x.astype(jnp.float32), (1, 0, 2))            # (C, N, L)
    xt = jnp.pad(xt, ((0, 0), (0, n_pad - N), (0, 2 * LE_PAD - L)))
    xr = xt.reshape(C, n_pad, LE_PAD, 2)                            # [..., m, parity]
    xp = jnp.transpose(xr, (0, 3, 1, 2)).reshape(2 * C, n_pad, LE_PAD)
    xp = xp.astype(conv_dtype)

    w1_flat = params["w1"].astype(jnp.float32).reshape(-1)          # (8*C*5,)
    b1 = params["b1"].astype(jnp.float32)                           # (8,)
    w2_flat = params["w2"].astype(jnp.float32).reshape(-1)          # (8*8*3,)
    b2 = params["b2"].astype(jnp.float32)                           # (8,)

    # fc1 weight: fw1p[c*128 + l, h] == fw1[h, c*L_POOL + l]; pad rows are zero.
    fw1r = jnp.transpose(params["fw1"].astype(jnp.float32).reshape(HIDDEN, 8, L_POOL),
                         (1, 2, 0))                                  # (8, 121, 100)
    fw1p = jnp.zeros((8, CH_PAD, HIDDEN), jnp.float32).at[:, :L_POOL, :].set(fw1r)
    fw1p = fw1p.reshape(8 * CH_PAD, HIDDEN).astype(jnp.bfloat16)     # (1024, 100)
    fb1 = params["fb1"].reshape(1, HIDDEN).astype(jnp.float32)

    # fc2 weight/bias padded to 128 lanes for an unmasked lane-dense store.
    fw2p = jnp.zeros((HIDDEN, OUT_PAD), jnp.float32).at[:, :num_classes].set(
        params["fw2"].astype(jnp.float32).T).astype(jnp.bfloat16)    # (100, 128)
    fb2p = jnp.zeros((1, OUT_PAD), jnp.float32).at[:, :num_classes].set(
        params["fb2"].astype(jnp.float32).reshape(1, -1))

    smem = pl.BlockSpec(memory_space=pltpu.MemorySpace.SMEM)

    def full_vmem(a):
        nd = a.ndim
        return pl.BlockSpec(a.shape, lambda i, nd=nd: (0,) * nd)

    kernel = functools.partial(simple_cnn_kernel, conv_dtype=conv_dtype)

    out = pl.pallas_call(
        kernel,
        out_shape=jax.ShapeDtypeStruct((n_pad, OUT_PAD), jnp.float32),
        grid=(n_pad // nb,),
        in_specs=[
            smem, smem, smem, smem,
            pl.BlockSpec((2 * C, nb, LE_PAD), lambda i: (0, i, 0)),
            full_vmem(fw1p), full_vmem(fb1), full_vmem(fw2p), full_vmem(fb2p),
        ],
        out_specs=pl.BlockSpec((nb, OUT_PAD), lambda i: (i, 0)),
        compiler_params=pltpu.CompilerParams(
            dimension_semantics=("parallel",),
            vmem_limit_bytes=48 * 1024 * 1024),
    )(w1_flat, b1, w2_flat, b2, xp, fw1p, fb1, fw2p, fb2p)

    return out[:N, :num_classes]


def reference_forward(x, params):
    """Pure-JAX reference matching the PyTorch forward (eval mode)."""
    hp = jax.lax.Precision.HIGHEST
    dn = ("NCH", "OIH", "NCH")
    y = jax.lax.conv_general_dilated(x, params["w1"], (1,), "VALID",
                                     dimension_numbers=dn, precision=hp)
    y = jnp.maximum(y + params["b1"][None, :, None], 0.0)
    y = jax.lax.conv_general_dilated(y, params["w2"], (1,), "VALID",
                                     dimension_numbers=dn, precision=hp)
    y = jnp.maximum(y + params["b2"][None, :, None], 0.0)
    Lp = (y.shape[2] // 2) * 2
    y = jnp.maximum(y[:, :, 0:Lp:2], y[:, :, 1:Lp:2])       # MaxPool1d(2)
    flat = y.reshape(y.shape[0], -1)
    h = jnp.maximum(jnp.dot(flat, params["fw1"].T, precision=hp) + params["fb1"], 0.0)
    return jnp.dot(h, params["fw2"].T, precision=hp) + params["fb2"]


if __name__ == "__main__":
    key = jax.random.PRNGKey(0)
    ks = jax.random.split(key, 9)
    params = {
        "w1": jax.random.uniform(ks[0], (8, NUM_CHANNELS, 5), jnp.float32, -0.2, 0.2),
        "b1": jax.random.uniform(ks[1], (8,), jnp.float32, -0.2, 0.2),
        "w2": jax.random.uniform(ks[2], (8, 8, 3), jnp.float32, -0.2, 0.2),
        "b2": jax.random.uniform(ks[3], (8,), jnp.float32, -0.2, 0.2),
        "fw1": jax.random.uniform(ks[4], (HIDDEN, FEAT), jnp.float32, -0.05, 0.05),
        "fb1": jax.random.uniform(ks[5], (HIDDEN,), jnp.float32, -0.05, 0.05),
        "fw2": jax.random.uniform(ks[6], (NUM_CLASSES, HIDDEN), jnp.float32, -0.1, 0.1),
        "fb2": jax.random.uniform(ks[7], (NUM_CLASSES,), jnp.float32, -0.1, 0.1),
    }
    x = jax.random.normal(ks[8], (2, NUM_CHANNELS, SEQ_LEN), jnp.float32)

    fwd = jax.jit(functools.partial(simple_cnn_forward, params=params))
    out = jax.block_until_ready(fwd(x))
    ref = reference_forward(x, params)
    np.testing.assert_allclose(np.asarray(out), np.asarray(ref),
                               rtol=2e-2, atol=2e-2)
    print("KERNEL_OK")
</pallas_src>

<mosaic_0001>
module attributes {stable_mosaic.version = 11 : i64} {
  func.func @simple_cnn_kernel(%arg0: i32, %arg1: memref<160xf32, #tpu.memory_space<smem>>, %arg2: memref<8xf32, #tpu.memory_space<smem>>, %arg3: memref<192xf32, #tpu.memory_space<smem>>, %arg4: memref<8xf32, #tpu.memory_space<smem>>, %arg5: memref<8x8x128xf32, #tpu.memory_space<vmem>>, %arg6: memref<1024x100xbf16, #tpu.memory_space<vmem>>, %arg7: memref<1x100xf32, #tpu.memory_space<vmem>>, %arg8: memref<100x128xbf16, #tpu.memory_space<vmem>>, %arg9: memref<1x128xf32, #tpu.memory_space<vmem>>, %arg10: memref<8x128xf32, #tpu.memory_space<vmem>>) attributes {dimension_semantics = [#tpu.dimension_semantics<parallel>], iteration_bounds = array<i64: 1>, scalar_prefetch = 0 : i64, scratch_operands = 0 : i64, tpu.core_type = #tpu.core_type<tc>, window_params = [{transform_indices = @transform_0, window_bounds = array<i64: 160>}, {transform_indices = @transform_1, window_bounds = array<i64: 8>}, {transform_indices = @transform_2, window_bounds = array<i64: 192>}, {transform_indices = @transform_3, window_bounds = array<i64: 8>}, {transform_indices = @transform_4, window_bounds = array<i64: 8, 8, 128>}, {pipeline_mode = #tpu.pipeline_mode<synchronous>, transform_indices = @transform_5, window_bounds = array<i64: 1024, 100>}, {pipeline_mode = #tpu.pipeline_mode<synchronous>, transform_indices = @transform_6, window_bounds = array<i64: 1, 100>}, {pipeline_mode = #tpu.pipeline_mode<synchronous>, transform_indices = @transform_7, window_bounds = array<i64: 100, 128>}, {pipeline_mode = #tpu.pipeline_mode<synchronous>, transform_indices = @transform_8, window_bounds = array<i64: 1, 128>}, {transform_indices = @transform_9, window_bounds = array<i64: 8, 128>}]} {
    %c0 = arith.constant 0 : index
    %c0_0 = arith.constant 0 : index
    %c0_1 = arith.constant 0 : index
    %0 = vector.load %arg5[%c0, %c0_0, %c0_1] : memref<8x8x128xf32, #tpu.memory_space<vmem>>, vector<1x8x122xf32>
    %1 = vector.shape_cast %0 : vector<1x8x122xf32> to vector<8x122xf32>
    %c0_2 = arith.constant 0 : index
    %c0_3 = arith.constant 0 : index
    %c1 = arith.constant 1 : index
    %2 = vector.load %arg5[%c0_2, %c0_3, %c1] : memref<8x8x128xf32, #tpu.memory_space<vmem>>, vector<1x8x122xf32>
    %3 = vector.shape_cast %2 : vector<1x8x122xf32> to vector<8x122xf32>
    %c0_4 = arith.constant 0 : index
    %c0_5 = arith.constant 0 : index
    %c2 = arith.constant 2 : index
    %4 = vector.load %arg5[%c0_4, %c0_5, %c2] : memref<8x8x128xf32, #tpu.memory_space<vmem>>, vector<1x8x122xf32>
    %5 = vector.shape_cast %4 : vector<1x8x122xf32> to vector<8x122xf32>
    %c2_6 = arith.constant 2 : index
    %c0_7 = arith.constant 0 : index
    %c0_8 = arith.constant 0 : index
    %6 = vector.load %arg5[%c2_6, %c0_7, %c0_8] : memref<8x8x128xf32, #tpu.memory_space<vmem>>, vector<1x8x122xf32>
    %7 = vector.shape_cast %6 : vector<1x8x122xf32> to vector<8x122xf32>
    %c2_9 = arith.constant 2 : index
    %c0_10 = arith.constant 0 : index
    %c1_11 = arith.constant 1 : index
    %8 = vector.load %arg5[%c2_9, %c0_10, %c1_11] : memref<8x8x128xf32, #tpu.memory_space<vmem>>, vector<1x8x122xf32>
    %9 = vector.shape_cast %8 : vector<1x8x122xf32> to vector<8x122xf32>
    %c2_12 = arith.constant 2 : index
    %c0_13 = arith.constant 0 : index
    %c2_14 = arith.constant 2 : index
    %10 = vector.load %arg5[%c2_12, %c0_13, %c2_14] : memref<8x8x128xf32, #tpu.memory_space<vmem>>, vector<1x8x122xf32>
    %11 = vector.shape_cast %10 : vector<1x8x122xf32> to vector<8x122xf32>
    %c4 = arith.constant 4 : index
    %c0_15 = arith.constant 0 : index
    %c0_16 = arith.constant 0 : index
    %12 = vector.load %arg5[%c4, %c0_15, %c0_16] : memref<8x8x128xf32, #tpu.memory_space<vmem>>, vector<1x8x122xf32>
    %13 = vector.shape_cast %12 : vector<1x8x122xf32> to vector<8x122xf32>
    %c4_17 = arith.constant 4 : index
    %c0_18 = arith.constant 0 : index
    %c1_19 = arith.constant 1 : index
    %14 = vector.load %arg5[%c4_17, %c0_18, %c1_19] : memref<8x8x128xf32, #tpu.memory_space<vmem>>, vector<1x8x122xf32>
    %15 = vector.shape_cast %14 : vector<1x8x122xf32> to vector<8x122xf32>
    %c4_20 = arith.constant 4 : index
    %c0_21 = arith.constant 0 : index
    %c2_22 = arith.constant 2 : index
    %16 = vector.load %arg5[%c4_20, %c0_21, %c2_22] : memref<8x8x128xf32, #tpu.memory_space<vmem>>, vector<1x8x122xf32>
    %17 = vector.shape_cast %16 : vector<1x8x122xf32> to vector<8x122xf32>
    %c6 = arith.constant 6 : index
    %c0_23 = arith.constant 0 : index
    %c0_24 = arith.constant 0 : index
    %18 = vector.load %arg5[%c6, %c0_23, %c0_24] : memref<8x8x128xf32, #tpu.memory_space<vmem>>, vector<1x8x122xf32>
    %19 = vector.shape_cast %18 : vector<1x8x122xf32> to vector<8x122xf32>
    %c6_25 = arith.constant 6 : index
    %c0_26 = arith.constant 0 : index
    %c1_27 = arith.constant 1 : index
    %20 = vector.load %arg5[%c6_25, %c0_26, %c1_27] : memref<8x8x128xf32, #tpu.memory_space<vmem>>, vector<1x8x122xf32>
    %21 = vector.shape_cast %20 : vector<1x8x122xf32> to vector<8x122xf32>
    %c6_28 = arith.constant 6 : index
    %c0_29 = arith.constant 0 : index
    %c2_30 = arith.constant 2 : index
    %22 = vector.load %arg5[%c6_28, %c0_29, %c2_30] : memref<8x8x128xf32, #tpu.memory_space<vmem>>, vector<1x8x122xf32>
    %23 = vector.shape_cast %22 : vector<1x8x122xf32> to vector<8x122xf32>
    %c1_31 = arith.constant 1 : index
    %c0_32 = arith.constant 0 : index
    %c0_33 = arith.constant 0 : index
    %24 = vector.load %arg5[%c1_31, %c0_32, %c0_33] : memref<8x8x128xf32, #tpu.memory_space<vmem>>, vector<1x8x122xf32>
    %25 = vector.shape_cast %24 : vector<1x8x122xf32> to vector<8x122xf32>
    %c1_34 = arith.constant 1 : index
    %c0_35 = arith.constant 0 : index
    %c1_36 = arith.constant 1 : index
    %26 = vector.load %arg5[%c1_34, %c0_35, %c1_36] : memref<8x8x128xf32, #tpu.memory_space<vmem>>, vector<1x8x122xf32>
    %27 = vector.shape_cast %26 : vector<1x8x122xf32> to vector<8x122xf32>
    %c1_37 = arith.constant 1 : index
    %c0_38 = arith.constant 0 : index
    %c2_39 = arith.constant 2 : index
    %28 = vector.load %arg5[%c1_37, %c0_38, %c2_39] : memref<8x8x128xf32, #tpu.memory_space<vmem>>, vector<1x8x122xf32>
    %29 = vector.shape_cast %28 : vector<1x8x122xf32> to vector<8x122xf32>
    %c3 = arith.constant 3 : index
    %c0_40 = arith.constant 0 : index
    %c0_41 = arith.constant 0 : index
    %30 = vector.load %arg5[%c3, %c0_40, %c0_41] : memref<8x8x128xf32, #tpu.memory_space<vmem>>, vector<1x8x122xf32>
    %31 = vector.shape_cast %30 : vector<1x8x122xf32> to vector<8x122xf32>
    %c3_42 = arith.constant 3 : index
    %c0_43 = arith.constant 0 : index
    %c1_44 = arith.constant 1 : index
    %32 = vector.load %arg5[%c3_42, %c0_43, %c1_44] : memref<8x8x128xf32, #tpu.memory_space<vmem>>, vector<1x8x122xf32>
    %33 = vector.shape_cast %32 : vector<1x8x122xf32> to vector<8x122xf32>
    %c3_45 = arith.constant 3 : index
    %c0_46 = arith.constant 0 : index
    %c2_47 = arith.constant 2 : index
    %34 = vector.load %arg5[%c3_45, %c0_46, %c2_47] : memref<8x8x128xf32, #tpu.memory_space<vmem>>, vector<1x8x122xf32>
    %35 = vector.shape_cast %34 : vector<1x8x122xf32> to vector<8x122xf32>
    %c5 = arith.constant 5 : index
    %c0_48 = arith.constant 0 : index
    %c0_49 = arith.constant 0 : index
    %36 = vector.load %arg5[%c5, %c0_48, %c0_49] : memref<8x8x128xf32, #tpu.memory_space<vmem>>, vector<1x8x122xf32>
    %37 = vector.shape_cast %36 : vector<1x8x122xf32> to vector<8x122xf32>
    %c5_50 = arith.constant 5 : index
    %c0_51 = arith.constant 0 : index
    %c1_52 = arith.constant 1 : index
    %38 = vector.load %arg5[%c5_50, %c0_51, %c1_52] : memref<8x8x128xf32, #tpu.memory_space<vmem>>, vector<1x8x122xf32>
    %39 = vector.shape_cast %38 : vector<1x8x122xf32> to vector<8x122xf32>
    %c5_53 = arith.constant 5 : index
    %c0_54 = arith.constant 0 : index
    %c2_55 = arith.constant 2 : index
    %40 = vector.load %arg5[%c5_53, %c0_54, %c2_55] : memref<8x8x128xf32, #tpu.memory_space<vmem>>, vector<1x8x122xf32>
    %41 = vector.shape_cast %40 : vector<1x8x122xf32> to vector<8x122xf32>
    %c7 = arith.constant 7 : index
    %c0_56 = arith.constant 0 : index
    %c0_57 = arith.constant 0 : index
    %42 = vector.load %arg5[%c7, %c0_56, %c0_57] : memref<8x8x128xf32, #tpu.memory_space<vmem>>, vector<1x8x122xf32>
    %43 = vector.shape_cast %42 : vector<1x8x122xf32> to vector<8x122xf32>
    %c7_58 = arith.constant 7 : index
    %c0_59 = arith.constant 0 : index
    %c1_60 = arith.constant 1 : index
    %44 = vector.load %arg5[%c7_58, %c0_59, %c1_60] : memref<8x8x128xf32, #tpu.memory_space<vmem>>, vector<1x8x122xf32>
    %45 = vector.shape_cast %44 : vector<1x8x122xf32> to vector<8x122xf32>
    %c7_61 = arith.constant 7 : index
    %c0_62 = arith.constant 0 : index
    %c2_63 = arith.constant 2 : index
    %46 = vector.load %arg5[%c7_61, %c0_62, %c2_63] : memref<8x8x128xf32, #tpu.memory_space<vmem>>, vector<1x8x122xf32>
    %47 = vector.shape_cast %46 : vector<1x8x122xf32> to vector<8x122xf32>
    %c0_64 = arith.constant 0 : index
    %48 = memref.load %arg1[%c0_64] : memref<160xf32, #tpu.memory_space<smem>>
    %c1_65 = arith.constant 1 : index
    %49 = memref.load %arg1[%c1_65] : memref<160xf32, #tpu.memory_space<smem>>
    %c2_66 = arith.constant 2 : index
    %50 = memref.load %arg1[%c2_66] : memref<160xf32, #tpu.memory_space<smem>>
    %c3_67 = arith.constant 3 : index
    %51 = memref.load %arg1[%c3_67] : memref<160xf32, #tpu.memory_space<smem>>
    %c4_68 = arith.constant 4 : index
    %52 = memref.load %arg1[%c4_68] : memref<160xf32, #tpu.memory_space<smem>>
    %c5_69 = arith.constant 5 : index
    %53 = memref.load %arg1[%c5_69] : memref<160xf32, #tpu.memory_space<smem>>
    %c6_70 = arith.constant 6 : index
    %54 = memref.load %arg1[%c6_70] : memref<160xf32, #tpu.memory_space<smem>>
    %c7_71 = arith.constant 7 : index
    %55 = memref.load %arg1[%c7_71] : memref<160xf32, #tpu.memory_space<smem>>
    %c8 = arith.constant 8 : index
    %56 = memref.load %arg1[%c8] : memref<160xf32, #tpu.memory_space<smem>>
    %c9 = arith.constant 9 : index
    %57 = memref.load %arg1[%c9] : memref<160xf32, #tpu.memory_space<smem>>
    %c10 = arith.constant 10 : index
    %58 = memref.load %arg1[%c10] : memref<160xf32, #tpu.memory_space<smem>>
    %c11 = arith.constant 11 : index
    %59 = memref.load %arg1[%c11] : memref<160xf32, #tpu.memory_space<smem>>
    %c12 = arith.constant 12 : index
    %60 = memref.load %arg1[%c12] : memref<160xf32, #tpu.memory_space<smem>>
    %c13 = arith.constant 13 : index
    %61 = memref.load %arg1[%c13] : memref<160xf32, #tpu.memory_space<smem>>
    %c14 = arith.constant 14 : index
    %62 = memref.load %arg1[%c14] : memref<160xf32, #tpu.memory_space<smem>>
    %c15 = arith.constant 15 : index
    %63 = memref.load %arg1[%c15] : memref<160xf32, #tpu.memory_space<smem>>
    %c16 = arith.constant 16 : index
    %64 = memref.load %arg1[%c16] : memref<160xf32, #tpu.memory_space<smem>>
    %c17 = arith.constant 17 : index
    %65 = memref.load %arg1[%c17] : memref<160xf32, #tpu.memory_space<smem>>
    %c18 = arith.constant 18 : index
    %66 = memref.load %arg1[%c18] : memref<160xf32, #tpu.memory_space<smem>>
    %c19 = arith.constant 19 : index
    %67 = memref.load %arg1[%c19] : memref<160xf32, #tpu.memory_space<smem>>
    %68 = vector.broadcast %48 : f32 to vector<8x122xf32>
    %69 = arith.mulf %68, %1 : vector<8x122xf32>
    %70 = vector.broadcast %49 : f32 to vector<8x122xf32>
    %71 = arith.mulf %70, %25 : vector<8x122xf32>
    %72 = arith.addf %69, %71 : vector<8x122xf32>
    %73 = vector.broadcast %50 : f32 to vector<8x122xf32>
    %74 = arith.mulf %73, %3 : vector<8x122xf32>
    %75 = arith.addf %72, %74 : vector<8x122xf32>
    %76 = vector.broadcast %51 : f32 to vector<8x122xf32>
    %77 = arith.mulf %76, %27 : vector<8x122xf32>
    %78 = arith.addf %75, %77 : vector<8x122xf32>
    %79 = vector.broadcast %52 : f32 to vector<8x122xf32>
    %80 = arith.mulf %79, %5 : vector<8x122xf32>
    %81 = arith.addf %78, %80 : vector<8x122xf32>
    %82 = vector.broadcast %53 : f32 to vector<8x122xf32>
    %83 = arith.mulf %82, %7 : vector<8x122xf32>
    %84 = arith.addf %81, %83 : vector<8x122xf32>
    %85 = vector.broadcast %54 : f32 to vector<8x122xf32>
    %86 = arith.mulf %85, %31 : vector<8x122xf32>
    %87 = arith.addf %84, %86 : vector<8x122xf32>
    %88 = vector.broadcast %55 : f32 to vector<8x122xf32>
    %89 = arith.mulf %88, %9 : vector<8x122xf32>
    %90 = arith.addf %87, %89 : vector<8x122xf32>
    %91 = vector.broadcast %56 : f32 to vector<8x122xf32>
    %92 = arith.mulf %91, %33 : vector<8x122xf32>
    %93 = arith.addf %90, %92 : vector<8x122xf32>
    %94 = vector.broadcast %57 : f32 to vector<8x122xf32>
    %95 = arith.mulf %94, %11 : vector<8x122xf32>
    %96 = arith.addf %93, %95 : vector<8x122xf32>
    %97 = vector.broadcast %58 : f32 to vector<8x122xf32>
    %98 = arith.mulf %97, %13 : vector<8x122xf32>
    %99 = arith.addf %96, %98 : vector<8x122xf32>
    %100 = vector.broadcast %59 : f32 to vector<8x122xf32>
    %101 = arith.mulf %100, %37 : vector<8x122xf32>
    %102 = arith.addf %99, %101 : vector<8x122xf32>
    %103 = vector.broadcast %60 : f32 to vector<8x122xf32>
    %104 = arith.mulf %103, %15 : vector<8x122xf32>
    %105 = arith.addf %102, %104 : vector<8x122xf32>
    %106 = vector.broadcast %61 : f32 to vector<8x122xf32>
    %107 = arith.mulf %106, %39 : vector<8x122xf32>
    %108 = arith.addf %105, %107 : vector<8x122xf32>
    %109 = vector.broadcast %62 : f32 to vector<8x122xf32>
    %110 = arith.mulf %109, %17 : vector<8x122xf32>
    %111 = arith.addf %108, %110 : vector<8x122xf32>
    %112 = vector.broadcast %63 : f32 to vector<8x122xf32>
    %113 = arith.mulf %112, %19 : vector<8x122xf32>
    %114 = arith.addf %111, %113 : vector<8x122xf32>
    %115 = vector.broadcast %64 : f32 to vector<8x122xf32>
    %116 = arith.mulf %115, %43 : vector<8x122xf32>
    %117 = arith.addf %114, %116 : vector<8x122xf32>
    %118 = vector.broadcast %65 : f32 to vector<8x122xf32>
    %119 = arith.mulf %118, %21 : vector<8x122xf32>
    %120 = arith.addf %117, %119 : vector<8x122xf32>
    %121 = vector.broadcast %66 : f32 to vector<8x122xf32>
    %122 = arith.mulf %121, %45 : vector<8x122xf32>
    %123 = arith.addf %120, %122 : vector<8x122xf32>
    %124 = vector.broadcast %67 : f32 to vector<8x122xf32>
    %125 = arith.mulf %124, %23 : vector<8x122xf32>
    %126 = arith.addf %123, %125 : vector<8x122xf32>
    %127 = vector.broadcast %48 : f32 to vector<8x122xf32>
    %128 = arith.mulf %127, %25 : vector<8x122xf32>
    %129 = vector.broadcast %49 : f32 to vector<8x122xf32>
    %130 = arith.mulf %129, %3 : vector<8x122xf32>
    %131 = arith.addf %128, %130 : vector<8x122xf32>
    %132 = vector.broadcast %50 : f32 to vector<8x122xf32>
    %133 = arith.mulf %132, %27 : vector<8x122xf32>
    %134 = arith.addf %131, %133 : vector<8x122xf32>
    %135 = vector.broadcast %51 : f32 to vector<8x122xf32>
    %136 = arith.mulf %135, %5 : vector<8x122xf32>
    %137 = arith.addf %134, %136 : vector<8x122xf32>
    %138 = vector.broadcast %52 : f32 to vector<8x122xf32>
    %139 = arith.mulf %138, %29 : vector<8x122xf32>
    %140 = arith.addf %137, %139 : vector<8x122xf32>
    %141 = vector.broadcast %53 : f32 to vector<8x122xf32>
    %142 = arith.mulf %141, %31 : vector<8x122xf32>
    %143 = arith.addf %140, %142 : vector<8x122xf32>
    %144 = vector.broadcast %54 : f32 to vector<8x122xf32>
    %145 = arith.mulf %144, %9 : vector<8x122xf32>
    %146 = arith.addf %143, %145 : vector<8x122xf32>
    %147 = vector.broadcast %55 : f32 to vector<8x122xf32>
    %148 = arith.mulf %147, %33 : vector<8x122xf32>
    %149 = arith.addf %146, %148 : vector<8x122xf32>
    %150 = vector.broadcast %56 : f32 to vector<8x122xf32>
    %151 = arith.mulf %150, %11 : vector<8x122xf32>
    %152 = arith.addf %149, %151 : vector<8x122xf32>
    %153 = vector.broadcast %57 : f32 to vector<8x122xf32>
    %154 = arith.mulf %153, %35 : vector<8x122xf32>
    %155 = arith.addf %152, %154 : vector<8x122xf32>
    %156 = vector.broadcast %58 : f32 to vector<8x122xf32>
    %157 = arith.mulf %156, %37 : vector<8x122xf32>
    %158 = arith.addf %155, %157 : vector<8x122xf32>
    %159 = vector.broadcast %59 : f32 to vector<8x122xf32>
    %160 = arith.mulf %159, %15 : vector<8x122xf32>
    %161 = arith.addf %158, %160 : vector<8x122xf32>
    %162 = vector.broadcast %60 : f32 to vector<8x122xf32>
    %163 = arith.mulf %162, %39 : vector<8x122xf32>
    %164 = arith.addf %161, %163 : vector<8x122xf32>
    %165 = vector.broadcast %61 : f32 to vector<8x122xf32>
    %166 = arith.mulf %165, %17 : vector<8x122xf32>
    %167 = arith.addf %164, %166 : vector<8x122xf32>
    %168 = vector.broadcast %62 : f32 to vector<8x122xf32>
    %169 = arith.mulf %168, %41 : vector<8x122xf32>
    %170 = arith.addf %167, %169 : vector<8x122xf32>
    %171 = vector.broadcast %63 : f32 to vector<8x122xf32>
    %172 = arith.mulf %171, %43 : vector<8x122xf32>
    %173 = arith.addf %170, %172 : vector<8x122xf32>
    %174 = vector.broadcast %64 : f32 to vector<8x122xf32>
    %175 = arith.mulf %174, %21 : vector<8x122xf32>
    %176 = arith.addf %173, %175 : vector<8x122xf32>
    %177 = vector.broadcast %65 : f32 to vector<8x122xf32>
    %178 = arith.mulf %177, %45 : vector<8x122xf32>
    %179 = arith.addf %176, %178 : vector<8x122xf32>
    %180 = vector.broadcast %66 : f32 to vector<8x122xf32>
    %181 = arith.mulf %180, %23 : vector<8x122xf32>
    %182 = arith.addf %179, %181 : vector<8x122xf32>
    %183 = vector.broadcast %67 : f32 to vector<8x122xf32>
    %184 = arith.mulf %183, %47 : vector<8x122xf32>
    %185 = arith.addf %182, %184 : vector<8x122xf32>
    %c0_72 = arith.constant 0 : index
    %186 = memref.load %arg2[%c0_72] : memref<8xf32, #tpu.memory_space<smem>>
    %187 = vector.broadcast %186 : f32 to vector<8x122xf32>
    %188 = arith.addf %126, %187 : vector<8x122xf32>
    %cst = arith.constant 0.000000e+00 : f32
    %189 = vector.broadcast %cst : f32 to vector<8x122xf32>
    %190 = arith.maximumf %188, %189 : vector<8x122xf32>
    %191 = vector.broadcast %186 : f32 to vector<8x122xf32>
    %192 = arith.addf %185, %191 : vector<8x122xf32>
    %cst_73 = arith.constant 0.000000e+00 : f32
    %193 = vector.broadcast %cst_73 : f32 to vector<8x122xf32>
    %194 = arith.maximumf %192, %193 : vector<8x122xf32>
    %c20 = arith.constant 20 : index
    %195 = memref.load %arg1[%c20] : memref<160xf32, #tpu.memory_space<smem>>
    %c21 = arith.constant 21 : index
    %196 = memref.load %arg1[%c21] : memref<160xf32, #tpu.memory_space<smem>>
    %c22 = arith.constant 22 : index
    %197 = memref.load %arg1[%c22] : memref<160xf32, #tpu.memory_space<smem>>
    %c23 = arith.constant 23 : index
    %198 = memref.load %arg1[%c23] : memref<160xf32, #tpu.memory_space<smem>>
    %c24 = arith.constant 24 : index
    %199 = memref.load %arg1[%c24] : memref<160xf32, #tpu.memory_space<smem>>
    %c25 = arith.constant 25 : index
    %200 = memref.load %arg1[%c25] : memref<160xf32, #tpu.memory_space<smem>>
    %c26 = arith.constant 26 : index
    %201 = memref.load %arg1[%c26] : memref<160xf32, #tpu.memory_space<smem>>
    %c27 = arith.constant 27 : index
    %202 = memref.load %arg1[%c27] : memref<160xf32, #tpu.memory_space<smem>>
    %c28 = arith.constant 28 : index
    %203 = memref.load %arg1[%c28] : memref<160xf32, #tpu.memory_space<smem>>
    %c29 = arith.constant 29 : index
    %204 = memref.load %arg1[%c29] : memref<160xf32, #tpu.memory_space<smem>>
    %c30 = arith.constant 30 : index
    %205 = memref.load %arg1[%c30] : memref<160xf32, #tpu.memory_space<smem>>
    %c31 = arith.constant 31 : index
    %206 = memref.load %arg1[%c31] : memref<160xf32, #tpu.memory_space<smem>>
    %c32 = arith.constant 32 : index
    %207 = memref.load %arg1[%c32] : memref<160xf32, #tpu.memory_space<smem>>
    %c33 = arith.constant 33 : index
    %208 = memref.load %arg1[%c33] : memref<160xf32, #tpu.memory_space<smem>>
    %c34 = arith.constant 34 : index
    %209 = memref.load %arg1[%c34] : memref<160xf32, #tpu.memory_space<smem>>
    %c35 = arith.constant 35 : index
    %210 = memref.load %arg1[%c35] : memref<160xf32, #tpu.memory_space<smem>>
    %c36 = arith.constant 36 : index
    %211 = memref.load %arg1[%c36] : memref<160xf32, #tpu.memory_space<smem>>
    %c37 = arith.constant 37 : index
    %212 = memref.load %arg1[%c37] : memref<160xf32, #tpu.memory_space<smem>>
    %c38 = arith.constant 38 : index
    %213 = memref.load %arg1[%c38] : memref<160xf32, #tpu.memory_space<smem>>
    %c39 = arith.constant 39 : index
    %214 = memref.load %arg1[%c39] : memref<160xf32, #tpu.memory_space<smem>>
    %215 = vector.broadcast %195 : f32 to vector<8x122xf32>
    %216 = arith.mulf %215, %1 : vector<8x122xf32>
    %217 = vector.broadcast %196 : f32 to vector<8x122xf32>
    %218 = arith.mulf %217, %25 : vector<8x122xf32>
    %219 = arith.addf %216, %218 : vector<8x122xf32>
    %220 = vector.broadcast %197 : f32 to vector<8x122xf32>
    %221 = arith.mulf %220, %3 : vector<8x122xf32>
    %222 = arith.addf %219, %221 : vector<8x122xf32>
    %223 = vector.broadcast %198 : f32 to vector<8x122xf32>
    %224 = arith.mulf %223, %27 : vector<8x122xf32>
    %225 = arith.addf %222, %224 : vector<8x122xf32>
    %226 = vector.broadcast %199 : f32 to vector<8x122xf32>
    %227 = arith.mulf %226, %5 : vector<8x122xf32>
    %228 = arith.addf %225, %227 : vector<8x122xf32>
    %229 = vector.broadcast %200 : f32 to vector<8x122xf32>
    %230 = arith.mulf %229, %7 : vector<8x122xf32>
    %231 = arith.addf %228, %230 : vector<8x122xf32>
    %232 = vector.broadcast %201 : f32 to vector<8x122xf32>
    %233 = arith.mulf %232, %31 : vector<8x122xf32>
    %234 = arith.addf %231, %233 : vector<8x122xf32>
    %235 = vector.broadcast %202 : f32 to vector<8x122xf32>
    %236 = arith.mulf %235, %9 : vector<8x122xf32>
    %237 = arith.addf %234, %236 : vector<8x122xf32>
    %238 = vector.broadcast %203 : f32 to vector<8x122xf32>
    %239 = arith.mulf %238, %33 : vector<8x122xf32>
    %240 = arith.addf %237, %239 : vector<8x122xf32>
    %241 = vector.broadcast %204 : f32 to vector<8x122xf32>
    %242 = arith.mulf %241, %11 : vector<8x122xf32>
    %243 = arith.addf %240, %242 : vector<8x122xf32>
    %244 = vector.broadcast %205 : f32 to vector<8x122xf32>
    %245 = arith.mulf %244, %13 : vector<8x122xf32>
    %246 = arith.addf %243, %245 : vector<8x122xf32>
    %247 = vector.broadcast %206 : f32 to vector<8x122xf32>
    %248 = arith.mulf %247, %37 : vector<8x122xf32>
    %249 = arith.addf %246, %248 : vector<8x122xf32>
    %250 = vector.broadcast %207 : f32 to vector<8x122xf32>
    %251 = arith.mulf %250, %15 : vector<8x122xf32>
    %252 = arith.addf %249, %251 : vector<8x122xf32>
    %253 = vector.broadcast %208 : f32 to vector<8x122xf32>
    %254 = arith.mulf %253, %39 : vector<8x122xf32>
    %255 = arith.addf %252, %254 : vector<8x122xf32>
    %256 = vector.broadcast %209 : f32 to vector<8x122xf32>
    %257 = arith.mulf %256, %17 : vector<8x122xf32>
    %258 = arith.addf %255, %257 : vector<8x122xf32>
    %259 = vector.broadcast %210 : f32 to vector<8x122xf32>
    %260 = arith.mulf %259, %19 : vector<8x122xf32>
    %261 = arith.addf %258, %260 : vector<8x122xf32>
    %262 = vector.broadcast %211 : f32 to vector<8x122xf32>
    %263 = arith.mulf %262, %43 : vector<8x122xf32>
    %264 = arith.addf %261, %263 : vector<8x122xf32>
    %265 = vector.broadcast %212 : f32 to vector<8x122xf32>
    %266 = arith.mulf %265, %21 : vector<8x122xf32>
    %267 = arith.addf %264, %266 : vector<8x122xf32>
    %268 = vector.broadcast %213 : f32 to vector<8x122xf32>
    %269 = arith.mulf %268, %45 : vector<8x122xf32>
    %270 = arith.addf %267, %269 : vector<8x122xf32>
    %271 = vector.broadcast %214 : f32 to vector<8x122xf32>
    %272 = arith.mulf %271, %23 : vector<8x122xf32>
    %273 = arith.addf %270, %272 : vector<8x122xf32>
    %274 = vector.broadcast %195 : f32 to vector<8x122xf32>
    %275 = arith.mulf %274, %25 : vector<8x122xf32>
    %276 = vector.broadcast %196 : f32 to vector<8x122xf32>
    %277 = arith.mulf %276, %3 : vector<8x122xf32>
    %278 = arith.addf %275, %277 : vector<8x122xf32>
    %279 = vector.broadcast %197 : f32 to vector<8x122xf32>
    %280 = arith.mulf %279, %27 : vector<8x122xf32>
    %281 = arith.addf %278, %280 : vector<8x122xf32>
    %282 = vector.broadcast %198 : f32 to vector<8x122xf32>
    %283 = arith.mulf %282, %5 : vector<8x122xf32>
    %284 = arith.addf %281, %283 : vector<8x122xf32>
    %285 = vector.broadcast %199 : f32 to vector<8x122xf32>
    %286 = arith.mulf %285, %29 : vector<8x122xf32>
    %287 = arith.addf %284, %286 : vector<8x122xf32>
    %288 = vector.broadcast %200 : f32 to vector<8x122xf32>
    %289 = arith.mulf %288, %31 : vector<8x122xf32>
    %290 = arith.addf %287, %289 : vector<8x122xf32>
    %291 = vector.broadcast %201 : f32 to vector<8x122xf32>
    %292 = arith.mulf %291, %9 : vector<8x122xf32>
    %293 = arith.addf %290, %292 : vector<8x122xf32>
    %294 = vector.broadcast %202 : f32 to vector<8x122xf32>
    %295 = arith.mulf %294, %33 : vector<8x122xf32>
    %296 = arith.addf %293, %295 : vector<8x122xf32>
    %297 = vector.broadcast %203 : f32 to vector<8x122xf32>
    %298 = arith.mulf %297, %11 : vector<8x122xf32>
    %299 = arith.addf %296, %298 : vector<8x122xf32>
    %300 = vector.broadcast %204 : f32 to vector<8x122xf32>
    %301 = arith.mulf %300, %35 : vector<8x122xf32>
    %302 = arith.addf %299, %301 : vector<8x122xf32>
    %303 = vector.broadcast %205 : f32 to vector<8x122xf32>
    %304 = arith.mulf %303, %37 : vector<8x122xf32>
    %305 = arith.addf %302, %304 : vector<8x122xf32>
    %306 = vector.broadcast %206 : f32 to vector<8x122xf32>
    %307 = arith.mulf %306, %15 : vector<8x122xf32>
    %308 = arith.addf %305, %307 : vector<8x122xf32>
    %309 = vector.broadcast %207 : f32 to vector<8x122xf32>
    %310 = arith.mulf %309, %39 : vector<8x122xf32>
    %311 = arith.addf %308, %310 : vector<8x122xf32>
    %312 = vector.broadcast %208 : f32 to vector<8x122xf32>
    %313 = arith.mulf %312, %17 : vector<8x122xf32>
    %314 = arith.addf %311, %313 : vector<8x122xf32>
    %315 = vector.broadcast %209 : f32 to vector<8x122xf32>
    %316 = arith.mulf %315, %41 : vector<8x122xf32>
    %317 = arith.addf %314, %316 : vector<8x122xf32>
    %318 = vector.broadcast %210 : f32 to vector<8x122xf32>
    %319 = arith.mulf %318, %43 : vector<8x122xf32>
    %320 = arith.addf %317, %319 : vector<8x122xf32>
    %321 = vector.broadcast %211 : f32 to vector<8x122xf32>
    %322 = arith.mulf %321, %21 : vector<8x122xf32>
    %323 = arith.addf %320, %322 : vector<8x122xf32>
    %324 = vector.broadcast %212 : f32 to vector<8x122xf32>
    %325 = arith.mulf %324, %45 : vector<8x122xf32>
    %326 = arith.addf %323, %325 : vector<8x122xf32>
    %327 = vector.broadcast %213 : f32 to vector<8x122xf32>
    %328 = arith.mulf %327, %23 : vector<8x122xf32>
    %329 = arith.addf %326, %328 : vector<8x122xf32>
    %330 = vector.broadcast %214 : f32 to vector<8x122xf32>
    %331 = arith.mulf %330, %47 : vector<8x122xf32>
    %332 = arith.addf %329, %331 : vector<8x122xf32>
    %c1_74 = arith.constant 1 : index
    %333 = memref.load %arg2[%c1_74] : memref<8xf32, #tpu.memory_space<smem>>
    %334 = vector.broadcast %333 : f32 to vector<8x122xf32>
    %335 = arith.addf %273, %334 : vector<8x122xf32>
    %cst_75 = arith.constant 0.000000e+00 : f32
    %336 = vector.broadcast %cst_75 : f32 to vector<8x122xf32>
    %337 = arith.maximumf %335, %336 : vector<8x122xf32>
    %338 = vector.broadcast %333 : f32 to vector<8x122xf32>
    %339 = arith.addf %332, %338 : vector<8x122xf32>
    %cst_76 = arith.constant 0.000000e+00 : f32
    %340 = vector.broadcast %cst_76 : f32 to vector<8x122xf32>
    %341 = arith.maximumf %339, %340 : vector<8x122xf32>
    %c40 = arith.constant 40 : index
    %342 = memref.load %arg1[%c40] : memref<160xf32, #tpu.memory_space<smem>>
    %c41 = arith.constant 41 : index
    %343 = memref.load %arg1[%c41] : memref<160xf32, #tpu.memory_space<smem>>
    %c42 = arith.constant 42 : index
    %344 = memref.load %arg1[%c42] : memref<160xf32, #tpu.memory_space<smem>>
    %c43 = arith.constant 43 : index
    %345 = memref.load %arg1[%c43] : memref<160xf32, #tpu.memory_space<smem>>
    %c44 = arith.constant 44 : index
    %346 = memref.load %arg1[%c44] : memref<160xf32, #tpu.memory_space<smem>>
    %c45 = arith.constant 45 : index
    %347 = memref.load %arg1[%c45] : memref<160xf32, #tpu.memory_space<smem>>
    %c46 = arith.constant 46 : index
    %348 = memref.load %arg1[%c46] : memref<160xf32, #tpu.memory_space<smem>>
    %c47 = arith.constant 47 : index
    %349 = memref.load %arg1[%c47] : memref<160xf32, #tpu.memory_space<smem>>
    %c48 = arith.constant 48 : index
    %350 = memref.load %arg1[%c48] : memref<160xf32, #tpu.memory_space<smem>>
    %c49 = arith.constant 49 : index
    %351 = memref.load %arg1[%c49] : memref<160xf32, #tpu.memory_space<smem>>
    %c50 = arith.constant 50 : index
    %352 = memref.load %arg1[%c50] : memref<160xf32, #tpu.memory_space<smem>>
    %c51 = arith.constant 51 : index
    %353 = memref.load %arg1[%c51] : memref<160xf32, #tpu.memory_space<smem>>
    %c52 = arith.constant 52 : index
    %354 = memref.load %arg1[%c52] : memref<160xf32, #tpu.memory_space<smem>>
    %c53 = arith.constant 53 : index
    %355 = memref.load %arg1[%c53] : memref<160xf32, #tpu.memory_space<smem>>
    %c54 = arith.constant 54 : index
    %356 = memref.load %arg1[%c54] : memref<160xf32, #tpu.memory_space<smem>>
    %c55 = arith.constant 55 : index
    %357 = memref.load %arg1[%c55] : memref<160xf32, #tpu.memory_space<smem>>
    %c56 = arith.constant 56 : index
    %358 = memref.load %arg1[%c56] : memref<160xf32, #tpu.memory_space<smem>>
    %c57 = arith.constant 57 : index
    %359 = memref.load %arg1[%c57] : memref<160xf32, #tpu.memory_space<smem>>
    %c58 = arith.constant 58 : index
    %360 = memref.load %arg1[%c58] : memref<160xf32, #tpu.memory_space<smem>>
    %c59 = arith.constant 59 : index
    %361 = memref.load %arg1[%c59] : memref<160xf32, #tpu.memory_space<smem>>
    %362 = vector.broadcast %342 : f32 to vector<8x122xf32>
    %363 = arith.mulf %362, %1 : vector<8x122xf32>
    %364 = vector.broadcast %343 : f32 to vector<8x122xf32>
    %365 = arith.mulf %364, %25 : vector<8x122xf32>
    %366 = arith.addf %363, %365 : vector<8x122xf32>
    %367 = vector.broadcast %344 : f32 to vector<8x122xf32>
    %368 = arith.mulf %367, %3 : vector<8x122xf32>
    %369 = arith.addf %366, %368 : vector<8x122xf32>
    %370 = vector.broadcast %345 : f32 to vector<8x122xf32>
    %371 = arith.mulf %370, %27 : vector<8x122xf32>
    %372 = arith.addf %369, %371 : vector<8x122xf32>
    %373 = vector.broadcast %346 : f32 to vector<8x122xf32>
    %374 = arith.mulf %373, %5 : vector<8x122xf32>
    %375 = arith.addf %372, %374 : vector<8x122xf32>
    %376 = vector.broadcast %347 : f32 to vector<8x122xf32>
    %377 = arith.mulf %376, %7 : vector<8x122xf32>
    %378 = arith.addf %375, %377 : vector<8x122xf32>
    %379 = vector.broadcast %348 : f32 to vector<8x122xf32>
    %380 = arith.mulf %379, %31 : vector<8x122xf32>
    %381 = arith.addf %378, %380 : vector<8x122xf32>
    %382 = vector.broadcast %349 : f32 to vector<8x122xf32>
    %383 = arith.mulf %382, %9 : vector<8x122xf32>
    %384 = arith.addf %381, %383 : vector<8x122xf32>
    %385 = vector.broadcast %350 : f32 to vector<8x122xf32>
    %386 = arith.mulf %385, %33 : vector<8x122xf32>
    %387 = arith.addf %384, %386 : vector<8x122xf32>
    %388 = vector.broadcast %351 : f32 to vector<8x122xf32>
    %389 = arith.mulf %388, %11 : vector<8x122xf32>
    %390 = arith.addf %387, %389 : vector<8x122xf32>
    %391 = vector.broadcast %352 : f32 to vector<8x122xf32>
    %392 = arith.mulf %391, %13 : vector<8x122xf32>
    %393 = arith.addf %390, %392 : vector<8x122xf32>
    %394 = vector.broadcast %353 : f32 to vector<8x122xf32>
    %395 = arith.mulf %394, %37 : vector<8x122xf32>
    %396 = arith.addf %393, %395 : vector<8x122xf32>
    %397 = vector.broadcast %354 : f32 to vector<8x122xf32>
    %398 = arith.mulf %397, %15 : vector<8x122xf32>
    %399 = arith.addf %396, %398 : vector<8x122xf32>
    %400 = vector.broadcast %355 : f32 to vector<8x122xf32>
    %401 = arith.mulf %400, %39 : vector<8x122xf32>
    %402 = arith.addf %399, %401 : vector<8x122xf32>
    %403 = vector.broadcast %356 : f32 to vector<8x122xf32>
    %404 = arith.mulf %403, %17 : vector<8x122xf32>
    %405 = arith.addf %402, %404 : vector<8x122xf32>
    %406 = vector.broadcast %357 : f32 to vector<8x122xf32>
    %407 = arith.mulf %406, %19 : vector<8x122xf32>
    %408 = arith.addf %405, %407 : vector<8x122xf32>
    %409 = vector.broadcast %358 : f32 to vector<8x122xf32>
    %410 = arith.mulf %409, %43 : vector<8x122xf32>
    %411 = arith.addf %408, %410 : vector<8x122xf32>
    %412 = vector.broadcast %359 : f32 to vector<8x122xf32>
    %413 = arith.mulf %412, %21 : vector<8x122xf32>
    %414 = arith.addf %411, %413 : vector<8x122xf32>
    %415 = vector.broadcast %360 : f32 to vector<8x122xf32>
    %416 = arith.mulf %415, %45 : vector<8x122xf32>
    %417 = arith.addf %414, %416 : vector<8x122xf32>
    %418 = vector.broadcast %361 : f32 to vector<8x122xf32>
    %419 = arith.mulf %418, %23 : vector<8x122xf32>
    %420 = arith.addf %417, %419 : vector<8x122xf32>
    %421 = vector.broadcast %342 : f32 to vector<8x122xf32>
    %422 = arith.mulf %421, %25 : vector<8x122xf32>
    %423 = vector.broadcast %343 : f32 to vector<8x122xf32>
    %424 = arith.mulf %423, %3 : vector<8x122xf32>
    %425 = arith.addf %422, %424 : vector<8x122xf32>
    %426 = vector.broadcast %344 : f32 to vector<8x122xf32>
    %427 = arith.mulf %426, %27 : vector<8x122xf32>
    %428 = arith.addf %425, %427 : vector<8x122xf32>
    %429 = vector.broadcast %345 : f32 to vector<8x122xf32>
    %430 = arith.mulf %429, %5 : vector<8x122xf32>
    %431 = arith.addf %428, %430 : vector<8x122xf32>
    %432 = vector.broadcast %346 : f32 to vector<8x122xf32>
    %433 = arith.mulf %432, %29 : vector<8x122xf32>
    %434 = arith.addf %431, %433 : vector<8x122xf32>
    %435 = vector.broadcast %347 : f32 to vector<8x122xf32>
    %436 = arith.mulf %435, %31 : vector<8x122xf32>
    %437 = arith.addf %434, %436 : vector<8x122xf32>
    %438 = vector.broadcast %348 : f32 to vector<8x122xf32>
    %439 = arith.mulf %438, %9 : vector<8x122xf32>
    %440 = arith.addf %437, %439 : vector<8x122xf32>
    %441 = vector.broadcast %349 : f32 to vector<8x122xf32>
    %442 = arith.mulf %441, %33 : vector<8x122xf32>
    %443 = arith.addf %440, %442 : vector<8x122xf32>
    %444 = vector.broadcast %350 : f32 to vector<8x122xf32>
    %445 = arith.mulf %444, %11 : vector<8x122xf32>
    %446 = arith.addf %443, %445 : vector<8x122xf32>
    %447 = vector.broadcast %351 : f32 to vector<8x122xf32>
    %448 = arith.mulf %447, %35 : vector<8x122xf32>
    %449 = arith.addf %446, %448 : vector<8x122xf32>
    %450 = vector.broadcast %352 : f32 to vector<8x122xf32>
    %451 = arith.mulf %450, %37 : vector<8x122xf32>
    %452 = arith.addf %449, %451 : vector<8x122xf32>
    %453 = vector.broadcast %353 : f32 to vector<8x122xf32>
    %454 = arith.mulf %453, %15 : vector<8x122xf32>
    %455 = arith.addf %452, %454 : vector<8x122xf32>
    %456 = vector.broadcast %354 : f32 to vector<8x122xf32>
    %457 = arith.mulf %456, %39 : vector<8x122xf32>
    %458 = arith.addf %455, %457 : vector<8x122xf32>
    %459 = vector.broadcast %355 : f32 to vector<8x122xf32>
    %460 = arith.mulf %459, %17 : vector<8x122xf32>
    %461 = arith.addf %458, %460 : vector<8x122xf32>
    %462 = vector.broadcast %356 : f32 to vector<8x122xf32>
    %463 = arith.mulf %462, %41 : vector<8x122xf32>
    %464 = arith.addf %461, %463 : vector<8x122xf32>
    %465 = vector.broadcast %357 : f32 to vector<8x122xf32>
    %466 = arith.mulf %465, %43 : vector<8x122xf32>
    %467 = arith.addf %464, %466 : vector<8x122xf32>
    %468 = vector.broadcast %358 : f32 to vector<8x122xf32>
    %469 = arith.mulf %468, %21 : vector<8x122xf32>
    %470 = arith.addf %467, %469 : vector<8x122xf32>
    %471 = vector.broadcast %359 : f32 to vector<8x122xf32>
    %472 = arith.mulf %471, %45 : vector<8x122xf32>
    %473 = arith.addf %470, %472 : vector<8x122xf32>
    %474 = vector.broadcast %360 : f32 to vector<8x122xf32>
    %475 = arith.mulf %474, %23 : vector<8x122xf32>
    %476 = arith.addf %473, %475 : vector<8x122xf32>
    %477 = vector.broadcast %361 : f32 to vector<8x122xf32>
    %478 = arith.mulf %477, %47 : vector<8x122xf32>
    %479 = arith.addf %476, %478 : vector<8x122xf32>
    %c2_77 = arith.constant 2 : index
    %480 = memref.load %arg2[%c2_77] : memref<8xf32, #tpu.memory_space<smem>>
    %481 = vector.broadcast %480 : f32 to vector<8x122xf32>
    %482 = arith.addf %420, %481 : vector<8x122xf32>
    %cst_78 = arith.constant 0.000000e+00 : f32
    %483 = vector.broadcast %cst_78 : f32 to vector<8x122xf32>
    %484 = arith.maximumf %482, %483 : vector<8x122xf32>
    %485 = vector.broadcast %480 : f32 to vector<8x122xf32>
    %486 = arith.addf %479, %485 : vector<8x122xf32>
    %cst_79 = arith.constant 0.000000e+00 : f32
    %487 = vector.broadcast %cst_79 : f32 to vector<8x122xf32>
    %488 = arith.maximumf %486, %487 : vector<8x122xf32>
    %c60 = arith.constant 60 : index
    %489 = memref.load %arg1[%c60] : memref<160xf32, #tpu.memory_space<smem>>
    %c61 = arith.constant 61 : index
    %490 = memref.load %arg1[%c61] : memref<160xf32, #tpu.memory_space<smem>>
    %c62 = arith.constant 62 : index
    %491 = memref.load %arg1[%c62] : memref<160xf32, #tpu.memory_space<smem>>
    %c63 = arith.constant 63 : index
    %492 = memref.load %arg1[%c63] : memref<160xf32, #tpu.memory_space<smem>>
    %c64 = arith.constant 64 : index
    %493 = memref.load %arg1[%c64] : memref<160xf32, #tpu.memory_space<smem>>
    %c65 = arith.constant 65 : index
    %494 = memref.load %arg1[%c65] : memref<160xf32, #tpu.memory_space<smem>>
    %c66 = arith.constant 66 : index
    %495 = memref.load %arg1[%c66] : memref<160xf32, #tpu.memory_space<smem>>
    %c67 = arith.constant 67 : index
    %496 = memref.load %arg1[%c67] : memref<160xf32, #tpu.memory_space<smem>>
    %c68 = arith.constant 68 : index
    %497 = memref.load %arg1[%c68] : memref<160xf32, #tpu.memory_space<smem>>
    %c69 = arith.constant 69 : index
    %498 = memref.load %arg1[%c69] : memref<160xf32, #tpu.memory_space<smem>>
    %c70 = arith.constant 70 : index
    %499 = memref.load %arg1[%c70] : memref<160xf32, #tpu.memory_space<smem>>
    %c71 = arith.constant 71 : index
    %500 = memref.load %arg1[%c71] : memref<160xf32, #tpu.memory_space<smem>>
    %c72 = arith.constant 72 : index
    %501 = memref.load %arg1[%c72] : memref<160xf32, #tpu.memory_space<smem>>
    %c73 = arith.constant 73 : index
    %502 = memref.load %arg1[%c73] : memref<160xf32, #tpu.memory_space<smem>>
    %c74 = arith.constant 74 : index
    %503 = memref.load %arg1[%c74] : memref<160xf32, #tpu.memory_space<smem>>
    %c75 = arith.constant 75 : index
    %504 = memref.load %arg1[%c75] : memref<160xf32, #tpu.memory_space<smem>>
    %c76 = arith.constant 76 : index
    %505 = memref.load %arg1[%c76] : memref<160xf32, #tpu.memory_space<smem>>
    %c77 = arith.constant 77 : index
    %506 = memref.load %arg1[%c77] : memref<160xf32, #tpu.memory_space<smem>>
    %c78 = arith.constant 78 : index
    %507 = memref.load %arg1[%c78] : memref<160xf32, #tpu.memory_space<smem>>
    %c79 = arith.constant 79 : index
    %508 = memref.load %arg1[%c79] : memref<160xf32, #tpu.memory_space<smem>>
    %509 = vector.broadcast %489 : f32 to vector<8x122xf32>
    %510 = arith.mulf %509, %1 : vector<8x122xf32>
    %511 = vector.broadcast %490 : f32 to vector<8x122xf32>
    %512 = arith.mulf %511, %25 : vector<8x122xf32>
    %513 = arith.addf %510, %512 : vector<8x122xf32>
    %514 = vector.broadcast %491 : f32 to vector<8x122xf32>
    %515 = arith.mulf %514, %3 : vector<8x122xf32>
    %516 = arith.addf %513, %515 : vector<8x122xf32>
    %517 = vector.broadcast %492 : f32 to vector<8x122xf32>
    %518 = arith.mulf %517, %27 : vector<8x122xf32>
    %519 = arith.addf %516, %518 : vector<8x122xf32>
    %520 = vector.broadcast %493 : f32 to vector<8x122xf32>
    %521 = arith.mulf %520, %5 : vector<8x122xf32>
    %522 = arith.addf %519, %521 : vector<8x122xf32>
    %523 = vector.broadcast %494 : f32 to vector<8x122xf32>
    %524 = arith.mulf %523, %7 : vector<8x122xf32>
    %525 = arith.addf %522, %524 : vector<8x122xf32>
    %526 = vector.broadcast %495 : f32 to vector<8x122xf32>
    %527 = arith.mulf %526, %31 : vector<8x122xf32>
    %528 = arith.addf %525, %527 : vector<8x122xf32>
    %529 = vector.broadcast %496 : f32 to vector<8x122xf32>
    %530 = arith.mulf %529, %9 : vector<8x122xf32>
    %531 = arith.addf %528, %530 : vector<8x122xf32>
    %532 = vector.broadcast %497 : f32 to vector<8x122xf32>
    %533 = arith.mulf %532, %33 : vector<8x122xf32>
    %534 = arith.addf %531, %533 : vector<8x122xf32>
    %535 = vector.broadcast %498 : f32 to vector<8x122xf32>
    %536 = arith.mulf %535, %11 : vector<8x122xf32>
    %537 = arith.addf %534, %536 : vector<8x122xf32>
    %538 = vector.broadcast %499 : f32 to vector<8x122xf32>
    %539 = arith.mulf %538, %13 : vector<8x122xf32>
    %540 = arith.addf %537, %539 : vector<8x122xf32>
    %541 = vector.broadcast %500 : f32 to vector<8x122xf32>
    %542 = arith.mulf %541, %37 : vector<8x122xf32>
    %543 = arith.addf %540, %542 : vector<8x122xf32>
    %544 = vector.broadcast %501 : f32 to vector<8x122xf32>
    %545 = arith.mulf %544, %15 : vector<8x122xf32>
    %546 = arith.addf %543, %545 : vector<8x122xf32>
    %547 = vector.broadcast %502 : f32 to vector<8x122xf32>
    %548 = arith.mulf %547, %39 : vector<8x122xf32>
    %549 = arith.addf %546, %548 : vector<8x122xf32>
    %550 = vector.broadcast %503 : f32 to vector<8x122xf32>
    %551 = arith.mulf %550, %17 : vector<8x122xf32>
    %552 = arith.addf %549, %551 : vector<8x122xf32>
    %553 = vector.broadcast %504 : f32 to vector<8x122xf32>
    %554 = arith.mulf %553, %19 : vector<8x122xf32>
    %555 = arith.addf %552, %554 : vector<8x122xf32>
    %556 = vector.broadcast %505 : f32 to vector<8x122xf32>
    %557 = arith.mulf %556, %43 : vector<8x122xf32>
    %558 = arith.addf %555, %557 : vector<8x122xf32>
    %559 = vector.broadcast %506 : f32 to vector<8x122xf32>
    %560 = arith.mulf %559, %21 : vector<8x122xf32>
    %561 = arith.addf %558, %560 : vector<8x122xf32>
    %562 = vector.broadcast %507 : f32 to vector<8x122xf32>
    %563 = arith.mulf %562, %45 : vector<8x122xf32>
    %564 = arith.addf %561, %563 : vector<8x122xf32>
    %565 = vector.broadcast %508 : f32 to vector<8x122xf32>
    %566 = arith.mulf %565, %23 : vector<8x122xf32>
    %567 = arith.addf %564, %566 : vector<8x122xf32>
    %568 = vector.broadcast %489 : f32 to vector<8x122xf32>
    %569 = arith.mulf %568, %25 : vector<8x122xf32>
    %570 = vector.broadcast %490 : f32 to vector<8x122xf32>
    %571 = arith.mulf %570, %3 : vector<8x122xf32>
    %572 = arith.addf %569, %571 : vector<8x122xf32>
    %573 = vector.broadcast %491 : f32 to vector<8x122xf32>
    %574 = arith.mulf %573, %27 : vector<8x122xf32>
    %575 = arith.addf %572, %574 : vector<8x122xf32>
    %576 = vector.broadcast %492 : f32 to vector<8x122xf32>
    %577 = arith.mulf %576, %5 : vector<8x122xf32>
    %578 = arith.addf %575, %577 : vector<8x122xf32>
    %579 = vector.broadcast %493 : f32 to vector<8x122xf32>
    %580 = arith.mulf %579, %29 : vector<8x122xf32>
    %581 = arith.addf %578, %580 : vector<8x122xf32>
    %582 = vector.broadcast %494 : f32 to vector<8x122xf32>
    %583 = arith.mulf %582, %31 : vector<8x122xf32>
    %584 = arith.addf %581, %583 : vector<8x122xf32>
    %585 = vector.broadcast %495 : f32 to vector<8x122xf32>
    %586 = arith.mulf %585, %9 : vector<8x122xf32>
    %587 = arith.addf %584, %586 : vector<8x122xf32>
    %588 = vector.broadcast %496 : f32 to vector<8x122xf32>
    %589 = arith.mulf %588, %33 : vector<8x122xf32>
    %590 = arith.addf %587, %589 : vector<8x122xf32>
    %591 = vector.broadcast %497 : f32 to vector<8x122xf32>
    %592 = arith.mulf %591, %11 : vector<8x122xf32>
    %593 = arith.addf %590, %592 : vector<8x122xf32>
    %594 = vector.broadcast %498 : f32 to vector<8x122xf32>
    %595 = arith.mulf %594, %35 : vector<8x122xf32>
    %596 = arith.addf %593, %595 : vector<8x122xf32>
    %597 = vector.broadcast %499 : f32 to vector<8x122xf32>
    %598 = arith.mulf %597, %37 : vector<8x122xf32>
    %599 = arith.addf %596, %598 : vector<8x122xf32>
    %600 = vector.broadcast %500 : f32 to vector<8x122xf32>
    %601 = arith.mulf %600, %15 : vector<8x122xf32>
    %602 = arith.addf %599, %601 : vector<8x122xf32>
    %603 = vector.broadcast %501 : f32 to vector<8x122xf32>
    %604 = arith.mulf %603, %39 : vector<8x122xf32>
    %605 = arith.addf %602, %604 : vector<8x122xf32>
    %606 = vector.broadcast %502 : f32 to vector<8x122xf32>
    %607 = arith.mulf %606, %17 : vector<8x122xf32>
    %608 = arith.addf %605, %607 : vector<8x122xf32>
    %609 = vector.broadcast %503 : f32 to vector<8x122xf32>
    %610 = arith.mulf %609, %41 : vector<8x122xf32>
    %611 = arith.addf %608, %610 : vector<8x122xf32>
    %612 = vector.broadcast %504 : f32 to vector<8x122xf32>
    %613 = arith.mulf %612, %43 : vector<8x122xf32>
    %614 = arith.addf %611, %613 : vector<8x122xf32>
    %615 = vector.broadcast %505 : f32 to vector<8x122xf32>
    %616 = arith.mulf %615, %21 : vector<8x122xf32>
    %617 = arith.addf %614, %616 : vector<8x122xf32>
    %618 = vector.broadcast %506 : f32 to vector<8x122xf32>
    %619 = arith.mulf %618, %45 : vector<8x122xf32>
    %620 = arith.addf %617, %619 : vector<8x122xf32>
    %621 = vector.broadcast %507 : f32 to vector<8x122xf32>
    %622 = arith.mulf %621, %23 : vector<8x122xf32>
    %623 = arith.addf %620, %622 : vector<8x122xf32>
    %624 = vector.broadcast %508 : f32 to vector<8x122xf32>
    %625 = arith.mulf %624, %47 : vector<8x122xf32>
    %626 = arith.addf %623, %625 : vector<8x122xf32>
    %c3_80 = arith.constant 3 : index
    %627 = memref.load %arg2[%c3_80] : memref<8xf32, #tpu.memory_space<smem>>
    %628 = vector.broadcast %627 : f32 to vector<8x122xf32>
    %629 = arith.addf %567, %628 : vector<8x122xf32>
    %cst_81 = arith.constant 0.000000e+00 : f32
    %630 = vector.broadcast %cst_81 : f32 to vector<8x122xf32>
    %631 = arith.maximumf %629, %630 : vector<8x122xf32>
    %632 = vector.broadcast %627 : f32 to vector<8x122xf32>
    %633 = arith.addf %626, %632 : vector<8x122xf32>
    %cst_82 = arith.constant 0.000000e+00 : f32
    %634 = vector.broadcast %cst_82 : f32 to vector<8x122xf32>
    %635 = arith.maximumf %633, %634 : vector<8x122xf32>
    %c80 = arith.constant 80 : index
    %636 = memref.load %arg1[%c80] : memref<160xf32, #tpu.memory_space<smem>>
    %c81 = arith.constant 81 : index
    %637 = memref.load %arg1[%c81] : memref<160xf32, #tpu.memory_space<smem>>
    %c82 = arith.constant 82 : index
    %638 = memref.load %arg1[%c82] : memref<160xf32, #tpu.memory_space<smem>>
    %c83 = arith.constant 83 : index
    %639 = memref.load %arg1[%c83] : memref<160xf32, #tpu.memory_space<smem>>
    %c84 = arith.constant 84 : index
    %640 = memref.load %arg1[%c84] : memref<160xf32, #tpu.memory_space<smem>>
    %c85 = arith.constant 85 : index
    %641 = memref.load %arg1[%c85] : memref<160xf32, #tpu.memory_space<smem>>
    %c86 = arith.constant 86 : index
    %642 = memref.load %arg1[%c86] : memref<160xf32, #tpu.memory_space<smem>>
    %c87 = arith.constant 87 : index
    %643 = memref.load %arg1[%c87] : memref<160xf32, #tpu.memory_space<smem>>
    %c88 = arith.constant 88 : index
    %644 = memref.load %arg1[%c88] : memref<160xf32, #tpu.memory_space<smem>>
    %c89 = arith.constant 89 : index
    %645 = memref.load %arg1[%c89] : memref<160xf32, #tpu.memory_space<smem>>
    %c90 = arith.constant 90 : index
    %646 = memref.load %arg1[%c90] : memref<160xf32, #tpu.memory_space<smem>>
    %c91 = arith.constant 91 : index
    %647 = memref.load %arg1[%c91] : memref<160xf32, #tpu.memory_space<smem>>
    %c92 = arith.constant 92 : index
    %648 = memref.load %arg1[%c92] : memref<160xf32, #tpu.memory_space<smem>>
    %c93 = arith.constant 93 : index
    %649 = memref.load %arg1[%c93] : memref<160xf32, #tpu.memory_space<smem>>
    %c94 = arith.constant 94 : index
    %650 = memref.load %arg1[%c94] : memref<160xf32, #tpu.memory_space<smem>>
    %c95 = arith.constant 95 : index
    %651 = memref.load %arg1[%c95] : memref<160xf32, #tpu.memory_space<smem>>
    %c96 = arith.constant 96 : index
    %652 = memref.load %arg1[%c96] : memref<160xf32, #tpu.memory_space<smem>>
    %c97 = arith.constant 97 : index
    %653 = memref.load %arg1[%c97] : memref<160xf32, #tpu.memory_space<smem>>
    %c98 = arith.constant 98 : index
    %654 = memref.load %arg1[%c98] : memref<160xf32, #tpu.memory_space<smem>>
    %c99 = arith.constant 99 : index
    %655 = memref.load %arg1[%c99] : memref<160xf32, #tpu.memory_space<smem>>
    %656 = vector.broadcast %636 : f32 to vector<8x122xf32>
    %657 = arith.mulf %656, %1 : vector<8x122xf32>
    %658 = vector.broadcast %637 : f32 to vector<8x122xf32>
    %659 = arith.mulf %658, %25 : vector<8x122xf32>
    %660 = arith.addf %657, %659 : vector<8x122xf32>
    %661 = vector.broadcast %638 : f32 to vector<8x122xf32>
    %662 = arith.mulf %661, %3 : vector<8x122xf32>
    %663 = arith.addf %660, %662 : vector<8x122xf32>
    %664 = vector.broadcast %639 : f32 to vector<8x122xf32>
    %665 = arith.mulf %664, %27 : vector<8x122xf32>
    %666 = arith.addf %663, %665 : vector<8x122xf32>
    %667 = vector.broadcast %640 : f32 to vector<8x122xf32>
    %668 = arith.mulf %667, %5 : vector<8x122xf32>
    %669 = arith.addf %666, %668 : vector<8x122xf32>
    %670 = vector.broadcast %641 : f32 to vector<8x122xf32>
    %671 = arith.mulf %670, %7 : vector<8x122xf32>
    %672 = arith.addf %669, %671 : vector<8x122xf32>
    %673 = vector.broadcast %642 : f32 to vector<8x122xf32>
    %674 = arith.mulf %673, %31 : vector<8x122xf32>
    %675 = arith.addf %672, %674 : vector<8x122xf32>
    %676 = vector.broadcast %643 : f32 to vector<8x122xf32>
    %677 = arith.mulf %676, %9 : vector<8x122xf32>
    %678 = arith.addf %675, %677 : vector<8x122xf32>
    %679 = vector.broadcast %644 : f32 to vector<8x122xf32>
    %680 = arith.mulf %679, %33 : vector<8x122xf32>
    %681 = arith.addf %678, %680 : vector<8x122xf32>
    %682 = vector.broadcast %645 : f32 to vector<8x122xf32>
    %683 = arith.mulf %682, %11 : vector<8x122xf32>
    %684 = arith.addf %681, %683 : vector<8x122xf32>
    %685 = vector.broadcast %646 : f32 to vector<8x122xf32>
    %686 = arith.mulf %685, %13 : vector<8x122xf32>
    %687 = arith.addf %684, %686 : vector<8x122xf32>
    %688 = vector.broadcast %647 : f32 to vector<8x122xf32>
    %689 = arith.mulf %688, %37 : vector<8x122xf32>
    %690 = arith.addf %687, %689 : vector<8x122xf32>
    %691 = vector.broadcast %648 : f32 to vector<8x122xf32>
    %692 = arith.mulf %691, %15 : vector<8x122xf32>
    %693 = arith.addf %690, %692 : vector<8x122xf32>
    %694 = vector.broadcast %649 : f32 to vector<8x122xf32>
    %695 = arith.mulf %694, %39 : vector<8x122xf32>
    %696 = arith.addf %693, %695 : vector<8x122xf32>
    %697 = vector.broadcast %650 : f32 to vector<8x122xf32>
    %698 = arith.mulf %697, %17 : vector<8x122xf32>
    %699 = arith.addf %696, %698 : vector<8x122xf32>
    %700 = vector.broadcast %651 : f32 to vector<8x122xf32>
    %701 = arith.mulf %700, %19 : vector<8x122xf32>
    %702 = arith.addf %699, %701 : vector<8x122xf32>
    %703 = vector.broadcast %652 : f32 to vector<8x122xf32>
    %704 = arith.mulf %703, %43 : vector<8x122xf32>
    %705 = arith.addf %702, %704 : vector<8x122xf32>
    %706 = vector.broadcast %653 : f32 to vector<8x122xf32>
    %707 = arith.mulf %706, %21 : vector<8x122xf32>
    %708 = arith.addf %705, %707 : vector<8x122xf32>
    %709 = vector.broadcast %654 : f32 to vector<8x122xf32>
    %710 = arith.mulf %709, %45 : vector<8x122xf32>
    %711 = arith.addf %708, %710 : vector<8x122xf32>
    %712 = vector.broadcast %655 : f32 to vector<8x122xf32>
    %713 = arith.mulf %712, %23 : vector<8x122xf32>
    %714 = arith.addf %711, %713 : vector<8x122xf32>
    %715 = vector.broadcast %636 : f32 to vector<8x122xf32>
    %716 = arith.mulf %715, %25 : vector<8x122xf32>
    %717 = vector.broadcast %637 : f32 to vector<8x122xf32>
    %718 = arith.mulf %717, %3 : vector<8x122xf32>
    %719 = arith.addf %716, %718 : vector<8x122xf32>
    %720 = vector.broadcast %638 : f32 to vector<8x122xf32>
    %721 = arith.mulf %720, %27 : vector<8x122xf32>
    %722 = arith.addf %719, %721 : vector<8x122xf32>
    %723 = vector.broadcast %639 : f32 to vector<8x122xf32>
    %724 = arith.mulf %723, %5 : vector<8x122xf32>
    %725 = arith.addf %722, %724 : vector<8x122xf32>
    %726 = vector.broadcast %640 : f32 to vector<8x122xf32>
    %727 = arith.mulf %726, %29 : vector<8x122xf32>
    %728 = arith.addf %725, %727 : vector<8x122xf32>
    %729 = vector.broadcast %641 : f32 to vector<8x122xf32>
    %730 = arith.mulf %729, %31 : vector<8x122xf32>
    %731 = arith.addf %728, %730 : vector<8x122xf32>
    %732 = vector.broadcast %642 : f32 to vector<8x122xf32>
    %733 = arith.mulf %732, %9 : vector<8x122xf32>
    %734 = arith.addf %731, %733 : vector<8x122xf32>
    %735 = vector.broadcast %643 : f32 to vector<8x122xf32>
    %736 = arith.mulf %735, %33 : vector<8x122xf32>
    %737 = arith.addf %734, %736 : vector<8x122xf32>
    %738 = vector.broadcast %644 : f32 to vector<8x122xf32>
    %739 = arith.mulf %738, %11 : vector<8x122xf32>
    %740 = arith.addf %737, %739 : vector<8x122xf32>
    %741 = vector.broadcast %645 : f32 to vector<8x122xf32>
    %742 = arith.mulf %741, %35 : vector<8x122xf32>
    %743 = arith.addf %740, %742 : vector<8x122xf32>
    %744 = vector.broadcast %646 : f32 to vector<8x122xf32>
    %745 = arith.mulf %744, %37 : vector<8x122xf32>
    %746 = arith.addf %743, %745 : vector<8x122xf32>
    %747 = vector.broadcast %647 : f32 to vector<8x122xf32>
    %748 = arith.mulf %747, %15 : vector<8x122xf32>
    %749 = arith.addf %746, %748 : vector<8x122xf32>
    %750 = vector.broadcast %648 : f32 to vector<8x122xf32>
    %751 = arith.mulf %750, %39 : vector<8x122xf32>
    %752 = arith.addf %749, %751 : vector<8x122xf32>
    %753 = vector.broadcast %649 : f32 to vector<8x122xf32>
    %754 = arith.mulf %753, %17 : vector<8x122xf32>
    %755 = arith.addf %752, %754 : vector<8x122xf32>
    %756 = vector.broadcast %650 : f32 to vector<8x122xf32>
    %757 = arith.mulf %756, %41 : vector<8x122xf32>
    %758 = arith.addf %755, %757 : vector<8x122xf32>
    %759 = vector.broadcast %651 : f32 to vector<8x122xf32>
    %760 = arith.mulf %759, %43 : vector<8x122xf32>
    %761 = arith.addf %758, %760 : vector<8x122xf32>
    %762 = vector.broadcast %652 : f32 to vector<8x122xf32>
    %763 = arith.mulf %762, %21 : vector<8x122xf32>
    %764 = arith.addf %761, %763 : vector<8x122xf32>
    %765 = vector.broadcast %653 : f32 to vector<8x122xf32>
    %766 = arith.mulf %765, %45 : vector<8x122xf32>
    %767 = arith.addf %764, %766 : vector<8x122xf32>
    %768 = vector.broadcast %654 : f32 to vector<8x122xf32>
    %769 = arith.mulf %768, %23 : vector<8x122xf32>
    %770 = arith.addf %767, %769 : vector<8x122xf32>
    %771 = vector.broadcast %655 : f32 to vector<8x122xf32>
    %772 = arith.mulf %771, %47 : vector<8x122xf32>
    %773 = arith.addf %770, %772 : vector<8x122xf32>
    %c4_83 = arith.constant 4 : index
    %774 = memref.load %arg2[%c4_83] : memref<8xf32, #tpu.memory_space<smem>>
    %775 = vector.broadcast %774 : f32 to vector<8x122xf32>
    %776 = arith.addf %714, %775 : vector<8x122xf32>
    %cst_84 = arith.constant 0.000000e+00 : f32
    %777 = vector.broadcast %cst_84 : f32 to vector<8x122xf32>
    %778 = arith.maximumf %776, %777 : vector<8x122xf32>
    %779 = vector.broadcast %774 : f32 to vector<8x122xf32>
    %780 = arith.addf %773, %779 : vector<8x122xf32>
    %cst_85 = arith.constant 0.000000e+00 : f32
    %781 = vector.broadcast %cst_85 : f32 to vector<8x122xf32>
    %782 = arith.maximumf %780, %781 : vector<8x122xf32>
    %c100 = arith.constant 100 : index
    %783 = memref.load %arg1[%c100] : memref<160xf32, #tpu.memory_space<smem>>
    %c101 = arith.constant 101 : index
    %784 = memref.load %arg1[%c101] : memref<160xf32, #tpu.memory_space<smem>>
    %c102 = arith.constant 102 : index
    %785 = memref.load %arg1[%c102] : memref<160xf32, #tpu.memory_space<smem>>
    %c103 = arith.constant 103 : index
    %786 = memref.load %arg1[%c103] : memref<160xf32, #tpu.memory_space<smem>>
    %c104 = arith.constant 104 : index
    %787 = memref.load %arg1[%c104] : memref<160xf32, #tpu.memory_space<smem>>
    %c105 = arith.constant 105 : index
    %788 = memref.load %arg1[%c105] : memref<160xf32, #tpu.memory_space<smem>>
    %c106 = arith.constant 106 : index
    %789 = memref.load %arg1[%c106] : memref<160xf32, #tpu.memory_space<smem>>
    %c107 = arith.constant 107 : index
    %790 = memref.load %arg1[%c107] : memref<160xf32, #tpu.memory_space<smem>>
    %c108 = arith.constant 108 : index
    %791 = memref.load %arg1[%c108] : memref<160xf32, #tpu.memory_space<smem>>
    %c109 = arith.constant 109 : index
    %792 = memref.load %arg1[%c109] : memref<160xf32, #tpu.memory_space<smem>>
    %c110 = arith.constant 110 : index
    %793 = memref.load %arg1[%c110] : memref<160xf32, #tpu.memory_space<smem>>
    %c111 = arith.constant 111 : index
    %794 = memref.load %arg1[%c111] : memref<160xf32, #tpu.memory_space<smem>>
    %c112 = arith.constant 112 : index
    %795 = memref.load %arg1[%c112] : memref<160xf32, #tpu.memory_space<smem>>
    %c113 = arith.constant 113 : index
    %796 = memref.load %arg1[%c113] : memref<160xf32, #tpu.memory_space<smem>>
    %c114 = arith.constant 114 : index
    %797 = memref.load %arg1[%c114] : memref<160xf32, #tpu.memory_space<smem>>
    %c115 = arith.constant 115 : index
    %798 = memref.load %arg1[%c115] : memref<160xf32, #tpu.memory_space<smem>>
    %c116 = arith.constant 116 : index
    %799 = memref.load %arg1[%c116] : memref<160xf32, #tpu.memory_space<smem>>
    %c117 = arith.constant 117 : index
    %800 = memref.load %arg1[%c117] : memref<160xf32, #tpu.memory_space<smem>>
    %c118 = arith.constant 118 : index
    %801 = memref.load %arg1[%c118] : memref<160xf32, #tpu.memory_space<smem>>
    %c119 = arith.constant 119 : index
    %802 = memref.load %arg1[%c119] : memref<160xf32, #tpu.memory_space<smem>>
    %803 = vector.broadcast %783 : f32 to vector<8x122xf32>
    %804 = arith.mulf %803, %1 : vector<8x122xf32>
    %805 = vector.broadcast %784 : f32 to vector<8x122xf32>
    %806 = arith.mulf %805, %25 : vector<8x122xf32>
    %807 = arith.addf %804, %806 : vector<8x122xf32>
    %808 = vector.broadcast %785 : f32 to vector<8x122xf32>
    %809 = arith.mulf %808, %3 : vector<8x122xf32>
    %810 = arith.addf %807, %809 : vector<8x122xf32>
    %811 = vector.broadcast %786 : f32 to vector<8x122xf32>
    %812 = arith.mulf %811, %27 : vector<8x122xf32>
    %813 = arith.addf %810, %812 : vector<8x122xf32>
    %814 = vector.broadcast %787 : f32 to vector<8x122xf32>
    %815 = arith.mulf %814, %5 : vector<8x122xf32>
    %816 = arith.addf %813, %815 : vector<8x122xf32>
    %817 = vector.broadcast %788 : f32 to vector<8x122xf32>
    %818 = arith.mulf %817, %7 : vector<8x122xf32>
    %819 = arith.addf %816, %818 : vector<8x122xf32>
    %820 = vector.broadcast %789 : f32 to vector<8x122xf32>
    %821 = arith.mulf %820, %31 : vector<8x122xf32>
    %822 = arith.addf %819, %821 : vector<8x122xf32>
    %823 = vector.broadcast %790 : f32 to vector<8x122xf32>
    %824 = arith.mulf %823, %9 : vector<8x122xf32>
    %825 = arith.addf %822, %824 : vector<8x122xf32>
    %826 = vector.broadcast %791 : f32 to vector<8x122xf32>
    %827 = arith.mulf %826, %33 : vector<8x122xf32>
    %828 = arith.addf %825, %827 : vector<8x122xf32>
    %829 = vector.broadcast %792 : f32 to vector<8x122xf32>
    %830 = arith.mulf %829, %11 : vector<8x122xf32>
    %831 = arith.addf %828, %830 : vector<8x122xf32>
    %832 = vector.broadcast %793 : f32 to vector<8x122xf32>
    %833 = arith.mulf %832, %13 : vector<8x122xf32>
    %834 = arith.addf %831, %833 : vector<8x122xf32>
    %835 = vector.broadcast %794 : f32 to vector<8x122xf32>
    %836 = arith.mulf %835, %37 : vector<8x122xf32>
    %837 = arith.addf %834, %836 : vector<8x122xf32>
    %838 = vector.broadcast %795 : f32 to vector<8x122xf32>
    %839 = arith.mulf %838, %15 : vector<8x122xf32>
    %840 = arith.addf %837, %839 : vector<8x122xf32>
    %841 = vector.broadcast %796 : f32 to vector<8x122xf32>
    %842 = arith.mulf %841, %39 : vector<8x122xf32>
    %843 = arith.addf %840, %842 : vector<8x122xf32>
    %844 = vector.broadcast %797 : f32 to vector<8x122xf32>
    %845 = arith.mulf %844, %17 : vector<8x122xf32>
    %846 = arith.addf %843, %845 : vector<8x122xf32>
    %847 = vector.broadcast %798 : f32 to vector<8x122xf32>
    %848 = arith.mulf %847, %19 : vector<8x122xf32>
    %849 = arith.addf %846, %848 : vector<8x122xf32>
    %850 = vector.broadcast %799 : f32 to vector<8x122xf32>
    %851 = arith.mulf %850, %43 : vector<8x122xf32>
    %852 = arith.addf %849, %851 : vector<8x122xf32>
    %853 = vector.broadcast %800 : f32 to vector<8x122xf32>
    %854 = arith.mulf %853, %21 : vector<8x122xf32>
    %855 = arith.addf %852, %854 : vector<8x122xf32>
    %856 = vector.broadcast %801 : f32 to vector<8x122xf32>
    %857 = arith.mulf %856, %45 : vector<8x122xf32>
    %858 = arith.addf %855, %857 : vector<8x122xf32>
    %859 = vector.broadcast %802 : f32 to vector<8x122xf32>
    %860 = arith.mulf %859, %23 : vector<8x122xf32>
    %861 = arith.addf %858, %860 : vector<8x122xf32>
    %862 = vector.broadcast %783 : f32 to vector<8x122xf32>
    %863 = arith.mulf %862, %25 : vector<8x122xf32>
    %864 = vector.broadcast %784 : f32 to vector<8x122xf32>
    %865 = arith.mulf %864, %3 : vector<8x122xf32>
    %866 = arith.addf %863, %865 : vector<8x122xf32>
    %867 = vector.broadcast %785 : f32 to vector<8x122xf32>
    %868 = arith.mulf %867, %27 : vector<8x122xf32>
    %869 = arith.addf %866, %868 : vector<8x122xf32>
    %870 = vector.broadcast %786 : f32 to vector<8x122xf32>
    %871 = arith.mulf %870, %5 : vector<8x122xf32>
    %872 = arith.addf %869, %871 : vector<8x122xf32>
    %873 = vector.broadcast %787 : f32 to vector<8x122xf32>
    %874 = arith.mulf %873, %29 : vector<8x122xf32>
    %875 = arith.addf %872, %874 : vector<8x122xf32>
    %876 = vector.broadcast %788 : f32 to vector<8x122xf32>
    %877 = arith.mulf %876, %31 : vector<8x122xf32>
    %878 = arith.addf %875, %877 : vector<8x122xf32>
    %879 = vector.broadcast %789 : f32 to vector<8x122xf32>
    %880 = arith.mulf %879, %9 : vector<8x122xf32>
    %881 = arith.addf %878, %880 : vector<8x122xf32>
    %882 = vector.broadcast %790 : f32 to vector<8x122xf32>
    %883 = arith.mulf %882, %33 : vector<8x122xf32>
    %884 = arith.addf %881, %883 : vector<8x122xf32>
    %885 = vector.broadcast %791 : f32 to vector<8x122xf32>
    %886 = arith.mulf %885, %11 : vector<8x122xf32>
    %887 = arith.addf %884, %886 : vector<8x122xf32>
    %888 = vector.broadcast %792 : f32 to vector<8x122xf32>
    %889 = arith.mulf %888, %35 : vector<8x122xf32>
    %890 = arith.addf %887, %889 : vector<8x122xf32>
    %891 = vector.broadcast %793 : f32 to vector<8x122xf32>
    %892 = arith.mulf %891, %37 : vector<8x122xf32>
    %893 = arith.addf %890, %892 : vector<8x122xf32>
    %894 = vector.broadcast %794 : f32 to vector<8x122xf32>
    %895 = arith.mulf %894, %15 : vector<8x122xf32>
    %896 = arith.addf %893, %895 : vector<8x122xf32>
    %897 = vector.broadcast %795 : f32 to vector<8x122xf32>
    %898 = arith.mulf %897, %39 : vector<8x122xf32>
    %899 = arith.addf %896, %898 : vector<8x122xf32>
    %900 = vector.broadcast %796 : f32 to vector<8x122xf32>
    %901 = arith.mulf %900, %17 : vector<8x122xf32>
    %902 = arith.addf %899, %901 : vector<8x122xf32>
    %903 = vector.broadcast %797 : f32 to vector<8x122xf32>
    %904 = arith.mulf %903, %41 : vector<8x122xf32>
    %905 = arith.addf %902, %904 : vector<8x122xf32>
    %906 = vector.broadcast %798 : f32 to vector<8x122xf32>
    %907 = arith.mulf %906, %43 : vector<8x122xf32>
    %908 = arith.addf %905, %907 : vector<8x122xf32>
    %909 = vector.broadcast %799 : f32 to vector<8x122xf32>
    %910 = arith.mulf %909, %21 : vector<8x122xf32>
    %911 = arith.addf %908, %910 : vector<8x122xf32>
    %912 = vector.broadcast %800 : f32 to vector<8x122xf32>
    %913 = arith.mulf %912, %45 : vector<8x122xf32>
    %914 = arith.addf %911, %913 : vector<8x122xf32>
    %915 = vector.broadcast %801 : f32 to vector<8x122xf32>
    %916 = arith.mulf %915, %23 : vector<8x122xf32>
    %917 = arith.addf %914, %916 : vector<8x122xf32>
    %918 = vector.broadcast %802 : f32 to vector<8x122xf32>
    %919 = arith.mulf %918, %47 : vector<8x122xf32>
    %920 = arith.addf %917, %919 : vector<8x122xf32>
    %c5_86 = arith.constant 5 : index
    %921 = memref.load %arg2[%c5_86] : memref<8xf32, #tpu.memory_space<smem>>
    %922 = vector.broadcast %921 : f32 to vector<8x122xf32>
    %923 = arith.addf %861, %922 : vector<8x122xf32>
    %cst_87 = arith.constant 0.000000e+00 : f32
    %924 = vector.broadcast %cst_87 : f32 to vector<8x122xf32>
    %925 = arith.maximumf %923, %924 : vector<8x122xf32>
    %926 = vector.broadcast %921 : f32 to vector<8x122xf32>
    %927 = arith.addf %920, %926 : vector<8x122xf32>
    %cst_88 = arith.constant 0.000000e+00 : f32
    %928 = vector.broadcast %cst_88 : f32 to vector<8x122xf32>
    %929 = arith.maximumf %927, %928 : vector<8x122xf32>
    %c120 = arith.constant 120 : index
    %930 = memref.load %arg1[%c120] : memref<160xf32, #tpu.memory_space<smem>>
    %c121 = arith.constant 121 : index
    %931 = memref.load %arg1[%c121] : memref<160xf32, #tpu.memory_space<smem>>
    %c122 = arith.constant 122 : index
    %932 = memref.load %arg1[%c122] : memref<160xf32, #tpu.memory_space<smem>>
    %c123 = arith.constant 123 : index
    %933 = memref.load %arg1[%c123] : memref<160xf32, #tpu.memory_space<smem>>
    %c124 = arith.constant 124 : index
    %934 = memref.load %arg1[%c124] : memref<160xf32, #tpu.memory_space<smem>>
    %c125 = arith.constant 125 : index
    %935 = memref.load %arg1[%c125] : memref<160xf32, #tpu.memory_space<smem>>
    %c126 = arith.constant 126 : index
    %936 = memref.load %arg1[%c126] : memref<160xf32, #tpu.memory_space<smem>>
    %c127 = arith.constant 127 : index
    %937 = memref.load %arg1[%c127] : memref<160xf32, #tpu.memory_space<smem>>
    %c128 = arith.constant 128 : index
    %938 = memref.load %arg1[%c128] : memref<160xf32, #tpu.memory_space<smem>>
    %c129 = arith.constant 129 : index
    %939 = memref.load %arg1[%c129] : memref<160xf32, #tpu.memory_space<smem>>
    %c130 = arith.constant 130 : index
    %940 = memref.load %arg1[%c130] : memref<160xf32, #tpu.memory_space<smem>>
    %c131 = arith.constant 131 : index
    %941 = memref.load %arg1[%c131] : memref<160xf32, #tpu.memory_space<smem>>
    %c132 = arith.constant 132 : index
    %942 = memref.load %arg1[%c132] : memref<160xf32, #tpu.memory_space<smem>>
    %c133 = arith.constant 133 : index
    %943 = memref.load %arg1[%c133] : memref<160xf32, #tpu.memory_space<smem>>
    %c134 = arith.constant 134 : index
    %944 = memref.load %arg1[%c134] : memref<160xf32, #tpu.memory_space<smem>>
    %c135 = arith.constant 135 : index
    %945 = memref.load %arg1[%c135] : memref<160xf32, #tpu.memory_space<smem>>
    %c136 = arith.constant 136 : index
    %946 = memref.load %arg1[%c136] : memref<160xf32, #tpu.memory_space<smem>>
    %c137 = arith.constant 137 : index
    %947 = memref.load %arg1[%c137] : memref<160xf32, #tpu.memory_space<smem>>
    %c138 = arith.constant 138 : index
    %948 = memref.load %arg1[%c138] : memref<160xf32, #tpu.memory_space<smem>>
    %c139 = arith.constant 139 : index
    %949 = memref.load %arg1[%c139] : memref<160xf32, #tpu.memory_space<smem>>
    %950 = vector.broadcast %930 : f32 to vector<8x122xf32>
    %951 = arith.mulf %950, %1 : vector<8x122xf32>
    %952 = vector.broadcast %931 : f32 to vector<8x122xf32>
    %953 = arith.mulf %952, %25 : vector<8x122xf32>
    %954 = arith.addf %951, %953 : vector<8x122xf32>
    %955 = vector.broadcast %932 : f32 to vector<8x122xf32>
    %956 = arith.mulf %955, %3 : vector<8x122xf32>
    %957 = arith.addf %954, %956 : vector<8x122xf32>
    %958 = vector.broadcast %933 : f32 to vector<8x122xf32>
    %959 = arith.mulf %958, %27 : vector<8x122xf32>
    %960 = arith.addf %957, %959 : vector<8x122xf32>
    %961 = vector.broadcast %934 : f32 to vector<8x122xf32>
    %962 = arith.mulf %961, %5 : vector<8x122xf32>
    %963 = arith.addf %960, %962 : vector<8x122xf32>
    %964 = vector.broadcast %935 : f32 to vector<8x122xf32>
    %965 = arith.mulf %964, %7 : vector<8x122xf32>
    %966 = arith.addf %963, %965 : vector<8x122xf32>
    %967 = vector.broadcast %936 : f32 to vector<8x122xf32>
    %968 = arith.mulf %967, %31 : vector<8x122xf32>
    %969 = arith.addf %966, %968 : vector<8x122xf32>
    %970 = vector.broadcast %937 : f32 to vector<8x122xf32>
    %971 = arith.mulf %970, %9 : vector<8x122xf32>
    %972 = arith.addf %969, %971 : vector<8x122xf32>
    %973 = vector.broadcast %938 : f32 to vector<8x122xf32>
    %974 = arith.mulf %973, %33 : vector<8x122xf32>
    %975 = arith.addf %972, %974 : vector<8x122xf32>
    %976 = vector.broadcast %939 : f32 to vector<8x122xf32>
    %977 = arith.mulf %976, %11 : vector<8x122xf32>
    %978 = arith.addf %975, %977 : vector<8x122xf32>
    %979 = vector.broadcast %940 : f32 to vector<8x122xf32>
    %980 = arith.mulf %979, %13 : vector<8x122xf32>
    %981 = arith.addf %978, %980 : vector<8x122xf32>
    %982 = vector.broadcast %941 : f32 to vector<8x122xf32>
    %983 = arith.mulf %982, %37 : vector<8x122xf32>
    %984 = arith.addf %981, %983 : vector<8x122xf32>
    %985 = vector.broadcast %942 : f32 to vector<8x122xf32>
    %986 = arith.mulf %985, %15 : vector<8x122xf32>
    %987 = arith.addf %984, %986 : vector<8x122xf32>
    %988 = vector.broadcast %943 : f32 to vector<8x122xf32>
    %989 = arith.mulf %988, %39 : vector<8x122xf32>
    %990 = arith.addf %987, %989 : vector<8x122xf32>
    %991 = vector.broadcast %944 : f32 to vector<8x122xf32>
    %992 = arith.mulf %991, %17 : vector<8x122xf32>
    %993 = arith.addf %990, %992 : vector<8x122xf32>
    %994 = vector.broadcast %945 : f32 to vector<8x122xf32>
    %995 = arith.mulf %994, %19 : vector<8x122xf32>
    %996 = arith.addf %993, %995 : vector<8x122xf32>
    %997 = vector.broadcast %946 : f32 to vector<8x122xf32>
    %998 = arith.mulf %997, %43 : vector<8x122xf32>
    %999 = arith.addf %996, %998 : vector<8x122xf32>
    %1000 = vector.broadcast %947 : f32 to vector<8x122xf32>
    %1001 = arith.mulf %1000, %21 : vector<8x122xf32>
    %1002 = arith.addf %999, %1001 : vector<8x122xf32>
    %1003 = vector.broadcast %948 : f32 to vector<8x122xf32>
    %1004 = arith.mulf %1003, %45 : vector<8x122xf32>
    %1005 = arith.addf %1002, %1004 : vector<8x122xf32>
    %1006 = vector.broadcast %949 : f32 to vector<8x122xf32>
    %1007 = arith.mulf %1006, %23 : vector<8x122xf32>
    %1008 = arith.addf %1005, %1007 : vector<8x122xf32>
    %1009 = vector.broadcast %930 : f32 to vector<8x122xf32>
    %1010 = arith.mulf %1009, %25 : vector<8x122xf32>
    %1011 = vector.broadcast %931 : f32 to vector<8x122xf32>
    %1012 = arith.mulf %1011, %3 : vector<8x122xf32>
    %1013 = arith.addf %1010, %1012 : vector<8x122xf32>
    %1014 = vector.broadcast %932 : f32 to vector<8x122xf32>
    %1015 = arith.mulf %1014, %27 : vector<8x122xf32>
    %1016 = arith.addf %1013, %1015 : vector<8x122xf32>
    %1017 = vector.broadcast %933 : f32 to vector<8x122xf32>
    %1018 = arith.mulf %1017, %5 : vector<8x122xf32>
    %1019 = arith.addf %1016, %1018 : vector<8x122xf32>
    %1020 = vector.broadcast %934 : f32 to vector<8x122xf32>
    %1021 = arith.mulf %1020, %29 : vector<8x122xf32>
    %1022 = arith.addf %1019, %1021 : vector<8x122xf32>
    %1023 = vector.broadcast %935 : f32 to vector<8x122xf32>
    %1024 = arith.mulf %1023, %31 : vector<8x122xf32>
    %1025 = arith.addf %1022, %1024 : vector<8x122xf32>
    %1026 = vector.broadcast %936 : f32 to vector<8x122xf32>
    %1027 = arith.mulf %1026, %9 : vector<8x122xf32>
    %1028 = arith.addf %1025, %1027 : vector<8x122xf32>
    %1029 = vector.broadcast %937 : f32 to vector<8x122xf32>
    %1030 = arith.mulf %1029, %33 : vector<8x122xf32>
    %1031 = arith.addf %1028, %1030 : vector<8x122xf32>
    %1032 = vector.broadcast %938 : f32 to vector<8x122xf32>
    %1033 = arith.mulf %1032, %11 : vector<8x122xf32>
    %1034 = arith.addf %1031, %1033 : vector<8x122xf32>
    %1035 = vector.broadcast %939 : f32 to vector<8x122xf32>
    %1036 = arith.mulf %1035, %35 : vector<8x122xf32>
    %1037 = arith.addf %1034, %1036 : vector<8x122xf32>
    %1038 = vector.broadcast %940 : f32 to vector<8x122xf32>
    %1039 = arith.mulf %1038, %37 : vector<8x122xf32>
    %1040 = arith.addf %1037, %1039 : vector<8x122xf32>
    %1041 = vector.broadcast %941 : f32 to vector<8x122xf32>
    %1042 = arith.mulf %1041, %15 : vector<8x122xf32>
    %1043 = arith.addf %1040, %1042 : vector<8x122xf32>
    %1044 = vector.broadcast %942 : f32 to vector<8x122xf32>
    %1045 = arith.mulf %1044, %39 : vector<8x122xf32>
    %1046 = arith.addf %1043, %1045 : vector<8x122xf32>
    %1047 = vector.broadcast %943 : f32 to vector<8x122xf32>
    %1048 = arith.mulf %1047, %17 : vector<8x122xf32>
    %1049 = arith.addf %1046, %1048 : vector<8x122xf32>
    %1050 = vector.broadcast %944 : f32 to vector<8x122xf32>
    %1051 = arith.mulf %1050, %41 : vector<8x122xf32>
    %1052 = arith.addf %1049, %1051 : vector<8x122xf32>
    %1053 = vector.broadcast %945 : f32 to vector<8x122xf32>
    %1054 = arith.mulf %1053, %43 : vector<8x122xf32>
    %1055 = arith.addf %1052, %1054 : vector<8x122xf32>
    %1056 = vector.broadcast %946 : f32 to vector<8x122xf32>
    %1057 = arith.mulf %1056, %21 : vector<8x122xf32>
    %1058 = arith.addf %1055, %1057 : vector<8x122xf32>
    %1059 = vector.broadcast %947 : f32 to vector<8x122xf32>
    %1060 = arith.mulf %1059, %45 : vector<8x122xf32>
    %1061 = arith.addf %1058, %1060 : vector<8x122xf32>
    %1062 = vector.broadcast %948 : f32 to vector<8x122xf32>
    %1063 = arith.mulf %1062, %23 : vector<8x122xf32>
    %1064 = arith.addf %1061, %1063 : vector<8x122xf32>
    %1065 = vector.broadcast %949 : f32 to vector<8x122xf32>
    %1066 = arith.mulf %1065, %47 : vector<8x122xf32>
    %1067 = arith.addf %1064, %1066 : vector<8x122xf32>
    %c6_89 = arith.constant 6 : index
    %1068 = memref.load %arg2[%c6_89] : memref<8xf32, #tpu.memory_space<smem>>
    %1069 = vector.broadcast %1068 : f32 to vector<8x122xf32>
    %1070 = arith.addf %1008, %1069 : vector<8x122xf32>
    %cst_90 = arith.constant 0.000000e+00 : f32
    %1071 = vector.broadcast %cst_90 : f32 to vector<8x122xf32>
    %1072 = arith.maximumf %1070, %1071 : vector<8x122xf32>
    %1073 = vector.broadcast %1068 : f32 to vector<8x122xf32>
    %1074 = arith.addf %1067, %1073 : vector<8x122xf32>
    %cst_91 = arith.constant 0.000000e+00 : f32
    %1075 = vector.broadcast %cst_91 : f32 to vector<8x122xf32>
    %1076 = arith.maximumf %1074, %1075 : vector<8x122xf32>
    %c140 = arith.constant 140 : index
    %1077 = memref.load %arg1[%c140] : memref<160xf32, #tpu.memory_space<smem>>
    %c141 = arith.constant 141 : index
    %1078 = memref.load %arg1[%c141] : memref<160xf32, #tpu.memory_space<smem>>
    %c142 = arith.constant 142 : index
    %1079 = memref.load %arg1[%c142] : memref<160xf32, #tpu.memory_space<smem>>
    %c143 = arith.constant 143 : index
    %1080 = memref.load %arg1[%c143] : memref<160xf32, #tpu.memory_space<smem>>
    %c144 = arith.constant 144 : index
    %1081 = memref.load %arg1[%c144] : memref<160xf32, #tpu.memory_space<smem>>
    %c145 = arith.constant 145 : index
    %1082 = memref.load %arg1[%c145] : memref<160xf32, #tpu.memory_space<smem>>
    %c146 = arith.constant 146 : index
    %1083 = memref.load %arg1[%c146] : memref<160xf32, #tpu.memory_space<smem>>
    %c147 = arith.constant 147 : index
    %1084 = memref.load %arg1[%c147] : memref<160xf32, #tpu.memory_space<smem>>
    %c148 = arith.constant 148 : index
    %1085 = memref.load %arg1[%c148] : memref<160xf32, #tpu.memory_space<smem>>
    %c149 = arith.constant 149 : index
    %1086 = memref.load %arg1[%c149] : memref<160xf32, #tpu.memory_space<smem>>
    %c150 = arith.constant 150 : index
    %1087 = memref.load %arg1[%c150] : memref<160xf32, #tpu.memory_space<smem>>
    %c151 = arith.constant 151 : index
    %1088 = memref.load %arg1[%c151] : memref<160xf32, #tpu.memory_space<smem>>
    %c152 = arith.constant 152 : index
    %1089 = memref.load %arg1[%c152] : memref<160xf32, #tpu.memory_space<smem>>
    %c153 = arith.constant 153 : index
    %1090 = memref.load %arg1[%c153] : memref<160xf32, #tpu.memory_space<smem>>
    %c154 = arith.constant 154 : index
    %1091 = memref.load %arg1[%c154] : memref<160xf32, #tpu.memory_space<smem>>
    %c155 = arith.constant 155 : index
    %1092 = memref.load %arg1[%c155] : memref<160xf32, #tpu.memory_space<smem>>
    %c156 = arith.constant 156 : index
    %1093 = memref.load %arg1[%c156] : memref<160xf32, #tpu.memory_space<smem>>
    %c157 = arith.constant 157 : index
    %1094 = memref.load %arg1[%c157] : memref<160xf32, #tpu.memory_space<smem>>
    %c158 = arith.constant 158 : index
    %1095 = memref.load %arg1[%c158] : memref<160xf32, #tpu.memory_space<smem>>
    %c159 = arith.constant 159 : index
    %1096 = memref.load %arg1[%c159] : memref<160xf32, #tpu.memory_space<smem>>
    %1097 = vector.broadcast %1077 : f32 to vector<8x122xf32>
    %1098 = arith.mulf %1097, %1 : vector<8x122xf32>
    %1099 = vector.broadcast %1078 : f32 to vector<8x122xf32>
    %1100 = arith.mulf %1099, %25 : vector<8x122xf32>
    %1101 = arith.addf %1098, %1100 : vector<8x122xf32>
    %1102 = vector.broadcast %1079 : f32 to vector<8x122xf32>
    %1103 = arith.mulf %1102, %3 : vector<8x122xf32>
    %1104 = arith.addf %1101, %1103 : vector<8x122xf32>
    %1105 = vector.broadcast %1080 : f32 to vector<8x122xf32>
    %1106 = arith.mulf %1105, %27 : vector<8x122xf32>
    %1107 = arith.addf %1104, %1106 : vector<8x122xf32>
    %1108 = vector.broadcast %1081 : f32 to vector<8x122xf32>
    %1109 = arith.mulf %1108, %5 : vector<8x122xf32>
    %1110 = arith.addf %1107, %1109 : vector<8x122xf32>
    %1111 = vector.broadcast %1082 : f32 to vector<8x122xf32>
    %1112 = arith.mulf %1111, %7 : vector<8x122xf32>
    %1113 = arith.addf %1110, %1112 : vector<8x122xf32>
    %1114 = vector.broadcast %1083 : f32 to vector<8x122xf32>
    %1115 = arith.mulf %1114, %31 : vector<8x122xf32>
    %1116 = arith.addf %1113, %1115 : vector<8x122xf32>
    %1117 = vector.broadcast %1084 : f32 to vector<8x122xf32>
    %1118 = arith.mulf %1117, %9 : vector<8x122xf32>
    %1119 = arith.addf %1116, %1118 : vector<8x122xf32>
    %1120 = vector.broadcast %1085 : f32 to vector<8x122xf32>
    %1121 = arith.mulf %1120, %33 : vector<8x122xf32>
    %1122 = arith.addf %1119, %1121 : vector<8x122xf32>
    %1123 = vector.broadcast %1086 : f32 to vector<8x122xf32>
    %1124 = arith.mulf %1123, %11 : vector<8x122xf32>
    %1125 = arith.addf %1122, %1124 : vector<8x122xf32>
    %1126 = vector.broadcast %1087 : f32 to vector<8x122xf32>
    %1127 = arith.mulf %1126, %13 : vector<8x122xf32>
    %1128 = arith.addf %1125, %1127 : vector<8x122xf32>
    %1129 = vector.broadcast %1088 : f32 to vector<8x122xf32>
    %1130 = arith.mulf %1129, %37 : vector<8x122xf32>
    %1131 = arith.addf %1128, %1130 : vector<8x122xf32>
    %1132 = vector.broadcast %1089 : f32 to vector<8x122xf32>
    %1133 = arith.mulf %1132, %15 : vector<8x122xf32>
    %1134 = arith.addf %1131, %1133 : vector<8x122xf32>
    %1135 = vector.broadcast %1090 : f32 to vector<8x122xf32>
    %1136 = arith.mulf %1135, %39 : vector<8x122xf32>
    %1137 = arith.addf %1134, %1136 : vector<8x122xf32>
    %1138 = vector.broadcast %1091 : f32 to vector<8x122xf32>
    %1139 = arith.mulf %1138, %17 : vector<8x122xf32>
    %1140 = arith.addf %1137, %1139 : vector<8x122xf32>
    %1141 = vector.broadcast %1092 : f32 to vector<8x122xf32>
    %1142 = arith.mulf %1141, %19 : vector<8x122xf32>
    %1143 = arith.addf %1140, %1142 : vector<8x122xf32>
    %1144 = vector.broadcast %1093 : f32 to vector<8x122xf32>
    %1145 = arith.mulf %1144, %43 : vector<8x122xf32>
    %1146 = arith.addf %1143, %1145 : vector<8x122xf32>
    %1147 = vector.broadcast %1094 : f32 to vector<8x122xf32>
    %1148 = arith.mulf %1147, %21 : vector<8x122xf32>
    %1149 = arith.addf %1146, %1148 : vector<8x122xf32>
    %1150 = vector.broadcast %1095 : f32 to vector<8x122xf32>
    %1151 = arith.mulf %1150, %45 : vector<8x122xf32>
    %1152 = arith.addf %1149, %1151 : vector<8x122xf32>
    %1153 = vector.broadcast %1096 : f32 to vector<8x122xf32>
    %1154 = arith.mulf %1153, %23 : vector<8x122xf32>
    %1155 = arith.addf %1152, %1154 : vector<8x122xf32>
    %1156 = vector.broadcast %1077 : f32 to vector<8x122xf32>
    %1157 = arith.mulf %1156, %25 : vector<8x122xf32>
    %1158 = vector.broadcast %1078 : f32 to vector<8x122xf32>
    %1159 = arith.mulf %1158, %3 : vector<8x122xf32>
    %1160 = arith.addf %1157, %1159 : vector<8x122xf32>
    %1161 = vector.broadcast %1079 : f32 to vector<8x122xf32>
    %1162 = arith.mulf %1161, %27 : vector<8x122xf32>
    %1163 = arith.addf %1160, %1162 : vector<8x122xf32>
    %1164 = vector.broadcast %1080 : f32 to vector<8x122xf32>
    %1165 = arith.mulf %1164, %5 : vector<8x122xf32>
    %1166 = arith.addf %1163, %1165 : vector<8x122xf32>
    %1167 = vector.broadcast %1081 : f32 to vector<8x122xf32>
    %1168 = arith.mulf %1167, %29 : vector<8x122xf32>
    %1169 = arith.addf %1166, %1168 : vector<8x122xf32>
    %1170 = vector.broadcast %1082 : f32 to vector<8x122xf32>
    %1171 = arith.mulf %1170, %31 : vector<8x122xf32>
    %1172 = arith.addf %1169, %1171 : vector<8x122xf32>
    %1173 = vector.broadcast %1083 : f32 to vector<8x122xf32>
    %1174 = arith.mulf %1173, %9 : vector<8x122xf32>
    %1175 = arith.addf %1172, %1174 : vector<8x122xf32>
    %1176 = vector.broadcast %1084 : f32 to vector<8x122xf32>
    %1177 = arith.mulf %1176, %33 : vector<8x122xf32>
    %1178 = arith.addf %1175, %1177 : vector<8x122xf32>
    %1179 = vector.broadcast %1085 : f32 to vector<8x122xf32>
    %1180 = arith.mulf %1179, %11 : vector<8x122xf32>
    %1181 = arith.addf %1178, %1180 : vector<8x122xf32>
    %1182 = vector.broadcast %1086 : f32 to vector<8x122xf32>
    %1183 = arith.mulf %1182, %35 : vector<8x122xf32>
    %1184 = arith.addf %1181, %1183 : vector<8x122xf32>
    %1185 = vector.broadcast %1087 : f32 to vector<8x122xf32>
    %1186 = arith.mulf %1185, %37 : vector<8x122xf32>
    %1187 = arith.addf %1184, %1186 : vector<8x122xf32>
    %1188 = vector.broadcast %1088 : f32 to vector<8x122xf32>
    %1189 = arith.mulf %1188, %15 : vector<8x122xf32>
    %1190 = arith.addf %1187, %1189 : vector<8x122xf32>
    %1191 = vector.broadcast %1089 : f32 to vector<8x122xf32>
    %1192 = arith.mulf %1191, %39 : vector<8x122xf32>
    %1193 = arith.addf %1190, %1192 : vector<8x122xf32>
    %1194 = vector.broadcast %1090 : f32 to vector<8x122xf32>
    %1195 = arith.mulf %1194, %17 : vector<8x122xf32>
    %1196 = arith.addf %1193, %1195 : vector<8x122xf32>
    %1197 = vector.broadcast %1091 : f32 to vector<8x122xf32>
    %1198 = arith.mulf %1197, %41 : vector<8x122xf32>
    %1199 = arith.addf %1196, %1198 : vector<8x122xf32>
    %1200 = vector.broadcast %1092 : f32 to vector<8x122xf32>
    %1201 = arith.mulf %1200, %43 : vector<8x122xf32>
    %1202 = arith.addf %1199, %1201 : vector<8x122xf32>
    %1203 = vector.broadcast %1093 : f32 to vector<8x122xf32>
    %1204 = arith.mulf %1203, %21 : vector<8x122xf32>
    %1205 = arith.addf %1202, %1204 : vector<8x122xf32>
    %1206 = vector.broadcast %1094 : f32 to vector<8x122xf32>
    %1207 = arith.mulf %1206, %45 : vector<8x122xf32>
    %1208 = arith.addf %1205, %1207 : vector<8x122xf32>
    %1209 = vector.broadcast %1095 : f32 to vector<8x122xf32>
    %1210 = arith.mulf %1209, %23 : vector<8x122xf32>
    %1211 = arith.addf %1208, %1210 : vector<8x122xf32>
    %1212 = vector.broadcast %1096 : f32 to vector<8x122xf32>
    %1213 = arith.mulf %1212, %47 : vector<8x122xf32>
    %1214 = arith.addf %1211, %1213 : vector<8x122xf32>
    %c7_92 = arith.constant 7 : index
    %1215 = memref.load %arg2[%c7_92] : memref<8xf32, #tpu.memory_space<smem>>
    %1216 = vector.broadcast %1215 : f32 to vector<8x122xf32>
    %1217 = arith.addf %1155, %1216 : vector<8x122xf32>
    %cst_93 = arith.constant 0.000000e+00 : f32
    %1218 = vector.broadcast %cst_93 : f32 to vector<8x122xf32>
    %1219 = arith.maximumf %1217, %1218 : vector<8x122xf32>
    %1220 = vector.broadcast %1215 : f32 to vector<8x122xf32>
    %1221 = arith.addf %1214, %1220 : vector<8x122xf32>
    %cst_94 = arith.constant 0.000000e+00 : f32
    %1222 = vector.broadcast %cst_94 : f32 to vector<8x122xf32>
    %1223 = arith.maximumf %1221, %1222 : vector<8x122xf32>
    %1224 = vector.extract_strided_slice %190 {offsets = [0, 0], sizes = [8, 121], strides = [1, 1]} : vector<8x122xf32> to vector<8x121xf32>
    %1225 = vector.extract_strided_slice %190 {offsets = [0, 1], sizes = [8, 121], strides = [1, 1]} : vector<8x122xf32> to vector<8x121xf32>
    %1226 = vector.extract_strided_slice %337 {offsets = [0, 0], sizes = [8, 121], strides = [1, 1]} : vector<8x122xf32> to vector<8x121xf32>
    %1227 = vector.extract_strided_slice %337 {offsets = [0, 1], sizes = [8, 121], strides = [1, 1]} : vector<8x122xf32> to vector<8x121xf32>
    %1228 = vector.extract_strided_slice %484 {offsets = [0, 0], sizes = [8, 121], strides = [1, 1]} : vector<8x122xf32> to vector<8x121xf32>
    %1229 = vector.extract_strided_slice %484 {offsets = [0, 1], sizes = [8, 121], strides = [1, 1]} : vector<8x122xf32> to vector<8x121xf32>
    %1230 = vector.extract_strided_slice %631 {offsets = [0, 0], sizes = [8, 121], strides = [1, 1]} : vector<8x122xf32> to vector<8x121xf32>
    %1231 = vector.extract_strided_slice %631 {offsets = [0, 1], sizes = [8, 121], strides = [1, 1]} : vector<8x122xf32> to vector<8x121xf32>
    %1232 = vector.extract_strided_slice %778 {offsets = [0, 0], sizes = [8, 121], strides = [1, 1]} : vector<8x122xf32> to vector<8x121xf32>
    %1233 = vector.extract_strided_slice %778 {offsets = [0, 1], sizes = [8, 121], strides = [1, 1]} : vector<8x122xf32> to vector<8x121xf32>
    %1234 = vector.extract_strided_slice %925 {offsets = [0, 0], sizes = [8, 121], strides = [1, 1]} : vector<8x122xf32> to vector<8x121xf32>
    %1235 = vector.extract_strided_slice %925 {offsets = [0, 1], sizes = [8, 121], strides = [1, 1]} : vector<8x122xf32> to vector<8x121xf32>
    %1236 = vector.extract_strided_slice %1072 {offsets = [0, 0], sizes = [8, 121], strides = [1, 1]} : vector<8x122xf32> to vector<8x121xf32>
    %1237 = vector.extract_strided_slice %1072 {offsets = [0, 1], sizes = [8, 121], strides = [1, 1]} : vector<8x122xf32> to vector<8x121xf32>
    %1238 = vector.extract_strided_slice %1219 {offsets = [0, 0], sizes = [8, 121], strides = [1, 1]} : vector<8x122xf32> to vector<8x121xf32>
    %1239 = vector.extract_strided_slice %1219 {offsets = [0, 1], sizes = [8, 121], strides = [1, 1]} : vector<8x122xf32> to vector<8x121xf32>
    %1240 = vector.extract_strided_slice %194 {offsets = [0, 0], sizes = [8, 121], strides = [1, 1]} : vector<8x122xf32> to vector<8x121xf32>
    %1241 = vector.extract_strided_slice %194 {offsets = [0, 1], sizes = [8, 121], strides = [1, 1]} : vector<8x122xf32> to vector<8x121xf32>
    %1242 = vector.extract_strided_slice %341 {offsets = [0, 0], sizes = [8, 121], strides = [1, 1]} : vector<8x122xf32> to vector<8x121xf32>
    %1243 = vector.extract_strided_slice %341 {offsets = [0, 1], sizes = [8, 121], strides = [1, 1]} : vector<8x122xf32> to vector<8x121xf32>
    %1244 = vector.extract_strided_slice %488 {offsets = [0, 0], sizes = [8, 121], strides = [1, 1]} : vector<8x122xf32> to vector<8x121xf32>
    %1245 = vector.extract_strided_slice %488 {offsets = [0, 1], sizes = [8, 121], strides = [1, 1]} : vector<8x122xf32> to vector<8x121xf32>
    %1246 = vector.extract_strided_slice %635 {offsets = [0, 0], sizes = [8, 121], strides = [1, 1]} : vector<8x122xf32> to vector<8x121xf32>
    %1247 = vector.extract_strided_slice %635 {offsets = [0, 1], sizes = [8, 121], strides = [1, 1]} : vector<8x122xf32> to vector<8x121xf32>
    %1248 = vector.extract_strided_slice %782 {offsets = [0, 0], sizes = [8, 121], strides = [1, 1]} : vector<8x122xf32> to vector<8x121xf32>
    %1249 = vector.extract_strided_slice %782 {offsets = [0, 1], sizes = [8, 121], strides = [1, 1]} : vector<8x122xf32> to vector<8x121xf32>
    %1250 = vector.extract_strided_slice %929 {offsets = [0, 0], sizes = [8, 121], strides = [1, 1]} : vector<8x122xf32> to vector<8x121xf32>
    %1251 = vector.extract_strided_slice %929 {offsets = [0, 1], sizes = [8, 121], strides = [1, 1]} : vector<8x122xf32> to vector<8x121xf32>
    %1252 = vector.extract_strided_slice %1076 {offsets = [0, 0], sizes = [8, 121], strides = [1, 1]} : vector<8x122xf32> to vector<8x121xf32>
    %1253 = vector.extract_strided_slice %1076 {offsets = [0, 1], sizes = [8, 121], strides = [1, 1]} : vector<8x122xf32> to vector<8x121xf32>
    %1254 = vector.extract_strided_slice %1223 {offsets = [0, 0], sizes = [8, 121], strides = [1, 1]} : vector<8x122xf32> to vector<8x121xf32>
    %1255 = vector.extract_strided_slice %1223 {offsets = [0, 1], sizes = [8, 121], strides = [1, 1]} : vector<8x122xf32> to vector<8x121xf32>
    %c0_95 = arith.constant 0 : index
    %1256 = memref.load %arg3[%c0_95] : memref<192xf32, #tpu.memory_space<smem>>
    %c1_96 = arith.constant 1 : index
    %1257 = memref.load %arg3[%c1_96] : memref<192xf32, #tpu.memory_space<smem>>
    %c2_97 = arith.constant 2 : index
    %1258 = memref.load %arg3[%c2_97] : memref<192xf32, #tpu.memory_space<smem>>
    %c3_98 = arith.constant 3 : index
    %1259 = memref.load %arg3[%c3_98] : memref<192xf32, #tpu.memory_space<smem>>
    %c4_99 = arith.constant 4 : index
    %1260 = memref.load %arg3[%c4_99] : memref<192xf32, #tpu.memory_space<smem>>
    %c5_100 = arith.constant 5 : index
    %1261 = memref.load %arg3[%c5_100] : memref<192xf32, #tpu.memory_space<smem>>
    %c6_101 = arith.constant 6 : index
    %1262 = memref.load %arg3[%c6_101] : memref<192xf32, #tpu.memory_space<smem>>
    %c7_102 = arith.constant 7 : index
    %1263 = memref.load %arg3[%c7_102] : memref<192xf32, #tpu.memory_space<smem>>
    %c8_103 = arith.constant 8 : index
    %1264 = memref.load %arg3[%c8_103] : memref<192xf32, #tpu.memory_space<smem>>
    %c9_104 = arith.constant 9 : index
    %1265 = memref.load %arg3[%c9_104] : memref<192xf32, #tpu.memory_space<smem>>
    %c10_105 = arith.constant 10 : index
    %1266 = memref.load %arg3[%c10_105] : memref<192xf32, #tpu.memory_space<smem>>
    %c11_106 = arith.constant 11 : index
    %1267 = memref.load %arg3[%c11_106] : memref<192xf32, #tpu.memory_space<smem>>
    %c12_107 = arith.constant 12 : index
    %1268 = memref.load %arg3[%c12_107] : memref<192xf32, #tpu.memory_space<smem>>
    %c13_108 = arith.constant 13 : index
    %1269 = memref.load %arg3[%c13_108] : memref<192xf32, #tpu.memory_space<smem>>
    %c14_109 = arith.constant 14 : index
    %1270 = memref.load %arg3[%c14_109] : memref<192xf32, #tpu.memory_space<smem>>
    %c15_110 = arith.constant 15 : index
    %1271 = memref.load %arg3[%c15_110] : memref<192xf32, #tpu.memory_space<smem>>
    %c16_111 = arith.constant 16 : index
    %1272 = memref.load %arg3[%c16_111] : memref<192xf32, #tpu.memory_space<smem>>
    %c17_112 = arith.constant 17 : index
    %1273 = memref.load %arg3[%c17_112] : memref<192xf32, #tpu.memory_space<smem>>
    %c18_113 = arith.constant 18 : index
    %1274 = memref.load %arg3[%c18_113] : memref<192xf32, #tpu.memory_space<smem>>
    %c19_114 = arith.constant 19 : index
    %1275 = memref.load %arg3[%c19_114] : memref<192xf32, #tpu.memory_space<smem>>
    %c20_115 = arith.constant 20 : index
    %1276 = memref.load %arg3[%c20_115] : memref<192xf32, #tpu.memory_space<smem>>
    %c21_116 = arith.constant 21 : index
    %1277 = memref.load %arg3[%c21_116] : memref<192xf32, #tpu.memory_space<smem>>
    %c22_117 = arith.constant 22 : index
    %1278 = memref.load %arg3[%c22_117] : memref<192xf32, #tpu.memory_space<smem>>
    %c23_118 = arith.constant 23 : index
    %1279 = memref.load %arg3[%c23_118] : memref<192xf32, #tpu.memory_space<smem>>
    %1280 = vector.broadcast %1256 : f32 to vector<8x121xf32>
    %1281 = arith.mulf %1280, %1224 : vector<8x121xf32>
    %1282 = vector.broadcast %1257 : f32 to vector<8x121xf32>
    %1283 = arith.mulf %1282, %1240 : vector<8x121xf32>
    %1284 = arith.addf %1281, %1283 : vector<8x121xf32>
    %1285 = vector.broadcast %1258 : f32 to vector<8x121xf32>
    %1286 = arith.mulf %1285, %1225 : vector<8x121xf32>
    %1287 = arith.addf %1284, %1286 : vector<8x121xf32>
    %1288 = vector.broadcast %1259 : f32 to vector<8x121xf32>
    %1289 = arith.mulf %1288, %1226 : vector<8x121xf32>
    %1290 = arith.addf %1287, %1289 : vector<8x121xf32>
    %1291 = vector.broadcast %1260 : f32 to vector<8x121xf32>
    %1292 = arith.mulf %1291, %1242 : vector<8x121xf32>
    %1293 = arith.addf %1290, %1292 : vector<8x121xf32>
    %1294 = vector.broadcast %1261 : f32 to vector<8x121xf32>
    %1295 = arith.mulf %1294, %1227 : vector<8x121xf32>
    %1296 = arith.addf %1293, %1295 : vector<8x121xf32>
    %1297 = vector.broadcast %1262 : f32 to vector<8x121xf32>
    %1298 = arith.mulf %1297, %1228 : vector<8x121xf32>
    %1299 = arith.addf %1296, %1298 : vector<8x121xf32>
    %1300 = vector.broadcast %1263 : f32 to vector<8x121xf32>
    %1301 = arith.mulf %1300, %1244 : vector<8x121xf32>
    %1302 = arith.addf %1299, %1301 : vector<8x121xf32>
    %1303 = vector.broadcast %1264 : f32 to vector<8x121xf32>
    %1304 = arith.mulf %1303, %1229 : vector<8x121xf32>
    %1305 = arith.addf %1302, %1304 : vector<8x121xf32>
    %1306 = vector.broadcast %1265 : f32 to vector<8x121xf32>
    %1307 = arith.mulf %1306, %1230 : vector<8x121xf32>
    %1308 = arith.addf %1305, %1307 : vector<8x121xf32>
    %1309 = vector.broadcast %1266 : f32 to vector<8x121xf32>
    %1310 = arith.mulf %1309, %1246 : vector<8x121xf32>
    %1311 = arith.addf %1308, %1310 : vector<8x121xf32>
    %1312 = vector.broadcast %1267 : f32 to vector<8x121xf32>
    %1313 = arith.mulf %1312, %1231 : vector<8x121xf32>
    %1314 = arith.addf %1311, %1313 : vector<8x121xf32>
    %1315 = vector.broadcast %1268 : f32 to vector<8x121xf32>
    %1316 = arith.mulf %1315, %1232 : vector<8x121xf32>
    %1317 = arith.addf %1314, %1316 : vector<8x121xf32>
    %1318 = vector.broadcast %1269 : f32 to vector<8x121xf32>
    %1319 = arith.mulf %1318, %1248 : vector<8x121xf32>
    %1320 = arith.addf %1317, %1319 : vector<8x121xf32>
    %1321 = vector.broadcast %1270 : f32 to vector<8x121xf32>
    %1322 = arith.mulf %1321, %1233 : vector<8x121xf32>
    %1323 = arith.addf %1320, %1322 : vector<8x121xf32>
    %1324 = vector.broadcast %1271 : f32 to vector<8x121xf32>
    %1325 = arith.mulf %1324, %1234 : vector<8x121xf32>
    %1326 = arith.addf %1323, %1325 : vector<8x121xf32>
    %1327 = vector.broadcast %1272 : f32 to vector<8x121xf32>
    %1328 = arith.mulf %1327, %1250 : vector<8x121xf32>
    %1329 = arith.addf %1326, %1328 : vector<8x121xf32>
    %1330 = vector.broadcast %1273 : f32 to vector<8x121xf32>
    %1331 = arith.mulf %1330, %1235 : vector<8x121xf32>
    %1332 = arith.addf %1329, %1331 : vector<8x121xf32>
    %1333 = vector.broadcast %1274 : f32 to vector<8x121xf32>
    %1334 = arith.mulf %1333, %1236 : vector<8x121xf32>
    %1335 = arith.addf %1332, %1334 : vector<8x121xf32>
    %1336 = vector.broadcast %1275 : f32 to vector<8x121xf32>
    %1337 = arith.mulf %1336, %1252 : vector<8x121xf32>
    %1338 = arith.addf %1335, %1337 : vector<8x121xf32>
    %1339 = vector.broadcast %1276 : f32 to vector<8x121xf32>
    %1340 = arith.mulf %1339, %1237 : vector<8x121xf32>
    %1341 = arith.addf %1338, %1340 : vector<8x121xf32>
    %1342 = vector.broadcast %1277 : f32 to vector<8x121xf32>
    %1343 = arith.mulf %1342, %1238 : vector<8x121xf32>
    %1344 = arith.addf %1341, %1343 : vector<8x121xf32>
    %1345 = vector.broadcast %1278 : f32 to vector<8x121xf32>
    %1346 = arith.mulf %1345, %1254 : vector<8x121xf32>
    %1347 = arith.addf %1344, %1346 : vector<8x121xf32>
    %1348 = vector.broadcast %1279 : f32 to vector<8x121xf32>
    %1349 = arith.mulf %1348, %1239 : vector<8x121xf32>
    %1350 = arith.addf %1347, %1349 : vector<8x121xf32>
    %1351 = vector.broadcast %1256 : f32 to vector<8x121xf32>
    %1352 = arith.mulf %1351, %1240 : vector<8x121xf32>
    %1353 = vector.broadcast %1257 : f32 to vector<8x121xf32>
    %1354 = arith.mulf %1353, %1225 : vector<8x121xf32>
    %1355 = arith.addf %1352, %1354 : vector<8x121xf32>
    %1356 = vector.broadcast %1258 : f32 to vector<8x121xf32>
    %1357 = arith.mulf %1356, %1241 : vector<8x121xf32>
    %1358 = arith.addf %1355, %1357 : vector<8x121xf32>
    %1359 = vector.broadcast %1259 : f32 to vector<8x121xf32>
    %1360 = arith.mulf %1359, %1242 : vector<8x121xf32>
    %1361 = arith.addf %1358, %1360 : vector<8x121xf32>
    %1362 = vector.broadcast %1260 : f32 to vector<8x121xf32>
    %1363 = arith.mulf %1362, %1227 : vector<8x121xf32>
    %1364 = arith.addf %1361, %1363 : vector<8x121xf32>
    %1365 = vector.broadcast %1261 : f32 to vector<8x121xf32>
    %1366 = arith.mulf %1365, %1243 : vector<8x121xf32>
    %1367 = arith.addf %1364, %1366 : vector<8x121xf32>
    %1368 = vector.broadcast %1262 : f32 to vector<8x121xf32>
    %1369 = arith.mulf %1368, %1244 : vector<8x121xf32>
    %1370 = arith.addf %1367, %1369 : vector<8x121xf32>
    %1371 = vector.broadcast %1263 : f32 to vector<8x121xf32>
    %1372 = arith.mulf %1371, %1229 : vector<8x121xf32>
    %1373 = arith.addf %1370, %1372 : vector<8x121xf32>
    %1374 = vector.broadcast %1264 : f32 to vector<8x121xf32>
    %1375 = arith.mulf %1374, %1245 : vector<8x121xf32>
    %1376 = arith.addf %1373, %1375 : vector<8x121xf32>
    %1377 = vector.broadcast %1265 : f32 to vector<8x121xf32>
    %1378 = arith.mulf %1377, %1246 : vector<8x121xf32>
    %1379 = arith.addf %1376, %1378 : vector<8x121xf32>
    %1380 = vector.broadcast %1266 : f32 to vector<8x121xf32>
    %1381 = arith.mulf %1380, %1231 : vector<8x121xf32>
    %1382 = arith.addf %1379, %1381 : vector<8x121xf32>
    %1383 = vector.broadcast %1267 : f32 to vector<8x121xf32>
    %1384 = arith.mulf %1383, %1247 : vector<8x121xf32>
    %1385 = arith.addf %1382, %1384 : vector<8x121xf32>
    %1386 = vector.broadcast %1268 : f32 to vector<8x121xf32>
    %1387 = arith.mulf %1386, %1248 : vector<8x121xf32>
    %1388 = arith.addf %1385, %1387 : vector<8x121xf32>
    %1389 = vector.broadcast %1269 : f32 to vector<8x121xf32>
    %1390 = arith.mulf %1389, %1233 : vector<8x121xf32>
    %1391 = arith.addf %1388, %1390 : vector<8x121xf32>
    %1392 = vector.broadcast %1270 : f32 to vector<8x121xf32>
    %1393 = arith.mulf %1392, %1249 : vector<8x121xf32>
    %1394 = arith.addf %1391, %1393 : vector<8x121xf32>
    %1395 = vector.broadcast %1271 : f32 to vector<8x121xf32>
    %1396 = arith.mulf %1395, %1250 : vector<8x121xf32>
    %1397 = arith.addf %1394, %1396 : vector<8x121xf32>
    %1398 = vector.broadcast %1272 : f32 to vector<8x121xf32>
    %1399 = arith.mulf %1398, %1235 : vector<8x121xf32>
    %1400 = arith.addf %1397, %1399 : vector<8x121xf32>
    %1401 = vector.broadcast %1273 : f32 to vector<8x121xf32>
    %1402 = arith.mulf %1401, %1251 : vector<8x121xf32>
    %1403 = arith.addf %1400, %1402 : vector<8x121xf32>
    %1404 = vector.broadcast %1274 : f32 to vector<8x121xf32>
    %1405 = arith.mulf %1404, %1252 : vector<8x121xf32>
    %1406 = arith.addf %1403, %1405 : vector<8x121xf32>
    %1407 = vector.broadcast %1275 : f32 to vector<8x121xf32>
    %1408 = arith.mulf %1407, %1237 : vector<8x121xf32>
    %1409 = arith.addf %1406, %1408 : vector<8x121xf32>
    %1410 = vector.broadcast %1276 : f32 to vector<8x121xf32>
    %1411 = arith.mulf %1410, %1253 : vector<8x121xf32>
    %1412 = arith.addf %1409, %1411 : vector<8x121xf32>
    %1413 = vector.broadcast %1277 : f32 to vector<8x121xf32>
    %1414 = arith.mulf %1413, %1254 : vector<8x121xf32>
    %1415 = arith.addf %1412, %1414 : vector<8x121xf32>
    %1416 = vector.broadcast %1278 : f32 to vector<8x121xf32>
    %1417 = arith.mulf %1416, %1239 : vector<8x121xf32>
    %1418 = arith.addf %1415, %1417 : vector<8x121xf32>
    %1419 = vector.broadcast %1279 : f32 to vector<8x121xf32>
    %1420 = arith.mulf %1419, %1255 : vector<8x121xf32>
    %1421 = arith.addf %1418, %1420 : vector<8x121xf32>
    %c0_119 = arith.constant 0 : index
    %1422 = memref.load %arg4[%c0_119] : memref<8xf32, #tpu.memory_space<smem>>
    %1423 = vector.broadcast %1422 : f32 to vector<8x121xf32>
    %1424 = arith.addf %1350, %1423 : vector<8x121xf32>
    %cst_120 = arith.constant 0.000000e+00 : f32
    %1425 = vector.broadcast %cst_120 : f32 to vector<8x121xf32>
    %1426 = arith.maximumf %1424, %1425 : vector<8x121xf32>
    %1427 = vector.broadcast %1422 : f32 to vector<8x121xf32>
    %1428 = arith.addf %1421, %1427 : vector<8x121xf32>
    %cst_121 = arith.constant 0.000000e+00 : f32
    %1429 = vector.broadcast %cst_121 : f32 to vector<8x121xf32>
    %1430 = arith.maximumf %1428, %1429 : vector<8x121xf32>
    %1431 = arith.maximumf %1426, %1430 : vector<8x121xf32>
    %1432 = arith.truncf %1431 : vector<8x121xf32> to vector<8x121xbf16>
    %c24_122 = arith.constant 24 : index
    %1433 = memref.load %arg3[%c24_122] : memref<192xf32, #tpu.memory_space<smem>>
    %c25_123 = arith.constant 25 : index
    %1434 = memref.load %arg3[%c25_123] : memref<192xf32, #tpu.memory_space<smem>>
    %c26_124 = arith.constant 26 : index
    %1435 = memref.load %arg3[%c26_124] : memref<192xf32, #tpu.memory_space<smem>>
    %c27_125 = arith.constant 27 : index
    %1436 = memref.load %arg3[%c27_125] : memref<192xf32, #tpu.memory_space<smem>>
    %c28_126 = arith.constant 28 : index
    %1437 = memref.load %arg3[%c28_126] : memref<192xf32, #tpu.memory_space<smem>>
    %c29_127 = arith.constant 29 : index
    %1438 = memref.load %arg3[%c29_127] : memref<192xf32, #tpu.memory_space<smem>>
    %c30_128 = arith.constant 30 : index
    %1439 = memref.load %arg3[%c30_128] : memref<192xf32, #tpu.memory_space<smem>>
    %c31_129 = arith.constant 31 : index
    %1440 = memref.load %arg3[%c31_129] : memref<192xf32, #tpu.memory_space<smem>>
    %c32_130 = arith.constant 32 : index
    %1441 = memref.load %arg3[%c32_130] : memref<192xf32, #tpu.memory_space<smem>>
    %c33_131 = arith.constant 33 : index
    %1442 = memref.load %arg3[%c33_131] : memref<192xf32, #tpu.memory_space<smem>>
    %c34_132 = arith.constant 34 : index
    %1443 = memref.load %arg3[%c34_132] : memref<192xf32, #tpu.memory_space<smem>>
    %c35_133 = arith.constant 35 : index
    %1444 = memref.load %arg3[%c35_133] : memref<192xf32, #tpu.memory_space<smem>>
    %c36_134 = arith.constant 36 : index
    %1445 = memref.load %arg3[%c36_134] : memref<192xf32, #tpu.memory_space<smem>>
    %c37_135 = arith.constant 37 : index
    %1446 = memref.load %arg3[%c37_135] : memref<192xf32, #tpu.memory_space<smem>>
    %c38_136 = arith.constant 38 : index
    %1447 = memref.load %arg3[%c38_136] : memref<192xf32, #tpu.memory_space<smem>>
    %c39_137 = arith.constant 39 : index
    %1448 = memref.load %arg3[%c39_137] : memref<192xf32, #tpu.memory_space<smem>>
    %c40_138 = arith.constant 40 : index
    %1449 = memref.load %arg3[%c40_138] : memref<192xf32, #tpu.memory_space<smem>>
    %c41_139 = arith.constant 41 : index
    %1450 = memref.load %arg3[%c41_139] : memref<192xf32, #tpu.memory_space<smem>>
    %c42_140 = arith.constant 42 : index
    %1451 = memref.load %arg3[%c42_140] : memref<192xf32, #tpu.memory_space<smem>>
    %c43_141 = arith.constant 43 : index
    %1452 = memref.load %arg3[%c43_141] : memref<192xf32, #tpu.memory_space<smem>>
    %c44_142 = arith.constant 44 : index
    %1453 = memref.load %arg3[%c44_142] : memref<192xf32, #tpu.memory_space<smem>>
    %c45_143 = arith.constant 45 : index
    %1454 = memref.load %arg3[%c45_143] : memref<192xf32, #tpu.memory_space<smem>>
    %c46_144 = arith.constant 46 : index
    %1455 = memref.load %arg3[%c46_144] : memref<192xf32, #tpu.memory_space<smem>>
    %c47_145 = arith.constant 47 : index
    %1456 = memref.load %arg3[%c47_145] : memref<192xf32, #tpu.memory_space<smem>>
    %1457 = vector.broadcast %1433 : f32 to vector<8x121xf32>
    %1458 = arith.mulf %1457, %1224 : vector<8x121xf32>
    %1459 = vector.broadcast %1434 : f32 to vector<8x121xf32>
    %1460 = arith.mulf %1459, %1240 : vector<8x121xf32>
    %1461 = arith.addf %1458, %1460 : vector<8x121xf32>
    %1462 = vector.broadcast %1435 : f32 to vector<8x121xf32>
    %1463 = arith.mulf %1462, %1225 : vector<8x121xf32>
    %1464 = arith.addf %1461, %1463 : vector<8x121xf32>
    %1465 = vector.broadcast %1436 : f32 to vector<8x121xf32>
    %1466 = arith.mulf %1465, %1226 : vector<8x121xf32>
    %1467 = arith.addf %1464, %1466 : vector<8x121xf32>
    %1468 = vector.broadcast %1437 : f32 to vector<8x121xf32>
    %1469 = arith.mulf %1468, %1242 : vector<8x121xf32>
    %1470 = arith.addf %1467, %1469 : vector<8x121xf32>
    %1471 = vector.broadcast %1438 : f32 to vector<8x121xf32>
    %1472 = arith.mulf %1471, %1227 : vector<8x121xf32>
    %1473 = arith.addf %1470, %1472 : vector<8x121xf32>
    %1474 = vector.broadcast %1439 : f32 to vector<8x121xf32>
    %1475 = arith.mulf %1474, %1228 : vector<8x121xf32>
    %1476 = arith.addf %1473, %1475 : vector<8x121xf32>
    %1477 = vector.broadcast %1440 : f32 to vector<8x121xf32>
    %1478 = arith.mulf %1477, %1244 : vector<8x121xf32>
    %1479 = arith.addf %1476, %1478 : vector<8x121xf32>
    %1480 = vector.broadcast %1441 : f32 to vector<8x121xf32>
    %1481 = arith.mulf %1480, %1229 : vector<8x121xf32>
    %1482 = arith.addf %1479, %1481 : vector<8x121xf32>
    %1483 = vector.broadcast %1442 : f32 to vector<8x121xf32>
    %1484 = arith.mulf %1483, %1230 : vector<8x121xf32>
    %1485 = arith.addf %1482, %1484 : vector<8x121xf32>
    %1486 = vector.broadcast %1443 : f32 to vector<8x121xf32>
    %1487 = arith.mulf %1486, %1246 : vector<8x121xf32>
    %1488 = arith.addf %1485, %1487 : vector<8x121xf32>
    %1489 = vector.broadcast %1444 : f32 to vector<8x121xf32>
    %1490 = arith.mulf %1489, %1231 : vector<8x121xf32>
    %1491 = arith.addf %1488, %1490 : vector<8x121xf32>
    %1492 = vector.broadcast %1445 : f32 to vector<8x121xf32>
    %1493 = arith.mulf %1492, %1232 : vector<8x121xf32>
    %1494 = arith.addf %1491, %1493 : vector<8x121xf32>
    %1495 = vector.broadcast %1446 : f32 to vector<8x121xf32>
    %1496 = arith.mulf %1495, %1248 : vector<8x121xf32>
    %1497 = arith.addf %1494, %1496 : vector<8x121xf32>
    %1498 = vector.broadcast %1447 : f32 to vector<8x121xf32>
    %1499 = arith.mulf %1498, %1233 : vector<8x121xf32>
    %1500 = arith.addf %1497, %1499 : vector<8x121xf32>
    %1501 = vector.broadcast %1448 : f32 to vector<8x121xf32>
    %1502 = arith.mulf %1501, %1234 : vector<8x121xf32>
    %1503 = arith.addf %1500, %1502 : vector<8x121xf32>
    %1504 = vector.broadcast %1449 : f32 to vector<8x121xf32>
    %1505 = arith.mulf %1504, %1250 : vector<8x121xf32>
    %1506 = arith.addf %1503, %1505 : vector<8x121xf32>
    %1507 = vector.broadcast %1450 : f32 to vector<8x121xf32>
    %1508 = arith.mulf %1507, %1235 : vector<8x121xf32>
    %1509 = arith.addf %1506, %1508 : vector<8x121xf32>
    %1510 = vector.broadcast %1451 : f32 to vector<8x121xf32>
    %1511 = arith.mulf %1510, %1236 : vector<8x121xf32>
    %1512 = arith.addf %1509, %1511 : vector<8x121xf32>
    %1513 = vector.broadcast %1452 : f32 to vector<8x121xf32>
    %1514 = arith.mulf %1513, %1252 : vector<8x121xf32>
    %1515 = arith.addf %1512, %1514 : vector<8x121xf32>
    %1516 = vector.broadcast %1453 : f32 to vector<8x121xf32>
    %1517 = arith.mulf %1516, %1237 : vector<8x121xf32>
    %1518 = arith.addf %1515, %1517 : vector<8x121xf32>
    %1519 = vector.broadcast %1454 : f32 to vector<8x121xf32>
    %1520 = arith.mulf %1519, %1238 : vector<8x121xf32>
    %1521 = arith.addf %1518, %1520 : vector<8x121xf32>
    %1522 = vector.broadcast %1455 : f32 to vector<8x121xf32>
    %1523 = arith.mulf %1522, %1254 : vector<8x121xf32>
    %1524 = arith.addf %1521, %1523 : vector<8x121xf32>
    %1525 = vector.broadcast %1456 : f32 to vector<8x121xf32>
    %1526 = arith.mulf %1525, %1239 : vector<8x121xf32>
    %1527 = arith.addf %1524, %1526 : vector<8x121xf32>
    %1528 = vector.broadcast %1433 : f32 to vector<8x121xf32>
    %1529 = arith.mulf %1528, %1240 : vector<8x121xf32>
    %1530 = vector.broadcast %1434 : f32 to vector<8x121xf32>
    %1531 = arith.mulf %1530, %1225 : vector<8x121xf32>
    %1532 = arith.addf %1529, %1531 : vector<8x121xf32>
    %1533 = vector.broadcast %1435 : f32 to vector<8x121xf32>
    %1534 = arith.mulf %1533, %1241 : vector<8x121xf32>
    %1535 = arith.addf %1532, %1534 : vector<8x121xf32>
    %1536 = vector.broadcast %1436 : f32 to vector<8x121xf32>
    %1537 = arith.mulf %1536, %1242 : vector<8x121xf32>
    %1538 = arith.addf %1535, %1537 : vector<8x121xf32>
    %1539 = vector.broadcast %1437 : f32 to vector<8x121xf32>
    %1540 = arith.mulf %1539, %1227 : vector<8x121xf32>
    %1541 = arith.addf %1538, %1540 : vector<8x121xf32>
    %1542 = vector.broadcast %1438 : f32 to vector<8x121xf32>
    %1543 = arith.mulf %1542, %1243 : vector<8x121xf32>
    %1544 = arith.addf %1541, %1543 : vector<8x121xf32>
    %1545 = vector.broadcast %1439 : f32 to vector<8x121xf32>
    %1546 = arith.mulf %1545, %1244 : vector<8x121xf32>
    %1547 = arith.addf %1544, %1546 : vector<8x121xf32>
    %1548 = vector.broadcast %1440 : f32 to vector<8x121xf32>
    %1549 = arith.mulf %1548, %1229 : vector<8x121xf32>
    %1550 = arith.addf %1547, %1549 : vector<8x121xf32>
    %1551 = vector.broadcast %1441 : f32 to vector<8x121xf32>
    %1552 = arith.mulf %1551, %1245 : vector<8x121xf32>
    %1553 = arith.addf %1550, %1552 : vector<8x121xf32>
    %1554 = vector.broadcast %1442 : f32 to vector<8x121xf32>
    %1555 = arith.mulf %1554, %1246 : vector<8x121xf32>
    %1556 = arith.addf %1553, %1555 : vector<8x121xf32>
    %1557 = vector.broadcast %1443 : f32 to vector<8x121xf32>
    %1558 = arith.mulf %1557, %1231 : vector<8x121xf32>
    %1559 = arith.addf %1556, %1558 : vector<8x121xf32>
    %1560 = vector.broadcast %1444 : f32 to vector<8x121xf32>
    %1561 = arith.mulf %1560, %1247 : vector<8x121xf32>
    %1562 = arith.addf %1559, %1561 : vector<8x121xf32>
    %1563 = vector.broadcast %1445 : f32 to vector<8x121xf32>
    %1564 = arith.mulf %1563, %1248 : vector<8x121xf32>
    %1565 = arith.addf %1562, %1564 : vector<8x121xf32>
    %1566 = vector.broadcast %1446 : f32 to vector<8x121xf32>
    %1567 = arith.mulf %1566, %1233 : vector<8x121xf32>
    %1568 = arith.addf %1565, %1567 : vector<8x121xf32>
    %1569 = vector.broadcast %1447 : f32 to vector<8x121xf32>
    %1570 = arith.mulf %1569, %1249 : vector<8x121xf32>
    %1571 = arith.addf %1568, %1570 : vector<8x121xf32>
    %1572 = vector.broadcast %1448 : f32 to vector<8x121xf32>
    %1573 = arith.mulf %1572, %1250 : vector<8x121xf32>
    %1574 = arith.addf %1571, %1573 : vector<8x121xf32>
    %1575 = vector.broadcast %1449 : f32 to vector<8x121xf32>
    %1576 = arith.mulf %1575, %1235 : vector<8x121xf32>
    %1577 = arith.addf %1574, %1576 : vector<8x121xf32>
    %1578 = vector.broadcast %1450 : f32 to vector<8x121xf32>
    %1579 = arith.mulf %1578, %1251 : vector<8x121xf32>
    %1580 = arith.addf %1577, %1579 : vector<8x121xf32>
    %1581 = vector.broadcast %1451 : f32 to vector<8x121xf32>
    %1582 = arith.mulf %1581, %1252 : vector<8x121xf32>
    %1583 = arith.addf %1580, %1582 : vector<8x121xf32>
    %1584 = vector.broadcast %1452 : f32 to vector<8x121xf32>
    %1585 = arith.mulf %1584, %1237 : vector<8x121xf32>
    %1586 = arith.addf %1583, %1585 : vector<8x121xf32>
    %1587 = vector.broadcast %1453 : f32 to vector<8x121xf32>
    %1588 = arith.mulf %1587, %1253 : vector<8x121xf32>
    %1589 = arith.addf %1586, %1588 : vector<8x121xf32>
    %1590 = vector.broadcast %1454 : f32 to vector<8x121xf32>
    %1591 = arith.mulf %1590, %1254 : vector<8x121xf32>
    %1592 = arith.addf %1589, %1591 : vector<8x121xf32>
    %1593 = vector.broadcast %1455 : f32 to vector<8x121xf32>
    %1594 = arith.mulf %1593, %1239 : vector<8x121xf32>
    %1595 = arith.addf %1592, %1594 : vector<8x121xf32>
    %1596 = vector.broadcast %1456 : f32 to vector<8x121xf32>
    %1597 = arith.mulf %1596, %1255 : vector<8x121xf32>
    %1598 = arith.addf %1595, %1597 : vector<8x121xf32>
    %c1_146 = arith.constant 1 : index
    %1599 = memref.load %arg4[%c1_146] : memref<8xf32, #tpu.memory_space<smem>>
    %1600 = vector.broadcast %1599 : f32 to vector<8x121xf32>
    %1601 = arith.addf %1527, %1600 : vector<8x121xf32>
    %cst_147 = arith.constant 0.000000e+00 : f32
    %1602 = vector.broadcast %cst_147 : f32 to vector<8x121xf32>
    %1603 = arith.maximumf %1601, %1602 : vector<8x121xf32>
    %1604 = vector.broadcast %1599 : f32 to vector<8x121xf32>
    %1605 = arith.addf %1598, %1604 : vector<8x121xf32>
    %cst_148 = arith.constant 0.000000e+00 : f32
    %1606 = vector.broadcast %cst_148 : f32 to vector<8x121xf32>
    %1607 = arith.maximumf %1605, %1606 : vector<8x121xf32>
    %1608 = arith.maximumf %1603, %1607 : vector<8x121xf32>
    %1609 = arith.truncf %1608 : vector<8x121xf32> to vector<8x121xbf16>
    %c48_149 = arith.constant 48 : index
    %1610 = memref.load %arg3[%c48_149] : memref<192xf32, #tpu.memory_space<smem>>
    %c49_150 = arith.constant 49 : index
    %1611 = memref.load %arg3[%c49_150] : memref<192xf32, #tpu.memory_space<smem>>
    %c50_151 = arith.constant 50 : index
    %1612 = memref.load %arg3[%c50_151] : memref<192xf32, #tpu.memory_space<smem>>
    %c51_152 = arith.constant 51 : index
    %1613 = memref.load %arg3[%c51_152] : memref<192xf32, #tpu.memory_space<smem>>
    %c52_153 = arith.constant 52 : index
    %1614 = memref.load %arg3[%c52_153] : memref<192xf32, #tpu.memory_space<smem>>
    %c53_154 = arith.constant 53 : index
    %1615 = memref.load %arg3[%c53_154] : memref<192xf32, #tpu.memory_space<smem>>
    %c54_155 = arith.constant 54 : index
    %1616 = memref.load %arg3[%c54_155] : memref<192xf32, #tpu.memory_space<smem>>
    %c55_156 = arith.constant 55 : index
    %1617 = memref.load %arg3[%c55_156] : memref<192xf32, #tpu.memory_space<smem>>
    %c56_157 = arith.constant 56 : index
    %1618 = memref.load %arg3[%c56_157] : memref<192xf32, #tpu.memory_space<smem>>
    %c57_158 = arith.constant 57 : index
    %1619 = memref.load %arg3[%c57_158] : memref<192xf32, #tpu.memory_space<smem>>
    %c58_159 = arith.constant 58 : index
    %1620 = memref.load %arg3[%c58_159] : memref<192xf32, #tpu.memory_space<smem>>
    %c59_160 = arith.constant 59 : index
    %1621 = memref.load %arg3[%c59_160] : memref<192xf32, #tpu.memory_space<smem>>
    %c60_161 = arith.constant 60 : index
    %1622 = memref.load %arg3[%c60_161] : memref<192xf32, #tpu.memory_space<smem>>
    %c61_162 = arith.constant 61 : index
    %1623 = memref.load %arg3[%c61_162] : memref<192xf32, #tpu.memory_space<smem>>
    %c62_163 = arith.constant 62 : index
    %1624 = memref.load %arg3[%c62_163] : memref<192xf32, #tpu.memory_space<smem>>
    %c63_164 = arith.constant 63 : index
    %1625 = memref.load %arg3[%c63_164] : memref<192xf32, #tpu.memory_space<smem>>
    %c64_165 = arith.constant 64 : index
    %1626 = memref.load %arg3[%c64_165] : memref<192xf32, #tpu.memory_space<smem>>
    %c65_166 = arith.constant 65 : index
    %1627 = memref.load %arg3[%c65_166] : memref<192xf32, #tpu.memory_space<smem>>
    %c66_167 = arith.constant 66 : index
    %1628 = memref.load %arg3[%c66_167] : memref<192xf32, #tpu.memory_space<smem>>
    %c67_168 = arith.constant 67 : index
    %1629 = memref.load %arg3[%c67_168] : memref<192xf32, #tpu.memory_space<smem>>
    %c68_169 = arith.constant 68 : index
    %1630 = memref.load %arg3[%c68_169] : memref<192xf32, #tpu.memory_space<smem>>
    %c69_170 = arith.constant 69 : index
    %1631 = memref.load %arg3[%c69_170] : memref<192xf32, #tpu.memory_space<smem>>
    %c70_171 = arith.constant 70 : index
    %1632 = memref.load %arg3[%c70_171] : memref<192xf32, #tpu.memory_space<smem>>
    %c71_172 = arith.constant 71 : index
    %1633 = memref.load %arg3[%c71_172] : memref<192xf32, #tpu.memory_space<smem>>
    %1634 = vector.broadcast %1610 : f32 to vector<8x121xf32>
    %1635 = arith.mulf %1634, %1224 : vector<8x121xf32>
    %1636 = vector.broadcast %1611 : f32 to vector<8x121xf32>
    %1637 = arith.mulf %1636, %1240 : vector<8x121xf32>
    %1638 = arith.addf %1635, %1637 : vector<8x121xf32>
    %1639 = vector.broadcast %1612 : f32 to vector<8x121xf32>
    %1640 = arith.mulf %1639, %1225 : vector<8x121xf32>
    %1641 = arith.addf %1638, %1640 : vector<8x121xf32>
    %1642 = vector.broadcast %1613 : f32 to vector<8x121xf32>
    %1643 = arith.mulf %1642, %1226 : vector<8x121xf32>
    %1644 = arith.addf %1641, %1643 : vector<8x121xf32>
    %1645 = vector.broadcast %1614 : f32 to vector<8x121xf32>
    %1646 = arith.mulf %1645, %1242 : vector<8x121xf32>
    %1647 = arith.addf %1644, %1646 : vector<8x121xf32>
    %1648 = vector.broadcast %1615 : f32 to vector<8x121xf32>
    %1649 = arith.mulf %1648, %1227 : vector<8x121xf32>
    %1650 = arith.addf %1647, %1649 : vector<8x121xf32>
    %1651 = vector.broadcast %1616 : f32 to vector<8x121xf32>
    %1652 = arith.mulf %1651, %1228 : vector<8x121xf32>
    %1653 = arith.addf %1650, %1652 : vector<8x121xf32>
    %1654 = vector.broadcast %1617 : f32 to vector<8x121xf32>
    %1655 = arith.mulf %1654, %1244 : vector<8x121xf32>
    %1656 = arith.addf %1653, %1655 : vector<8x121xf32>
    %1657 = vector.broadcast %1618 : f32 to vector<8x121xf32>
    %1658 = arith.mulf %1657, %1229 : vector<8x121xf32>
    %1659 = arith.addf %1656, %1658 : vector<8x121xf32>
    %1660 = vector.broadcast %1619 : f32 to vector<8x121xf32>
    %1661 = arith.mulf %1660, %1230 : vector<8x121xf32>
    %1662 = arith.addf %1659, %1661 : vector<8x121xf32>
    %1663 = vector.broadcast %1620 : f32 to vector<8x121xf32>
    %1664 = arith.mulf %1663, %1246 : vector<8x121xf32>
    %1665 = arith.addf %1662, %1664 : vector<8x121xf32>
    %1666 = vector.broadcast %1621 : f32 to vector<8x121xf32>
    %1667 = arith.mulf %1666, %1231 : vector<8x121xf32>
    %1668 = arith.addf %1665, %1667 : vector<8x121xf32>
    %1669 = vector.broadcast %1622 : f32 to vector<8x121xf32>
    %1670 = arith.mulf %1669, %1232 : vector<8x121xf32>
    %1671 = arith.addf %1668, %1670 : vector<8x121xf32>
    %1672 = vector.broadcast %1623 : f32 to vector<8x121xf32>
    %1673 = arith.mulf %1672, %1248 : vector<8x121xf32>
    %1674 = arith.addf %1671, %1673 : vector<8x121xf32>
    %1675 = vector.broadcast %1624 : f32 to vector<8x121xf32>
    %1676 = arith.mulf %1675, %1233 : vector<8x121xf32>
    %1677 = arith.addf %1674, %1676 : vector<8x121xf32>
    %1678 = vector.broadcast %1625 : f32 to vector<8x121xf32>
    %1679 = arith.mulf %1678, %1234 : vector<8x121xf32>
    %1680 = arith.addf %1677, %1679 : vector<8x121xf32>
    %1681 = vector.broadcast %1626 : f32 to vector<8x121xf32>
    %1682 = arith.mulf %1681, %1250 : vector<8x121xf32>
    %1683 = arith.addf %1680, %1682 : vector<8x121xf32>
    %1684 = vector.broadcast %1627 : f32 to vector<8x121xf32>
    %1685 = arith.mulf %1684, %1235 : vector<8x121xf32>
    %1686 = arith.addf %1683, %1685 : vector<8x121xf32>
    %1687 = vector.broadcast %1628 : f32 to vector<8x121xf32>
    %1688 = arith.mulf %1687, %1236 : vector<8x121xf32>
    %1689 = arith.addf %1686, %1688 : vector<8x121xf32>
    %1690 = vector.broadcast %1629 : f32 to vector<8x121xf32>
    %1691 = arith.mulf %1690, %1252 : vector<8x121xf32>
    %1692 = arith.addf %1689, %1691 : vector<8x121xf32>
    %1693 = vector.broadcast %1630 : f32 to vector<8x121xf32>
    %1694 = arith.mulf %1693, %1237 : vector<8x121xf32>
    %1695 = arith.addf %1692, %1694 : vector<8x121xf32>
    %1696 = vector.broadcast %1631 : f32 to vector<8x121xf32>
    %1697 = arith.mulf %1696, %1238 : vector<8x121xf32>
    %1698 = arith.addf %1695, %1697 : vector<8x121xf32>
    %1699 = vector.broadcast %1632 : f32 to vector<8x121xf32>
    %1700 = arith.mulf %1699, %1254 : vector<8x121xf32>
    %1701 = arith.addf %1698, %1700 : vector<8x121xf32>
    %1702 = vector.broadcast %1633 : f32 to vector<8x121xf32>
    %1703 = arith.mulf %1702, %1239 : vector<8x121xf32>
    %1704 = arith.addf %1701, %1703 : vector<8x121xf32>
    %1705 = vector.broadcast %1610 : f32 to vector<8x121xf32>
    %1706 = arith.mulf %1705, %1240 : vector<8x121xf32>
    %1707 = vector.broadcast %1611 : f32 to vector<8x121xf32>
    %1708 = arith.mulf %1707, %1225 : vector<8x121xf32>
    %1709 = arith.addf %1706, %1708 : vector<8x121xf32>
    %1710 = vector.broadcast %1612 : f32 to vector<8x121xf32>
    %1711 = arith.mulf %1710, %1241 : vector<8x121xf32>
    %1712 = arith.addf %1709, %1711 : vector<8x121xf32>
    %1713 = vector.broadcast %1613 : f32 to vector<8x121xf32>
    %1714 = arith.mulf %1713, %1242 : vector<8x121xf32>
    %1715 = arith.addf %1712, %1714 : vector<8x121xf32>
    %1716 = vector.broadcast %1614 : f32 to vector<8x121xf32>
    %1717 = arith.mulf %1716, %1227 : vector<8x121xf32>
    %1718 = arith.addf %1715, %1717 : vector<8x121xf32>
    %1719 = vector.broadcast %1615 : f32 to vector<8x121xf32>
    %1720 = arith.mulf %1719, %1243 : vector<8x121xf32>
    %1721 = arith.addf %1718, %1720 : vector<8x121xf32>
    %1722 = vector.broadcast %1616 : f32 to vector<8x121xf32>
    %1723 = arith.mulf %1722, %1244 : vector<8x121xf32>
    %1724 = arith.addf %1721, %1723 : vector<8x121xf32>
    %1725 = vector.broadcast %1617 : f32 to vector<8x121xf32>
    %1726 = arith.mulf %1725, %1229 : vector<8x121xf32>
    %1727 = arith.addf %1724, %1726 : vector<8x121xf32>
    %1728 = vector.broadcast %1618 : f32 to vector<8x121xf32>
    %1729 = arith.mulf %1728, %1245 : vector<8x121xf32>
    %1730 = arith.addf %1727, %1729 : vector<8x121xf32>
    %1731 = vector.broadcast %1619 : f32 to vector<8x121xf32>
    %1732 = arith.mulf %1731, %1246 : vector<8x121xf32>
    %1733 = arith.addf %1730, %1732 : vector<8x121xf32>
    %1734 = vector.broadcast %1620 : f32 to vector<8x121xf32>
    %1735 = arith.mulf %1734, %1231 : vector<8x121xf32>
    %1736 = arith.addf %1733, %1735 : vector<8x121xf32>
    %1737 = vector.broadcast %1621 : f32 to vector<8x121xf32>
    %1738 = arith.mulf %1737, %1247 : vector<8x121xf32>
    %1739 = arith.addf %1736, %1738 : vector<8x121xf32>
    %1740 = vector.broadcast %1622 : f32 to vector<8x121xf32>
    %1741 = arith.mulf %1740, %1248 : vector<8x121xf32>
    %1742 = arith.addf %1739, %1741 : vector<8x121xf32>
    %1743 = vector.broadcast %1623 : f32 to vector<8x121xf32>
    %1744 = arith.mulf %1743, %1233 : vector<8x121xf32>
    %1745 = arith.addf %1742, %1744 : vector<8x121xf32>
    %1746 = vector.broadcast %1624 : f32 to vector<8x121xf32>
    %1747 = arith.mulf %1746, %1249 : vector<8x121xf32>
    %1748 = arith.addf %1745, %1747 : vector<8x121xf32>
    %1749 = vector.broadcast %1625 : f32 to vector<8x121xf32>
    %1750 = arith.mulf %1749, %1250 : vector<8x121xf32>
    %1751 = arith.addf %1748, %1750 : vector<8x121xf32>
    %1752 = vector.broadcast %1626 : f32 to vector<8x121xf32>
    %1753 = arith.mulf %1752, %1235 : vector<8x121xf32>
    %1754 = arith.addf %1751, %1753 : vector<8x121xf32>
    %1755 = vector.broadcast %1627 : f32 to vector<8x121xf32>
    %1756 = arith.mulf %1755, %1251 : vector<8x121xf32>
    %1757 = arith.addf %1754, %1756 : vector<8x121xf32>
    %1758 = vector.broadcast %1628 : f32 to vector<8x121xf32>
    %1759 = arith.mulf %1758, %1252 : vector<8x121xf32>
    %1760 = arith.addf %1757, %1759 : vector<8x121xf32>
    %1761 = vector.broadcast %1629 : f32 to vector<8x121xf32>
    %1762 = arith.mulf %1761, %1237 : vector<8x121xf32>
    %1763 = arith.addf %1760, %1762 : vector<8x121xf32>
    %1764 = vector.broadcast %1630 : f32 to vector<8x121xf32>
    %1765 = arith.mulf %1764, %1253 : vector<8x121xf32>
    %1766 = arith.addf %1763, %1765 : vector<8x121xf32>
    %1767 = vector.broadcast %1631 : f32 to vector<8x121xf32>
    %1768 = arith.mulf %1767, %1254 : vector<8x121xf32>
    %1769 = arith.addf %1766, %1768 : vector<8x121xf32>
    %1770 = vector.broadcast %1632 : f32 to vector<8x121xf32>
    %1771 = arith.mulf %1770, %1239 : vector<8x121xf32>
    %1772 = arith.addf %1769, %1771 : vector<8x121xf32>
    %1773 = vector.broadcast %1633 : f32 to vector<8x121xf32>
    %1774 = arith.mulf %1773, %1255 : vector<8x121xf32>
    %1775 = arith.addf %1772, %1774 : vector<8x121xf32>
    %c2_173 = arith.constant 2 : index
    %1776 = memref.load %arg4[%c2_173] : memref<8xf32, #tpu.memory_space<smem>>
    %1777 = vector.broadcast %1776 : f32 to vector<8x121xf32>
    %1778 = arith.addf %1704, %1777 : vector<8x121xf32>
    %cst_174 = arith.constant 0.000000e+00 : f32
    %1779 = vector.broadcast %cst_174 : f32 to vector<8x121xf32>
    %1780 = arith.maximumf %1778, %1779 : vector<8x121xf32>
    %1781 = vector.broadcast %1776 : f32 to vector<8x121xf32>
    %1782 = arith.addf %1775, %1781 : vector<8x121xf32>
    %cst_175 = arith.constant 0.000000e+00 : f32
    %1783 = vector.broadcast %cst_175 : f32 to vector<8x121xf32>
    %1784 = arith.maximumf %1782, %1783 : vector<8x121xf32>
    %1785 = arith.maximumf %1780, %1784 : vector<8x121xf32>
    %1786 = arith.truncf %1785 : vector<8x121xf32> to vector<8x121xbf16>
    %c72_176 = arith.constant 72 : index
    %1787 = memref.load %arg3[%c72_176] : memref<192xf32, #tpu.memory_space<smem>>
    %c73_177 = arith.constant 73 : index
    %1788 = memref.load %arg3[%c73_177] : memref<192xf32, #tpu.memory_space<smem>>
    %c74_178 = arith.constant 74 : index
    %1789 = memref.load %arg3[%c74_178] : memref<192xf32, #tpu.memory_space<smem>>
    %c75_179 = arith.constant 75 : index
    %1790 = memref.load %arg3[%c75_179] : memref<192xf32, #tpu.memory_space<smem>>
    %c76_180 = arith.constant 76 : index
    %1791 = memref.load %arg3[%c76_180] : memref<192xf32, #tpu.memory_space<smem>>
    %c77_181 = arith.constant 77 : index
    %1792 = memref.load %arg3[%c77_181] : memref<192xf32, #tpu.memory_space<smem>>
    %c78_182 = arith.constant 78 : index
    %1793 = memref.load %arg3[%c78_182] : memref<192xf32, #tpu.memory_space<smem>>
    %c79_183 = arith.constant 79 : index
    %1794 = memref.load %arg3[%c79_183] : memref<192xf32, #tpu.memory_space<smem>>
    %c80_184 = arith.constant 80 : index
    %1795 = memref.load %arg3[%c80_184] : memref<192xf32, #tpu.memory_space<smem>>
    %c81_185 = arith.constant 81 : index
    %1796 = memref.load %arg3[%c81_185] : memref<192xf32, #tpu.memory_space<smem>>
    %c82_186 = arith.constant 82 : index
    %1797 = memref.load %arg3[%c82_186] : memref<192xf32, #tpu.memory_space<smem>>
    %c83_187 = arith.constant 83 : index
    %1798 = memref.load %arg3[%c83_187] : memref<192xf32, #tpu.memory_space<smem>>
    %c84_188 = arith.constant 84 : index
    %1799 = memref.load %arg3[%c84_188] : memref<192xf32, #tpu.memory_space<smem>>
    %c85_189 = arith.constant 85 : index
    %1800 = memref.load %arg3[%c85_189] : memref<192xf32, #tpu.memory_space<smem>>
    %c86_190 = arith.constant 86 : index
    %1801 = memref.load %arg3[%c86_190] : memref<192xf32, #tpu.memory_space<smem>>
    %c87_191 = arith.constant 87 : index
    %1802 = memref.load %arg3[%c87_191] : memref<192xf32, #tpu.memory_space<smem>>
    %c88_192 = arith.constant 88 : index
    %1803 = memref.load %arg3[%c88_192] : memref<192xf32, #tpu.memory_space<smem>>
    %c89_193 = arith.constant 89 : index
    %1804 = memref.load %arg3[%c89_193] : memref<192xf32, #tpu.memory_space<smem>>
    %c90_194 = arith.constant 90 : index
    %1805 = memref.load %arg3[%c90_194] : memref<192xf32, #tpu.memory_space<smem>>
    %c91_195 = arith.constant 91 : index
    %1806 = memref.load %arg3[%c91_195] : memref<192xf32, #tpu.memory_space<smem>>
    %c92_196 = arith.constant 92 : index
    %1807 = memref.load %arg3[%c92_196] : memref<192xf32, #tpu.memory_space<smem>>
    %c93_197 = arith.constant 93 : index
    %1808 = memref.load %arg3[%c93_197] : memref<192xf32, #tpu.memory_space<smem>>
    %c94_198 = arith.constant 94 : index
    %1809 = memref.load %arg3[%c94_198] : memref<192xf32, #tpu.memory_space<smem>>
    %c95_199 = arith.constant 95 : index
    %1810 = memref.load %arg3[%c95_199] : memref<192xf32, #tpu.memory_space<smem>>
    %1811 = vector.broadcast %1787 : f32 to vector<8x121xf32>
    %1812 = arith.mulf %1811, %1224 : vector<8x121xf32>
    %1813 = vector.broadcast %1788 : f32 to vector<8x121xf32>
    %1814 = arith.mulf %1813, %1240 : vector<8x121xf32>
    %1815 = arith.addf %1812, %1814 : vector<8x121xf32>
    %1816 = vector.broadcast %1789 : f32 to vector<8x121xf32>
    %1817 = arith.mulf %1816, %1225 : vector<8x121xf32>
    %1818 = arith.addf %1815, %1817 : vector<8x121xf32>
    %1819 = vector.broadcast %1790 : f32 to vector<8x121xf32>
    %1820 = arith.mulf %1819, %1226 : vector<8x121xf32>
    %1821 = arith.addf %1818, %1820 : vector<8x121xf32>
    %1822 = vector.broadcast %1791 : f32 to vector<8x121xf32>
    %1823 = arith.mulf %1822, %1242 : vector<8x121xf32>
    %1824 = arith.addf %1821, %1823 : vector<8x121xf32>
    %1825 = vector.broadcast %1792 : f32 to vector<8x121xf32>
    %1826 = arith.mulf %1825, %1227 : vector<8x121xf32>
    %1827 = arith.addf %1824, %1826 : vector<8x121xf32>
    %1828 = vector.broadcast %1793 : f32 to vector<8x121xf32>
    %1829 = arith.mulf %1828, %1228 : vector<8x121xf32>
    %1830 = arith.addf %1827, %1829 : vector<8x121xf32>
    %1831 = vector.broadcast %1794 : f32 to vector<8x121xf32>
    %1832 = arith.mulf %1831, %1244 : vector<8x121xf32>
    %1833 = arith.addf %1830, %1832 : vector<8x121xf32>
    %1834 = vector.broadcast %1795 : f32 to vector<8x121xf32>
    %1835 = arith.mulf %1834, %1229 : vector<8x121xf32>
    %1836 = arith.addf %1833, %1835 : vector<8x121xf32>
    %1837 = vector.broadcast %1796 : f32 to vector<8x121xf32>
    %1838 = arith.mulf %1837, %1230 : vector<8x121xf32>
    %1839 = arith.addf %1836, %1838 : vector<8x121xf32>
    %1840 = vector.broadcast %1797 : f32 to vector<8x121xf32>
    %1841 = arith.mulf %1840, %1246 : vector<8x121xf32>
    %1842 = arith.addf %1839, %1841 : vector<8x121xf32>
    %1843 = vector.broadcast %1798 : f32 to vector<8x121xf32>
    %1844 = arith.mulf %1843, %1231 : vector<8x121xf32>
    %1845 = arith.addf %1842, %1844 : vector<8x121xf32>
    %1846 = vector.broadcast %1799 : f32 to vector<8x121xf32>
    %1847 = arith.mulf %1846, %1232 : vector<8x121xf32>
    %1848 = arith.addf %1845, %1847 : vector<8x121xf32>
    %1849 = vector.broadcast %1800 : f32 to vector<8x121xf32>
    %1850 = arith.mulf %1849, %1248 : vector<8x121xf32>
    %1851 = arith.addf %1848, %1850 : vector<8x121xf32>
    %1852 = vector.broadcast %1801 : f32 to vector<8x121xf32>
    %1853 = arith.mulf %1852, %1233 : vector<8x121xf32>
    %1854 = arith.addf %1851, %1853 : vector<8x121xf32>
    %1855 = vector.broadcast %1802 : f32 to vector<8x121xf32>
    %1856 = arith.mulf %1855, %1234 : vector<8x121xf32>
    %1857 = arith.addf %1854, %1856 : vector<8x121xf32>
    %1858 = vector.broadcast %1803 : f32 to vector<8x121xf32>
    %1859 = arith.mulf %1858, %1250 : vector<8x121xf32>
    %1860 = arith.addf %1857, %1859 : vector<8x121xf32>
    %1861 = vector.broadcast %1804 : f32 to vector<8x121xf32>
    %1862 = arith.mulf %1861, %1235 : vector<8x121xf32>
    %1863 = arith.addf %1860, %1862 : vector<8x121xf32>
    %1864 = vector.broadcast %1805 : f32 to vector<8x121xf32>
    %1865 = arith.mulf %1864, %1236 : vector<8x121xf32>
    %1866 = arith.addf %1863, %1865 : vector<8x121xf32>
    %1867 = vector.broadcast %1806 : f32 to vector<8x121xf32>
    %1868 = arith.mulf %1867, %1252 : vector<8x121xf32>
    %1869 = arith.addf %1866, %1868 : vector<8x121xf32>
    %1870 = vector.broadcast %1807 : f32 to vector<8x121xf32>
    %1871 = arith.mulf %1870, %1237 : vector<8x121xf32>
    %1872 = arith.addf %1869, %1871 : vector<8x121xf32>
    %1873 = vector.broadcast %1808 : f32 to vector<8x121xf32>
    %1874 = arith.mulf %1873, %1238 : vector<8x121xf32>
    %1875 = arith.addf %1872, %1874 : vector<8x121xf32>
    %1876 = vector.broadcast %1809 : f32 to vector<8x121xf32>
    %1877 = arith.mulf %1876, %1254 : vector<8x121xf32>
    %1878 = arith.addf %1875, %1877 : vector<8x121xf32>
    %1879 = vector.broadcast %1810 : f32 to vector<8x121xf32>
    %1880 = arith.mulf %1879, %1239 : vector<8x121xf32>
    %1881 = arith.addf %1878, %1880 : vector<8x121xf32>
    %1882 = vector.broadcast %1787 : f32 to vector<8x121xf32>
    %1883 = arith.mulf %1882, %1240 : vector<8x121xf32>
    %1884 = vector.broadcast %1788 : f32 to vector<8x121xf32>
    %1885 = arith.mulf %1884, %1225 : vector<8x121xf32>
    %1886 = arith.addf %1883, %1885 : vector<8x121xf32>
    %1887 = vector.broadcast %1789 : f32 to vector<8x121xf32>
    %1888 = arith.mulf %1887, %1241 : vector<8x121xf32>
    %1889 = arith.addf %1886, %1888 : vector<8x121xf32>
    %1890 = vector.broadcast %1790 : f32 to vector<8x121xf32>
    %1891 = arith.mulf %1890, %1242 : vector<8x121xf32>
    %1892 = arith.addf %1889, %1891 : vector<8x121xf32>
    %1893 = vector.broadcast %1791 : f32 to vector<8x121xf32>
    %1894 = arith.mulf %1893, %1227 : vector<8x121xf32>
    %1895 = arith.addf %1892, %1894 : vector<8x121xf32>
    %1896 = vector.broadcast %1792 : f32 to vector<8x121xf32>
    %1897 = arith.mulf %1896, %1243 : vector<8x121xf32>
    %1898 = arith.addf %1895, %1897 : vector<8x121xf32>
    %1899 = vector.broadcast %1793 : f32 to vector<8x121xf32>
    %1900 = arith.mulf %1899, %1244 : vector<8x121xf32>
    %1901 = arith.addf %1898, %1900 : vector<8x121xf32>
    %1902 = vector.broadcast %1794 : f32 to vector<8x121xf32>
    %1903 = arith.mulf %1902, %1229 : vector<8x121xf32>
    %1904 = arith.addf %1901, %1903 : vector<8x121xf32>
    %1905 = vector.broadcast %1795 : f32 to vector<8x121xf32>
    %1906 = arith.mulf %1905, %1245 : vector<8x121xf32>
    %1907 = arith.addf %1904, %1906 : vector<8x121xf32>
    %1908 = vector.broadcast %1796 : f32 to vector<8x121xf32>
    %1909 = arith.mulf %1908, %1246 : vector<8x121xf32>
    %1910 = arith.addf %1907, %1909 : vector<8x121xf32>
    %1911 = vector.broadcast %1797 : f32 to vector<8x121xf32>
    %1912 = arith.mulf %1911, %1231 : vector<8x121xf32>
    %1913 = arith.addf %1910, %1912 : vector<8x121xf32>
    %1914 = vector.broadcast %1798 : f32 to vector<8x121xf32>
    %1915 = arith.mulf %1914, %1247 : vector<8x121xf32>
    %1916 = arith.addf %1913, %1915 : vector<8x121xf32>
    %1917 = vector.broadcast %1799 : f32 to vector<8x121xf32>
    %1918 = arith.mulf %1917, %1248 : vector<8x121xf32>
    %1919 = arith.addf %1916, %1918 : vector<8x121xf32>
    %1920 = vector.broadcast %1800 : f32 to vector<8x121xf32>
    %1921 = arith.mulf %1920, %1233 : vector<8x121xf32>
    %1922 = arith.addf %1919, %1921 : vector<8x121xf32>
    %1923 = vector.broadcast %1801 : f32 to vector<8x121xf32>
    %1924 = arith.mulf %1923, %1249 : vector<8x121xf32>
    %1925 = arith.addf %1922, %1924 : vector<8x121xf32>
    %1926 = vector.broadcast %1802 : f32 to vector<8x121xf32>
    %1927 = arith.mulf %1926, %1250 : vector<8x121xf32>
    %1928 = arith.addf %1925, %1927 : vector<8x121xf32>
    %1929 = vector.broadcast %1803 : f32 to vector<8x121xf32>
    %1930 = arith.mulf %1929, %1235 : vector<8x121xf32>
    %1931 = arith.addf %1928, %1930 : vector<8x121xf32>
    %1932 = vector.broadcast %1804 : f32 to vector<8x121xf32>
    %1933 = arith.mulf %1932, %1251 : vector<8x121xf32>
    %1934 = arith.addf %1931, %1933 : vector<8x121xf32>
    %1935 = vector.broadcast %1805 : f32 to vector<8x121xf32>
    %1936 = arith.mulf %1935, %1252 : vector<8x121xf32>
    %1937 = arith.addf %1934, %1936 : vector<8x121xf32>
    %1938 = vector.broadcast %1806 : f32 to vector<8x121xf32>
    %1939 = arith.mulf %1938, %1237 : vector<8x121xf32>
    %1940 = arith.addf %1937, %1939 : vector<8x121xf32>
    %1941 = vector.broadcast %1807 : f32 to vector<8x121xf32>
    %1942 = arith.mulf %1941, %1253 : vector<8x121xf32>
    %1943 = arith.addf %1940, %1942 : vector<8x121xf32>
    %1944 = vector.broadcast %1808 : f32 to vector<8x121xf32>
    %1945 = arith.mulf %1944, %1254 : vector<8x121xf32>
    %1946 = arith.addf %1943, %1945 : vector<8x121xf32>
    %1947 = vector.broadcast %1809 : f32 to vector<8x121xf32>
    %1948 = arith.mulf %1947, %1239 : vector<8x121xf32>
    %1949 = arith.addf %1946, %1948 : vector<8x121xf32>
    %1950 = vector.broadcast %1810 : f32 to vector<8x121xf32>
    %1951 = arith.mulf %1950, %1255 : vector<8x121xf32>
    %1952 = arith.addf %1949, %1951 : vector<8x121xf32>
    %c3_200 = arith.constant 3 : index
    %1953 = memref.load %arg4[%c3_200] : memref<8xf32, #tpu.memory_space<smem>>
    %1954 = vector.broadcast %1953 : f32 to vector<8x121xf32>
    %1955 = arith.addf %1881, %1954 : vector<8x121xf32>
    %cst_201 = arith.constant 0.000000e+00 : f32
    %1956 = vector.broadcast %cst_201 : f32 to vector<8x121xf32>
    %1957 = arith.maximumf %1955, %1956 : vector<8x121xf32>
    %1958 = vector.broadcast %1953 : f32 to vector<8x121xf32>
    %1959 = arith.addf %1952, %1958 : vector<8x121xf32>
    %cst_202 = arith.constant 0.000000e+00 : f32
    %1960 = vector.broadcast %cst_202 : f32 to vector<8x121xf32>
    %1961 = arith.maximumf %1959, %1960 : vector<8x121xf32>
    %1962 = arith.maximumf %1957, %1961 : vector<8x121xf32>
    %1963 = arith.truncf %1962 : vector<8x121xf32> to vector<8x121xbf16>
    %c96_203 = arith.constant 96 : index
    %1964 = memref.load %arg3[%c96_203] : memref<192xf32, #tpu.memory_space<smem>>
    %c97_204 = arith.constant 97 : index
    %1965 = memref.load %arg3[%c97_204] : memref<192xf32, #tpu.memory_space<smem>>
    %c98_205 = arith.constant 98 : index
    %1966 = memref.load %arg3[%c98_205] : memref<192xf32, #tpu.memory_space<smem>>
    %c99_206 = arith.constant 99 : index
    %1967 = memref.load %arg3[%c99_206] : memref<192xf32, #tpu.memory_space<smem>>
    %c100_207 = arith.constant 100 : index
    %1968 = memref.load %arg3[%c100_207] : memref<192xf32, #tpu.memory_space<smem>>
    %c101_208 = arith.constant 101 : index
    %1969 = memref.load %arg3[%c101_208] : memref<192xf32, #tpu.memory_space<smem>>
    %c102_209 = arith.constant 102 : index
    %1970 = memref.load %arg3[%c102_209] : memref<192xf32, #tpu.memory_space<smem>>
    %c103_210 = arith.constant 103 : index
    %1971 = memref.load %arg3[%c103_210] : memref<192xf32, #tpu.memory_space<smem>>
    %c104_211 = arith.constant 104 : index
    %1972 = memref.load %arg3[%c104_211] : memref<192xf32, #tpu.memory_space<smem>>
    %c105_212 = arith.constant 105 : index
    %1973 = memref.load %arg3[%c105_212] : memref<192xf32, #tpu.memory_space<smem>>
    %c106_213 = arith.constant 106 : index
    %1974 = memref.load %arg3[%c106_213] : memref<192xf32, #tpu.memory_space<smem>>
    %c107_214 = arith.constant 107 : index
    %1975 = memref.load %arg3[%c107_214] : memref<192xf32, #tpu.memory_space<smem>>
    %c108_215 = arith.constant 108 : index
    %1976 = memref.load %arg3[%c108_215] : memref<192xf32, #tpu.memory_space<smem>>
    %c109_216 = arith.constant 109 : index
    %1977 = memref.load %arg3[%c109_216] : memref<192xf32, #tpu.memory_space<smem>>
    %c110_217 = arith.constant 110 : index
    %1978 = memref.load %arg3[%c110_217] : memref<192xf32, #tpu.memory_space<smem>>
    %c111_218 = arith.constant 111 : index
    %1979 = memref.load %arg3[%c111_218] : memref<192xf32, #tpu.memory_space<smem>>
    %c112_219 = arith.constant 112 : index
    %1980 = memref.load %arg3[%c112_219] : memref<192xf32, #tpu.memory_space<smem>>
    %c113_220 = arith.constant 113 : index
    %1981 = memref.load %arg3[%c113_220] : memref<192xf32, #tpu.memory_space<smem>>
    %c114_221 = arith.constant 114 : index
    %1982 = memref.load %arg3[%c114_221] : memref<192xf32, #tpu.memory_space<smem>>
    %c115_222 = arith.constant 115 : index
    %1983 = memref.load %arg3[%c115_222] : memref<192xf32, #tpu.memory_space<smem>>
    %c116_223 = arith.constant 116 : index
    %1984 = memref.load %arg3[%c116_223] : memref<192xf32, #tpu.memory_space<smem>>
    %c117_224 = arith.constant 117 : index
    %1985 = memref.load %arg3[%c117_224] : memref<192xf32, #tpu.memory_space<smem>>
    %c118_225 = arith.constant 118 : index
    %1986 = memref.load %arg3[%c118_225] : memref<192xf32, #tpu.memory_space<smem>>
    %c119_226 = arith.constant 119 : index
    %1987 = memref.load %arg3[%c119_226] : memref<192xf32, #tpu.memory_space<smem>>
    %1988 = vector.broadcast %1964 : f32 to vector<8x121xf32>
    %1989 = arith.mulf %1988, %1224 : vector<8x121xf32>
    %1990 = vector.broadcast %1965 : f32 to vector<8x121xf32>
    %1991 = arith.mulf %1990, %1240 : vector<8x121xf32>
    %1992 = arith.addf %1989, %1991 : vector<8x121xf32>
    %1993 = vector.broadcast %1966 : f32 to vector<8x121xf32>
    %1994 = arith.mulf %1993, %1225 : vector<8x121xf32>
    %1995 = arith.addf %1992, %1994 : vector<8x121xf32>
    %1996 = vector.broadcast %1967 : f32 to vector<8x121xf32>
    %1997 = arith.mulf %1996, %1226 : vector<8x121xf32>
    %1998 = arith.addf %1995, %1997 : vector<8x121xf32>
    %1999 = vector.broadcast %1968 : f32 to vector<8x121xf32>
    %2000 = arith.mulf %1999, %1242 : vector<8x121xf32>
    %2001 = arith.addf %1998, %2000 : vector<8x121xf32>
    %2002 = vector.broadcast %1969 : f32 to vector<8x121xf32>
    %2003 = arith.mulf %2002, %1227 : vector<8x121xf32>
    %2004 = arith.addf %2001, %2003 : vector<8x121xf32>
    %2005 = vector.broadcast %1970 : f32 to vector<8x121xf32>
    %2006 = arith.mulf %2005, %1228 : vector<8x121xf32>
    %2007 = arith.addf %2004, %2006 : vector<8x121xf32>
    %2008 = vector.broadcast %1971 : f32 to vector<8x121xf32>
    %2009 = arith.mulf %2008, %1244 : vector<8x121xf32>
    %2010 = arith.addf %2007, %2009 : vector<8x121xf32>
    %2011 = vector.broadcast %1972 : f32 to vector<8x121xf32>
    %2012 = arith.mulf %2011, %1229 : vector<8x121xf32>
    %2013 = arith.addf %2010, %2012 : vector<8x121xf32>
    %2014 = vector.broadcast %1973 : f32 to vector<8x121xf32>
    %2015 = arith.mulf %2014, %1230 : vector<8x121xf32>
    %2016 = arith.addf %2013, %2015 : vector<8x121xf32>
    %2017 = vector.broadcast %1974 : f32 to vector<8x121xf32>
    %2018 = arith.mulf %2017, %1246 : vector<8x121xf32>
    %2019 = arith.addf %2016, %2018 : vector<8x121xf32>
    %2020 = vector.broadcast %1975 : f32 to vector<8x121xf32>
    %2021 = arith.mulf %2020, %1231 : vector<8x121xf32>
    %2022 = arith.addf %2019, %2021 : vector<8x121xf32>
    %2023 = vector.broadcast %1976 : f32 to vector<8x121xf32>
    %2024 = arith.mulf %2023, %1232 : vector<8x121xf32>
    %2025 = arith.addf %2022, %2024 : vector<8x121xf32>
    %2026 = vector.broadcast %1977 : f32 to vector<8x121xf32>
    %2027 = arith.mulf %2026, %1248 : vector<8x121xf32>
    %2028 = arith.addf %2025, %2027 : vector<8x121xf32>
    %2029 = vector.broadcast %1978 : f32 to vector<8x121xf32>
    %2030 = arith.mulf %2029, %1233 : vector<8x121xf32>
    %2031 = arith.addf %2028, %2030 : vector<8x121xf32>
    %2032 = vector.broadcast %1979 : f32 to vector<8x121xf32>
    %2033 = arith.mulf %2032, %1234 : vector<8x121xf32>
    %2034 = arith.addf %2031, %2033 : vector<8x121xf32>
    %2035 = vector.broadcast %1980 : f32 to vector<8x121xf32>
    %2036 = arith.mulf %2035, %1250 : vector<8x121xf32>
    %2037 = arith.addf %2034, %2036 : vector<8x121xf32>
    %2038 = vector.broadcast %1981 : f32 to vector<8x121xf32>
    %2039 = arith.mulf %2038, %1235 : vector<8x121xf32>
    %2040 = arith.addf %2037, %2039 : vector<8x121xf32>
    %2041 = vector.broadcast %1982 : f32 to vector<8x121xf32>
    %2042 = arith.mulf %2041, %1236 : vector<8x121xf32>
    %2043 = arith.addf %2040, %2042 : vector<8x121xf32>
    %2044 = vector.broadcast %1983 : f32 to vector<8x121xf32>
    %2045 = arith.mulf %2044, %1252 : vector<8x121xf32>
    %2046 = arith.addf %2043, %2045 : vector<8x121xf32>
    %2047 = vector.broadcast %1984 : f32 to vector<8x121xf32>
    %2048 = arith.mulf %2047, %1237 : vector<8x121xf32>
    %2049 = arith.addf %2046, %2048 : vector<8x121xf32>
    %2050 = vector.broadcast %1985 : f32 to vector<8x121xf32>
    %2051 = arith.mulf %2050, %1238 : vector<8x121xf32>
    %2052 = arith.addf %2049, %2051 : vector<8x121xf32>
    %2053 = vector.broadcast %1986 : f32 to vector<8x121xf32>
    %2054 = arith.mulf %2053, %1254 : vector<8x121xf32>
    %2055 = arith.addf %2052, %2054 : vector<8x121xf32>
    %2056 = vector.broadcast %1987 : f32 to vector<8x121xf32>
    %2057 = arith.mulf %2056, %1239 : vector<8x121xf32>
    %2058 = arith.addf %2055, %2057 : vector<8x121xf32>
    %2059 = vector.broadcast %1964 : f32 to vector<8x121xf32>
    %2060 = arith.mulf %2059, %1240 : vector<8x121xf32>
    %2061 = vector.broadcast %1965 : f32 to vector<8x121xf32>
    %2062 = arith.mulf %2061, %1225 : vector<8x121xf32>
    %2063 = arith.addf %2060, %2062 : vector<8x121xf32>
    %2064 = vector.broadcast %1966 : f32 to vector<8x121xf32>
    %2065 = arith.mulf %2064, %1241 : vector<8x121xf32>
    %2066 = arith.addf %2063, %2065 : vector<8x121xf32>
    %2067 = vector.broadcast %1967 : f32 to vector<8x121xf32>
    %2068 = arith.mulf %2067, %1242 : vector<8x121xf32>
    %2069 = arith.addf %2066, %2068 : vector<8x121xf32>
    %2070 = vector.broadcast %1968 : f32 to vector<8x121xf32>
    %2071 = arith.mulf %2070, %1227 : vector<8x121xf32>
    %2072 = arith.addf %2069, %2071 : vector<8x121xf32>
    %2073 = vector.broadcast %1969 : f32 to vector<8x121xf32>
    %2074 = arith.mulf %2073, %1243 : vector<8x121xf32>
    %2075 = arith.addf %2072, %2074 : vector<8x121xf32>
    %2076 = vector.broadcast %1970 : f32 to vector<8x121xf32>
    %2077 = arith.mulf %2076, %1244 : vector<8x121xf32>
    %2078 = arith.addf %2075, %2077 : vector<8x121xf32>
    %2079 = vector.broadcast %1971 : f32 to vector<8x121xf32>
    %2080 = arith.mulf %2079, %1229 : vector<8x121xf32>
    %2081 = arith.addf %2078, %2080 : vector<8x121xf32>
    %2082 = vector.broadcast %1972 : f32 to vector<8x121xf32>
    %2083 = arith.mulf %2082, %1245 : vector<8x121xf32>
    %2084 = arith.addf %2081, %2083 : vector<8x121xf32>
    %2085 = vector.broadcast %1973 : f32 to vector<8x121xf32>
    %2086 = arith.mulf %2085, %1246 : vector<8x121xf32>
    %2087 = arith.addf %2084, %2086 : vector<8x121xf32>
    %2088 = vector.broadcast %1974 : f32 to vector<8x121xf32>
    %2089 = arith.mulf %2088, %1231 : vector<8x121xf32>
    %2090 = arith.addf %2087, %2089 : vector<8x121xf32>
    %2091 = vector.broadcast %1975 : f32 to vector<8x121xf32>
    %2092 = arith.mulf %2091, %1247 : vector<8x121xf32>
    %2093 = arith.addf %2090, %2092 : vector<8x121xf32>
    %2094 = vector.broadcast %1976 : f32 to vector<8x121xf32>
    %2095 = arith.mulf %2094, %1248 : vector<8x121xf32>
    %2096 = arith.addf %2093, %2095 : vector<8x121xf32>
    %2097 = vector.broadcast %1977 : f32 to vector<8x121xf32>
    %2098 = arith.mulf %2097, %1233 : vector<8x121xf32>
    %2099 = arith.addf %2096, %2098 : vector<8x121xf32>
    %2100 = vector.broadcast %1978 : f32 to vector<8x121xf32>
    %2101 = arith.mulf %2100, %1249 : vector<8x121xf32>
    %2102 = arith.addf %2099, %2101 : vector<8x121xf32>
    %2103 = vector.broadcast %1979 : f32 to vector<8x121xf32>
    %2104 = arith.mulf %2103, %1250 : vector<8x121xf32>
    %2105 = arith.addf %2102, %2104 : vector<8x121xf32>
    %2106 = vector.broadcast %1980 : f32 to vector<8x121xf32>
    %2107 = arith.mulf %2106, %1235 : vector<8x121xf32>
    %2108 = arith.addf %2105, %2107 : vector<8x121xf32>
    %2109 = vector.broadcast %1981 : f32 to vector<8x121xf32>
    %2110 = arith.mulf %2109, %1251 : vector<8x121xf32>
    %2111 = arith.addf %2108, %2110 : vector<8x121xf32>
    %2112 = vector.broadcast %1982 : f32 to vector<8x121xf32>
    %2113 = arith.mulf %2112, %1252 : vector<8x121xf32>
    %2114 = arith.addf %2111, %2113 : vector<8x121xf32>
    %2115 = vector.broadcast %1983 : f32 to vector<8x121xf32>
    %2116 = arith.mulf %2115, %1237 : vector<8x121xf32>
    %2117 = arith.addf %2114, %2116 : vector<8x121xf32>
    %2118 = vector.broadcast %1984 : f32 to vector<8x121xf32>
    %2119 = arith.mulf %2118, %1253 : vector<8x121xf32>
    %2120 = arith.addf %2117, %2119 : vector<8x121xf32>
    %2121 = vector.broadcast %1985 : f32 to vector<8x121xf32>
    %2122 = arith.mulf %2121, %1254 : vector<8x121xf32>
    %2123 = arith.addf %2120, %2122 : vector<8x121xf32>
    %2124 = vector.broadcast %1986 : f32 to vector<8x121xf32>
    %2125 = arith.mulf %2124, %1239 : vector<8x121xf32>
    %2126 = arith.addf %2123, %2125 : vector<8x121xf32>
    %2127 = vector.broadcast %1987 : f32 to vector<8x121xf32>
    %2128 = arith.mulf %2127, %1255 : vector<8x121xf32>
    %2129 = arith.addf %2126, %2128 : vector<8x121xf32>
    %c4_227 = arith.constant 4 : index
    %2130 = memref.load %arg4[%c4_227] : memref<8xf32, #tpu.memory_space<smem>>
    %2131 = vector.broadcast %2130 : f32 to vector<8x121xf32>
    %2132 = arith.addf %2058, %2131 : vector<8x121xf32>
    %cst_228 = arith.constant 0.000000e+00 : f32
    %2133 = vector.broadcast %cst_228 : f32 to vector<8x121xf32>
    %2134 = arith.maximumf %2132, %2133 : vector<8x121xf32>
    %2135 = vector.broadcast %2130 : f32 to vector<8x121xf32>
    %2136 = arith.addf %2129, %2135 : vector<8x121xf32>
    %cst_229 = arith.constant 0.000000e+00 : f32
    %2137 = vector.broadcast %cst_229 : f32 to vector<8x121xf32>
    %2138 = arith.maximumf %2136, %2137 : vector<8x121xf32>
    %2139 = arith.maximumf %2134, %2138 : vector<8x121xf32>
    %2140 = arith.truncf %2139 : vector<8x121xf32> to vector<8x121xbf16>
    %c120_230 = arith.constant 120 : index
    %2141 = memref.load %arg3[%c120_230] : memref<192xf32, #tpu.memory_space<smem>>
    %c121_231 = arith.constant 121 : index
    %2142 = memref.load %arg3[%c121_231] : memref<192xf32, #tpu.memory_space<smem>>
    %c122_232 = arith.constant 122 : index
    %2143 = memref.load %arg3[%c122_232] : memref<192xf32, #tpu.memory_space<smem>>
    %c123_233 = arith.constant 123 : index
    %2144 = memref.load %arg3[%c123_233] : memref<192xf32, #tpu.memory_space<smem>>
    %c124_234 = arith.constant 124 : index
    %2145 = memref.load %arg3[%c124_234] : memref<192xf32, #tpu.memory_space<smem>>
    %c125_235 = arith.constant 125 : index
    %2146 = memref.load %arg3[%c125_235] : memref<192xf32, #tpu.memory_space<smem>>
    %c126_236 = arith.constant 126 : index
    %2147 = memref.load %arg3[%c126_236] : memref<192xf32, #tpu.memory_space<smem>>
    %c127_237 = arith.constant 127 : index
    %2148 = memref.load %arg3[%c127_237] : memref<192xf32, #tpu.memory_space<smem>>
    %c128_238 = arith.constant 128 : index
    %2149 = memref.load %arg3[%c128_238] : memref<192xf32, #tpu.memory_space<smem>>
    %c129_239 = arith.constant 129 : index
    %2150 = memref.load %arg3[%c129_239] : memref<192xf32, #tpu.memory_space<smem>>
    %c130_240 = arith.constant 130 : index
    %2151 = memref.load %arg3[%c130_240] : memref<192xf32, #tpu.memory_space<smem>>
    %c131_241 = arith.constant 131 : index
    %2152 = memref.load %arg3[%c131_241] : memref<192xf32, #tpu.memory_space<smem>>
    %c132_242 = arith.constant 132 : index
    %2153 = memref.load %arg3[%c132_242] : memref<192xf32, #tpu.memory_space<smem>>
    %c133_243 = arith.constant 133 : index
    %2154 = memref.load %arg3[%c133_243] : memref<192xf32, #tpu.memory_space<smem>>
    %c134_244 = arith.constant 134 : index
    %2155 = memref.load %arg3[%c134_244] : memref<192xf32, #tpu.memory_space<smem>>
    %c135_245 = arith.constant 135 : index
    %2156 = memref.load %arg3[%c135_245] : memref<192xf32, #tpu.memory_space<smem>>
    %c136_246 = arith.constant 136 : index
    %2157 = memref.load %arg3[%c136_246] : memref<192xf32, #tpu.memory_space<smem>>
    %c137_247 = arith.constant 137 : index
    %2158 = memref.load %arg3[%c137_247] : memref<192xf32, #tpu.memory_space<smem>>
    %c138_248 = arith.constant 138 : index
    %2159 = memref.load %arg3[%c138_248] : memref<192xf32, #tpu.memory_space<smem>>
    %c139_249 = arith.constant 139 : index
    %2160 = memref.load %arg3[%c139_249] : memref<192xf32, #tpu.memory_space<smem>>
    %c140_250 = arith.constant 140 : index
    %2161 = memref.load %arg3[%c140_250] : memref<192xf32, #tpu.memory_space<smem>>
    %c141_251 = arith.constant 141 : index
    %2162 = memref.load %arg3[%c141_251] : memref<192xf32, #tpu.memory_space<smem>>
    %c142_252 = arith.constant 142 : index
    %2163 = memref.load %arg3[%c142_252] : memref<192xf32, #tpu.memory_space<smem>>
    %c143_253 = arith.constant 143 : index
    %2164 = memref.load %arg3[%c143_253] : memref<192xf32, #tpu.memory_space<smem>>
    %2165 = vector.broadcast %2141 : f32 to vector<8x121xf32>
    %2166 = arith.mulf %2165, %1224 : vector<8x121xf32>
    %2167 = vector.broadcast %2142 : f32 to vector<8x121xf32>
    %2168 = arith.mulf %2167, %1240 : vector<8x121xf32>
    %2169 = arith.addf %2166, %2168 : vector<8x121xf32>
    %2170 = vector.broadcast %2143 : f32 to vector<8x121xf32>
    %2171 = arith.mulf %2170, %1225 : vector<8x121xf32>
    %2172 = arith.addf %2169, %2171 : vector<8x121xf32>
    %2173 = vector.broadcast %2144 : f32 to vector<8x121xf32>
    %2174 = arith.mulf %2173, %1226 : vector<8x121xf32>
    %2175 = arith.addf %2172, %2174 : vector<8x121xf32>
    %2176 = vector.broadcast %2145 : f32 to vector<8x121xf32>
    %2177 = arith.mulf %2176, %1242 : vector<8x121xf32>
    %2178 = arith.addf %2175, %2177 : vector<8x121xf32>
    %2179 = vector.broadcast %2146 : f32 to vector<8x121xf32>
    %2180 = arith.mulf %2179, %1227 : vector<8x121xf32>
    %2181 = arith.addf %2178, %2180 : vector<8x121xf32>
    %2182 = vector.broadcast %2147 : f32 to vector<8x121xf32>
    %2183 = arith.mulf %2182, %1228 : vector<8x121xf32>
    %2184 = arith.addf %2181, %2183 : vector<8x121xf32>
    %2185 = vector.broadcast %2148 : f32 to vector<8x121xf32>
    %2186 = arith.mulf %2185, %1244 : vector<8x121xf32>
    %2187 = arith.addf %2184, %2186 : vector<8x121xf32>
    %2188 = vector.broadcast %2149 : f32 to vector<8x121xf32>
    %2189 = arith.mulf %2188, %1229 : vector<8x121xf32>
    %2190 = arith.addf %2187, %2189 : vector<8x121xf32>
    %2191 = vector.broadcast %2150 : f32 to vector<8x121xf32>
    %2192 = arith.mulf %2191, %1230 : vector<8x121xf32>
    %2193 = arith.addf %2190, %2192 : vector<8x121xf32>
    %2194 = vector.broadcast %2151 : f32 to vector<8x121xf32>
    %2195 = arith.mulf %2194, %1246 : vector<8x121xf32>
    %2196 = arith.addf %2193, %2195 : vector<8x121xf32>
    %2197 = vector.broadcast %2152 : f32 to vector<8x121xf32>
    %2198 = arith.mulf %2197, %1231 : vector<8x121xf32>
    %2199 = arith.addf %2196, %2198 : vector<8x121xf32>
    %2200 = vector.broadcast %2153 : f32 to vector<8x121xf32>
    %2201 = arith.mulf %2200, %1232 : vector<8x121xf32>
    %2202 = arith.addf %2199, %2201 : vector<8x121xf32>
    %2203 = vector.broadcast %2154 : f32 to vector<8x121xf32>
    %2204 = arith.mulf %2203, %1248 : vector<8x121xf32>
    %2205 = arith.addf %2202, %2204 : vector<8x121xf32>
    %2206 = vector.broadcast %2155 : f32 to vector<8x121xf32>
    %2207 = arith.mulf %2206, %1233 : vector<8x121xf32>
    %2208 = arith.addf %2205, %2207 : vector<8x121xf32>
    %2209 = vector.broadcast %2156 : f32 to vector<8x121xf32>
    %2210 = arith.mulf %2209, %1234 : vector<8x121xf32>
    %2211 = arith.addf %2208, %2210 : vector<8x121xf32>
    %2212 = vector.broadcast %2157 : f32 to vector<8x121xf32>
    %2213 = arith.mulf %2212, %1250 : vector<8x121xf32>
    %2214 = arith.addf %2211, %2213 : vector<8x121xf32>
    %2215 = vector.broadcast %2158 : f32 to vector<8x121xf32>
    %2216 = arith.mulf %2215, %1235 : vector<8x121xf32>
    %2217 = arith.addf %2214, %2216 : vector<8x121xf32>
    %2218 = vector.broadcast %2159 : f32 to vector<8x121xf32>
    %2219 = arith.mulf %2218, %1236 : vector<8x121xf32>
    %2220 = arith.addf %2217, %2219 : vector<8x121xf32>
    %2221 = vector.broadcast %2160 : f32 to vector<8x121xf32>
    %2222 = arith.mulf %2221, %1252 : vector<8x121xf32>
    %2223 = arith.addf %2220, %2222 : vector<8x121xf32>
    %2224 = vector.broadcast %2161 : f32 to vector<8x121xf32>
    %2225 = arith.mulf %2224, %1237 : vector<8x121xf32>
    %2226 = arith.addf %2223, %2225 : vector<8x121xf32>
    %2227 = vector.broadcast %2162 : f32 to vector<8x121xf32>
    %2228 = arith.mulf %2227, %1238 : vector<8x121xf32>
    %2229 = arith.addf %2226, %2228 : vector<8x121xf32>
    %2230 = vector.broadcast %2163 : f32 to vector<8x121xf32>
    %2231 = arith.mulf %2230, %1254 : vector<8x121xf32>
    %2232 = arith.addf %2229, %2231 : vector<8x121xf32>
    %2233 = vector.broadcast %2164 : f32 to vector<8x121xf32>
    %2234 = arith.mulf %2233, %1239 : vector<8x121xf32>
    %2235 = arith.addf %2232, %2234 : vector<8x121xf32>
    %2236 = vector.broadcast %2141 : f32 to vector<8x121xf32>
    %2237 = arith.mulf %2236, %1240 : vector<8x121xf32>
    %2238 = vector.broadcast %2142 : f32 to vector<8x121xf32>
    %2239 = arith.mulf %2238, %1225 : vector<8x121xf32>
    %2240 = arith.addf %2237, %2239 : vector<8x121xf32>
    %2241 = vector.broadcast %2143 : f32 to vector<8x121xf32>
    %2242 = arith.mulf %2241, %1241 : vector<8x121xf32>
    %2243 = arith.addf %2240, %2242 : vector<8x121xf32>
    %2244 = vector.broadcast %2144 : f32 to vector<8x121xf32>
    %2245 = arith.mulf %2244, %1242 : vector<8x121xf32>
    %2246 = arith.addf %2243, %2245 : vector<8x121xf32>
    %2247 = vector.broadcast %2145 : f32 to vector<8x121xf32>
    %2248 = arith.mulf %2247, %1227 : vector<8x121xf32>
    %2249 = arith.addf %2246, %2248 : vector<8x121xf32>
    %2250 = vector.broadcast %2146 : f32 to vector<8x121xf32>
    %2251 = arith.mulf %2250, %1243 : vector<8x121xf32>
    %2252 = arith.addf %2249, %2251 : vector<8x121xf32>
    %2253 = vector.broadcast %2147 : f32 to vector<8x121xf32>
    %2254 = arith.mulf %2253, %1244 : vector<8x121xf32>
    %2255 = arith.addf %2252, %2254 : vector<8x121xf32>
    %2256 = vector.broadcast %2148 : f32 to vector<8x121xf32>
    %2257 = arith.mulf %2256, %1229 : vector<8x121xf32>
    %2258 = arith.addf %2255, %2257 : vector<8x121xf32>
    %2259 = vector.broadcast %2149 : f32 to vector<8x121xf32>
    %2260 = arith.mulf %2259, %1245 : vector<8x121xf32>
    %2261 = arith.addf %2258, %2260 : vector<8x121xf32>
    %2262 = vector.broadcast %2150 : f32 to vector<8x121xf32>
    %2263 = arith.mulf %2262, %1246 : vector<8x121xf32>
    %2264 = arith.addf %2261, %2263 : vector<8x121xf32>
    %2265 = vector.broadcast %2151 : f32 to vector<8x121xf32>
    %2266 = arith.mulf %2265, %1231 : vector<8x121xf32>
    %2267 = arith.addf %2264, %2266 : vector<8x121xf32>
    %2268 = vector.broadcast %2152 : f32 to vector<8x121xf32>
    %2269 = arith.mulf %2268, %1247 : vector<8x121xf32>
    %2270 = arith.addf %2267, %2269 : vector<8x121xf32>
    %2271 = vector.broadcast %2153 : f32 to vector<8x121xf32>
    %2272 = arith.mulf %2271, %1248 : vector<8x121xf32>
    %2273 = arith.addf %2270, %2272 : vector<8x121xf32>
    %2274 = vector.broadcast %2154 : f32 to vector<8x121xf32>
    %2275 = arith.mulf %2274, %1233 : vector<8x121xf32>
    %2276 = arith.addf %2273, %2275 : vector<8x121xf32>
    %2277 = vector.broadcast %2155 : f32 to vector<8x121xf32>
    %2278 = arith.mulf %2277, %1249 : vector<8x121xf32>
    %2279 = arith.addf %2276, %2278 : vector<8x121xf32>
    %2280 = vector.broadcast %2156 : f32 to vector<8x121xf32>
    %2281 = arith.mulf %2280, %1250 : vector<8x121xf32>
    %2282 = arith.addf %2279, %2281 : vector<8x121xf32>
    %2283 = vector.broadcast %2157 : f32 to vector<8x121xf32>
    %2284 = arith.mulf %2283, %1235 : vector<8x121xf32>
    %2285 = arith.addf %2282, %2284 : vector<8x121xf32>
    %2286 = vector.broadcast %2158 : f32 to vector<8x121xf32>
    %2287 = arith.mulf %2286, %1251 : vector<8x121xf32>
    %2288 = arith.addf %2285, %2287 : vector<8x121xf32>
    %2289 = vector.broadcast %2159 : f32 to vector<8x121xf32>
    %2290 = arith.mulf %2289, %1252 : vector<8x121xf32>
    %2291 = arith.addf %2288, %2290 : vector<8x121xf32>
    %2292 = vector.broadcast %2160 : f32 to vector<8x121xf32>
    %2293 = arith.mulf %2292, %1237 : vector<8x121xf32>
    %2294 = arith.addf %2291, %2293 : vector<8x121xf32>
    %2295 = vector.broadcast %2161 : f32 to vector<8x121xf32>
    %2296 = arith.mulf %2295, %1253 : vector<8x121xf32>
    %2297 = arith.addf %2294, %2296 : vector<8x121xf32>
    %2298 = vector.broadcast %2162 : f32 to vector<8x121xf32>
    %2299 = arith.mulf %2298, %1254 : vector<8x121xf32>
    %2300 = arith.addf %2297, %2299 : vector<8x121xf32>
    %2301 = vector.broadcast %2163 : f32 to vector<8x121xf32>
    %2302 = arith.mulf %2301, %1239 : vector<8x121xf32>
    %2303 = arith.addf %2300, %2302 : vector<8x121xf32>
    %2304 = vector.broadcast %2164 : f32 to vector<8x121xf32>
    %2305 = arith.mulf %2304, %1255 : vector<8x121xf32>
    %2306 = arith.addf %2303, %2305 : vector<8x121xf32>
    %c5_254 = arith.constant 5 : index
    %2307 = memref.load %arg4[%c5_254] : memref<8xf32, #tpu.memory_space<smem>>
    %2308 = vector.broadcast %2307 : f32 to vector<8x121xf32>
    %2309 = arith.addf %2235, %2308 : vector<8x121xf32>
    %cst_255 = arith.constant 0.000000e+00 : f32
    %2310 = vector.broadcast %cst_255 : f32 to vector<8x121xf32>
    %2311 = arith.maximumf %2309, %2310 : vector<8x121xf32>
    %2312 = vector.broadcast %2307 : f32 to vector<8x121xf32>
    %2313 = arith.addf %2306, %2312 : vector<8x121xf32>
    %cst_256 = arith.constant 0.000000e+00 : f32
    %2314 = vector.broadcast %cst_256 : f32 to vector<8x121xf32>
    %2315 = arith.maximumf %2313, %2314 : vector<8x121xf32>
    %2316 = arith.maximumf %2311, %2315 : vector<8x121xf32>
    %2317 = arith.truncf %2316 : vector<8x121xf32> to vector<8x121xbf16>
    %c144_257 = arith.constant 144 : index
    %2318 = memref.load %arg3[%c144_257] : memref<192xf32, #tpu.memory_space<smem>>
    %c145_258 = arith.constant 145 : index
    %2319 = memref.load %arg3[%c145_258] : memref<192xf32, #tpu.memory_space<smem>>
    %c146_259 = arith.constant 146 : index
    %2320 = memref.load %arg3[%c146_259] : memref<192xf32, #tpu.memory_space<smem>>
    %c147_260 = arith.constant 147 : index
    %2321 = memref.load %arg3[%c147_260] : memref<192xf32, #tpu.memory_space<smem>>
    %c148_261 = arith.constant 148 : index
    %2322 = memref.load %arg3[%c148_261] : memref<192xf32, #tpu.memory_space<smem>>
    %c149_262 = arith.constant 149 : index
    %2323 = memref.load %arg3[%c149_262] : memref<192xf32, #tpu.memory_space<smem>>
    %c150_263 = arith.constant 150 : index
    %2324 = memref.load %arg3[%c150_263] : memref<192xf32, #tpu.memory_space<smem>>
    %c151_264 = arith.constant 151 : index
    %2325 = memref.load %arg3[%c151_264] : memref<192xf32, #tpu.memory_space<smem>>
    %c152_265 = arith.constant 152 : index
    %2326 = memref.load %arg3[%c152_265] : memref<192xf32, #tpu.memory_space<smem>>
    %c153_266 = arith.constant 153 : index
    %2327 = memref.load %arg3[%c153_266] : memref<192xf32, #tpu.memory_space<smem>>
    %c154_267 = arith.constant 154 : index
    %2328 = memref.load %arg3[%c154_267] : memref<192xf32, #tpu.memory_space<smem>>
    %c155_268 = arith.constant 155 : index
    %2329 = memref.load %arg3[%c155_268] : memref<192xf32, #tpu.memory_space<smem>>
    %c156_269 = arith.constant 156 : index
    %2330 = memref.load %arg3[%c156_269] : memref<192xf32, #tpu.memory_space<smem>>
    %c157_270 = arith.constant 157 : index
    %2331 = memref.load %arg3[%c157_270] : memref<192xf32, #tpu.memory_space<smem>>
    %c158_271 = arith.constant 158 : index
    %2332 = memref.load %arg3[%c158_271] : memref<192xf32, #tpu.memory_space<smem>>
    %c159_272 = arith.constant 159 : index
    %2333 = memref.load %arg3[%c159_272] : memref<192xf32, #tpu.memory_space<smem>>
    %c160 = arith.constant 160 : index
    %2334 = memref.load %arg3[%c160] : memref<192xf32, #tpu.memory_space<smem>>
    %c161 = arith.constant 161 : index
    %2335 = memref.load %arg3[%c161] : memref<192xf32, #tpu.memory_space<smem>>
    %c162 = arith.constant 162 : index
    %2336 = memref.load %arg3[%c162] : memref<192xf32, #tpu.memory_space<smem>>
    %c163 = arith.constant 163 : index
    %2337 = memref.load %arg3[%c163] : memref<192xf32, #tpu.memory_space<smem>>
    %c164 = arith.constant 164 : index
    %2338 = memref.load %arg3[%c164] : memref<192xf32, #tpu.memory_space<smem>>
    %c165 = arith.constant 165 : index
    %2339 = memref.load %arg3[%c165] : memref<192xf32, #tpu.memory_space<smem>>
    %c166 = arith.constant 166 : index
    %2340 = memref.load %arg3[%c166] : memref<192xf32, #tpu.memory_space<smem>>
    %c167 = arith.constant 167 : index
    %2341 = memref.load %arg3[%c167] : memref<192xf32, #tpu.memory_space<smem>>
    %2342 = vector.broadcast %2318 : f32 to vector<8x121xf32>
    %2343 = arith.mulf %2342, %1224 : vector<8x121xf32>
    %2344 = vector.broadcast %2319 : f32 to vector<8x121xf32>
    %2345 = arith.mulf %2344, %1240 : vector<8x121xf32>
    %2346 = arith.addf %2343, %2345 : vector<8x121xf32>
    %2347 = vector.broadcast %2320 : f32 to vector<8x121xf32>
    %2348 = arith.mulf %2347, %1225 : vector<8x121xf32>
    %2349 = arith.addf %2346, %2348 : vector<8x121xf32>
    %2350 = vector.broadcast %2321 : f32 to vector<8x121xf32>
    %2351 = arith.mulf %2350, %1226 : vector<8x121xf32>
    %2352 = arith.addf %2349, %2351 : vector<8x121xf32>
    %2353 = vector.broadcast %2322 : f32 to vector<8x121xf32>
    %2354 = arith.mulf %2353, %1242 : vector<8x121xf32>
    %2355 = arith.addf %2352, %2354 : vector<8x121xf32>
    %2356 = vector.broadcast %2323 : f32 to vector<8x121xf32>
    %2357 = arith.mulf %2356, %1227 : vector<8x121xf32>
    %2358 = arith.addf %2355, %2357 : vector<8x121xf32>
    %2359 = vector.broadcast %2324 : f32 to vector<8x121xf32>
    %2360 = arith.mulf %2359, %1228 : vector<8x121xf32>
    %2361 = arith.addf %2358, %2360 : vector<8x121xf32>
    %2362 = vector.broadcast %2325 : f32 to vector<8x121xf32>
    %2363 = arith.mulf %2362, %1244 : vector<8x121xf32>
    %2364 = arith.addf %2361, %2363 : vector<8x121xf32>
    %2365 = vector.broadcast %2326 : f32 to vector<8x121xf32>
    %2366 = arith.mulf %2365, %1229 : vector<8x121xf32>
    %2367 = arith.addf %2364, %2366 : vector<8x121xf32>
    %2368 = vector.broadcast %2327 : f32 to vector<8x121xf32>
    %2369 = arith.mulf %2368, %1230 : vector<8x121xf32>
    %2370 = arith.addf %2367, %2369 : vector<8x121xf32>
    %2371 = vector.broadcast %2328 : f32 to vector<8x121xf32>
    %2372 = arith.mulf %2371, %1246 : vector<8x121xf32>
    %2373 = arith.addf %2370, %2372 : vector<8x121xf32>
    %2374 = vector.broadcast %2329 : f32 to vector<8x121xf32>
    %2375 = arith.mulf %2374, %1231 : vector<8x121xf32>
    %2376 = arith.addf %2373, %2375 : vector<8x121xf32>
    %2377 = vector.broadcast %2330 : f32 to vector<8x121xf32>
    %2378 = arith.mulf %2377, %1232 : vector<8x121xf32>
    %2379 = arith.addf %2376, %2378 : vector<8x121xf32>
    %2380 = vector.broadcast %2331 : f32 to vector<8x121xf32>
    %2381 = arith.mulf %2380, %1248 : vector<8x121xf32>
    %2382 = arith.addf %2379, %2381 : vector<8x121xf32>
    %2383 = vector.broadcast %2332 : f32 to vector<8x121xf32>
    %2384 = arith.mulf %2383, %1233 : vector<8x121xf32>
    %2385 = arith.addf %2382, %2384 : vector<8x121xf32>
    %2386 = vector.broadcast %2333 : f32 to vector<8x121xf32>
    %2387 = arith.mulf %2386, %1234 : vector<8x121xf32>
    %2388 = arith.addf %2385, %2387 : vector<8x121xf32>
    %2389 = vector.broadcast %2334 : f32 to vector<8x121xf32>
    %2390 = arith.mulf %2389, %1250 : vector<8x121xf32>
    %2391 = arith.addf %2388, %2390 : vector<8x121xf32>
    %2392 = vector.broadcast %2335 : f32 to vector<8x121xf32>
    %2393 = arith.mulf %2392, %1235 : vector<8x121xf32>
    %2394 = arith.addf %2391, %2393 : vector<8x121xf32>
    %2395 = vector.broadcast %2336 : f32 to vector<8x121xf32>
    %2396 = arith.mulf %2395, %1236 : vector<8x121xf32>
    %2397 = arith.addf %2394, %2396 : vector<8x121xf32>
    %2398 = vector.broadcast %2337 : f32 to vector<8x121xf32>
    %2399 = arith.mulf %2398, %1252 : vector<8x121xf32>
    %2400 = arith.addf %2397, %2399 : vector<8x121xf32>
    %2401 = vector.broadcast %2338 : f32 to vector<8x121xf32>
    %2402 = arith.mulf %2401, %1237 : vector<8x121xf32>
    %2403 = arith.addf %2400, %2402 : vector<8x121xf32>
    %2404 = vector.broadcast %2339 : f32 to vector<8x121xf32>
    %2405 = arith.mulf %2404, %1238 : vector<8x121xf32>
    %2406 = arith.addf %2403, %2405 : vector<8x121xf32>
    %2407 = vector.broadcast %2340 : f32 to vector<8x121xf32>
    %2408 = arith.mulf %2407, %1254 : vector<8x121xf32>
    %2409 = arith.addf %2406, %2408 : vector<8x121xf32>
    %2410 = vector.broadcast %2341 : f32 to vector<8x121xf32>
    %2411 = arith.mulf %2410, %1239 : vector<8x121xf32>
    %2412 = arith.addf %2409, %2411 : vector<8x121xf32>
    %2413 = vector.broadcast %2318 : f32 to vector<8x121xf32>
    %2414 = arith.mulf %2413, %1240 : vector<8x121xf32>
    %2415 = vector.broadcast %2319 : f32 to vector<8x121xf32>
    %2416 = arith.mulf %2415, %1225 : vector<8x121xf32>
    %2417 = arith.addf %2414, %2416 : vector<8x121xf32>
    %2418 = vector.broadcast %2320 : f32 to vector<8x121xf32>
    %2419 = arith.mulf %2418, %1241 : vector<8x121xf32>
    %2420 = arith.addf %2417, %2419 : vector<8x121xf32>
    %2421 = vector.broadcast %2321 : f32 to vector<8x121xf32>
    %2422 = arith.mulf %2421, %1242 : vector<8x121xf32>
    %2423 = arith.addf %2420, %2422 : vector<8x121xf32>
    %2424 = vector.broadcast %2322 : f32 to vector<8x121xf32>
    %2425 = arith.mulf %2424, %1227 : vector<8x121xf32>
    %2426 = arith.addf %2423, %2425 : vector<8x121xf32>
    %2427 = vector.broadcast %2323 : f32 to vector<8x121xf32>
    %2428 = arith.mulf %2427, %1243 : vector<8x121xf32>
    %2429 = arith.addf %2426, %2428 : vector<8x121xf32>
    %2430 = vector.broadcast %2324 : f32 to vector<8x121xf32>
    %2431 = arith.mulf %2430, %1244 : vector<8x121xf32>
    %2432 = arith.addf %2429, %2431 : vector<8x121xf32>
    %2433 = vector.broadcast %2325 : f32 to vector<8x121xf32>
    %2434 = arith.mulf %2433, %1229 : vector<8x121xf32>
    %2435 = arith.addf %2432, %2434 : vector<8x121xf32>
    %2436 = vector.broadcast %2326 : f32 to vector<8x121xf32>
    %2437 = arith.mulf %2436, %1245 : vector<8x121xf32>
    %2438 = arith.addf %2435, %2437 : vector<8x121xf32>
    %2439 = vector.broadcast %2327 : f32 to vector<8x121xf32>
    %2440 = arith.mulf %2439, %1246 : vector<8x121xf32>
    %2441 = arith.addf %2438, %2440 : vector<8x121xf32>
    %2442 = vector.broadcast %2328 : f32 to vector<8x121xf32>
    %2443 = arith.mulf %2442, %1231 : vector<8x121xf32>
    %2444 = arith.addf %2441, %2443 : vector<8x121xf32>
    %2445 = vector.broadcast %2329 : f32 to vector<8x121xf32>
    %2446 = arith.mulf %2445, %1247 : vector<8x121xf32>
    %2447 = arith.addf %2444, %2446 : vector<8x121xf32>
    %2448 = vector.broadcast %2330 : f32 to vector<8x121xf32>
    %2449 = arith.mulf %2448, %1248 : vector<8x121xf32>
    %2450 = arith.addf %2447, %2449 : vector<8x121xf32>
    %2451 = vector.broadcast %2331 : f32 to vector<8x121xf32>
    %2452 = arith.mulf %2451, %1233 : vector<8x121xf32>
    %2453 = arith.addf %2450, %2452 : vector<8x121xf32>
    %2454 = vector.broadcast %2332 : f32 to vector<8x121xf32>
    %2455 = arith.mulf %2454, %1249 : vector<8x121xf32>
    %2456 = arith.addf %2453, %2455 : vector<8x121xf32>
    %2457 = vector.broadcast %2333 : f32 to vector<8x121xf32>
    %2458 = arith.mulf %2457, %1250 : vector<8x121xf32>
    %2459 = arith.addf %2456, %2458 : vector<8x121xf32>
    %2460 = vector.broadcast %2334 : f32 to vector<8x121xf32>
    %2461 = arith.mulf %2460, %1235 : vector<8x121xf32>
    %2462 = arith.addf %2459, %2461 : vector<8x121xf32>
    %2463 = vector.broadcast %2335 : f32 to vector<8x121xf32>
    %2464 = arith.mulf %2463, %1251 : vector<8x121xf32>
    %2465 = arith.addf %2462, %2464 : vector<8x121xf32>
    %2466 = vector.broadcast %2336 : f32 to vector<8x121xf32>
    %2467 = arith.mulf %2466, %1252 : vector<8x121xf32>
    %2468 = arith.addf %2465, %2467 : vector<8x121xf32>
    %2469 = vector.broadcast %2337 : f32 to vector<8x121xf32>
    %2470 = arith.mulf %2469, %1237 : vector<8x121xf32>
    %2471 = arith.addf %2468, %2470 : vector<8x121xf32>
    %2472 = vector.broadcast %2338 : f32 to vector<8x121xf32>
    %2473 = arith.mulf %2472, %1253 : vector<8x121xf32>
    %2474 = arith.addf %2471, %2473 : vector<8x121xf32>
    %2475 = vector.broadcast %2339 : f32 to vector<8x121xf32>
    %2476 = arith.mulf %2475, %1254 : vector<8x121xf32>
    %2477 = arith.addf %2474, %2476 : vector<8x121xf32>
    %2478 = vector.broadcast %2340 : f32 to vector<8x121xf32>
    %2479 = arith.mulf %2478, %1239 : vector<8x121xf32>
    %2480 = arith.addf %2477, %2479 : vector<8x121xf32>
    %2481 = vector.broadcast %2341 : f32 to vector<8x121xf32>
    %2482 = arith.mulf %2481, %1255 : vector<8x121xf32>
    %2483 = arith.addf %2480, %2482 : vector<8x121xf32>
    %c6_273 = arith.constant 6 : index
    %2484 = memref.load %arg4[%c6_273] : memref<8xf32, #tpu.memory_space<smem>>
    %2485 = vector.broadcast %2484 : f32 to vector<8x121xf32>
    %2486 = arith.addf %2412, %2485 : vector<8x121xf32>
    %cst_274 = arith.constant 0.000000e+00 : f32
    %2487 = vector.broadcast %cst_274 : f32 to vector<8x121xf32>
    %2488 = arith.maximumf %2486, %2487 : vector<8x121xf32>
    %2489 = vector.broadcast %2484 : f32 to vector<8x121xf32>
    %2490 = arith.addf %2483, %2489 : vector<8x121xf32>
    %cst_275 = arith.constant 0.000000e+00 : f32
    %2491 = vector.broadcast %cst_275 : f32 to vector<8x121xf32>
    %2492 = arith.maximumf %2490, %2491 : vector<8x121xf32>
    %2493 = arith.maximumf %2488, %2492 : vector<8x121xf32>
    %2494 = arith.truncf %2493 : vector<8x121xf32> to vector<8x121xbf16>
    %c168 = arith.constant 168 : index
    %2495 = memref.load %arg3[%c168] : memref<192xf32, #tpu.memory_space<smem>>
    %c169 = arith.constant 169 : index
    %2496 = memref.load %arg3[%c169] : memref<192xf32, #tpu.memory_space<smem>>
    %c170 = arith.constant 170 : index
    %2497 = memref.load %arg3[%c170] : memref<192xf32, #tpu.memory_space<smem>>
    %c171 = arith.constant 171 : index
    %2498 = memref.load %arg3[%c171] : memref<192xf32, #tpu.memory_space<smem>>
    %c172 = arith.constant 172 : index
    %2499 = memref.load %arg3[%c172] : memref<192xf32, #tpu.memory_space<smem>>
    %c173 = arith.constant 173 : index
    %2500 = memref.load %arg3[%c173] : memref<192xf32, #tpu.memory_space<smem>>
    %c174 = arith.constant 174 : index
    %2501 = memref.load %arg3[%c174] : memref<192xf32, #tpu.memory_space<smem>>
    %c175 = arith.constant 175 : index
    %2502 = memref.load %arg3[%c175] : memref<192xf32, #tpu.memory_space<smem>>
    %c176 = arith.constant 176 : index
    %2503 = memref.load %arg3[%c176] : memref<192xf32, #tpu.memory_space<smem>>
    %c177 = arith.constant 177 : index
    %2504 = memref.load %arg3[%c177] : memref<192xf32, #tpu.memory_space<smem>>
    %c178 = arith.constant 178 : index
    %2505 = memref.load %arg3[%c178] : memref<192xf32, #tpu.memory_space<smem>>
    %c179 = arith.constant 179 : index
    %2506 = memref.load %arg3[%c179] : memref<192xf32, #tpu.memory_space<smem>>
    %c180 = arith.constant 180 : index
    %2507 = memref.load %arg3[%c180] : memref<192xf32, #tpu.memory_space<smem>>
    %c181 = arith.constant 181 : index
    %2508 = memref.load %arg3[%c181] : memref<192xf32, #tpu.memory_space<smem>>
    %c182 = arith.constant 182 : index
    %2509 = memref.load %arg3[%c182] : memref<192xf32, #tpu.memory_space<smem>>
    %c183 = arith.constant 183 : index
    %2510 = memref.load %arg3[%c183] : memref<192xf32, #tpu.memory_space<smem>>
    %c184 = arith.constant 184 : index
    %2511 = memref.load %arg3[%c184] : memref<192xf32, #tpu.memory_space<smem>>
    %c185 = arith.constant 185 : index
    %2512 = memref.load %arg3[%c185] : memref<192xf32, #tpu.memory_space<smem>>
    %c186 = arith.constant 186 : index
    %2513 = memref.load %arg3[%c186] : memref<192xf32, #tpu.memory_space<smem>>
    %c187 = arith.constant 187 : index
    %2514 = memref.load %arg3[%c187] : memref<192xf32, #tpu.memory_space<smem>>
    %c188 = arith.constant 188 : index
    %2515 = memref.load %arg3[%c188] : memref<192xf32, #tpu.memory_space<smem>>
    %c189 = arith.constant 189 : index
    %2516 = memref.load %arg3[%c189] : memref<192xf32, #tpu.memory_space<smem>>
    %c190 = arith.constant 190 : index
    %2517 = memref.load %arg3[%c190] : memref<192xf32, #tpu.memory_space<smem>>
    %c191 = arith.constant 191 : index
    %2518 = memref.load %arg3[%c191] : memref<192xf32, #tpu.memory_space<smem>>
    %2519 = vector.broadcast %2495 : f32 to vector<8x121xf32>
    %2520 = arith.mulf %2519, %1224 : vector<8x121xf32>
    %2521 = vector.broadcast %2496 : f32 to vector<8x121xf32>
    %2522 = arith.mulf %2521, %1240 : vector<8x121xf32>
    %2523 = arith.addf %2520, %2522 : vector<8x121xf32>
    %2524 = vector.broadcast %2497 : f32 to vector<8x121xf32>
    %2525 = arith.mulf %2524, %1225 : vector<8x121xf32>
    %2526 = arith.addf %2523, %2525 : vector<8x121xf32>
    %2527 = vector.broadcast %2498 : f32 to vector<8x121xf32>
    %2528 = arith.mulf %2527, %1226 : vector<8x121xf32>
    %2529 = arith.addf %2526, %2528 : vector<8x121xf32>
    %2530 = vector.broadcast %2499 : f32 to vector<8x121xf32>
    %2531 = arith.mulf %2530, %1242 : vector<8x121xf32>
    %2532 = arith.addf %2529, %2531 : vector<8x121xf32>
    %2533 = vector.broadcast %2500 : f32 to vector<8x121xf32>
    %2534 = arith.mulf %2533, %1227 : vector<8x121xf32>
    %2535 = arith.addf %2532, %2534 : vector<8x121xf32>
    %2536 = vector.broadcast %2501 : f32 to vector<8x121xf32>
    %2537 = arith.mulf %2536, %1228 : vector<8x121xf32>
    %2538 = arith.addf %2535, %2537 : vector<8x121xf32>
    %2539 = vector.broadcast %2502 : f32 to vector<8x121xf32>
    %2540 = arith.mulf %2539, %1244 : vector<8x121xf32>
    %2541 = arith.addf %2538, %2540 : vector<8x121xf32>
    %2542 = vector.broadcast %2503 : f32 to vector<8x121xf32>
    %2543 = arith.mulf %2542, %1229 : vector<8x121xf32>
    %2544 = arith.addf %2541, %2543 : vector<8x121xf32>
    %2545 = vector.broadcast %2504 : f32 to vector<8x121xf32>
    %2546 = arith.mulf %2545, %1230 : vector<8x121xf32>
    %2547 = arith.addf %2544, %2546 : vector<8x121xf32>
    %2548 = vector.broadcast %2505 : f32 to vector<8x121xf32>
    %2549 = arith.mulf %2548, %1246 : vector<8x121xf32>
    %2550 = arith.addf %2547, %2549 : vector<8x121xf32>
    %2551 = vector.broadcast %2506 : f32 to vector<8x121xf32>
    %2552 = arith.mulf %2551, %1231 : vector<8x121xf32>
    %2553 = arith.addf %2550, %2552 : vector<8x121xf32>
    %2554 = vector.broadcast %2507 : f32 to vector<8x121xf32>
    %2555 = arith.mulf %2554, %1232 : vector<8x121xf32>
    %2556 = arith.addf %2553, %2555 : vector<8x121xf32>
    %2557 = vector.broadcast %2508 : f32 to vector<8x121xf32>
    %2558 = arith.mulf %2557, %1248 : vector<8x121xf32>
    %2559 = arith.addf %2556, %2558 : vector<8x121xf32>
    %2560 = vector.broadcast %2509 : f32 to vector<8x121xf32>
    %2561 = arith.mulf %2560, %1233 : vector<8x121xf32>
    %2562 = arith.addf %2559, %2561 : vector<8x121xf32>
    %2563 = vector.broadcast %2510 : f32 to vector<8x121xf32>
    %2564 = arith.mulf %2563, %1234 : vector<8x121xf32>
    %2565 = arith.addf %2562, %2564 : vector<8x121xf32>
    %2566 = vector.broadcast %2511 : f32 to vector<8x121xf32>
    %2567 = arith.mulf %2566, %1250 : vector<8x121xf32>
    %2568 = arith.addf %2565, %2567 : vector<8x121xf32>
    %2569 = vector.broadcast %2512 : f32 to vector<8x121xf32>
    %2570 = arith.mulf %2569, %1235 : vector<8x121xf32>
    %2571 = arith.addf %2568, %2570 : vector<8x121xf32>
    %2572 = vector.broadcast %2513 : f32 to vector<8x121xf32>
    %2573 = arith.mulf %2572, %1236 : vector<8x121xf32>
    %2574 = arith.addf %2571, %2573 : vector<8x121xf32>
    %2575 = vector.broadcast %2514 : f32 to vector<8x121xf32>
    %2576 = arith.mulf %2575, %1252 : vector<8x121xf32>
    %2577 = arith.addf %2574, %2576 : vector<8x121xf32>
    %2578 = vector.broadcast %2515 : f32 to vector<8x121xf32>
    %2579 = arith.mulf %2578, %1237 : vector<8x121xf32>
    %2580 = arith.addf %2577, %2579 : vector<8x121xf32>
    %2581 = vector.broadcast %2516 : f32 to vector<8x121xf32>
    %2582 = arith.mulf %2581, %1238 : vector<8x121xf32>
    %2583 = arith.addf %2580, %2582 : vector<8x121xf32>
    %2584 = vector.broadcast %2517 : f32 to vector<8x121xf32>
    %2585 = arith.mulf %2584, %1254 : vector<8x121xf32>
    %2586 = arith.addf %2583, %2585 : vector<8x121xf32>
    %2587 = vector.broadcast %2518 : f32 to vector<8x121xf32>
    %2588 = arith.mulf %2587, %1239 : vector<8x121xf32>
    %2589 = arith.addf %2586, %2588 : vector<8x121xf32>
    %2590 = vector.broadcast %2495 : f32 to vector<8x121xf32>
    %2591 = arith.mulf %2590, %1240 : vector<8x121xf32>
    %2592 = vector.broadcast %2496 : f32 to vector<8x121xf32>
    %2593 = arith.mulf %2592, %1225 : vector<8x121xf32>
    %2594 = arith.addf %2591, %2593 : vector<8x121xf32>
    %2595 = vector.broadcast %2497 : f32 to vector<8x121xf32>
    %2596 = arith.mulf %2595, %1241 : vector<8x121xf32>
    %2597 = arith.addf %2594, %2596 : vector<8x121xf32>
    %2598 = vector.broadcast %2498 : f32 to vector<8x121xf32>
    %2599 = arith.mulf %2598, %1242 : vector<8x121xf32>
    %2600 = arith.addf %2597, %2599 : vector<8x121xf32>
    %2601 = vector.broadcast %2499 : f32 to vector<8x121xf32>
    %2602 = arith.mulf %2601, %1227 : vector<8x121xf32>
    %2603 = arith.addf %2600, %2602 : vector<8x121xf32>
    %2604 = vector.broadcast %2500 : f32 to vector<8x121xf32>
    %2605 = arith.mulf %2604, %1243 : vector<8x121xf32>
    %2606 = arith.addf %2603, %2605 : vector<8x121xf32>
    %2607 = vector.broadcast %2501 : f32 to vector<8x121xf32>
    %2608 = arith.mulf %2607, %1244 : vector<8x121xf32>
    %2609 = arith.addf %2606, %2608 : vector<8x121xf32>
    %2610 = vector.broadcast %2502 : f32 to vector<8x121xf32>
    %2611 = arith.mulf %2610, %1229 : vector<8x121xf32>
    %2612 = arith.addf %2609, %2611 : vector<8x121xf32>
    %2613 = vector.broadcast %2503 : f32 to vector<8x121xf32>
    %2614 = arith.mulf %2613, %1245 : vector<8x121xf32>
    %2615 = arith.addf %2612, %2614 : vector<8x121xf32>
    %2616 = vector.broadcast %2504 : f32 to vector<8x121xf32>
    %2617 = arith.mulf %2616, %1246 : vector<8x121xf32>
    %2618 = arith.addf %2615, %2617 : vector<8x121xf32>
    %2619 = vector.broadcast %2505 : f32 to vector<8x121xf32>
    %2620 = arith.mulf %2619, %1231 : vector<8x121xf32>
    %2621 = arith.addf %2618, %2620 : vector<8x121xf32>
    %2622 = vector.broadcast %2506 : f32 to vector<8x121xf32>
    %2623 = arith.mulf %2622, %1247 : vector<8x121xf32>
    %2624 = arith.addf %2621, %2623 : vector<8x121xf32>
    %2625 = vector.broadcast %2507 : f32 to vector<8x121xf32>
    %2626 = arith.mulf %2625, %1248 : vector<8x121xf32>
    %2627 = arith.addf %2624, %2626 : vector<8x121xf32>
    %2628 = vector.broadcast %2508 : f32 to vector<8x121xf32>
    %2629 = arith.mulf %2628, %1233 : vector<8x121xf32>
    %2630 = arith.addf %2627, %2629 : vector<8x121xf32>
    %2631 = vector.broadcast %2509 : f32 to vector<8x121xf32>
    %2632 = arith.mulf %2631, %1249 : vector<8x121xf32>
    %2633 = arith.addf %2630, %2632 : vector<8x121xf32>
    %2634 = vector.broadcast %2510 : f32 to vector<8x121xf32>
    %2635 = arith.mulf %2634, %1250 : vector<8x121xf32>
    %2636 = arith.addf %2633, %2635 : vector<8x121xf32>
    %2637 = vector.broadcast %2511 : f32 to vector<8x121xf32>
    %2638 = arith.mulf %2637, %1235 : vector<8x121xf32>
    %2639 = arith.addf %2636, %2638 : vector<8x121xf32>
    %2640 = vector.broadcast %2512 : f32 to vector<8x121xf32>
    %2641 = arith.mulf %2640, %1251 : vector<8x121xf32>
    %2642 = arith.addf %2639, %2641 : vector<8x121xf32>
    %2643 = vector.broadcast %2513 : f32 to vector<8x121xf32>
    %2644 = arith.mulf %2643, %1252 : vector<8x121xf32>
    %2645 = arith.addf %2642, %2644 : vector<8x121xf32>
    %2646 = vector.broadcast %2514 : f32 to vector<8x121xf32>
    %2647 = arith.mulf %2646, %1237 : vector<8x121xf32>
    %2648 = arith.addf %2645, %2647 : vector<8x121xf32>
    %2649 = vector.broadcast %2515 : f32 to vector<8x121xf32>
    %2650 = arith.mulf %2649, %1253 : vector<8x121xf32>
    %2651 = arith.addf %2648, %2650 : vector<8x121xf32>
    %2652 = vector.broadcast %2516 : f32 to vector<8x121xf32>
    %2653 = arith.mulf %2652, %1254 : vector<8x121xf32>
    %2654 = arith.addf %2651, %2653 : vector<8x121xf32>
    %2655 = vector.broadcast %2517 : f32 to vector<8x121xf32>
    %2656 = arith.mulf %2655, %1239 : vector<8x121xf32>
    %2657 = arith.addf %2654, %2656 : vector<8x121xf32>
    %2658 = vector.broadcast %2518 : f32 to vector<8x121xf32>
    %2659 = arith.mulf %2658, %1255 : vector<8x121xf32>
    %2660 = arith.addf %2657, %2659 : vector<8x121xf32>
    %c7_276 = arith.constant 7 : index
    %2661 = memref.load %arg4[%c7_276] : memref<8xf32, #tpu.memory_space<smem>>
    %2662 = vector.broadcast %2661 : f32 to vector<8x121xf32>
    %2663 = arith.addf %2589, %2662 : vector<8x121xf32>
    %cst_277 = arith.constant 0.000000e+00 : f32
    %2664 = vector.broadcast %cst_277 : f32 to vector<8x121xf32>
    %2665 = arith.maximumf %2663, %2664 : vector<8x121xf32>
    %2666 = vector.broadcast %2661 : f32 to vector<8x121xf32>
    %2667 = arith.addf %2660, %2666 : vector<8x121xf32>
    %cst_278 = arith.constant 0.000000e+00 : f32
    %2668 = vector.broadcast %cst_278 : f32 to vector<8x121xf32>
    %2669 = arith.maximumf %2667, %2668 : vector<8x121xf32>
    %2670 = arith.maximumf %2665, %2669 : vector<8x121xf32>
    %2671 = arith.truncf %2670 : vector<8x121xf32> to vector<8x121xbf16>
    %cst_279 = arith.constant 0.000000e+00 : bf16
    %2672 = vector.broadcast %cst_279 : bf16 to vector<8x7xbf16>
    %2673 = tpu.concatenate %1432, %2672, %1609, %2672, %1786, %2672, %1963, %2672, %2140, %2672, %2317, %2672, %2494, %2672, %2671, %2672 in 1 : vector<8x121xbf16>, vector<8x7xbf16>, vector<8x121xbf16>, vector<8x7xbf16>, vector<8x121xbf16>, vector<8x7xbf16>, vector<8x121xbf16>, vector<8x7xbf16>, vector<8x121xbf16>, vector<8x7xbf16>, vector<8x121xbf16>, vector<8x7xbf16>, vector<8x121xbf16>, vector<8x7xbf16>, vector<8x121xbf16>, vector<8x7xbf16> -> vector<8x1024xbf16>
    %c0_280 = arith.constant 0 : index
    %c0_281 = arith.constant 0 : index
    %2674 = vector.load %arg6[%c0_280, %c0_281] : memref<1024x100xbf16, #tpu.memory_space<vmem>>, vector<1024x100xbf16>
    %cst_282 = arith.constant dense<0.000000e+00> : vector<8x100xf32>
    %2675 = tpu.matmul %2673, %2674, %cst_282 {dimension_numbers = #tpu.dot_dimension_numbers<[1], [0], [0], [1], [0, 0, 1, 1], [], []>} : vector<8x1024xbf16>, vector<1024x100xbf16>, vector<8x100xf32> -> vector<8x100xf32>
    %c0_283 = arith.constant 0 : index
    %c0_284 = arith.constant 0 : index
    %2676 = vector.load %arg7[%c0_283, %c0_284] : memref<1x100xf32, #tpu.memory_space<vmem>>, vector<1x100xf32>
    %2677 = vector.broadcast %2676 : vector<1x100xf32> to vector<8x100xf32>
    %2678 = arith.addf %2675, %2677 : vector<8x100xf32>
    %cst_285 = arith.constant 0.000000e+00 : f32
    %2679 = vector.broadcast %cst_285 : f32 to vector<8x100xf32>
    %2680 = arith.maximumf %2678, %2679 : vector<8x100xf32>
    %2681 = arith.truncf %2680 : vector<8x100xf32> to vector<8x100xbf16>
    %c0_286 = arith.constant 0 : index
    %c0_287 = arith.constant 0 : index
    %2682 = vector.load %arg8[%c0_286, %c0_287] : memref<100x128xbf16, #tpu.memory_space<vmem>>, vector<100x128xbf16>
    %cst_288 = arith.constant dense<0.000000e+00> : vector<8x128xf32>
    %2683 = tpu.matmul %2681, %2682, %cst_288 {dimension_numbers = #tpu.dot_dimension_numbers<[1], [0], [0], [1], [0, 0, 1, 1], [], []>} : vector<8x100xbf16>, vector<100x128xbf16>, vector<8x128xf32> -> vector<8x128xf32>
    %c0_289 = arith.constant 0 : index
    %c0_290 = arith.constant 0 : index
    %2684 = vector.load %arg9[%c0_289, %c0_290] : memref<1x128xf32, #tpu.memory_space<vmem>>, vector<1x128xf32>
    %2685 = vector.broadcast %2684 : vector<1x128xf32> to vector<8x128xf32>
    %2686 = arith.addf %2683, %2685 : vector<8x128xf32>
    %c0_291 = arith.constant 0 : index
    %c0_292 = arith.constant 0 : index
    %2687 = vector.load %arg10[%c0_291, %c0_292] : memref<8x128xf32, #tpu.memory_space<vmem>>, vector<8x128xf32>
    tpu.vector_store %arg10[%c0_291, %c0_292], %2686 {strides = array<i32>} : memref<8x128xf32, #tpu.memory_space<vmem>>, vector<8x128xf32>,
    return
  }
  func.func @transform_0(%arg0: i32) -> i32 {
    %c0_i32 = arith.constant 0 : i32
    %c0_i32_0 = arith.constant 0 : i32
    return %c0_i32 : i32
  }
  func.func @transform_1(%arg0: i32) -> i32 {
    %c0_i32 = arith.constant 0 : i32
    %c0_i32_0 = arith.constant 0 : i32
    return %c0_i32 : i32
  }
  func.func @transform_2(%arg0: i32) -> i32 {
    %c0_i32 = arith.constant 0 : i32
    %c0_i32_0 = arith.constant 0 : i32
    return %c0_i32 : i32
  }
  func.func @transform_3(%arg0: i32) -> i32 {
    %c0_i32 = arith.constant 0 : i32
    %c0_i32_0 = arith.constant 0 : i32
    return %c0_i32 : i32
  }
  func.func @transform_4(%arg0: i32) -> (i32, i32, i32) {
    %c0_i32 = arith.constant 0 : i32
    %c0_i32_0 = arith.constant 0 : i32
    %c0_i32_1 = arith.constant 0 : i32
    return %c0_i32, %arg0, %c0_i32_0 : i32, i32, i32
  }
  func.func @transform_5(%arg0: i32) -> (i32, i32) {
    %c0_i32 = arith.constant 0 : i32
    %c0_i32_0 = arith.constant 0 : i32
    %c0_i32_1 = arith.constant 0 : i32
    return %c0_i32, %c0_i32_0 : i32, i32
  }
  func.func @transform_6(%arg0: i32) -> (i32, i32) {
    %c0_i32 = arith.constant 0 : i32
    %c0_i32_0 = arith.constant 0 : i32
    %c0_i32_1 = arith.constant 0 : i32
    return %c0_i32, %c0_i32_0 : i32, i32
  }
  func.func @transform_7(%arg0: i32) -> (i32, i32) {
    %c0_i32 = arith.constant 0 : i32
    %c0_i32_0 = arith.constant 0 : i32
    %c0_i32_1 = arith.constant 0 : i32
    return %c0_i32, %c0_i32_0 : i32, i32
  }
  func.func @transform_8(%arg0: i32) -> (i32, i32) {
    %c0_i32 = arith.constant 0 : i32
    %c0_i32_0 = arith.constant 0 : i32
    %c0_i32_1 = arith.constant 0 : i32
    return %c0_i32, %c0_i32_0 : i32, i32
  }
  func.func @transform_9(%arg0: i32) -> (i32, i32) {
    %c0_i32 = arith.constant 0 : i32
    %c0_i32_0 = arith.constant 0 : i32
    return %arg0, %c0_i32 : i32, i32
  }
}

</mosaic_0001>

<bundles_post_ra>
// kernel: simple_cnn_forward.1
= control target key start
LH: loop header
LB: loop body
LE: loop exit
PB: predicated region body
PF: predicated region fallthrough
CT: control target
= control target key end

     0   :  { %s9772_s0 = inlined_call_operand.vmem [shape: f32[160], index: 0, kind: input, shape index: {}]   ;;  %s9773_s1 = inlined_call_operand.vmem [shape: f32[8], index: 1, kind: input, shape index: {}]   ;;  %s9774_s2 = inlined_call_operand.vmem [shape: f32[192], index: 2, kind: input, shape index: {}]   ;;  %s9775_s3 = inlined_call_operand.vmem [shape: f32[8], index: 3, kind: input, shape index: {}]   ;;  %s9776_s4 = inlined_call_operand.vmem [shape: f32[8,8,128], index: 4, kind: input, shape index: {}]   ;;  %s9777_s5 = inlined_call_operand.vmem [shape: bf16[1024,100], index: 5, kind: input, shape index: {}]   ;;  %s9778_s6 = inlined_call_operand.vmem [shape: f32[1,100], index: 6, kind: input, shape index: {}]   ;;  %s9779_s7 = inlined_call_operand.vmem [shape: bf16[100,128], index: 7, kind: input, shape index: {}]   ;;  %s9780_s8 = inlined_call_operand.vmem [shape: f32[1,128], index: 8, kind: input, shape index: {}]   ;;  %s9781_s9 = inlined_call_operand.vmem [shape: f32[8,128], index: 9, kind: output, shape index: {}]  }
   0x1   :  { %9953 = sst [smem:[#allocation127_spill]] %s9777_s5 }
   0x2   :  { %9954 = sst [smem:[#allocation128_spill]] %s9778_s6 }
   0x3   :  { %9955 = sst [smem:[#allocation129_spill]] %s9779_s7 }
   0x4   :  { %9956 = sst [smem:[#allocation130_spill]] %s9780_s8 }
   0x5   :  { %9957 = sst [smem:[#allocation131_spill]] %s9781_s9 }
   0x6   :  { %14 = vsyncpa [#allocation3], 0 }
   0x7   :  { %15 = vsyncpa [#allocation5], 0  ;;  %s33_s11 = sshll.u32 %s9773_s1, 4  ;;  %s34_s11 = int_to_ptr.vmem [resolvable:$true] %s33_s11 }
   0x8   :  { %16 = vsyncpa [#allocation8], 0  ;;  %s23_s14 = sshll.u32 %s9772_s0, 4  ;;  %s5445_s15 = scalar_lea.vmem %s34_s11, 16  ;;  %s24_s14 = int_to_ptr.vmem [resolvable:$true] %s23_s14 }
   0x9   :  { %p5446_p0 = scmp.ne.s32.totalorder %s34_s11, %s5445_s15  ;;  %p5450_p1 = scmp.lt.s32.totalorder %s34_s11, %s34_s11 }
   0xa   :  { %p5451_p2 = scmp.lt.s32.totalorder %s5445_s15, %s5445_s15 }
   0xc   :  { %p5452_p3 = por %p5451_p2, %p5450_p1 }
   0xe   :  { %p5453_p4 = pnand %p5452_p3, %p5446_p0 }
  0x10   :  { %5456 = shalt.err (!%p5453_p4)
}
  0x11   :  { %s5499_s16 = smov [#allocation4]   ;;  %s5457_s17 = scalar_lea.vmem %s24_s14, 32 }
  0x12   :  { %36 = dma.vmem_to_smem %s34_s11, 16, %s5499_s16, [#allocation5]  }
  0x13   :  { %p5458_p5 = scmp.ne.s32.totalorder %s24_s14, %s5457_s17  ;;  %p5462_p6 = scmp.lt.s32.totalorder %s24_s14, %s24_s14 }
  0x14   :  { %p5463_p7 = scmp.lt.s32.totalorder %s5457_s17, %s5457_s17 }
  0x16   :  { %p5464_p8 = por %p5463_p7, %p5462_p6 }
  0x18   :  { %p5465_p9 = pnand %p5464_p8, %p5458_p5 }
  0x1a   :  { %5468 = shalt.err (!%p5465_p9)
}
  0x1b   :  { %s5500_s1 = smov [#allocation2]   ;;  %s43_s19 = sshll.u32 %s9774_s2, 4  ;;  %s44_s19 = int_to_ptr.vmem [resolvable:$true] %s43_s19 }
  0x1c   :  { %26 = dma.vmem_to_smem %s24_s14, 32, %s5500_s1, [#allocation3]  }
  0x1d   :  { %s53_s22 = sshll.u32 %s9775_s3, 4  ;;  %s5469_s23 = scalar_lea.vmem %s44_s19, 32  ;;  %s54_s22 = int_to_ptr.vmem [resolvable:$true] %s53_s22 }
  0x1e   :  { %p5470_p10 = scmp.ne.s32.totalorder %s44_s19, %s5469_s23  ;;  %p5474_p11 = scmp.lt.s32.totalorder %s44_s19, %s44_s19 }
  0x1f   :  { %p5475_p12 = scmp.lt.s32.totalorder %s5469_s23, %s5469_s23 }
  0x21   :  { %p5476_p13 = por %p5475_p12, %p5474_p11 }
  0x23   :  { %p5477_p0 = pnand %p5476_p13, %p5470_p10 }
  0x25   :  { %5480 = shalt.err (!%p5477_p0)
}
  0x26   :  { %s5501_s24 = smov [#allocation6]   ;;  %s5481_s25 = scalar_lea.vmem %s54_s22, 16 }
  0x27   :  { %46 = dma.vmem_to_smem %s44_s19, 32, %s5501_s24, [#allocation5]  }
  0x28   :  { %p5482_p1 = scmp.ne.s32.totalorder %s54_s22, %s5481_s25  ;;  %p5486_p2 = scmp.lt.s32.totalorder %s54_s22, %s54_s22 }
  0x29   :  { %p5487_p3 = scmp.lt.s32.totalorder %s5481_s25, %s5481_s25 }
  0x2b   :  { %p5488_p4 = por %p5487_p3, %p5486_p2 }
  0x2d   :  { %p5489_p5 = pnand %p5488_p4, %p5482_p1 }
  0x2f   :  { %5492 = shalt.err (!%p5489_p5)
}
  0x30   :  { %s5502_s2 = smov [#allocation7]  }
  0x31   :  { %56 = dma.vmem_to_smem %s54_s22, 16, %s5502_s2, [#allocation8]  }
  0x32   :  { %5493 = dma.done.wait [#allocation3], 32  }
  0x33   :  { %5494 = vsyncadd [#allocation3], 4294967264 }
  0x34   :  { %5495 = dma.done.wait [#allocation5], 48  }
  0x35   :  { %5496 = vsyncadd [#allocation5], 4294967248 }
  0x36   :  { %5497 = dma.done.wait [#allocation8], 16  }
  0x37   :  { %5498 = vsyncadd [#allocation8], 4294967280 }
  0x38   :  { %79 = sfence }
  0x39   :  { %s5569_s3 = sld [smem:[#allocation2 + $0x4]]  ;;  %v5576_v0 = vld [vmem:[%s9776_s4] sm:$0xff]  ;;  %v5585_v1 = vld [vmem:[%s9776_s4 + $0x10] sm:$0xff]  ;;  %v5592_v2 = vld [vmem:[%s9776_s4 + $0x8] sm:$0xff]  ;;  %s9784_s1 = smov 126   ;;  %vm3952_vm0 = vcmask 990208  }
  0x3a   :  { %s5571_s26 = sld [smem:[#allocation2 + $0x2]]  ;;  %v5611_v10 = vld [vmem:[%s9776_s4 + $0x18] sm:$0xff]  ;;  %s9782_s19 = smov 127   ;;  %v5624_v14 = vld [vmem:[%s9776_s4 + $0x28] sm:$0xff]  ;;  %v5631_v16 = vld [vmem:[%s9776_s4 + $0x20] sm:$0xff]  ;;  %vm4722_vm1 = vcmask 1041408  }
  0x3b   :  { %s5578_s29 = sld [smem:[#allocation2 + $0x7]]  ;;  %v5646_v21 = vld [vmem:[%s9776_s4 + $0x30] sm:$0xff]  ;;  %v5662_v28 = vld [vmem:[%s9776_s4 + $0x38] sm:$0xff]  ;;  %s9960_s9 = smov 127   ;;  %vm5506_vm2 = vmmov 0   ;;  %vm4718_vm3 = vcmask 818176  }
  0x3c   :  { %s5580_s30 = sld [smem:[#allocation2 + $0x3]] }
  0x3d   :  { %s5587_s12 = sld [smem:[#allocation2 + $0x9]] }
  0x3e   :  { %s5594_s15 = sld [smem:[#allocation2 + $0x8]] }
  0x3f   :  { %v135_v3 = vstv %s5569_s3  ;;  %s5597_s16 = sld [smem:[#allocation2 + $0xd]] }
  0x40   :  { %v136_v4 = vmul.f32 %v135_v3, %v5576_v0  ;;  %v121_v5 = vstv %s5571_s26  ;;  %s5601_s17 = sld [smem:[#allocation2 + $0xc]]  ;;  %v242_v35 = vmul.f32 %v5592_v2, %v135_v3 }
  0x41   :  { %v122_v6 = vmul.f32 %v121_v5, %v5576_v0  ;;  %v148_v7 = vstv %s5578_s29  ;;  %s5616_s20 = sld [smem:[#allocation2 + $0x11]]  ;;  %v230_v33 = vmul.f32 %v5592_v2, %v121_v5 }
  0x42   :  { %138 = vrot.lane.b32.xlu1 %v136_v4, %s9784_s1  ;;  %v149_v8 = vmul.f32 %v5585_v1, %v148_v7  ;;  %v128_v9 = vstv %s5580_s30  ;;  %s5619_s21 = sld [smem:[#allocation2 + $0xe]]  ;;  %v256_v38 = vmul.f32 %v5611_v10, %v148_v7 }
  0x43   :  { %124 = vrot.lane.b32.xlu0 %v122_v6, %s9782_s19  ;;  %v129_v11 = vmul.f32 %v5592_v2, %v128_v9  ;;  %v162_v12 = vstv %s5587_s12  ;;  %s5636_s2 = sld [smem:[#allocation2 + $0x13]]  ;;  %v236_v36 = vmul.f32 %v128_v9, %v5576_v0 }
  0x44   :  { %v155_v13 = vstv %s5594_s15  ;;  %v163_v15 = vmul.f32 %v5585_v1, %v162_v12  ;;  %s5639_s3 = sld [smem:[#allocation2 + $0x12]]  ;;  %v268_v40 = vmul.f32 %v5611_v10, %v162_v12 }
  0x45   :  { %v156_v17 = vmul.f32 %v5611_v10, %v155_v13  ;;  %v182_v18 = vstv %s5597_s16  ;;  %s5652_s28 = sld [smem:[#allocation2 + $0x1]]  ;;  %v262_v41 = vmul.f32 %v5585_v1, %v155_v13 }
  0x46   :  { %151 = vrot.lane.b32.xlu1 %v149_v8, %s9782_s19  ;;  %v175_v19 = vstv %s5601_s17  ;;  %v183_v20 = vmul.f32 %v5624_v14, %v182_v18  ;;  %s5670_s10 = sld [smem:[#allocation2 + $0x6]]  ;;  %v288_v46 = vmul.f32 %v5631_v16, %v182_v18 }
  0x47   :  { %131 = vrot.lane.b32.xlu0 %v129_v11, %s9782_s19  ;;  %v176_v22 = vmul.f32 %v5631_v16, %v175_v19  ;;  %v202_v23 = vstv %s5616_s20  ;;  %s5683_s11 = sld [smem:[#allocation2 + $0xb]]  ;;  %v282_v43 = vmul.f32 %v5624_v14, %v175_v19 }
  0x48   :  { %v189_v24 = vstv %s5619_s21  ;;  %v203_v25 = vmul.f32 %v5646_v21, %v202_v23  ;;  %s5696_s12 = sld [smem:[#allocation2 + $0x10]]  ;;  %v308_v48 = vmul.f32 %v5662_v28, %v202_v23 }
  0x49   :  { %v190_v26 = vmul.f32 %v5631_v16, %v189_v24  ;;  %v216_v27 = vstv %s5636_s2  ;;  %v294_v45 = vmul.f32 %v5624_v14, %v189_v24  ;;  %s5708_s13 = sld [smem:[#allocation2 + $0x17]] }
  0x4a   :  { %165 = vrot.lane.b32.xlu1 %v163_v15, %s9784_s1  ;;  %v209_v29 = vstv %s5639_s3  ;;  %v217_v30 = vmul.f32 %v5646_v21, %v216_v27  ;;  %s5711_s14 = sld [smem:[#allocation2 + $0x16]]  ;;  %v320_v50 = vmul.f32 %v5662_v28, %v216_v27 }
  0x4b   :  { %158 = vrot.lane.b32.xlu0 %v156_v17, %s9782_s19  ;;  %v210_v31 = vmul.f32 %v5662_v28, %v209_v29  ;;  %v118_v32 = vstv %s5652_s28  ;;  %s5719_s15 = sld [smem:[#allocation2 + $0x1b]]  ;;  %v314_v51 = vmul.f32 %v5646_v21, %v209_v29 }
  0x4c   :  { %v224_v34 = vmul.f32 %v118_v32, %v5576_v0  ;;  %v145_v37 = vstv %s5670_s10  ;;  %s5721_s16 = sld [smem:[#allocation2 + $0x18]] }
  0x4d   :  { %v250_v39 = vmul.f32 %v5585_v1, %v145_v37  ;;  %v172_v42 = vstv %s5683_s11  ;;  %s5728_s17 = sld [smem:[#allocation2 + $0x1d]] }
  0x4e   :  { %185 = vrot.lane.b32.xlu1 %v183_v20, %s9782_s19  ;;  %v276_v44 = vmul.f32 %v5631_v16, %v172_v42  ;;  %v199_v47 = vstv %s5696_s12  ;;  %s5731_s0 = sld [smem:[#allocation2 + $0x1c]] }
  0x4f   :  { %178 = vrot.lane.b32.xlu0 %v176_v22, %s9782_s19  ;;  %v302_v49 = vmul.f32 %v5646_v21, %v199_v47  ;;  %v364_v52 = vstv %s5708_s13  ;;  %s5738_s18 = sld [smem:[#allocation2 + $0x21]] }
  0x50   :  { %v357_v53 = vstv %s5711_s14  ;;  %v365_v54 = vmul.f32 %v5592_v2, %v364_v52  ;;  %s5741_s20 = sld [smem:[#allocation2 + $0x20]]  ;;  %v472_v23 = vmul.f32 %v364_v52, %v5576_v0 }
  0x51   :  { %v358_v55 = vmul.f32 %v357_v53, %v5576_v0  ;;  %v384_v56 = vstv %s5719_s15  ;;  %s5748_s21 = sld [smem:[#allocation2 + $0x25]]  ;;  %v466_v19 = vmul.f32 %v5592_v2, %v357_v53 }
  0x52   :  { %205 = vrot.lane.b32.xlu1 %v203_v25, %s9782_s19  ;;  %v371_v57 = vstv %s5721_s16  ;;  %v385_v58 = vmul.f32 %v5585_v1, %v384_v56  ;;  %s5751_s22 = sld [smem:[#allocation2 + $0x22]]  ;;  %v492_v25 = vmul.f32 %v5611_v10, %v384_v56 }
  0x53   :  { %192 = vrot.lane.b32.xlu0 %v190_v26, %s9784_s1  ;;  %v372_v59 = vmul.f32 %v371_v57, %v5576_v0  ;;  %v398_v60 = vstv %s5728_s17  ;;  %s5758_s23 = sld [smem:[#allocation2 + $0x27]]  ;;  %v478_v22 = vmul.f32 %v5592_v2, %v371_v57 }
  0x54   :  { %v391_v61 = vstv %s5731_s0  ;;  %v399_v62 = vmul.f32 %v5585_v1, %v398_v60  ;;  %s5761_s24 = sld [smem:[#allocation2 + $0x26]]  ;;  %v504_v27 = vmul.f32 %v5611_v10, %v398_v60 }
  0x55   :  { %v392_v63 = vmul.f32 %v5611_v10, %v391_v61  ;;  %v418_v3 = vstv %s5738_s18  ;;  %s5769_s25 = sld [smem:[#allocation2 + $0x15]]  ;;  %v498_v29 = vmul.f32 %v5585_v1, %v391_v61 }
  0x56   :  { %219 = vrot.lane.b32.xlu1 %v217_v30, %s9784_s1  ;;  %v411_v4 = vstv %s5741_s20  ;;  %v419_v5 = vmul.f32 %v5624_v14, %v418_v3  ;;  %s5782_s2 = sld [smem:[#allocation2 + $0x1a]] }
  0x57   :  { %212 = vrot.lane.b32.xlu0 %v210_v31, %s9782_s19  ;;  %v412_v6 = vmul.f32 %v5631_v16, %v411_v4  ;;  %v438_v7 = vstv %s5748_s21  ;;  %s5795_s3 = sld [smem:[#allocation2 + $0x1f]]  ;;  %v518_v31 = vmul.f32 %v5624_v14, %v411_v4 }
  0x58   :  { %v425_v8 = vstv %s5751_s22  ;;  %v439_v9 = vmul.f32 %v5646_v21, %v438_v7  ;;  %s5808_s26 = sld [smem:[#allocation2 + $0x24]] }
  0x59   :  { %v426_v11 = vmul.f32 %v5631_v16, %v425_v8  ;;  %v452_v12 = vstv %s5758_s23  ;;  %s5820_s27 = sld [smem:[#allocation2 + $0x2b]] }
  0x5a   :  { %232 = vrot.lane.b32.xlu1 %v230_v33, %s9782_s19  ;;  %v445_v13 = vstv %s5761_s24  ;;  %v453_v15 = vmul.f32 %v5646_v21, %v452_v12  ;;  %s5823_s29 = sld [smem:[#allocation2 + $0x2a]] }
  0x5b   :  { %226 = vrot.lane.b32.xlu0 %v224_v34, %s9782_s19  ;;  %v446_v17 = vmul.f32 %v5662_v28, %v445_v13  ;;  %v354_v18 = vstv %s5769_s25  ;;  %v530_v34 = vmul.f32 %v5624_v14, %v425_v8  ;;  %s5825_s30 = sld [smem:[#allocation2]] }
  0x5c   :  { %v460_v20 = vmul.f32 %v354_v18, %v5576_v0  ;;  %v381_v24 = vstv %s5782_s2  ;;  %s5833_s13 = sld [smem:[#allocation2 + $0x2f]] }
  0x5d   :  { %v486_v26 = vmul.f32 %v5585_v1, %v381_v24  ;;  %v408_v30 = vstv %s5795_s3  ;;  %s5835_s14 = sld [smem:[#allocation2 + $0x2c]] }
  0x5e   :  { %244 = vrot.lane.b32.xlu1 %v242_v35, %s9784_s1  ;;  %v512_v33 = vmul.f32 %v5631_v16, %v408_v30  ;;  %v524_v35 = vmul.f32 %v5631_v16, %v418_v3  ;;  %s5842_s15 = sld [smem:[#allocation2 + $0x31]] }
  0x5f   :  { %238 = vrot.lane.b32.xlu0 %v236_v36, %s9784_s1  ;;  %v435_v36 = vstv %s5808_s26  ;;  %s5845_s16 = sld [smem:[#allocation2 + $0x30]] }
  0x60   :  { %s5852_s17 = sld [smem:[#allocation2 + $0x5]] }
  0x61   :  { %s5859_s0 = sld [smem:[#allocation2 + $0x35]] }
  0x62   :  { %258 = vrot.lane.b32.xlu1 %v256_v38, %s9782_s19  ;;  %v544_v38 = vmul.f32 %v5662_v28, %v438_v7  ;;  %s5868_s18 = sld [smem:[#allocation2 + $0x34]] }
  0x63   :  { %252 = vrot.lane.b32.xlu0 %v250_v39, %s9782_s19  ;;  %v538_v39 = vmul.f32 %v5646_v21, %v435_v36  ;;  %v607_v52 = vstv %s5835_s14  ;;  %s5879_s28 = sld [smem:[#allocation2 + $0x39]] }
  0x64   :  { %s5882_s20 = sld [smem:[#allocation2 + $0x36]] }
  0x65   :  { %v627_v57 = vstv %s5845_s16  ;;  %s5894_s21 = sld [smem:[#allocation2 + $0x3b]] }
  0x66   :  { %270 = vrot.lane.b32.xlu1 %v268_v40, %s9784_s1  ;;  %v556_v40 = vmul.f32 %v5662_v28, %v452_v12  ;;  %v142_v60 = vstv %s5852_s17  ;;  %v628_v61 = vmul.f32 %v5611_v10, %v627_v57  ;;  %s5897_s22 = sld [smem:[#allocation2 + $0x3a]]  ;;  %v146_v12 = vmul.f32 %v5611_v10, %v145_v37 }
  0x67   :  { %264 = vrot.lane.b32.xlu0 %v262_v41, %s9784_s1  ;;  %v550_v41 = vmul.f32 %v5646_v21, %v445_v13  ;;  %s5899_s23 = sld [smem:[#allocation2 + $0xa]] }
  0x68   :  { %v647_v4 = vstv %s5868_s18  ;;  %s5917_s24 = sld [smem:[#allocation2 + $0x29]] }
  0x69   :  { %s5935_s10 = sld [smem:[#allocation2 + $0xf]] }
  0x6a   :  { %284 = vrot.lane.b32.xlu1 %v282_v43, %s9782_s19  ;;  %v600_v43 = vstv %s5820_s27  ;;  %s5976_s11 = sld [smem:[#allocation2 + $0x33]] }
  0x6b   :  { %278 = vrot.lane.b32.xlu0 %v276_v44, %s9782_s19  ;;  %v593_v44 = vstv %s5823_s29  ;;  %s6006_s12 = sld [smem:[#allocation2 + $0x38]] }
  0x6c   :  { %s6016_s27 = sld [smem:[#allocation4]] }
  0x6d   :  { %s6022_s29 = sld [smem:[#allocation2 + $0x3f]] }
  0x6e   :  { %296 = vrot.lane.b32.xlu1 %v294_v45, %s9784_s1  ;;  %v116_v45 = vstv %s5825_s30  ;;  %9958 = sst [smem:[#allocation12_spill]] %s5917_s24 }
  0x6f   :  { %290 = vrot.lane.b32.xlu0 %v288_v46, %s9784_s1  ;;  %v601_v46 = vmul.f32 %v5592_v2, %v600_v43  ;;  %s6028_s30 = sld [smem:[#allocation2 + $0x14]] }
  0x70   :  { %9961 = sst [smem:[#allocation14_spill]] %s5976_s11 }
  0x71   :  { %9962 = sst [smem:[#allocation15_spill]] %s6006_s12 }
  0x72   :  { %310 = vrot.lane.b32.xlu1 %v308_v48, %s9782_s19  ;;  %v594_v48 = vmul.f32 %v593_v44, %v5576_v0  ;;  %s6036_s14 = sld [smem:[#allocation2 + $0x43]] }
  0x73   :  { %304 = vrot.lane.b32.xlu0 %v302_v49, %s9782_s19  ;;  %v620_v49 = vstv %s5833_s13  ;;  %s6034_s13 = sld [smem:[#allocation2 + $0x3e]] }
  0x74   :  { %v621_v53 = vmul.f32 %v5585_v1, %v620_v49  ;;  %s6048_s16 = sld [smem:[#allocation2 + $0x19]] }
  0x75   :  { %s6050_s17 = sld [smem:[#allocation2 + $0x45]] }
  0x76   :  { %322 = vrot.lane.b32.xlu1 %v320_v50, %s9784_s1  ;;  %v119_v50 = vmul.f32 %v5592_v2, %v118_v32  ;;  %v608_v32 = vmul.f32 %v607_v52, %v5576_v0  ;;  %s6058_s18 = sld [smem:[#allocation2 + $0x49]] }
  0x77   :  { %316 = vrot.lane.b32.xlu0 %v314_v51, %s9784_s1  ;;  %v117_v51 = vmul.f32 %v116_v45, %v5576_v0  ;;  %s6095_s25 = sld [smem:[#allocation2 + $0x4f]] }
  0x78   :  { %s6111_s6 = sld [smem:[#allocation6 + $0x19]] }
  0x79   :  { %v120_v56 = vadd.f32 %v119_v50, %v117_v51  ;;  %v173_v50 = vmul.f32 %v5624_v14, %v172_v42  ;;  %v702_v51 = vmul.f32 %v5592_v2, %v593_v44  ;;  %v223_v42 = vmul.f32 %v5592_v2, %v116_v45  ;;  %s6124_s8 = sld [smem:[#allocation2 + $0x23]] }
  0x7a   :  { %367 = vrot.lane.b32.xlu1 %v365_v54, %s9782_s19  ;;  %v634_v54 = vstv %s5842_s15  ;;  %v714_v44 = vmul.f32 %v5592_v2, %v607_v52  ;;  %s6042_s15 = sld [smem:[#allocation2 + $0x40]] }
  0x7b   :  { %360 = vrot.lane.b32.xlu0 %v358_v55, %s9782_s19  ;;  %9963 = sst [smem:[#allocation16_spill]] %s6048_s16 }
  0x7c   :  { %9964 = sst [smem:[#allocation17_spill]] %s6050_s17 }
  0x7d   :  { %s6130_s5 = sld [smem:[#allocation6 + $0x49]] }
  0x7e   :  { %387 = vrot.lane.b32.xlu1 %v385_v58, %s9782_s19  ;;  %9966 = sst [smem:[#allocation19_spill]] %s6111_s6 }
  0x7f   :  { %374 = vrot.lane.b32.xlu0 %v372_v59, %s9784_s1  ;;  %v635_v59 = vmul.f32 %v5585_v1, %v634_v54  ;;  %s6136_s7 = sld [smem:[#allocation6 + $0x31]] }
  0x80   :  { %s6175_s2 = sld [smem:[#allocation6 + $0x30]] }
  0x81   :  { %s6259_s3 = sld [smem:[#allocation6 + $0xa9]] }
  0x82   :  { %401 = vrot.lane.b32.xlu1 %v399_v62, %s9784_s1  ;;  %v654_v62 = vstv %s5859_s0  ;;  %s6052_s0 = sld [smem:[#allocation2 + $0x44]] }
  0x83   :  { %394 = vrot.lane.b32.xlu0 %v392_v63, %s9782_s19  ;;  %v655_v8 = vmul.f32 %v5624_v14, %v654_v62  ;;  %s6382_s26 = sld [smem:[#allocation2 + $0x53]] }
  0x85   :  { %9967 = sst [smem:[#allocation20_spill]] %s6136_s7 }
  0x86   :  { %421 = vrot.lane.b32.xlu1 %v419_v5, %s9782_s19  ;;  %9972 = sst [smem:[#allocation24_spill]] %s6175_s2 }
  0x87   :  { %414 = vrot.lane.b32.xlu0 %v412_v6, %s9782_s19  ;;  %v143_v6 = vmul.f32 %v5585_v1, %v142_v60  ;;  %9979 = sst [smem:[#allocation31_spill]] %s6259_s3 }
  0x88   :  { %9965 = sst [smem:[#allocation18_spill]] %s6052_s0 }
  0x8a   :  { %441 = vrot.lane.b32.xlu1 %v439_v9, %s9782_s19  ;;  %v648_v9 = vmul.f32 %v5631_v16, %v647_v4 }
  0x8b   :  { %428 = vrot.lane.b32.xlu0 %v426_v11, %s9784_s1  ;;  %v674_v11 = vstv %s5879_s28  ;;  %s6066_s28 = sld [smem:[#allocation2 + $0x48]] }
  0x8e   :  { %455 = vrot.lane.b32.xlu1 %v453_v15, %s9784_s1 }
  0x8f   :  { %448 = vrot.lane.b32.xlu0 %v446_v17, %s9782_s19  ;;  %v661_v17 = vstv %s5882_s20  ;;  %s6069_s20 = sld [smem:[#allocation2 + $0x1e]] }
  0x90   :  { %v662_v37 = vmul.f32 %v5631_v16, %v661_v17 }
  0x92   :  { %468 = vrot.lane.b32.xlu1 %v466_v19, %s9782_s19 }
  0x93   :  { %462 = vrot.lane.b32.xlu0 %v460_v20, %s9782_s19 }
  0x96   :  { %480 = vrot.lane.b32.xlu1 %v478_v22, %s9784_s1  ;;  %v675_v22 = vmul.f32 %v5646_v21, %v674_v11 }
  0x97   :  { %474 = vrot.lane.b32.xlu0 %v472_v23, %s9784_s1  ;;  %v688_v23 = vstv %s5894_s21  ;;  %s6074_s21 = sld [smem:[#allocation2 + $0x4d]] }
  0x9a   :  { %494 = vrot.lane.b32.xlu1 %v492_v25, %s9782_s19 }
  0x9b   :  { %488 = vrot.lane.b32.xlu0 %v486_v26, %s9782_s19 }
  0x9e   :  { %506 = vrot.lane.b32.xlu1 %v504_v27, %s9784_s1  ;;  %v681_v27 = vstv %s5897_s22  ;;  %s6086_s22 = sld [smem:[#allocation2 + $0x4a]] }
  0x9f   :  { %500 = vrot.lane.b32.xlu0 %v498_v29, %s9784_s1  ;;  %v169_v29 = vstv %s5899_s23  ;;  %s6098_s23 = sld [smem:[#allocation2 + $0x4e]] }
  0xa2   :  { %520 = vrot.lane.b32.xlu1 %v518_v31, %s9782_s19 }
  0xa3   :  { %514 = vrot.lane.b32.xlu0 %v512_v33, %s9782_s19 }
  0xa6   :  { %532 = vrot.lane.b32.xlu1 %v530_v34, %s9784_s1  ;;  %v689_v34 = vmul.f32 %v5646_v21, %v688_v23 }
  0xa7   :  { %526 = vrot.lane.b32.xlu0 %v524_v35, %s9784_s1  ;;  %v682_v35 = vmul.f32 %v5662_v28, %v681_v27 }
  0xaa   :  { %546 = vrot.lane.b32.xlu1 %v544_v38, %s9782_s19 }
  0xab   :  { %540 = vrot.lane.b32.xlu0 %v538_v39, %s9782_s19  ;;  %v170_v39 = vmul.f32 %v5631_v16, %v169_v29 }
  0xae   :  { %558 = vrot.lane.b32.xlu1 %v556_v40, %s9784_s1 }
  0xaf   :  { %552 = vrot.lane.b32.xlu0 %v550_v41, %s9784_s1  ;;  %v590_v41 = vstv %s5917_s24  ;;  %s6181_s24 = sld [smem:[#allocation6 + $0x79]] }
  0xb2   :  { %603 = vrot.lane.b32.xlu1 %v601_v46, %s9782_s19 }
  0xb3   :  { %596 = vrot.lane.b32.xlu0 %v594_v48, %s9782_s19 }
  0xb4   :  { %v139_v55 = vpop.permute.xlu1 %138 }
  0xb5   :  { %v125_v58 = vpop.permute.xlu0 %124  ;;  %9973 = sst [smem:[#allocation25_spill]] %s6181_s24 }
  0xb6   :  { %623 = vrot.lane.b32.xlu1 %v621_v53, %s9782_s19  ;;  %v127_v63 = vadd.f32 %v125_v58, %v120_v56  ;;  %v696_v53 = vmul.f32 %v590_v41, %v5576_v0 }
  0xb7   :  { %610 = vrot.lane.b32.xlu0 %v608_v32, %s9784_s1 }
  0xb8   :  { %v152_v3 = vpop.permute.xlu1 %151 }
  0xb9   :  { %v132_v5 = vpop.permute.xlu0 %131 }
  0xba   :  { %v134_v7 = vadd.f32 %v132_v5, %v127_v63  ;;  %637 = vrot.lane.b32.xlu1 %v635_v59, %s9784_s1  ;;  %v196_v59 = vstv %s5935_s10  ;;  %s6100_s10 = sld [smem:[#allocation2 + $0x3d]] }
  0xbb   :  { %630 = vrot.lane.b32.xlu0 %v628_v61, %s9782_s19  ;;  %v708_v61 = vmul.f32 %v600_v43, %v5576_v0  ;;  %v197_v45 = vmul.f32 %v5646_v21, %v196_v59 }
  0xbc   :  { %v141_v13 = vadd.f32 %v139_v55, %v134_v7  ;;  %v166_v15 = vpop.permute.xlu1 %165 }
  0xbd   :  { %v159_v19 = vpop.permute.xlu0 %158 }
  0xbe   :  { %v144_v20 = vadd.f32 %v143_v6, %v141_v13  ;;  %657 = vrot.lane.b32.xlu1 %v655_v8, %s9782_s19  ;;  %v728_v8 = vmul.f32 %v5611_v10, %v620_v49  ;;  %v248_v49 = vmul.f32 %v5611_v10, %v142_v60 }
  0xbf   :  { %650 = vrot.lane.b32.xlu0 %v648_v9, %s9782_s19  ;;  %v200_v9 = vmul.f32 %v5662_v28, %v199_v47  ;;  %v734_v47 = vmul.f32 %v5585_v1, %v627_v57 }
  0xc0   :  { %v147_v25 = vadd.f32 %v146_v12, %v144_v20  ;;  %v186_v26 = vpop.permute.xlu1 %185 }
  0xc1   :  { %v179_v31 = vpop.permute.xlu0 %178 }
  0xc2   :  { %v154_v33 = vadd.f32 %v152_v3, %v147_v25  ;;  %677 = vrot.lane.b32.xlu1 %v675_v22, %s9782_s19  ;;  %s5946_s19 = sld [smem:[#allocation2 + $0x2e]] }
  0xc3   :  { %664 = vrot.lane.b32.xlu0 %v662_v37, %s9784_s1  ;;  %v740_v37 = vmul.f32 %v5611_v10, %v634_v54  ;;  %v754_v54 = vmul.f32 %v5624_v14, %v647_v4  ;;  %v760_v4 = vmul.f32 %v5631_v16, %v654_v62  ;;  %v780_v62 = vmul.f32 %v5662_v28, %v674_v11 }
  0xc4   :  { %v161_v38 = vadd.f32 %v159_v19, %v154_v33  ;;  %v5943_v40 = vpop.permute.xlu1 %205  ;;  %v644_v33 = vstv %s5976_s11  ;;  %s6145_s11 = sld [smem:[#allocation6 + $0x18]] }
  0xc5   :  { %v193_v46 = vpop.permute.xlu0 %192 }
  0xc6   :  { %v168_v48 = vadd.f32 %v166_v15, %v161_v38  ;;  %691 = vrot.lane.b32.xlu1 %v689_v34, %s9784_s1 }
  0xc7   :  { %684 = vrot.lane.b32.xlu0 %v682_v35, %s9960_s9 }
  0xc8   :  { %9959 = sst [smem:[#allocation13_spill]] %s5946_s19  ;;  %v171_v32 = vadd.f32 %v170_v39, %v168_v48  ;;  %v5959_v55 = vpop.permute.xlu1 %219  ;;  %v617_v5 = vstv %s5946_s19 }
  0xc9   :  { %v5961_v56 = vpop.permute.xlu0 %212  ;;  %v722_v43 = vmul.f32 %v5585_v1, %v617_v5  ;;  %v748_v1 = vmul.f32 %v5631_v16, %v644_v33  ;;  %s6151_s19 = sld [smem:[#allocation6]] }
  0xca   :  { %v174_v58 = vadd.f32 %v173_v50, %v171_v32  ;;  %704 = vrot.lane.b32.xlu1 %v702_v51, %s9960_s9  ;;  %v274_v51 = vmul.f32 %v5624_v14, %v169_v29  ;;  %9969 = sst [smem:[#allocation21_spill]] %s6145_s11 }
  0xcb   :  { %698 = vrot.lane.b32.xlu0 %v696_v53, %s9960_s9  ;;  %v671_v53 = vstv %s6006_s12  ;;  %s9968_s12 = smov 126  }
  0xcc   :  { %v181_v63 = vadd.f32 %v179_v31, %v174_v58  ;;  %v233_v3 = vpop.permute.xlu1 %232 }
  0xcd   :  { %v227_v6 = vpop.permute.xlu0 %226 }
  0xce   :  { %v188_v7 = vadd.f32 %v186_v26, %v181_v63  ;;  %v229_v52 = vadd.f32 %v227_v6, %v223_v42  ;;  %716 = vrot.lane.b32.xlu1 %v714_v44, %s9784_s1  ;;  %v792_v44 = vmul.f32 %v5662_v28, %v688_v23  ;;  %v836_v63 = vstv %s6022_s29  ;;  %s6205_s29 = sld [smem:[#allocation6 + $0x60]] }
  0xcf   :  { %710 = vrot.lane.b32.xlu0 %v708_v61, %s9784_s1  ;;  %v786_v61 = vmul.f32 %v5646_v21, %v681_v27  ;;  %v837_v27 = vmul.f32 %v5592_v2, %v836_v63  ;;  %9970 = sst [smem:[#allocation22_spill]] %s6151_s19 }
  0xd0   :  { %v195_v12 = vadd.f32 %v193_v46, %v188_v7  ;;  %v245_v13 = vpop.permute.xlu1 %244  ;;  %v235_v15 = vadd.f32 %v233_v3, %v229_v52  ;;  %v766_v46 = vmul.f32 %v5624_v14, %v661_v17  ;;  %v774_v14 = vmul.f32 %v5646_v21, %v671_v53 }
  0xd1   :  { %v239_v19 = vpop.permute.xlu0 %238  ;;  %v352_v3 = vstv %s6028_s30  ;;  %v829_v7 = vstv %s6034_s13  ;;  %v355_v52 = vmul.f32 %v5592_v2, %v354_v18  ;;  %v300_v21 = vmul.f32 %v5662_v28, %v196_v59  ;;  %s6253_s13 = sld [smem:[#allocation6 + $0x90]] }
  0xd2   :  { %v198_v20 = vadd.f32 %v197_v45, %v195_v12  ;;  %v241_v22 = vadd.f32 %v239_v19, %v235_v15  ;;  %730 = vrot.lane.b32.xlu1 %v728_v8, %s9960_s9  ;;  %v856_v59 = vstv %s6036_s14  ;;  %s6339_s30 = sld [smem:[#allocation2 + $0x52]] }
  0xd3   :  { %724 = vrot.lane.b32.xlu0 %v722_v43, %s9960_s9  ;;  %v353_v43 = vmul.f32 %v352_v3, %v5576_v0  ;;  %s6384_s14 = sld [smem:[#allocation2 + $0x51]] }
  0xd4   :  { %v6003_v25 = vadd.f32 %v200_v9, %v198_v20  ;;  %v247_v26 = vadd.f32 %v245_v13, %v241_v22  ;;  %v259_v31 = vpop.permute.xlu1 %258  ;;  %v830_v9 = vmul.f32 %v829_v7, %v5576_v0  ;;  %v843_v13 = vstv %s6042_s15  ;;  %v6106_v0 = vld [vmem:[%s9776_s4 + $0x10] sm:$0xff]  ;;  %9975 = sst [smem:[#allocation27_spill]] %s6205_s29 }
  0xd5   :  { %v253_v34 = vpop.permute.xlu0 %252  ;;  %v356_v19 = vadd.f32 %v355_v52, %v353_v43  ;;  %v857_v20 = vmul.f32 %v6106_v0, %v856_v59  ;;  %v6194_v52 = vld [vmem:[%s9776_s4 + $0x8] sm:$0xff]  ;;  %v9848_v43 = vstv %s6098_s23  ;;  %s6274_s15 = sld [smem:[#allocation6 + $0x91]] }
  0xd6   :  { %v249_v35 = vadd.f32 %v248_v49, %v247_v26  ;;  %742 = vrot.lane.b32.xlu1 %v740_v37, %s9784_s1  ;;  %v208_v18 = vadd.f32 %v5943_v40, %v6003_v25  ;;  %v6118_v49 = vld [vmem:[%s9776_s4] sm:$0xff] }
  0xd7   :  { %736 = vrot.lane.b32.xlu0 %v734_v47, %s9784_s1  ;;  %v844_v37 = vmul.f32 %v6118_v49, %v843_v13  ;;  %v870_v47 = vstv %s6050_s17  ;;  %s6227_s17 = sld [smem:[#allocation6 + $0x61]] }
  0xd8   :  { %v255_v57 = vadd.f32 %v253_v34, %v249_v35  ;;  %v271_v60 = vpop.permute.xlu1 %270  ;;  %v215_v22 = vadd.f32 %v5961_v56, %v208_v18  ;;  %v863_v56 = vstv %s6052_s0  ;;  %v378_v34 = vstv %s6048_s16  ;;  %s6184_s16 = sld [smem:[#allocation6 + $0x78]]  ;;  %v6211_v18 = vld [vmem:[%s9776_s4 + $0x20] sm:$0xff] }
  0xd9   :  { %v265_v38 = vpop.permute.xlu0 %264  ;;  %s6240_s0 = sld [smem:[#allocation6 + $0xa8]] }
  0xda   :  { %v261_v39 = vadd.f32 %v259_v31, %v255_v57  ;;  %756 = vrot.lane.b32.xlu1 %v754_v54, %s9960_s9  ;;  %v222_v57 = vadd.f32 %v5959_v55, %v215_v22  ;;  %9978 = sst [smem:[#allocation30_spill]] %s6253_s13 }
  0xdb   :  { %750 = vrot.lane.b32.xlu0 %v748_v1, %s9960_s9  ;;  %v871_v1 = vmul.f32 %v6106_v0, %v870_v47  ;;  %9980 = sst [smem:[#allocation32_spill]] %s6274_s15 }
  0xdc   :  { %v267_v48 = vadd.f32 %v265_v38, %v261_v39  ;;  %v285_v50 = vpop.permute.xlu1 %284  ;;  %v890_v38 = vstv %s6058_s18  ;;  %v883_v39 = vstv %s6066_s28  ;;  %9993 = sst [smem:[#allocation17_spill]] %s6384_s14 }
  0xdd   :  { %v279_v32 = vpop.permute.xlu0 %278  ;;  %9976 = sst [smem:[#allocation28_spill]] %s6227_s17 }
  0xde   :  { %v273_v17 = vadd.f32 %v271_v60, %v267_v48  ;;  %768 = vrot.lane.b32.xlu1 %v766_v46, %s9784_s1  ;;  %v864_v60 = vmul.f32 %v5611_v10, %v863_v56  ;;  %v327_v46 = vstv %s6016_s27  ;;  %v6156_v10 = vld [vmem:[%s9776_s4 + $0x18] sm:$0xff]  ;;  %s6161_s27 = sld [smem:[#allocation6 + $0x48]] }
  0xdf   :  { %762 = vrot.lane.b32.xlu0 %v760_v4, %s9784_s1  ;;  %v382_v55 = vmul.f32 %v6156_v10, %v381_v24  ;;  %v884_v24 = vmul.f32 %v5631_v16, %v883_v39  ;;  %9974 = sst [smem:[#allocation26_spill]] %s6184_s16  ;;  %v6189_v16 = vmul.f32 %v6118_v49, %v836_v63 }
  0xe0   :  { %v275_v29 = vadd.f32 %v274_v51, %v273_v17  ;;  %v297_v58 = vpop.permute.xlu1 %296  ;;  %v379_v51 = vmul.f32 %v6106_v0, %v378_v34  ;;  %9977 = sst [smem:[#allocation29_spill]] %s6240_s0 }
  0xe1   :  { %v291_v42 = vpop.permute.xlu0 %290  ;;  %s6653_s28 = sld [smem:[#allocation2 + $0x6c]] }
  0xe2   :  { %v281_v11 = vadd.f32 %v279_v32, %v275_v29  ;;  %782 = vrot.lane.b32.xlu1 %v780_v62, %s9960_s9  ;;  %s6682_s18 = sld [smem:[#allocation2 + $0x5b]] }
  0xe3   :  { %776 = vrot.lane.b32.xlu0 %v774_v14, %s9960_s9  ;;  %v6167_v14 = vld [vmem:[%s9776_s4 + $0x28] sm:$0xff] }
  0xe4   :  { %v287_v6 = vadd.f32 %v285_v50, %v281_v11  ;;  %v311_v45 = vpop.permute.xlu1 %310  ;;  %9971 = sst [smem:[#allocation23_spill]] %s6161_s27  ;;  %v891_v29 = vmul.f32 %v6167_v14, %v890_v38  ;;  %v9861_v11 = vstv %s6074_s21 }
  0xe5   :  { %v305_v23 = vpop.permute.xlu0 %304 }
  0xe6   :  { %v293_v8 = vadd.f32 %v291_v42, %v287_v6  ;;  %794 = vrot.lane.b32.xlu1 %v792_v44, %s9784_s1  ;;  %v405_v42 = vstv %s6069_s20  ;;  %v897_v44 = vstv %s6086_s22  ;;  %s6431_s20 = sld [smem:[#allocation2 + $0x67]] }
  0xe7   :  { %788 = vrot.lane.b32.xlu0 %v786_v61, %s9784_s1  ;;  %s6127_s1 = sld [smem:[#allocation6 + $0x1]] }
  0xe8   :  { %v299_v12 = vadd.f32 %v297_v58, %v293_v8  ;;  %v323_v2 = vpop.permute.xlu1 %322  ;;  %v328_v58 = vadd.f32 %v327_v46, %v222_v57  ;;  %v6199_v8 = vmul.f32 %v6194_v52, %v843_v13  ;;  %s6712_s22 = sld [smem:[#allocation4 + $0x2]] }
  0xe9   :  { %v317_v15 = vpop.permute.xlu0 %316 }
  0xea   :  { %v301_v40 = vadd.f32 %v300_v21, %v299_v12  ;;  %839 = vrot.lane.b32.xlu1 %v837_v27, %s9960_s9  ;;  %v409_v27 = vmul.f32 %v6167_v14, %v408_v30  ;;  %v6219_v30 = vld [vmem:[%s9776_s4 + $0x30] sm:$0xff]  ;;  %v6229_v13 = vmax.f32 %v328_v58, 0.0 }
  0xeb   :  { %832 = vrot.lane.b32.xlu0 %v830_v9, %s9960_s9  ;;  %v406_v9 = vmul.f32 %v6211_v18, %v405_v42  ;;  %v911_v12 = vmul.f32 %v6219_v30, %v9861_v11 }
  0xec   :  { %v307_v25 = vadd.f32 %v305_v23, %v301_v40  ;;  %v368_v26 = vpop.permute.xlu1 %367  ;;  %v9847_v23 = vstv %s6095_s25 }
  0xed   :  { %v361_v31 = vpop.permute.xlu0 %360  ;;  %v925_v40 = vmul.f32 %v6219_v30, %v9847_v23 }
  0xee   :  { %v313_v35 = vadd.f32 %v311_v45, %v307_v25  ;;  %v363_v54 = vadd.f32 %v361_v31, %v356_v19  ;;  %859 = vrot.lane.b32.xlu1 %v857_v20, %s9960_s9  ;;  %v938_v19 = vmul.f32 %v6194_v52, %v829_v7  ;;  %v9825_v25 = vstv %s6145_s11  ;;  %s6502_s11 = sld [smem:[#allocation6 + $0x7c]] }
  0xef   :  { %846 = vrot.lane.b32.xlu0 %v844_v37, %s9968_s12  ;;  %v918_v37 = vmul.f32 %v5662_v28, %v9848_v43  ;;  %v9843_v7 = vstv %s6111_s6  ;;  %v9844_v28 = vstv %s6127_s1  ;;  %s6278_s6 = sld [smem:[#allocation2 + $0x42]] }
  0xf0   :  { %v319_v4 = vadd.f32 %v317_v15, %v313_v35  ;;  %v388_v48 = vpop.permute.xlu1 %387  ;;  %v370_v50 = vadd.f32 %v368_v26, %v363_v54  ;;  %v9823_v26 = vstv %s6151_s19  ;;  %v432_v35 = vstv %s6124_s8  ;;  %s6462_s8 = sld [smem:[#allocation2 + $0x68]] }
  0xf1   :  { %v375_v32 = vpop.permute.xlu0 %374  ;;  %v9846_v54 = vstv %s6100_s10  ;;  %s6493_s19 = sld [smem:[#allocation6 + $0x4c]] }
  0xf2   :  { %v325_v17 = vadd.f32 %v323_v2, %v319_v4  ;;  %v377_v62 = vadd.f32 %v375_v32, %v370_v50  ;;  %873 = vrot.lane.b32.xlu1 %v871_v1, %s9968_s12  ;;  %v898_v2 = vmul.f32 %v6211_v18, %v897_v44  ;;  %v9799_v1 = vstv %s6161_s27  ;;  %s6512_s27 = sld [smem:[#allocation2 + $0x79]] }
  0xf3   :  { %866 = vrot.lane.b32.xlu0 %v864_v60, %s9960_s9  ;;  %v9837_v60 = vstv %s6130_s5 }
  0xf4   :  { %v330_v61 = vadd.f32 %v327_v46, %v325_v17  ;;  %v380_v6 = vadd.f32 %v379_v51, %v377_v62  ;;  %v402_v45 = vpop.permute.xlu1 %401  ;;  %v9797_v46 = vstv %s6175_s2  ;;  %v2009_v51 = vmul.f32 %v9823_v26, %v6229_v13  ;;  %s6400_s2 = sld [smem:[#allocation2 + $0x54]] }
  0xf5   :  { %v395_v21 = vpop.permute.xlu0 %394  ;;  %v9836_v17 = vstv %s6136_s7  ;;  %v2747_v62 = vmul.f32 %v9799_v1, %v6229_v13  ;;  %9999 = sst [smem:[#allocation13_spill]] %s6502_s11 }
  0xf6   :  { %v383_v63 = vadd.f32 %v382_v55, %v380_v6  ;;  %893 = vrot.lane.b32.xlu1 %v891_v29, %s9960_s9  ;;  %v6231_v15 = vmax.f32 %v330_v61, 0.0  ;;  %v9796_v6 = vstv %s6184_s16  ;;  %s6413_s16 = sld [smem:[#allocation2 + $0x65]] }
  0xf7   :  { %886 = vrot.lane.b32.xlu0 %v884_v24, %s9960_s9  ;;  %s6532_s7 = sld [smem:[#allocation2 + $0x37]] }
  0xf8   :  { %v390_v20 = vadd.f32 %v388_v48, %v383_v63  ;;  %v6242_v22 = vpop.permute.xlu1 %421  ;;  %v2257_v4 = vmul.f32 %v9843_v7, %v6231_v15  ;;  %v2255_v48 = vmul.f32 %v9825_v25, %v6229_v13  ;;  %v2011_v50 = vmul.f32 %v9844_v28, %v6231_v15 }
  0xf9   :  { %v415_v31 = vpop.permute.xlu0 %414  ;;  %v2749_v29 = vmul.f32 %v9837_v60, %v6231_v15 }
  0xfa   :  { %v397_v57 = vadd.f32 %v395_v21, %v390_v20  ;;  %913 = vrot.lane.b32.xlu1 %v911_v12, %s9960_s9  ;;  %v6287_v58 = vadd.f32 %v2257_v4, %v2255_v48  ;;  %v6289_v61 = vadd.f32 %v2011_v50, %v2009_v51  ;;  %v2501_v12 = vmul.f32 %v9797_v46, %v6229_v13 }
  0xfb   :  { %900 = vrot.lane.b32.xlu0 %v898_v2, %s9968_s12  ;;  %v6294_v63 = vadd.f32 %v2749_v29, %v2747_v62  ;;  %v2503_v2 = vmul.f32 %v9836_v17, %v6231_v15  ;;  %v9824_v20 = vstv %s6181_s24  ;;  %v3239_v51 = vmul.f32 %v9796_v6, %v6229_v13  ;;  %s6495_s24 = sld [smem:[#allocation6 + $0x34]] }
  0xfc   :  { %v404_v55 = vadd.f32 %v402_v45, %v397_v57  ;;  %v6276_v32 = vpop.permute.xlu1 %441  ;;  %9981 = vst [vmem:[#allocation33_spill] sm:$0xff] %v6287_v58  ;;  %9982 = vst [vmem:[#allocation34_spill] sm:$0xff] %v6289_v61  ;;  %v9798_v45 = vstv %s6205_s29  ;;  %v9804_v57 = vstv %s6240_s0  ;;  %v459_v62 = vmul.f32 %v6194_v52, %v352_v3  ;;  %s6352_s29 = sld [smem:[#allocation2 + $0x47]] }
  0xfd   :  { %v429_v24 = vpop.permute.xlu0 %428  ;;  %9983 = vst [vmem:[#allocation35_spill] sm:$0xff] %v6294_v63  ;;  %v6311_v50 = vadd.f32 %v2503_v2, %v2501_v12  ;;  %v433_v2 = vmul.f32 %v6219_v30, %v432_v35  ;;  %v9805_v6 = vstv %s6259_s3  ;;  %v9809_v3 = vstv %s6274_s15  ;;  %9994 = sst [smem:[#allocation16_spill]] %s6413_s16 }
  0xfe   :  { %v407_v21 = vadd.f32 %v406_v9, %v404_v55  ;;  %927 = vrot.lane.b32.xlu1 %v925_v40, %s9968_s12  ;;  %v932_v9 = vmul.f32 %v6118_v49, %v9846_v54  ;;  %v9810_v40 = vstv %s6227_s17  ;;  %s6420_s0 = sld [smem:[#allocation2 + $0x28]] }
  0xff   :  { %920 = vrot.lane.b32.xlu0 %v918_v37, %s9960_s9  ;;  %9984 = vst [vmem:[#allocation36_spill] sm:$0xff] %v6311_v50  ;;  %v3241_v37 = vmul.f32 %v9824_v20, %v6231_v15  ;;  %v2995_v29 = vmul.f32 %v9810_v40, %v6231_v15  ;;  %s6471_s15 = sld [smem:[#allocation6 + $0x1c]] }
 0x100   :  { %v410_v4 = vadd.f32 %v409_v27, %v407_v21  ;;  %v6309_v48 = vpop.permute.xlu1 %455  ;;  %v2993_v27 = vmul.f32 %v9798_v45, %v6229_v13  ;;  %v9807_v21 = vstv %s6253_s13  ;;  %s6425_s13 = sld [smem:[#allocation2 + $0x66]] }
 0x101   :  { %v6319_v55 = vpop.permute.xlu0 %448  ;;  %v6336_v46 = vadd.f32 %v3241_v37, %v3239_v51  ;;  %v9845_v51 = vstv %s6278_s6  ;;  %v3487_v37 = vmul.f32 %v9809_v3, %v6231_v15  ;;  %s6477_s3 = sld [smem:[#allocation6 + $0x4]] }
 0x102   :  { %v417_v12 = vadd.f32 %v415_v31, %v410_v4  ;;  %940 = vrot.lane.b32.xlu1 %v938_v19, %s9960_s9  ;;  %v6342_v45 = vadd.f32 %v2995_v29, %v2993_v27  ;;  %v3731_v31 = vmul.f32 %v9804_v57, %v6229_v13  ;;  %v3733_v4 = vmul.f32 %v9805_v6, %v6231_v15  ;;  %9987 = sst [smem:[#allocation39_spill]] %s6352_s29  ;;  %v6363_v27 = vld [vmem:[%s9776_s4 + $0x38] sm:$0xff] }
 0x103   :  { %9985 = vst [vmem:[#allocation37_spill] sm:$0xff] %v6336_v46  ;;  %934 = vrot.lane.b32.xlu0 %v932_v9, %s9960_s9  ;;  %v3485_v9 = vmul.f32 %v9807_v21, %v6229_v13  ;;  %v436_v29 = vmul.f32 %v6363_v27, %v435_v36  ;;  %v964_v57 = vmul.f32 %v6156_v10, %v856_v59  ;;  %s6483_s17 = sld [smem:[#allocation2 + $0x32]] }
 0x104   :  { %9986 = vst [vmem:[#allocation38_spill] sm:$0xff] %v6342_v45  ;;  %v424_v19 = vadd.f32 %v6242_v22, %v417_v12  ;;  %v469_v1 = vpop.permute.xlu1 %468  ;;  %v6368_v12 = vadd.f32 %v3733_v4, %v3731_v31  ;;  %v958_v36 = vmul.f32 %v6106_v0, %v9845_v51 }
 0x105   :  { %v463_v22 = vpop.permute.xlu0 %462  ;;  %v6375_v3 = vadd.f32 %v3487_v37, %v3485_v9 }
 0x106   :  { %9989 = vst [vmem:[#allocation40_spill] sm:$0xff] %v6368_v12  ;;  %v431_v6 = vadd.f32 %v429_v24, %v424_v19  ;;  %v465_v21 = vadd.f32 %v463_v22, %v459_v62  ;;  %952 = vrot.lane.b32.xlu1 %v6199_v8, %s9968_s12  ;;  %v976_v8 = vmul.f32 %v6156_v10, %v870_v47 }
 0x107   :  { %9992 = vst [vmem:[#allocation41_spill] sm:$0xff] %v6375_v3  ;;  %946 = vrot.lane.b32.xlu0 %v6189_v16, %s9968_s12  ;;  %v484_v16 = vmul.f32 %v6156_v10, %v378_v34 }
 0x108   :  { %v434_v31 = vadd.f32 %v433_v2, %v431_v6  ;;  %v481_v59 = vpop.permute.xlu1 %480  ;;  %v471_v24 = vadd.f32 %v469_v1, %v465_v21  ;;  %v970_v6 = vmul.f32 %v6106_v0, %v863_v56  ;;  %v1065_v1 = vstv %s6339_s30  ;;  %s6439_s30 = sld [smem:[#allocation2 + $0x56]] }
 0x109   :  { %v475_v62 = vpop.permute.xlu0 %474  ;;  %v9833_v2 = vstv %s6352_s29  ;;  %v1066_v34 = vmul.f32 %v6118_v49, %v1065_v1  ;;  %s6530_s29 = sld [smem:[#allocation6 + $0x94]] }
 0x10a   :  { %v6389_v4 = vadd.f32 %v436_v29, %v434_v31  ;;  %v477_v19 = vadd.f32 %v475_v62, %v471_v24  ;;  %966 = vrot.lane.b32.xlu1 %v964_v57, %s9960_s9  ;;  %v984_v56 = vmul.f32 %v6211_v18, %v9833_v2  ;;  %v1072_v57 = vstv %s6382_s26  ;;  %s6442_s26 = sld [smem:[#allocation2 + $0x57]] }
 0x10b   :  { %960 = vrot.lane.b32.xlu0 %v958_v36, %s9960_s9  ;;  %v9828_v36 = vstv %s6384_s14  ;;  %v1073_v24 = vmul.f32 %v6194_v52, %v1072_v57  ;;  %s6528_s14 = sld [smem:[#allocation6 + $0xac]] }
 0x10c   :  { %v483_v47 = vadd.f32 %v481_v59, %v477_v19  ;;  %v495_v21 = vpop.permute.xlu1 %494  ;;  %v1168_v62 = vmul.f32 %v6118_v49, %v9828_v36 }
 0x10d   :  { %v489_v9 = vpop.permute.xlu0 %488 }
 0x10e   :  { %v485_v37 = vadd.f32 %v484_v16, %v483_v47  ;;  %978 = vrot.lane.b32.xlu1 %v976_v8, %s9968_s12  ;;  %v1079_v8 = vstv %s6400_s2  ;;  %9996 = sst [smem:[#allocation18_spill]] %s6439_s30 }
 0x10f   :  { %972 = vrot.lane.b32.xlu0 %v970_v6, %s9968_s12  ;;  %v510_v6 = vmul.f32 %v6167_v14, %v405_v42  ;;  %s6447_s2 = sld [smem:[#allocation2 + $0x2d]] }
 0x110   :  { %v491_v29 = vadd.f32 %v489_v9, %v485_v37  ;;  %v507_v22 = vpop.permute.xlu1 %506  ;;  %v1080_v9 = vmul.f32 %v6118_v49, %v1079_v8  ;;  %v1174_v37 = vmul.f32 %v6194_v52, %v1065_v1  ;;  %v588_v1 = vstv %s6420_s0  ;;  %10002 = sst [smem:[#allocation44_spill]] %s6530_s29 }
 0x111   :  { %v501_v31 = vpop.permute.xlu0 %500  ;;  %v1092_v40 = vstv %s6442_s26  ;;  %s6487_s26 = sld [smem:[#allocation2 + $0x7a]]  ;;  %v9840_v2 = vstv %s6528_s14 }
 0x112   :  { %v497_v59 = vadd.f32 %v495_v21, %v491_v29  ;;  %1068 = vrot.lane.b32.xlu1 %v1066_v34, %s9960_s9  ;;  %10001 = sst [smem:[#allocation43_spill]] %s6528_s14 }
 0x113   :  { %986 = vrot.lane.b32.xlu0 %v984_v56, %s9960_s9  ;;  %s6623_s14 = sld [smem:[#allocation2 + $0x7c]] }
 0x114   :  { %v503_v19 = vadd.f32 %v501_v31, %v497_v59  ;;  %v521_v16 = vpop.permute.xlu1 %520  ;;  %v1180_v31 = vmul.f32 %v6118_v49, %v1072_v57  ;;  %v9827_v59 = vstv %s6413_s16  ;;  %s6518_s16 = sld [smem:[#allocation2 + $0x7b]] }
 0x115   :  { %v515_v47 = vpop.permute.xlu0 %514  ;;  %v1404_v57 = vmul.f32 %v6118_v49, %v9827_v59  ;;  %s6628_s0 = sld [smem:[#allocation2 + $0x6a]] }
 0x116   :  { %v509_v21 = vadd.f32 %v507_v22, %v503_v19  ;;  %1075 = vrot.lane.b32.xlu1 %v1073_v24, %s9960_s9  ;;  %v1186_v22 = vmul.f32 %v6194_v52, %v1079_v8  ;;  %v1301_v19 = vstv %s6425_s13  ;;  %s6464_s13 = sld [smem:[#allocation4 + $0x1]] }
 0x117   :  { %1170 = vrot.lane.b32.xlu0 %v1168_v62, %s9960_s9 }
 0x118   :  { %v511_v34 = vadd.f32 %v510_v6, %v509_v21  ;;  %v533_v56 = vpop.permute.xlu1 %532  ;;  %v536_v6 = vmul.f32 %v6363_v27, %v432_v35  ;;  %v591_v21 = vmul.f32 %v6194_v52, %v590_v41  ;;  %v1302_v35 = vmul.f32 %v6118_v49, %v1301_v19 }
 0x119   :  { %v527_v42 = vpop.permute.xlu0 %526  ;;  %v1410_v41 = vmul.f32 %v6194_v52, %v1301_v19 }
 0x11a   :  { %v517_v29 = vadd.f32 %v515_v47, %v511_v34  ;;  %1082 = vrot.lane.b32.xlu1 %v1080_v9, %s9968_s12  ;;  %v1308_v34 = vstv %s6431_s20  ;;  %s6474_s20 = sld [smem:[#allocation2 + $0x58]] }
 0x11b   :  { %1176 = vrot.lane.b32.xlu0 %v1174_v37, %s9960_s9 }
 0x11c   :  { %v523_v24 = vadd.f32 %v521_v16, %v517_v29  ;;  %v547_v62 = vpop.permute.xlu1 %546  ;;  %v589_v16 = vmul.f32 %v6118_v49, %v588_v1  ;;  %9997 = sst [smem:[#allocation12_spill]] %s6464_s13 }
 0x11d   :  { %v541_v8 = vpop.permute.xlu0 %540 }
 0x11e   :  { %v529_v47 = vadd.f32 %v527_v42, %v523_v24  ;;  %1188 = vrot.lane.b32.xlu1 %v1186_v22, %s9968_s12  ;;  %v592_v22 = vadd.f32 %v591_v21, %v589_v16 }
 0x11f   :  { %1182 = vrot.lane.b32.xlu0 %v1180_v31, %s9968_s12  ;;  %v9826_v31 = vstv %s6439_s30  ;;  %s6514_s30 = sld [smem:[#allocation6 + $0x64]] }
 0x120   :  { %v535_v9 = vadd.f32 %v533_v56, %v529_v47  ;;  %v559_v37 = vpop.permute.xlu1 %558  ;;  %v1309_v56 = vmul.f32 %v6194_v52, %v1308_v34  ;;  %v1194_v21 = vmul.f32 %v6106_v0, %v9826_v31  ;;  %v645_v31 = vmul.f32 %v6167_v14, %v644_v33 }
 0x121   :  { %v553_v42 = vpop.permute.xlu0 %552 }
 0x122   :  { %v537_v29 = vadd.f32 %v536_v6, %v535_v9  ;;  %1406 = vrot.lane.b32.xlu1 %v1404_v57, %s9960_s9  ;;  %v614_v57 = vstv %s6447_s2  ;;  %s6675_s2 = sld [smem:[#allocation2 + $0x8d]] }
 0x123   :  { %1304 = vrot.lane.b32.xlu0 %v1302_v35, %s9960_s9 }
 0x124   :  { %v543_v24 = vadd.f32 %v541_v8, %v537_v29  ;;  %v604_v47 = vpop.permute.xlu1 %603  ;;  %v1093_v8 = vmul.f32 %v6106_v0, %v1092_v40 }
 0x125   :  { %v597_v6 = vpop.permute.xlu0 %596  ;;  %10000 = sst [smem:[#allocation42_spill]] %s6514_s30 }
 0x126   :  { %v549_v16 = vadd.f32 %v547_v62, %v543_v24  ;;  %v599_v19 = vadd.f32 %v597_v6, %v592_v22  ;;  %1412 = vrot.lane.b32.xlu1 %v1410_v41, %s9960_s9  ;;  %v615_v62 = vmul.f32 %v6106_v0, %v614_v57  ;;  %v1315_v22 = vstv %s6462_s8  ;;  %s6507_s8 = sld [smem:[#allocation2 + $0x59]] }
 0x127   :  { %1311 = vrot.lane.b32.xlu0 %v1309_v56, %s9960_s9  ;;  %v618_v56 = vmul.f32 %v6156_v10, %v617_v5  ;;  %v1422_v20 = vmul.f32 %v6194_v52, %v1315_v22 }
 0x128   :  { %v555_v35 = vadd.f32 %v553_v42, %v549_v16  ;;  %v624_v9 = vpop.permute.xlu1 %623  ;;  %v606_v29 = vadd.f32 %v604_v47, %v599_v19  ;;  %v1416_v42 = vmul.f32 %v6118_v49, %v1308_v34  ;;  %v9835_v47 = vstv %s6464_s13  ;;  %s6582_s13 = sld [smem:[#allocation2 + $0x6b]] }
 0x129   :  { %v611_v41 = vpop.permute.xlu0 %610  ;;  %v1316_v16 = vmul.f32 %v6118_v49, %v1315_v22  ;;  %v9834_v22 = vstv %s6512_s27  ;;  %10013 = sst [smem:[#allocation14_spill]] %s6675_s2 }
 0x12a   :  { %v561_v24 = vadd.f32 %v559_v37, %v555_v35  ;;  %v613_v6 = vadd.f32 %v611_v41, %v606_v29  ;;  %1196 = vrot.lane.b32.xlu1 %v1194_v21, %s9960_s9  ;;  %v1099_v35 = vstv %s6474_s20  ;;  %s6706_s20 = sld [smem:[#allocation2 + $0x8f]] }
 0x12b   :  { %1095 = vrot.lane.b32.xlu0 %v1093_v8, %s9960_s9  ;;  %v1200_v8 = vmul.f32 %v6156_v10, %v1092_v40  ;;  %v1100_v41 = vmul.f32 %v6156_v10, %v1099_v35 }
 0x12c   :  { %v566_v5 = vadd.f32 %v9835_v47, %v561_v24  ;;  %v616_v37 = vadd.f32 %v615_v62, %v613_v6  ;;  %v638_v19 = vpop.permute.xlu1 %637  ;;  %v641_v62 = vstv %s6483_s17  ;;  %v1106_v25 = vstv %s6507_s8  ;;  %s6684_s17 = sld [smem:[#allocation2 + $0x5c]] }
 0x12d   :  { %v631_v34 = vpop.permute.xlu0 %630  ;;  %v642_v26 = vmul.f32 %v6211_v18, %v641_v62  ;;  %v1107_v33 = vmul.f32 %v6106_v0, %v1106_v25  ;;  %v668_v47 = vstv %s6532_s7  ;;  %s6719_s7 = sld [smem:[#allocation2 + $0x5d]] }
 0x12e   :  { %v619_v21 = vadd.f32 %v618_v56, %v616_v37  ;;  %1418 = vrot.lane.b32.xlu1 %v1416_v42, %s9968_s12  ;;  %v6520_v29 = vmax.f32 %v566_v5, 0.0  ;;  %v1537_v56 = vstv %s6487_s26  ;;  %v9829_v42 = vstv %s6471_s15  ;;  %s6723_s26 = sld [smem:[#allocation6 + $0x1f]] }
 0x12f   :  { %1318 = vrot.lane.b32.xlu0 %v1316_v16, %s9968_s12  ;;  %v9831_v16 = vstv %s6477_s3  ;;  %v9830_v5 = vstv %s6493_s19  ;;  %s6731_s8 = sld [smem:[#allocation2 + $0x7f]] }
 0x130   :  { %v626_v24 = vadd.f32 %v624_v9, %v619_v21  ;;  %v658_v40 = vpop.permute.xlu1 %657  ;;  %v1538_v9 = vmul.f32 %v6118_v49, %v1537_v56  ;;  %v9832_v21 = vstv %s6495_s24  ;;  %v6567_v59 = vmul.f32 %v9830_v5, %v6520_v29 }
 0x131   :  { %v651_v6 = vpop.permute.xlu0 %650  ;;  %v1640_v5 = vmul.f32 %v6118_v49, %v9834_v22  ;;  %v6605_v60 = vmul.f32 %v9840_v2, %v6520_v29  ;;  %v1206_v2 = vmul.f32 %v6106_v0, %v1099_v35  ;;  %v1646_v35 = vmul.f32 %v6194_v52, %v1537_v56 }
 0x132   :  { %v633_v37 = vadd.f32 %v631_v34, %v626_v24  ;;  %1202 = vrot.lane.b32.xlu1 %v1200_v8, %s9960_s9  ;;  %v6551_v34 = vmul.f32 %v9829_v42, %v6520_v29  ;;  %v6556_v24 = vmul.f32 %v9831_v16, %v6520_v29  ;;  %10006 = vst [vmem:[#allocation47_spill] sm:$0xff] %v6567_v59  ;;  %v1544_v16 = vstv %s6518_s16  ;;  %s6691_s16 = sld [smem:[#allocation2 + $0x6d]] }
 0x133   :  { %1102 = vrot.lane.b32.xlu0 %v1100_v41, %s9960_s9  ;;  %v6572_v42 = vmul.f32 %v9832_v21, %v6520_v29  ;;  %v9838_v21 = vstv %s6514_s30  ;;  %10011 = vst [vmem:[#allocation51_spill] sm:$0xff] %v6605_v60  ;;  %s6762_s30 = sld [smem:[#allocation6 + $0x67]] }
 0x134   :  { %10004 = vst [vmem:[#allocation45_spill] sm:$0xff] %v6551_v34  ;;  %10005 = vst [vmem:[#allocation46_spill] sm:$0xff] %v6556_v24  ;;  %v640_v8 = vadd.f32 %v638_v19, %v633_v37  ;;  %v6561_v41 = vpop.permute.xlu1 %677  ;;  %v9839_v37 = vstv %s6502_s11  ;;  %v6597_v22 = vmul.f32 %v9838_v21, %v6520_v29  ;;  %v695_v21 = vmul.f32 %v6194_v52, %v588_v1  ;;  %s6768_s11 = sld [smem:[#allocation6 + $0xaf]] }
 0x135   :  { %v665_v36 = vpop.permute.xlu0 %664  ;;  %10007 = vst [vmem:[#allocation48_spill] sm:$0xff] %v6572_v42 }
 0x136   :  { %v643_v19 = vadd.f32 %v642_v26, %v640_v8  ;;  %1540 = vrot.lane.b32.xlu1 %v1538_v9, %s9960_s9  ;;  %v6588_v26 = vmul.f32 %v9839_v37, %v6520_v29  ;;  %10009 = vst [vmem:[#allocation50_spill] sm:$0xff] %v6597_v22  ;;  %v1545_v37 = vmul.f32 %v6194_v52, %v1544_v16 }
 0x137   :  { %1424 = vrot.lane.b32.xlu0 %v1422_v20, %s9968_s12  ;;  %v9842_v20 = vstv %s6530_s29  ;;  %s6758_s29 = sld [smem:[#allocation2 + $0x7e]] }
 0x138   :  { %10008 = vst [vmem:[#allocation49_spill] sm:$0xff] %v6588_v26  ;;  %v646_v9 = vadd.f32 %v645_v31, %v643_v19  ;;  %v6590_v8 = vpop.permute.xlu1 %691  ;;  %v6610_v31 = vmul.f32 %v9842_v20, %v6520_v29 }
 0x139   :  { %v6600_v17 = vpop.permute.xlu0 %684  ;;  %10016 = sst [smem:[#allocation54_spill]] %s6762_s30 }
 0x13a   :  { %10012 = vst [vmem:[#allocation52_spill] sm:$0xff] %v6610_v31  ;;  %v653_v19 = vadd.f32 %v651_v6, %v646_v9  ;;  %1109 = vrot.lane.b32.xlu1 %v1107_v33, %s9968_s12  ;;  %v669_v6 = vmul.f32 %v6219_v30, %v668_v47  ;;  %v672_v9 = vmul.f32 %v6363_v27, %v671_v53  ;;  %10018 = sst [smem:[#allocation56_spill]] %s6768_s11 }
 0x13b   :  { %1642 = vrot.lane.b32.xlu0 %v1640_v5, %s9960_s9  ;;  %v990_v5 = vmul.f32 %v6167_v14, %v883_v39  ;;  %v720_v39 = vmul.f32 %v6156_v10, %v614_v57 }
 0x13c   :  { %v660_v20 = vadd.f32 %v658_v40, %v653_v19  ;;  %v705_v33 = vpop.permute.xlu1 %704  ;;  %v1328_v40 = vstv %s6582_s13  ;;  %s6727_s13 = sld [smem:[#allocation6 + $0x7]] }
 0x13d   :  { %v699_v1 = vpop.permute.xlu0 %698  ;;  %10015 = sst [smem:[#allocation53_spill]] %s6758_s29 }
 0x13e   :  { %v667_v7 = vadd.f32 %v665_v36, %v660_v20  ;;  %v701_v28 = vadd.f32 %v699_v1, %v695_v21  ;;  %1547 = vrot.lane.b32.xlu1 %v1545_v37, %s9960_s9  ;;  %v1212_v36 = vmul.f32 %v6156_v10, %v1106_v25  ;;  %v9854_v21 = vstv %s6628_s0 }
 0x13f   :  { %1208 = vrot.lane.b32.xlu0 %v1206_v2, %s9968_s12  ;;  %v1329_v2 = vmul.f32 %v6106_v0, %v1328_v40  ;;  %v1430_v25 = vmul.f32 %v6106_v0, %v9854_v21  ;;  %v996_v20 = vmul.f32 %v6211_v18, %v890_v38  ;;  %v1436_v38 = vmul.f32 %v6156_v10, %v1328_v40 }
 0x140   :  { %v670_v19 = vadd.f32 %v669_v6, %v667_v7  ;;  %v717_v51 = vpop.permute.xlu1 %716  ;;  %v707_v54 = vadd.f32 %v705_v33, %v701_v28  ;;  %v1551_v7 = vstv %s6623_s14  ;;  %s6661_s14 = sld [smem:[#allocation2 + $0x8e]]  ;;  %v1652_v33 = vmul.f32 %v6118_v49, %v1544_v16 }
 0x141   :  { %v711_v23 = vpop.permute.xlu0 %710  ;;  %v1552_v57 = vmul.f32 %v6118_v49, %v1551_v7  ;;  %v9864_v21 = vstv %s6758_s29  ;;  %s4972_s29 = sld [smem:[#allocation6 + $0x1a]] }
 0x142   :  { %v6642_v53 = vadd.f32 %v672_v9, %v670_v19  ;;  %v713_v43 = vadd.f32 %v711_v23, %v707_v54  ;;  %992 = vrot.lane.b32.xlu1 %v990_v5, %s9960_s9  ;;  %v746_v5 = vmul.f32 %v6167_v14, %v641_v62 }
 0x143   :  { %1648 = vrot.lane.b32.xlu0 %v1646_v35, %s9960_s9  ;;  %v1335_v35 = vstv %s6653_s28  ;;  %s6736_s28 = sld [smem:[#allocation6 + $0x4f]] }
 0x144   :  { %v719_v56 = vadd.f32 %v717_v51, %v713_v43  ;;  %v731_v28 = vpop.permute.xlu1 %730 }
 0x145   :  { %v725_v23 = vpop.permute.xlu0 %724 }
 0x146   :  { %v721_v54 = vadd.f32 %v720_v39, %v719_v56  ;;  %1331 = vrot.lane.b32.xlu1 %v1329_v2, %s9960_s9  ;;  %v1336_v2 = vmul.f32 %v6156_v10, %v1335_v35  ;;  %v1773_v16 = vstv %s6661_s14  ;;  %s6740_s14 = sld [smem:[#allocation6 + $0x37]] }
 0x147   :  { %1214 = vrot.lane.b32.xlu0 %v1212_v36, %s9968_s12  ;;  %v1774_v40 = vmul.f32 %v6118_v49, %v1773_v16 }
 0x148   :  { %v727_v43 = vadd.f32 %v725_v23, %v721_v54  ;;  %v743_v51 = vpop.permute.xlu1 %742  ;;  %v1658_v23 = vmul.f32 %v6194_v52, %v1551_v7 }
 0x149   :  { %v737_v37 = vpop.permute.xlu0 %736 }
 0x14a   :  { %v733_v6 = vadd.f32 %v731_v28, %v727_v43  ;;  %1554 = vrot.lane.b32.xlu1 %v1552_v57, %s9968_s12 }
 0x14b   :  { %1432 = vrot.lane.b32.xlu0 %v1430_v25, %s9960_s9  ;;  %v9853_v25 = vstv %s6675_s2  ;;  %s6777_s2 = sld [smem:[#allocation6 + $0x97]] }
 0x14c   :  { %v739_v1 = vadd.f32 %v737_v37, %v733_v6  ;;  %v757_v9 = vpop.permute.xlu1 %756  ;;  %v1876_v7 = vmul.f32 %v6118_v49, %v9853_v25  ;;  %v9856_v6 = vstv %s6682_s18 }
 0x14d   :  { %v751_v19 = vpop.permute.xlu0 %750 }
 0x14e   :  { %v745_v39 = vadd.f32 %v743_v51, %v739_v1  ;;  %998 = vrot.lane.b32.xlu1 %v996_v20, %s9968_s12  ;;  %v1002_v51 = vmul.f32 %v6167_v14, %v897_v44  ;;  %v772_v20 = vmul.f32 %v6363_v27, %v668_v47  ;;  %v1220_v47 = vmul.f32 %v6211_v18, %v9856_v6 }
 0x14f   :  { %1654 = vrot.lane.b32.xlu0 %v1652_v33, %s9968_s12 }
 0x150   :  { %v747_v36 = vadd.f32 %v746_v5, %v745_v39  ;;  %v769_v62 = vpop.permute.xlu1 %768 }
 0x151   :  { %v763_v56 = vpop.permute.xlu0 %762  ;;  %10019 = sst [smem:[#allocation57_spill]] %s6777_s2 }
 0x152   :  { %v753_v28 = vadd.f32 %v751_v19, %v747_v36  ;;  %1438 = vrot.lane.b32.xlu1 %v1436_v38, %s9960_s9 }
 0x153   :  { %1338 = vrot.lane.b32.xlu0 %v1336_v2, %s9960_s9  ;;  %v1342_v2 = vstv %s6691_s16  ;;  %s6751_s16 = sld [smem:[#allocation2 + $0x90]] }
 0x154   :  { %v759_v54 = vadd.f32 %v757_v9, %v753_v28  ;;  %v783_v57 = vpop.permute.xlu1 %782  ;;  %v1119_v9 = vstv %s6684_s17  ;;  %v1343_v28 = vmul.f32 %v6106_v0, %v1342_v2  ;;  %s6744_s17 = sld [smem:[#allocation6 + $0x7f]] }
 0x155   :  { %v777_v43 = vpop.permute.xlu0 %776  ;;  %v1120_v19 = vmul.f32 %v6211_v18, %v1119_v9 }
 0x156   :  { %v765_v37 = vadd.f32 %v763_v56, %v759_v54  ;;  %1776 = vrot.lane.b32.xlu1 %v1774_v40, %s9960_s9  ;;  %v1442_v56 = vmul.f32 %v6106_v0, %v1335_v35  ;;  %v9862_v54 = vstv %s6706_s20 }
 0x157   :  { %1660 = vrot.lane.b32.xlu0 %v1658_v23, %s9968_s12 }
 0x158   :  { %v771_v33 = vadd.f32 %v769_v62, %v765_v37  ;;  %v795_v1 = vpop.permute.xlu1 %794  ;;  %v1781_v37 = vmul.f32 %v6194_v52, %v9862_v54  ;;  %v9866_v54 = vstv %s6777_s2  ;;  %s6871_s2 = sld [smem:[#allocation2 + $0x70]] }
 0x159   :  { %v789_v5 = vpop.permute.xlu0 %788 }
 0x15a   :  { %v773_v44 = vadd.f32 %v772_v20, %v771_v33  ;;  %1004 = vrot.lane.b32.xlu1 %v1002_v51, %s9968_s12  ;;  %10014 = sst [smem:[#allocation15_spill]] %s6744_s17  ;;  %v9860_v51 = vstv %s6712_s22  ;;  %v1126_v33 = vstv %s6719_s7  ;;  %v9863_v6 = vstv %s6744_s17 }
 0x15b   :  { %1878 = vrot.lane.b32.xlu0 %v1876_v7, %s9960_s9  ;;  %s6773_s7 = sld [smem:[#allocation2 + $0x4c]] }
 0x15c   :  { %v779_v39 = vadd.f32 %v777_v43, %v773_v44  ;;  %v6716_v38 = vpop.permute.xlu1 %839  ;;  %v1882_v43 = vmul.f32 %v6194_v52, %v1773_v16  ;;  %v1127_v44 = vmul.f32 %v6167_v14, %v1126_v33  ;;  %s7130_s17 = sld [smem:[#allocation2 + $0x97]] }
 0x15d   :  { %v6721_v36 = vpop.permute.xlu0 %832 }
 0x15e   :  { %v785_v62 = vadd.f32 %v783_v57, %v779_v39  ;;  %1222 = vrot.lane.b32.xlu1 %v1220_v47, %s9960_s9  ;;  %v1564_v47 = vstv %s6731_s8  ;;  %s6808_s8 = sld [smem:[#allocation2 + $0x5e]] }
 0x15f   :  { %1122 = vrot.lane.b32.xlu0 %v1120_v19, %s9960_s9 }
 0x160   :  { %v791_v40 = vadd.f32 %v789_v5, %v785_v62  ;;  %v6733_v23 = vpop.permute.xlu1 %859  ;;  %v1226_v5 = vmul.f32 %v6167_v14, %v1119_v9  ;;  %v9857_v9 = vstv %s6723_s26  ;;  %v9858_v62 = vstv %s6727_s13 }
 0x161   :  { %v6738_v57 = vpop.permute.xlu0 %846 }
 0x162   :  { %v797_v35 = vadd.f32 %v795_v1, %v791_v40  ;;  %1444 = vrot.lane.b32.xlu1 %v1442_v56, %s9968_s12  ;;  %v1565_v56 = vmul.f32 %v6106_v0, %v1564_v47  ;;  %v9859_v40 = vstv %s6740_s14  ;;  %10059 = sst [smem:[#allocation92_spill]] %s7130_s17 }
 0x163   :  { %1345 = vrot.lane.b32.xlu0 %v1343_v28, %s9968_s12  ;;  %v9855_v28 = vstv %s6736_s28 }
 0x164   :  { %v802_v20 = vadd.f32 %v9860_v51, %v797_v35  ;;  %v6755_v7 = vpop.permute.xlu1 %873  ;;  %v1133_v60 = vstv %s6808_s8  ;;  %s6886_s8 = sld [smem:[#allocation2 + $0x6f]] }
 0x165   :  { %v6760_v16 = vpop.permute.xlu0 %866 }
 0x166   :  { %v6764_v1 = vmax.f32 %v802_v20, 0.0  ;;  %1884 = vrot.lane.b32.xlu1 %v1882_v43, %s9960_s9  ;;  %v1448_v43 = vmul.f32 %v6156_v10, %v1342_v2 }
 0x167   :  { %1783 = vrot.lane.b32.xlu0 %v1781_v37, %s9960_s9  ;;  %v1787_v37 = vstv %s6751_s16  ;;  %s6833_s16 = sld [smem:[#allocation2 + $0x80]] }
 0x168   :  { %10017 = vst [vmem:[#allocation55_spill] sm:$0xff] %v6764_v1  ;;  %v6775_v19 = vpop.permute.xlu1 %893  ;;  %v6790_v35 = vmul.f32 %v9857_v9, %v6764_v1  ;;  %v6798_v20 = vmul.f32 %v9858_v62, %v6764_v1  ;;  %v6813_v2 = vmul.f32 %v9859_v40, %v6764_v1  ;;  %v1666_v62 = vmul.f32 %v6106_v0, %v9864_v21 }
 0x169   :  { %v6779_v39 = vpop.permute.xlu0 %886  ;;  %v9865_v40 = vstv %s6762_s30  ;;  %v6829_v51 = vmul.f32 %v9863_v6, %v6764_v1  ;;  %v6852_v6 = vmul.f32 %v9866_v54, %v6764_v1  ;;  %v10031_v21 = vstv %s6773_s7  ;;  %s7020_s30 = sld [smem:[#allocation2 + $0x84]] }
 0x16a   :  { %1228 = vrot.lane.b32.xlu1 %v1226_v5, %s9960_s9  ;;  %10020 = vst [vmem:[#allocation58_spill] sm:$0xff] %v6790_v35  ;;  %10021 = vst [vmem:[#allocation59_spill] sm:$0xff] %v6798_v20  ;;  %v6803_v5 = vmul.f32 %v9855_v28, %v6764_v1  ;;  %v1788_v28 = vmul.f32 %v6118_v49, %v1787_v37  ;;  %v1232_v54 = vmul.f32 %v6211_v18, %v1126_v33 }
 0x16b   :  { %1129 = vrot.lane.b32.xlu0 %v1127_v44, %s9960_s9  ;;  %10024 = vst [vmem:[#allocation62_spill] sm:$0xff] %v6813_v2  ;;  %10025 = vst [vmem:[#allocation63_spill] sm:$0xff] %v6829_v51  ;;  %v1010_v51 = vmul.f32 %v6219_v30, %v10031_v21 }
 0x16c   :  { %10022 = vst [vmem:[#allocation60_spill] sm:$0xff] %v6803_v5  ;;  %v6805_v25 = vpop.permute.xlu1 %913  ;;  %10030 = vst [vmem:[#allocation68_spill] sm:$0xff] %v6852_v6 }
 0x16d   :  { %10023 = vst [vmem:[#allocation61_spill] sm:$0xff] %v6805_v25  ;;  %v6815_v44 = vpop.permute.xlu0 %900 }
 0x16e   :  { %1567 = vrot.lane.b32.xlu1 %v1565_v56, %s9960_s9  ;;  %v9868_v56 = vstv %s6768_s11  ;;  %s6989_s11 = sld [smem:[#allocation2 + $0x94]] }
 0x16f   :  { %1450 = vrot.lane.b32.xlu0 %v1448_v43, %s9968_s12  ;;  %v6840_v43 = vmul.f32 %v9865_v40, %v6764_v1  ;;  %v6847_v0 = vmul.f32 %v9868_v56, %v6764_v1  ;;  %v10032_v40 = vstv %s6706_s20  ;;  %s6882_s20 = sld [smem:[#allocation2 + $0x81]]  ;;  %v10033_v56 = vstv %s6074_s21 }
 0x170   :  { %v6831_v11 = vpop.permute.xlu1 %927  ;;  %v1016_v6 = vmul.f32 %v6363_v27, %v10033_v56  ;;  %v1238_v56 = vmul.f32 %v6167_v14, %v1133_v60  ;;  %s6909_s21 = sld [smem:[#allocation2 + $0x71]] }
 0x171   :  { %10026 = vst [vmem:[#allocation64_spill] sm:$0xff] %v6831_v11  ;;  %10027 = vst [vmem:[#allocation65_spill] sm:$0xff] %v6840_v43  ;;  %v6842_v9 = vpop.permute.xlu0 %920  ;;  %v1888_v43 = vmul.f32 %v6118_v49, %v10032_v40  ;;  %v1571_v49 = vstv %s6833_s16  ;;  %v1672_v40 = vmul.f32 %v6156_v10, %v1564_v47  ;;  %s7089_s16 = sld [smem:[#allocation2 + $0x86]] }
 0x172   :  { %10028 = vst [vmem:[#allocation66_spill] sm:$0xff] %v6842_v9  ;;  %10029 = vst [vmem:[#allocation67_spill] sm:$0xff] %v6847_v0  ;;  %1790 = vrot.lane.b32.xlu1 %v1788_v28, %s9968_s12  ;;  %v1134_v28 = vmul.f32 %v6211_v18, %v1133_v60 }
 0x173   :  { %1668 = vrot.lane.b32.xlu0 %v1666_v62, %s9960_s9 }
 0x174   :  { %v6862_v31 = vpop.permute.xlu1 %940  ;;  %v1807_v34 = vstv %s6989_s11  ;;  %s7045_s11 = sld [smem:[#allocation2 + $0x63]] }
 0x175   :  { %v6865_v3 = vpop.permute.xlu0 %934 }
 0x176   :  { %1012 = vrot.lane.b32.xlu1 %v1010_v51, %s9960_s9  ;;  %v1572_v51 = vmul.f32 %v6156_v10, %v1571_v49  ;;  %v1355_v10 = vstv %s6871_s2  ;;  %v1362_v26 = vstv %s6909_s21  ;;  %s6939_s2 = sld [smem:[#allocation2 + $0x92]] }
 0x177   :  { %1890 = vrot.lane.b32.xlu0 %v1888_v43, %s9968_s12  ;;  %v1356_v0 = vmul.f32 %v6211_v18, %v1355_v10  ;;  %s6957_s21 = sld [smem:[#allocation2 + $0x61]] }
 0x178   :  { %v6873_v21 = vpop.permute.xlu1 %952 }
 0x179   :  { %v6876_v62 = vpop.permute.xlu0 %946 }
 0x17a   :  { %1234 = vrot.lane.b32.xlu1 %v1232_v54, %s9968_s12  ;;  %v1894_v54 = vmul.f32 %v6194_v52, %v1787_v37 }
 0x17b   :  { %1136 = vrot.lane.b32.xlu0 %v1134_v28, %s9968_s12 }
 0x17c   :  { %v6884_v33 = vpop.permute.xlu1 %966  ;;  %10037 = sst [smem:[#allocation71_spill]] %s6939_s2  ;;  %v9871_v2 = vstv %s6939_s2 }
 0x17d   :  { %v6888_v43 = vpop.permute.xlu0 %960  ;;  %v1146_v42 = vstv %s6957_s21  ;;  %s7007_s21 = sld [smem:[#allocation2 + $0x62]] }
 0x17e   :  { %1674 = vrot.lane.b32.xlu1 %v1672_v40, %s9960_s9  ;;  %v1578_v40 = vstv %s6882_s20  ;;  %s6924_s20 = sld [smem:[#allocation2 + $0x93]] }
 0x17f   :  { %1574 = vrot.lane.b32.xlu0 %v1572_v51, %s9960_s9  ;;  %v9870_v51 = vstv %s6886_s8  ;;  %s7242_s2 = sld [smem:[#allocation2 + $0x9c]] }
 0x180   :  { %v6897_v47 = vpop.permute.xlu1 %978  ;;  %v1456_v14 = vmul.f32 %v6211_v18, %v9870_v51 }
 0x181   :  { %v6899_v28 = vpop.permute.xlu0 %972 }
 0x182   :  { %1018 = vrot.lane.b32.xlu1 %v1016_v6, %s9960_s9  ;;  %v6917_v6 = vld [vmem:[%s9776_s4 + $0x10] sm:$0xff] }
 0x183   :  { %1896 = vrot.lane.b32.xlu0 %v1894_v54, %s9968_s12  ;;  %v1579_v37 = vmul.f32 %v6917_v6, %v1578_v40  ;;  %v1678_v45 = vmul.f32 %v6917_v6, %v1571_v49  ;;  %v1153_v58 = vstv %s7007_s21  ;;  %s7056_s21 = sld [smem:[#allocation2 + $0x85]] }
 0x184   :  { %v6906_v12 = vpop.permute.xlu1 %1068 }
 0x185   :  { %v6911_v52 = vpop.permute.xlu0 %986  ;;  %10078 = sst [smem:[#allocation111_spill]] %s7242_s2 }
 0x186   :  { %10034 = vst [vmem:[#allocation69_spill] sm:$0xff] %v6911_v52  ;;  %1358 = vrot.lane.b32.xlu1 %v1356_v0, %s9960_s9  ;;  %v10035_v0 = vstv %s6098_s23  ;;  %s6953_s23 = sld [smem:[#allocation2 + $0x60]] }
 0x187   :  { %1240 = vrot.lane.b32.xlu0 %v1238_v56, %s9968_s12  ;;  %v1022_v22 = vmul.f32 %v6219_v30, %v10035_v0  ;;  %v6947_v30 = vld [vmem:[%s9776_s4 + $0x28] sm:$0xff] }
 0x188   :  { %v6926_v60 = vpop.permute.xlu1 %1075  ;;  %v1363_v49 = vmul.f32 %v6947_v30, %v1362_v26 }
 0x189   :  { %v6928_v54 = vpop.permute.xlu0 %1170 }
 0x18a   :  { %1581 = vrot.lane.b32.xlu1 %v1579_v37, %s9968_s12  ;;  %v1462_v37 = vmul.f32 %v6947_v30, %v1355_v10 }
 0x18b   :  { %1458 = vrot.lane.b32.xlu0 %v1456_v14, %s9960_s9  ;;  %v1800_v14 = vstv %s6924_s20  ;;  %s6973_s20 = sld [smem:[#allocation2 + $0x72]] }
 0x18c   :  { %v6936_v56 = vpop.permute.xlu1 %1082  ;;  %v1801_v10 = vmul.f32 %v6917_v6, %v1800_v14 }
 0x18d   :  { %10036 = vst [vmem:[#allocation70_spill] sm:$0xff] %v6936_v56  ;;  %v6941_v18 = vpop.permute.xlu0 %1176  ;;  %v9886_v56 = vstv %s7242_s2  ;;  %s8209_s2 = sld [smem:[#allocation6 + $0x5e]] }
 0x18e   :  { %1024 = vrot.lane.b32.xlu1 %v1022_v22, %s9968_s12 }
 0x18f   :  { %1680 = vrot.lane.b32.xlu0 %v1678_v45, %s9968_s12  ;;  %v6967_v45 = vld [vmem:[%s9776_s4 + $0x18] sm:$0xff] }
 0x190   :  { %v6955_v0 = vpop.permute.xlu1 %1188  ;;  %v1684_v51 = vmul.f32 %v6967_v45, %v1578_v40  ;;  %v9872_v40 = vstv %s6953_s23 }
 0x191   :  { %v6959_v22 = vpop.permute.xlu0 %1182  ;;  %v1369_v50 = vstv %s6973_s20  ;;  %s7031_s20 = sld [smem:[#allocation2 + $0x95]] }
 0x192   :  { %1464 = vrot.lane.b32.xlu1 %v1462_v37, %s9960_s9  ;;  %v10039_v37 = vstv %s6095_s25  ;;  %s7036_s25 = sld [smem:[#allocation2 + $0x83]] }
 0x193   :  { %1365 = vrot.lane.b32.xlu0 %v1363_v49, %s9960_s9  ;;  %v1028_v20 = vmul.f32 %v6363_v27, %v10039_v37  ;;  %v1902_v49 = vmul.f32 %v6917_v6, %v9871_v2 }
 0x194   :  { %v6970_v46 = vpop.permute.xlu1 %1406 }
 0x195   :  { %v6975_v5 = vpop.permute.xlu0 %1304 }
 0x196   :  { %10038 = vst [vmem:[#allocation72_spill] sm:$0xff] %v6975_v5  ;;  %1803 = vrot.lane.b32.xlu1 %v1801_v10, %s9960_s9  ;;  %v6997_v10 = vld [vmem:[%s9776_s4 + $0x30] sm:$0xff] }
 0x197   :  { %1686 = vrot.lane.b32.xlu0 %v1684_v51, %s9968_s12  ;;  %v1246_v51 = vmul.f32 %v6997_v10, %v9872_v40  ;;  %v1147_v37 = vmul.f32 %v6997_v10, %v1146_v42 }
 0x198   :  { %v6986_v35 = vpop.permute.xlu1 %1412  ;;  %10045 = sst [smem:[#allocation78_spill]] %s7036_s25 }
 0x199   :  { %10040 = vst [vmem:[#allocation73_spill] sm:$0xff] %v6986_v35  ;;  %v6991_v59 = vpop.permute.xlu0 %1311 }
 0x19a   :  { %10041 = vst [vmem:[#allocation74_spill] sm:$0xff] %v6991_v59  ;;  %1030 = vrot.lane.b32.xlu1 %v1028_v20, %s9968_s12  ;;  %v7015_v20 = vld [vmem:[%s9776_s4 + $0x20] sm:$0xff] }
 0x19b   :  { %1904 = vrot.lane.b32.xlu0 %v1902_v49, %s9960_s9  ;;  %v1468_v40 = vmul.f32 %v7015_v20, %v1362_v26  ;;  %v1370_v49 = vmul.f32 %v7015_v20, %v1369_v50  ;;  %v1808_v26 = vmul.f32 %v6967_v45, %v1807_v34 }
 0x19c   :  { %v7004_v2 = vpop.permute.xlu1 %1196 }
 0x19d   :  { %v7009_v63 = vpop.permute.xlu0 %1095 }
 0x19e   :  { %10042 = vst [vmem:[#allocation75_spill] sm:$0xff] %v7009_v63  ;;  %1248 = vrot.lane.b32.xlu1 %v1246_v51, %s9960_s9  ;;  %v1908_v51 = vmul.f32 %v6967_v45, %v1800_v14  ;;  %v1154_v14 = vmul.f32 %v6363_v27, %v1153_v58 }
 0x19f   :  { %1149 = vrot.lane.b32.xlu0 %v1147_v37, %s9960_s9 }
 0x1a0   :  { %v7022_v24 = vpop.permute.xlu1 %1418 }
 0x1a1   :  { %10043 = vst [vmem:[#allocation76_spill] sm:$0xff] %v7022_v24  ;;  %v7025_v61 = vpop.permute.xlu0 %1318 }
 0x1a2   :  { %10044 = vst [vmem:[#allocation77_spill] sm:$0xff] %v7025_v61  ;;  %1470 = vrot.lane.b32.xlu1 %v1468_v40, %s9968_s12  ;;  %v1252_v40 = vmul.f32 %v6363_v27, %v1146_v42  ;;  %v1474_v42 = vmul.f32 %v6947_v30, %v1369_v50 }
 0x1a3   :  { %1372 = vrot.lane.b32.xlu0 %v1370_v49, %s9968_s12  ;;  %v1591_v49 = vstv %s7020_s30  ;;  %s7079_s30 = sld [smem:[#allocation2 + $0x75]] }
 0x1a4   :  { %v7033_v37 = vpop.permute.xlu1 %1202  ;;  %v1592_v11 = vmul.f32 %v7015_v20, %v1591_v49 }
 0x1a5   :  { %v7038_v59 = vpop.permute.xlu0 %1102 }
 0x1a6   :  { %10046 = vst [vmem:[#allocation79_spill] sm:$0xff] %v7038_v59  ;;  %1910 = vrot.lane.b32.xlu1 %v1908_v51, %s9960_s9  ;;  %v1814_v51 = vstv %s7031_s20  ;;  %s7093_s20 = sld [smem:[#allocation2 + $0x74]] }
 0x1a7   :  { %1810 = vrot.lane.b32.xlu0 %v1808_v26, %s9960_s9  ;;  %v9876_v26 = vstv %s7036_s25  ;;  %s7265_s25 = sld [smem:[#allocation2 + $0x9f]] }
 0x1a8   :  { %v7047_v61 = vpop.permute.xlu1 %1540 }
 0x1a9   :  { %10047 = vst [vmem:[#allocation80_spill] sm:$0xff] %v7047_v61  ;;  %v7049_v5 = vpop.permute.xlu0 %1424  ;;  %v1815_v61 = vmul.f32 %v6917_v6, %v1814_v51 }
 0x1aa   :  { %10048 = vst [vmem:[#allocation81_spill] sm:$0xff] %v7049_v5  ;;  %1254 = vrot.lane.b32.xlu1 %v1252_v40, %s9960_s9  ;;  %v1692_v40 = vmul.f32 %v7015_v20, %v9876_v26 }
 0x1ab   :  { %1156 = vrot.lane.b32.xlu0 %v1154_v14, %s9960_s9  ;;  %v1160_v14 = vstv %s7045_s11  ;;  %s7102_s11 = sld [smem:[#allocation2 + $0x76]] }
 0x1ac   :  { %v7058_v27 = vpop.permute.xlu1 %1109  ;;  %v9878_v9 = vstv %s7093_s20 }
 0x1ad   :  { %10049 = vst [vmem:[#allocation82_spill] sm:$0xff] %v7058_v27  ;;  %v7061_v59 = vpop.permute.xlu0 %1642  ;;  %v1161_v27 = vmul.f32 %v6997_v10, %v1160_v14 }
 0x1ae   :  { %10050 = vst [vmem:[#allocation83_spill] sm:$0xff] %v7061_v59  ;;  %1594 = vrot.lane.b32.xlu1 %v1592_v11, %s9960_s9  ;;  %v1914_v11 = vmul.f32 %v6917_v6, %v1807_v34  ;;  %v1598_v59 = vstv %s7056_s21  ;;  %s7166_s21 = sld [smem:[#allocation2 + $0x89]] }
 0x1af   :  { %1476 = vrot.lane.b32.xlu0 %v1474_v42, %s9968_s12 }
 0x1b0   :  { %v7070_v50 = vpop.permute.xlu1 %1547 }
 0x1b1   :  { %10051 = vst [vmem:[#allocation84_spill] sm:$0xff] %v7070_v50  ;;  %v7072_v1 = vpop.permute.xlu0 %1208  ;;  %v1599_v50 = vmul.f32 %v6947_v30, %v1598_v59 }
 0x1b2   :  { %1817 = vrot.lane.b32.xlu1 %v1815_v61, %s9968_s12  ;;  %v1258_v61 = vmul.f32 %v6997_v10, %v1153_v58 }
 0x1b3   :  { %1694 = vrot.lane.b32.xlu0 %v1692_v40, %s9960_s9 }
 0x1b4   :  { %v7081_v42 = vpop.permute.xlu1 %992 }
 0x1b5   :  { %10052 = vst [vmem:[#allocation85_spill] sm:$0xff] %v7081_v42  ;;  %v7083_v26 = vpop.permute.xlu0 %1648 }
 0x1b6   :  { %10053 = vst [vmem:[#allocation86_spill] sm:$0xff] %v7083_v26  ;;  %1163 = vrot.lane.b32.xlu1 %v1161_v27, %s9968_s12  ;;  %v1920_v27 = vmul.f32 %v6967_v45, %v1814_v51  ;;  %v1382_v26 = vstv %s7079_s30  ;;  %v7114_v51 = vld [vmem:[%s9776_s4 + $0x38] sm:$0xff]  ;;  %s7134_s30 = sld [smem:[#allocation2 + $0x98]] }
 0x1b7   :  { %1916 = vrot.lane.b32.xlu0 %v1914_v11, %s9968_s12  ;;  %v1698_v11 = vmul.f32 %v6947_v30, %v1591_v49  ;;  %v1383_v63 = vmul.f32 %v6997_v10, %v1382_v26  ;;  %v1264_v49 = vmul.f32 %v7114_v51, %v1160_v14 }
 0x1b8   :  { %v7091_v40 = vpop.permute.xlu1 %1331 }
 0x1b9   :  { %10054 = vst [vmem:[#allocation87_spill] sm:$0xff] %v7091_v40  ;;  %v7095_v34 = vpop.permute.xlu0 %1214 }
 0x1ba   :  { %1601 = vrot.lane.b32.xlu1 %v1599_v50, %s9960_s9  ;;  %v1605_v50 = vstv %s7089_s16  ;;  %s7144_s16 = sld [smem:[#allocation2 + $0x77]] }
 0x1bb   :  { %1260 = vrot.lane.b32.xlu0 %v1258_v61, %s9968_s12 }
 0x1bc   :  { %v7104_v58 = vpop.permute.xlu1 %1554 }
 0x1bd   :  { %10055 = vst [vmem:[#allocation88_spill] sm:$0xff] %v7104_v58  ;;  %v7106_v40 = vpop.permute.xlu0 %1432 }
 0x1be   :  { %10056 = vst [vmem:[#allocation89_spill] sm:$0xff] %v7106_v40  ;;  %1922 = vrot.lane.b32.xlu1 %v1920_v27, %s9968_s12  ;;  %v1606_v27 = vmul.f32 %v7015_v20, %v1605_v50  ;;  %v1389_v40 = vstv %s7102_s11  ;;  %s7156_s11 = sld [smem:[#allocation2 + $0x99]] }
 0x1bf   :  { %1700 = vrot.lane.b32.xlu0 %v1698_v11, %s9960_s9  ;;  %v1482_v11 = vmul.f32 %v6997_v10, %v9878_v9 }
 0x1c0   :  { %v7118_v61 = vpop.permute.xlu1 %998 }
 0x1c1   :  { %10057 = vst [vmem:[#allocation90_spill] sm:$0xff] %v7118_v61  ;;  %v7121_v58 = vpop.permute.xlu0 %1654 }
 0x1c2   :  { %10058 = vst [vmem:[#allocation91_spill] sm:$0xff] %v7121_v58  ;;  %1385 = vrot.lane.b32.xlu1 %v1383_v63, %s9960_s9  ;;  %v1390_v63 = vmul.f32 %v7114_v51, %v1389_v40 }
 0x1c3   :  { %1266 = vrot.lane.b32.xlu0 %v1264_v49, %s9968_s12  ;;  %v1704_v49 = vmul.f32 %v7015_v20, %v1598_v59 }
 0x1c4   :  { %v7132_v14 = vpop.permute.xlu1 %1438 }
 0x1c5   :  { %10060 = vst [vmem:[#allocation93_spill] sm:$0xff] %v7132_v14  ;;  %v7136_v61 = vpop.permute.xlu0 %1338  ;;  %v9879_v14 = vstv %s7130_s17  ;;  %s7182_s17 = sld [smem:[#allocation2 + $0x88]] }
 0x1c6   :  { %10061 = vst [vmem:[#allocation94_spill] sm:$0xff] %v7136_v61  ;;  %1608 = vrot.lane.b32.xlu1 %v1606_v27, %s9968_s12  ;;  %v1710_v61 = vmul.f32 %v6947_v30, %v1605_v50  ;;  %v1488_v27 = vmul.f32 %v7114_v51, %v1382_v26 }
 0x1c7   :  { %1484 = vrot.lane.b32.xlu0 %v1482_v11, %s9960_s9  ;;  %v1827_v11 = vstv %s7134_s30  ;;  %s7177_s30 = sld [smem:[#allocation2 + $0x9a]] }
 0x1c8   :  { %v7142_v9 = vpop.permute.xlu1 %1776  ;;  %v1828_v50 = vmul.f32 %v7015_v20, %v1827_v11 }
 0x1c9   :  { %10062 = vst [vmem:[#allocation95_spill] sm:$0xff] %v7142_v9  ;;  %v7146_v58 = vpop.permute.xlu0 %1660 }
 0x1ca   :  { %10063 = vst [vmem:[#allocation96_spill] sm:$0xff] %v7146_v58  ;;  %1392 = vrot.lane.b32.xlu1 %v1390_v63, %s9960_s9  ;;  %v1928_v63 = vmul.f32 %v7015_v20, %v9879_v14  ;;  %v1834_v14 = vstv %s7156_s11  ;;  %s7209_s11 = sld [smem:[#allocation2 + $0x3c]] }
 0x1cb   :  { %1706 = vrot.lane.b32.xlu0 %v1704_v49, %s9968_s12  ;;  %v1396_v49 = vstv %s7144_s16  ;;  %10068 = sst [smem:[#allocation101_spill]] %s7182_s17 }
 0x1cc   :  { %v7153_v42 = vpop.permute.xlu1 %1004  ;;  %s7191_s16 = sld [smem:[#allocation2 + $0x8a]] }
 0x1cd   :  { %10064 = vst [vmem:[#allocation97_spill] sm:$0xff] %v7153_v42  ;;  %v7158_v59 = vpop.permute.xlu0 %1878  ;;  %v9881_v42 = vstv %s7182_s17  ;;  %s10086_s17 = sld [smem:[#allocation19_spill]] }
 0x1ce   :  { %10065 = vst [vmem:[#allocation98_spill] sm:$0xff] %v7158_v59  ;;  %1712 = vrot.lane.b32.xlu1 %v1710_v61, %s9968_s12  ;;  %v1494_v59 = vmul.f32 %v6997_v10, %v1389_v40  ;;  %v1397_v61 = vmul.f32 %v6997_v10, %v1396_v49  ;;  %v1835_v40 = vmul.f32 %v6947_v30, %v1834_v14 }
 0x1cf   :  { %1490 = vrot.lane.b32.xlu0 %v1488_v27, %s9960_s9 }
 0x1d0   :  { %v7168_v26 = vpop.permute.xlu1 %1222 }
 0x1d1   :  { %v7171_v9 = vpop.permute.xlu0 %1122 }
 0x1d2   :  { %10066 = vst [vmem:[#allocation99_spill] sm:$0xff] %v7171_v9  ;;  %1930 = vrot.lane.b32.xlu1 %v1928_v63, %s9960_s9  ;;  %v1934_v63 = vmul.f32 %v6947_v30, %v1827_v11  ;;  %v1500_v11 = vmul.f32 %v7114_v51, %v1396_v49 }
 0x1d3   :  { %1830 = vrot.lane.b32.xlu0 %v1828_v50, %s9960_s9  ;;  %v1618_v50 = vstv %s7166_s21  ;;  %s7218_s21 = sld [smem:[#allocation2 + $0x8b]] }
 0x1d4   :  { %v7179_v27 = vpop.permute.xlu1 %1444 }
 0x1d5   :  { %10067 = vst [vmem:[#allocation100_spill] sm:$0xff] %v7179_v27  ;;  %v7184_v58 = vpop.permute.xlu0 %1345 }
 0x1d6   :  { %10069 = vst [vmem:[#allocation102_spill] sm:$0xff] %v7184_v58  ;;  %1496 = vrot.lane.b32.xlu1 %v1494_v59, %s9968_s12  ;;  %v1619_v58 = vmul.f32 %v6997_v10, %v1618_v50  ;;  %v1841_v59 = vstv %s7177_s30  ;;  %s7226_s30 = sld [smem:[#allocation2 + $0x9d]] }
 0x1d7   :  { %1399 = vrot.lane.b32.xlu0 %v1397_v61, %s9968_s12 }
 0x1d8   :  { %v7193_v9 = vpop.permute.xlu1 %1884 }
 0x1d9   :  { %10070 = vst [vmem:[#allocation103_spill] sm:$0xff] %v7193_v9  ;;  %v7195_v27 = vpop.permute.xlu0 %1783  ;;  %v1842_v9 = vmul.f32 %v7015_v20, %v1841_v59 }
 0x1da   :  { %10071 = vst [vmem:[#allocation104_spill] sm:$0xff] %v7195_v27  ;;  %1936 = vrot.lane.b32.xlu1 %v1934_v63, %s9960_s9  ;;  %v1718_v63 = vmul.f32 %v6997_v10, %v9881_v42 }
 0x1db   :  { %1837 = vrot.lane.b32.xlu0 %v1835_v40, %s9960_s9  ;;  %v1625_v40 = vstv %s7191_s16  ;;  %s7236_s16 = sld [smem:[#allocation2 + $0x9e]] }
 0x1dc   :  { %v7202_v61 = vpop.permute.xlu1 %1228 }
 0x1dd   :  { %v7205_v25 = vpop.permute.xlu0 %1129 }
 0x1de   :  { %10072 = vst [vmem:[#allocation105_spill] sm:$0xff] %v7205_v25  ;;  %1621 = vrot.lane.b32.xlu1 %v1619_v58, %s9960_s9  ;;  %v1626_v58 = vmul.f32 %v7114_v51, %v1625_v40 }
 0x1df   :  { %1502 = vrot.lane.b32.xlu0 %v1500_v11, %s9968_s12  ;;  %v1940_v11 = vmul.f32 %v7015_v20, %v1834_v14 }
 0x1e0   :  { %v7216_v49 = vpop.permute.xlu1 %1567 }
 0x1e1   :  { %10073 = vst [vmem:[#allocation106_spill] sm:$0xff] %v7216_v49  ;;  %v7220_v27 = vpop.permute.xlu0 %1450  ;;  %v1946_v49 = vmul.f32 %v6947_v30, %v1841_v59  ;;  %v7251_v59 = vld [vmem:[%s9776_s4] sm:$0xff] }
 0x1e2   :  { %10074 = vst [vmem:[#allocation107_spill] sm:$0xff] %v7220_v27  ;;  %1844 = vrot.lane.b32.xlu1 %v1842_v9, %s9968_s12  ;;  %v1724_v9 = vmul.f32 %v7114_v51, %v1618_v50  ;;  %v1632_v27 = vstv %s7218_s21  ;;  %s7315_s21 = sld [smem:[#allocation6 + $0x2]] }
 0x1e3   :  { %1720 = vrot.lane.b32.xlu0 %v1718_v63, %s9960_s9  ;;  %v824_v63 = vstv %s7209_s11  ;;  %s7366_s11 = sld [smem:[#allocation2 + $0x55]] }
 0x1e4   :  { %v7228_v42 = vpop.permute.xlu1 %1790  ;;  %v825_v50 = vmul.f32 %v7251_v59, %v824_v63 }
 0x1e5   :  { %10075 = vst [vmem:[#allocation108_spill] sm:$0xff] %v7228_v42  ;;  %v7230_v25 = vpop.permute.xlu0 %1668 }
 0x1e6   :  { %10076 = vst [vmem:[#allocation109_spill] sm:$0xff] %v7230_v25  ;;  %1628 = vrot.lane.b32.xlu1 %v1626_v58, %s9960_s9  ;;  %v1730_v58 = vmul.f32 %v6997_v10, %v1625_v40  ;;  %v10080_v25 = vstv %s6100_s10  ;;  %v1633_v40 = vmul.f32 %v6997_v10, %v1632_v27  ;;  %s7276_s10 = sld [smem:[#allocation2 + $0x41]] }
 0x1e7   :  { %1942 = vrot.lane.b32.xlu0 %v1940_v11, %s9968_s12  ;;  %v7257_v11 = vld [vmem:[%s9776_s4 + $0x8] sm:$0xff] }
 0x1e8   :  { %v7239_v14 = vpop.permute.xlu1 %1012 }
 0x1e9   :  { %10077 = vst [vmem:[#allocation110_spill] sm:$0xff] %v7239_v14  ;;  %v7244_v42 = vpop.permute.xlu0 %1890 }
 0x1ea   :  { %10079 = vst [vmem:[#allocation112_spill] sm:$0xff] %v7244_v42  ;;  %1948 = vrot.lane.b32.xlu1 %v1946_v49, %s9968_s12  ;;  %v827_v42 = vmul.f32 %v7257_v11, %v10080_v25  ;;  %v1854_v49 = vstv %s7226_s30  ;;  %v1736_v25 = vmul.f32 %v7114_v51, %v1632_v27  ;;  %v1868_v27 = vstv %s7265_s25  ;;  %s7317_s30 = sld [smem:[#allocation2 + $0x50]] }
 0x1eb   :  { %1726 = vrot.lane.b32.xlu0 %v1724_v9, %s9960_s9  ;;  %v1855_v52 = vmul.f32 %v6997_v10, %v1854_v49  ;;  %v1861_v9 = vstv %s7236_s16  ;;  %s7364_s16 = sld [smem:[#allocation6 + $0x32]] }
 0x1ec   :  { %v7267_v14 = vpop.permute.xlu1 %1234  ;;  %v828_v24 = vadd.f32 %v827_v42, %v825_v50  ;;  %v1954_v42 = vmul.f32 %v6997_v10, %v9886_v56  ;;  %s10094_s25 = sld [smem:[#allocation12_spill]] }
 0x1ed   :  { %10081 = vst [vmem:[#allocation113_spill] sm:$0xff] %v7267_v14  ;;  %v7269_v5 = vpop.permute.xlu0 %1136 }
 0x1ee   :  { %10082 = vst [vmem:[#allocation114_spill] sm:$0xff] %v7269_v5  ;;  %1732 = vrot.lane.b32.xlu1 %v1730_v58, %s9968_s12  ;;  %v1862_v58 = vmul.f32 %v7114_v51, %v1861_v9  ;;  %v835_v5 = vadd.f32 %v6721_v36, %v828_v24  ;;  %v1960_v24 = vmul.f32 %v7114_v51, %v1854_v49  ;;  %v9887_v36 = vstv %s7276_s10 }
 0x1ef   :  { %1635 = vrot.lane.b32.xlu0 %v1633_v40, %s9968_s12  ;;  %v1966_v49 = vmul.f32 %v6997_v10, %v1861_v9  ;;  %v10089_v9 = vstv %s6127_s1  ;;  %s10092_s1 = sld [smem:[#allocation20_spill]] }
 0x1f0   :  { %v7278_v35 = vpop.permute.xlu1 %1674 }
 0x1f1   :  { %v7281_v14 = vpop.permute.xlu0 %1574 }
 0x1f2   :  { %10083 = vst [vmem:[#allocation115_spill] sm:$0xff] %v7281_v14  ;;  %1857 = vrot.lane.b32.xlu1 %v1855_v52, %s9960_s9  ;;  %v1869_v14 = vmul.f32 %v6997_v10, %v1868_v27  ;;  %v842_v52 = vadd.f32 %v6716_v38, %v835_v5  ;;  %v851_v38 = vmul.f32 %v6917_v6, %v9887_v36 }
 0x1f3   :  { %1738 = vrot.lane.b32.xlu0 %v1736_v25, %s9968_s12 }
 0x1f4   :  { %v7291_v50 = vpop.permute.xlu1 %1018  ;;  %v849_v5 = vadd.f32 %v6738_v57, %v842_v52  ;;  %v2112_v52 = vmul.f32 %v10089_v9, %v6229_v13 }
 0x1f5   :  { %v7293_v40 = vpop.permute.xlu0 %1896 }
 0x1f6   :  { %10084 = vst [vmem:[#allocation116_spill] sm:$0xff] %v7293_v40  ;;  %1864 = vrot.lane.b32.xlu1 %v1862_v58, %s9960_s9  ;;  %v1972_v40 = vmul.f32 %v7114_v51, %v1868_v27  ;;  %v10088_v27 = vstv %s6278_s6  ;;  %s7341_s6 = sld [smem:[#allocation2 + $0x46]] }
 0x1f7   :  { %1956 = vrot.lane.b32.xlu0 %v1954_v42, %s9960_s9  ;;  %v852_v42 = vadd.f32 %v851_v38, %v849_v5  ;;  %v854_v36 = vmul.f32 %v6967_v45, %v10088_v27  ;;  %v2259_v38 = vstv %s4972_s29  ;;  %s7417_s29 = sld [smem:[#allocation6 + $0x1d]] }
 0x1f8   :  { %v7301_v25 = vpop.permute.xlu1 %1358  ;;  %v2364_v9 = vmul.f32 %v2259_v38, %v6231_v15 }
 0x1f9   :  { %10085 = vst [vmem:[#allocation117_spill] sm:$0xff] %v7301_v25  ;;  %v7303_v56 = vpop.permute.xlu0 %1240  ;;  %v855_v5 = vadd.f32 %v854_v36, %v852_v42 }
 0x1fa   :  { %1871 = vrot.lane.b32.xlu1 %v1869_v14, %s9968_s12 }
 0x1fb   :  { %1962 = vrot.lane.b32.xlu0 %v1960_v24, %s9960_s9 }
 0x1fc   :  { %v7313_v58 = vpop.permute.xlu1 %1581 }
 0x1fd   :  { %10087 = vst [vmem:[#allocation118_spill] sm:$0xff] %v7313_v58  ;;  %v7319_v14 = vpop.permute.xlu0 %1458  ;;  %v10091_v58 = vstv %s10086_s17  ;;  %s7430_s17 = sld [smem:[#allocation2 + $0x5a]] }
 0x1fe   :  { %1974 = vrot.lane.b32.xlu1 %v1972_v40, %s9968_s12  ;;  %v2358_v25 = vmul.f32 %v10091_v58, %v6229_v13  ;;  %v931_v40 = vmul.f32 %v7257_v11, %v824_v63  ;;  %v2260_v63 = vmul.f32 %v2259_v38, %v6229_v13 }
 0x1ff   :  { %1968 = vrot.lane.b32.xlu0 %v1966_v49, %s9968_s12  ;;  %v444_v49 = vadd.f32 %v6276_v32, %v6389_v4  ;;  %s7356_s12 = sld [smem:[#allocation6 + $0x4a]]  ;;  %v862_v32 = vadd.f32 %v6733_v23, %v855_v5 }
 0x200   :  { %v7326_v57 = vpop.permute.xlu1 %1024  ;;  %v937_v36 = vadd.f32 %v6865_v3, %v931_v40  ;;  %v10093_v40 = vstv %s6130_s5  ;;  %s10096_s5 = sld [smem:[#allocation39_spill]] }
 0x201   :  { %v7331_v24 = vpop.permute.xlu0 %1680  ;;  %v451_v4 = vadd.f32 %v6319_v55, %v444_v49  ;;  %v869_v55 = vadd.f32 %v6760_v16, %v862_v32 }
 0x202   :  { %10090 = vst [vmem:[#allocation119_spill] sm:$0xff] %v7331_v24  ;;  %2114 = vrot.lane.b32.xlu1 %v2112_v52, %s9960_s9  ;;  %v9888_v24 = vstv %s7317_s30  ;;  %v2013_v52 = vstv %s7315_s21  ;;  %v943_v23 = vadd.f32 %v6862_v31, %v937_v36  ;;  %v10095_v31 = vstv %s10092_s1  ;;  %s7437_s21 = sld [smem:[#allocation2 + $0x4b]] }
 0x203   :  { %2360 = vrot.lane.b32.xlu0 %v2358_v25, %s9960_s9  ;;  %v1167_v25 = vmul.f32 %v7257_v11, %v9888_v24  ;;  %v2014_v38 = vmul.f32 %v2013_v52, %v6229_v13  ;;  %v458_v49 = vadd.f32 %v6309_v48, %v451_v4  ;;  %v2604_v36 = vmul.f32 %v10095_v31, %v6229_v13  ;;  %s7454_s1 = sld [smem:[#allocation6 + $0x4d]] }
 0x204   :  { %v7343_v27 = vpop.permute.xlu1 %1464  ;;  %v949_v16 = vadd.f32 %v6876_v62, %v943_v23  ;;  %v9890_v23 = vstv %s7366_s11 }
 0x205   :  { %v7347_v58 = vpop.permute.xlu0 %1365  ;;  %v1173_v5 = vadd.f32 %v6928_v54, %v1167_v25  ;;  %v2118_v25 = vmul.f32 %v2013_v52, %v6231_v15  ;;  %v2751_v48 = vstv %s7356_s12  ;;  %s10102_s12 = sld [smem:[#allocation17_spill]] }
 0x206   :  { %2366 = vrot.lane.b32.xlu1 %v2364_v9, %s9960_s9  ;;  %v2850_v9 = vmul.f32 %v10093_v40, %v6229_v13  ;;  %v2856_v62 = vmul.f32 %v2751_v48, %v6231_v15 }
 0x207   :  { %2262 = vrot.lane.b32.xlu0 %v2260_v63, %s9960_s9  ;;  %v9889_v63 = vstv %s7341_s6  ;;  %v1179_v24 = vadd.f32 %v6941_v18, %v1173_v5  ;;  %v876_v18 = vadd.f32 %v6755_v7, %v869_v55  ;;  %v2505_v5 = vstv %s7364_s16  ;;  %s7479_s16 = sld [smem:[#allocation6 + $0x20]] }
 0x208   :  { %v7361_v42 = vpop.permute.xlu1 %1803  ;;  %v878_v4 = vmul.f32 %v7015_v20, %v9889_v63  ;;  %v955_v7 = vadd.f32 %v6873_v21, %v949_v16  ;;  %v10098_v55 = vstv %s7276_s10  ;;  %s7428_s10 = sld [smem:[#allocation6 + $0x5]] }
 0x209   :  { %v7368_v3 = vpop.permute.xlu0 %1686  ;;  %v1185_v32 = vadd.f32 %v6959_v22, %v1179_v24  ;;  %v2752_v24 = vmul.f32 %v2751_v48, %v6229_v13  ;;  %v956_v31 = vmul.f32 %v6967_v45, %v10098_v55  ;;  %v2506_v48 = vmul.f32 %v2505_v5, %v6229_v13 }
 0x20a   :  { %2016 = vrot.lane.b32.xlu1 %v2014_v38, %s9960_s9  ;;  %v10097_v38 = vstv %s10094_s25  ;;  %v10100_v55 = vstv %s6477_s3  ;;  %s7457_s3 = sld [smem:[#allocation2 + $0x64]] }
 0x20b   :  { %2852 = vrot.lane.b32.xlu0 %v2850_v9, %s9960_s9  ;;  %v564_v9 = vadd.f32 %v10097_v38, %v458_v49  ;;  %v1192_v49 = vmul.f32 %v6967_v45, %v9890_v23  ;;  %v10099_v38 = vstv %s10096_s5  ;;  %s7491_s25 = sld [smem:[#allocation6 + $0x50]] }
 0x20c   :  { %v7381_v40 = vpop.permute.xlu1 %1030  ;;  %v881_v63 = vmul.f32 %v6947_v30, %v10099_v38  ;;  %s7498_s5 = sld [smem:[#allocation2 + $0x5f]] }
 0x20d   :  { %v7386_v54 = vpop.permute.xlu0 %1904  ;;  %v7423_v21 = vmax.f32 %v564_v9, 0.0 }
 0x20e   :  { %2606 = vrot.lane.b32.xlu1 %v2604_v36, %s9960_s9  ;;  %v1191_v36 = vadd.f32 %v6955_v0, %v1185_v32  ;;  %v2610_v0 = vmul.f32 %v2505_v5, %v6231_v15  ;;  %v10101_v5 = vstv %s6471_s15  ;;  %s7467_s15 = sld [smem:[#allocation6 + $0x35]] }
 0x20f   :  { %2120 = vrot.lane.b32.xlu0 %v2118_v25, %s9960_s9  ;;  %v879_v25 = vadd.f32 %v878_v4, %v876_v18  ;;  %v957_v18 = vadd.f32 %v956_v31, %v955_v7  ;;  %v2126_v38 = vmul.f32 %v10100_v55, %v7423_v21  ;;  %v2372_v7 = vmul.f32 %v10101_v5, %v7423_v21 }
 0x210   :  { %v7400_v52 = vpop.permute.xlu1 %1248  ;;  %v1193_v4 = vadd.f32 %v1192_v49, %v1191_v36  ;;  %v680_v49 = vadd.f32 %v6561_v41, %v6642_v53  ;;  %v904_v5 = vstv %s7437_s21  ;;  %s7675_s21 = sld [smem:[#allocation6 + $0x85]] }
 0x211   :  { %v7404_v22 = vpop.permute.xlu0 %1149  ;;  %v882_v9 = vadd.f32 %v881_v63, %v879_v25  ;;  %v963_v63 = vadd.f32 %v6888_v43, %v957_v18  ;;  %v10104_v18 = vstv %s10102_s12  ;;  %s7554_s12 = sld [smem:[#allocation2 + $0x78]] }
 0x212   :  { %2858 = vrot.lane.b32.xlu1 %v2856_v62, %s9960_s9  ;;  %v1199_v62 = vadd.f32 %v7004_v2, %v1193_v4  ;;  %v2272_v2 = vstv %s7417_s29  ;;  %v1063_v4 = vmul.f32 %v7257_v11, %v10104_v18  ;;  %s7519_s29 = sld [smem:[#allocation4 + $0x3]] }
 0x213   :  { %2754 = vrot.lane.b32.xlu0 %v2752_v24, %s9960_s9  ;;  %v889_v36 = vadd.f32 %v6779_v39, %v882_v9  ;;  %v1113_v9 = vstv %s7430_s17  ;;  %v2273_v41 = vmul.f32 %v2272_v2, %v7423_v21  ;;  %v969_v53 = vadd.f32 %v6884_v33, %v963_v63  ;;  %s7663_s17 = sld [smem:[#allocation6 + $0x3d]] }
 0x214   :  { %v7425_v16 = vpop.permute.xlu1 %1470  ;;  %v1205_v31 = vadd.f32 %v7033_v37, %v1199_v62  ;;  %v2378_v37 = vmul.f32 %v2272_v2, %v6520_v29  ;;  %v1218_v55 = vmul.f32 %v6947_v30, %v1113_v9  ;;  %v687_v33 = vadd.f32 %v6600_v17, %v680_v49 }
 0x215   :  { %v7432_v32 = vpop.permute.xlu0 %1372  ;;  %v905_v17 = vmul.f32 %v6997_v10, %v904_v5 }
 0x216   :  { %2612 = vrot.lane.b32.xlu1 %v2610_v0, %s9960_s9  ;;  %v1211_v43 = vadd.f32 %v7072_v1, %v1205_v31  ;;  %v2026_v0 = vstv %s7428_s10  ;;  %s7527_s10 = sld [smem:[#allocation2 + $0x69]] }
 0x217   :  { %2508 = vrot.lane.b32.xlu0 %v2506_v48, %s9960_s9  ;;  %v10103_v48 = vstv %s7317_s30  ;;  %s7487_s30 = sld [smem:[#allocation6 + $0x8]] }
 0x218   :  { %v7440_v24 = vpop.permute.xlu1 %1910  ;;  %v1061_v39 = vmul.f32 %v7251_v59, %v10103_v48  ;;  %v1217_v1 = vadd.f32 %v7095_v34, %v1211_v43  ;;  %v2764_v48 = vstv %s7454_s1  ;;  %s10112_s1 = sld [smem:[#allocation16_spill]] }
 0x219   :  { %v7445_v23 = vpop.permute.xlu0 %1810  ;;  %10136 = sst [smem:[#allocation19_spill]] %s7675_s21 }
 0x21a   :  { %2128 = vrot.lane.b32.xlu1 %v2126_v38, %s9960_s9  ;;  %v896_v38 = vadd.f32 %v6775_v19, %v889_v36  ;;  %v1064_v63 = vadd.f32 %v1063_v4, %v1061_v39  ;;  %v10105_v19 = vstv %s6493_s19  ;;  %v975_v36 = vadd.f32 %v6899_v28, %v969_v53  ;;  %s7514_s19 = sld [smem:[#allocation6 + $0x38]] }
 0x21b   :  { %2374 = vrot.lane.b32.xlu0 %v2372_v7, %s9960_s9  ;;  %v2027_v7 = vmul.f32 %v2026_v0, %v7423_v21  ;;  %v2864_v2 = vmul.f32 %v10105_v19, %v7423_v21  ;;  %v1219_v43 = vadd.f32 %v1218_v55, %v1217_v1  ;;  %v694_v39 = vadd.f32 %v6590_v8, %v687_v33 }
 0x21c   :  { %v7463_v25 = vpop.permute.xlu1 %1254  ;;  %v903_v49 = vadd.f32 %v6815_v44, %v896_v38  ;;  %v10107_v44 = vstv %s6495_s24  ;;  %v2132_v8 = vmul.f32 %v2026_v0, %v6520_v29  ;;  %v2518_v1 = vstv %s7467_s15  ;;  %s7541_s24 = sld [smem:[#allocation6 + $0x22]] }
 0x21d   :  { %v7476_v62 = vpop.permute.xlu0 %1156  ;;  %v1225_v18 = vadd.f32 %v7168_v26, %v1219_v43  ;;  %v2618_v4 = vmul.f32 %v10107_v44, %v7423_v21  ;;  %v2285_v26 = vstv %s7479_s16  ;;  %v981_v55 = vadd.f32 %v6897_v47, %v975_v36  ;;  %s7603_s15 = sld [smem:[#allocation4 + $0x4]] }
 0x21e   :  { %2380 = vrot.lane.b32.xlu1 %v2378_v37, %s9960_s9  ;;  %v1296_v37 = vstv %s7457_s3  ;;  %v10108_v38 = vstv %s7341_s6  ;;  %v10109_v19 = vstv %s6773_s7  ;;  %s7549_s6 = sld [smem:[#allocation6 + $0xa]] }
 0x21f   :  { %2275 = vrot.lane.b32.xlu0 %v2273_v41, %s9960_s9  ;;  %v1403_v28 = vmul.f32 %v7257_v11, %v1296_v37  ;;  %v1071_v41 = vadd.f32 %v6906_v12, %v1064_v63  ;;  %v982_v33 = vmul.f32 %v6947_v30, %v10108_v38  ;;  %v906_v63 = vadd.f32 %v905_v17, %v903_v49  ;;  %s7583_s7 = sld [smem:[#allocation2 + $0x7d]] }
 0x220   :  { %v7495_v34 = vpop.permute.xlu1 %1594  ;;  %v908_v0 = vmul.f32 %v7114_v51, %v10109_v19  ;;  %v10113_v44 = vstv %s7366_s11  ;;  %v9891_v38 = vstv %s7498_s5  ;;  %v10115_v19 = vld [vmem:[#allocation73_spill] sm:$0xff]  ;;  %s7593_s11 = sld [smem:[#allocation2 + $0x8c]] }
 0x221   :  { %v7500_v31 = vpop.permute.xlu0 %1476  ;;  %v1409_v43 = vadd.f32 %v6970_v46, %v1403_v28  ;;  %v2765_v46 = vmul.f32 %v2764_v48, %v7423_v21  ;;  %v983_v28 = vadd.f32 %v982_v33, %v981_v55  ;;  %v10118_v33 = vld [vmem:[#allocation76_spill] sm:$0xff]  ;;  %s7599_s3 = sld [smem:[#allocation2 + $0x6e]] }
 0x222   :  { %2029 = vrot.lane.b32.xlu1 %v2027_v7, %s9960_s9  ;;  %v1231_v7 = vadd.f32 %v7202_v61, %v1225_v18  ;;  %v10110_v61 = vstv %s6712_s22  ;;  %v10111_v18 = vld [vmem:[#allocation113_spill] sm:$0xff]  ;;  %s10116_s22 = sld [smem:[#allocation18_spill]] }
 0x223   :  { %2866 = vrot.lane.b32.xlu0 %v2864_v2, %s9960_s9  ;;  %v1078_v2 = vadd.f32 %v6926_v60, %v1071_v41  ;;  %v800_v36 = vadd.f32 %v10110_v61, %v694_v39  ;;  %v2870_v60 = vmul.f32 %v2764_v48, %v6520_v29  ;;  %v10114_v41 = vld [vmem:[#allocation70_spill] sm:$0xff]  ;;  %v1415_v61 = vadd.f32 %v10115_v19, %v1409_v43  ;;  %s7682_s16 = sld [smem:[#allocation6 + $0x6d]] }
 0x224   :  { %v7521_v10 = vpop.permute.xlu1 %1817  ;;  %v1237_v17 = vadd.f32 %v10111_v18, %v1231_v7  ;;  %v1244_v18 = vmul.f32 %v7114_v51, %v9891_v38  ;;  %v1322_v19 = vstv %s7527_s10  ;;  %s7690_s10 = sld [smem:[#allocation6 + $0xb5]] }
 0x225   :  { %10106 = vst [vmem:[#allocation120_spill] sm:$0xff] %v7521_v10  ;;  %v7529_v53 = vpop.permute.xlu0 %1694  ;;  %v7580_v55 = vmax.f32 %v800_v36, 0.0  ;;  %v1421_v43 = vadd.f32 %v10118_v33, %v1415_v61  ;;  %v10120_v61 = vld [vmem:[#allocation69_spill] sm:$0xff]  ;;  %v10121_v33 = vld [vmem:[#allocation81_spill] sm:$0xff]  ;;  %v1428_v48 = vmul.f32 %v6967_v45, %v1322_v19 }
 0x226   :  { %2620 = vrot.lane.b32.xlu1 %v2618_v4, %s9960_s9  ;;  %v1087_v4 = vmul.f32 %v6917_v6, %v10113_v44  ;;  %v1243_v7 = vadd.f32 %v7303_v56, %v1237_v17  ;;  %v909_v44 = vadd.f32 %v908_v0, %v906_v63 }
 0x227   :  { %2134 = vrot.lane.b32.xlu0 %v2132_v8, %s9960_s9  ;;  %v1085_v8 = vadd.f32 %v10114_v41, %v1078_v2  ;;  %v1297_v2 = vmul.f32 %v7251_v59, %v1296_v37  ;;  %v10117_v41 = vstv %s10112_s1  ;;  %v1427_v38 = vadd.f32 %v10121_v33, %v1421_v43  ;;  %s7706_s1 = sld [smem:[#allocation6 + $0x9d]] }
 0x228   :  { %v7557_v49 = vpop.permute.xlu1 %1163  ;;  %v1299_v47 = vmul.f32 %v7257_v11, %v10117_v41  ;;  %v10119_v0 = vstv %s10116_s22  ;;  %v989_v41 = vadd.f32 %v10120_v61, %v983_v28  ;;  %v9892_v43 = vstv %s7554_s12  ;;  %v10123_v61 = vld [vmem:[#allocation85_spill] sm:$0xff]  ;;  %s8049_s22 = sld [smem:[#allocation6 + $0xe]] }
 0x229   :  { %v7565_v39 = vpop.permute.xlu0 %1916  ;;  %v1088_v63 = vadd.f32 %v1087_v4, %v1085_v8  ;;  %v1090_v37 = vmul.f32 %v6967_v45, %v10119_v0  ;;  %v1245_v4 = vadd.f32 %v1244_v18, %v1243_v7  ;;  %v10122_v8 = vld [vmem:[#allocation61_spill] sm:$0xff]  ;;  %v10124_v18 = vstv %s6727_s13  ;;  %s7633_s13 = sld [smem:[#allocation6 + $0x25]] }
 0x22a   :  { %2872 = vrot.lane.b32.xlu1 %v2870_v60, %s9960_s9  ;;  %v2624_v60 = vmul.f32 %v2518_v1, %v6520_v29  ;;  %v916_v0 = vadd.f32 %v10122_v8, %v909_v44  ;;  %v1300_v56 = vadd.f32 %v1299_v47, %v1297_v2  ;;  %v995_v33 = vadd.f32 %v10123_v61, %v989_v41  ;;  %v10126_v61 = vld [vmem:[#allocation90_spill] sm:$0xff]  ;;  %10139 = sst [smem:[#allocation20_spill]] %s7682_s16 }
 0x22b   :  { %2767 = vrot.lane.b32.xlu0 %v2765_v46, %s9960_s9  ;;  %v2519_v46 = vmul.f32 %v2518_v1, %v7423_v21  ;;  %v1251_v12 = vadd.f32 %v7400_v52, %v1245_v4  ;;  %v2140_v44 = vmul.f32 %v10124_v18, %v7580_v55  ;;  %v7617_v47 = vmul.f32 %v6917_v6, %v1322_v19  ;;  %v10127_v6 = vld [vmem:[#allocation66_spill] sm:$0xff]  ;;  %10142 = sst [smem:[#allocation12_spill]] %s7690_s10 }
 0x22c   :  { %v7586_v17 = vpop.permute.xlu1 %1601  ;;  %v1639_v2 = vmul.f32 %v7257_v11, %v9892_v43  ;;  %v10125_v41 = vstv %s6723_s26  ;;  %v1114_v52 = vmul.f32 %v7015_v20, %v1113_v9  ;;  %v1429_v4 = vadd.f32 %v1428_v48, %v1427_v38  ;;  %v10128_v19 = vld [vmem:[#allocation75_spill] sm:$0xff]  ;;  %s7646_s26 = sld [smem:[#allocation6 + $0xd]] }
 0x22d   :  { %v1261_v36 = vpop.permute.xlu0 %1260  ;;  %v2386_v8 = vmul.f32 %v10125_v41, %v7580_v55  ;;  %v1001_v1 = vadd.f32 %v10126_v61, %v995_v33  ;;  %v10129_v41 = vstv %s6682_s18  ;;  %v1008_v9 = vmul.f32 %v7114_v51, %v904_v5  ;;  %v10131_v38 = vld [vmem:[#allocation97_spill] sm:$0xff]  ;;  %s7655_s18 = sld [smem:[#allocation6 + $0x55]]  ;;  %v10133_v5 = vld [vmem:[#allocation79_spill] sm:$0xff] }
 0x22e   :  { %2626 = vrot.lane.b32.xlu1 %v2624_v60, %s9960_s9  ;;  %v1091_v60 = vadd.f32 %v1090_v37, %v1088_v63  ;;  %v1257_v63 = vadd.f32 %v7463_v25, %v1251_v12  ;;  %v923_v37 = vadd.f32 %v10127_v6, %v916_v0  ;;  %v7640_v20 = vmul.f32 %v6947_v30, %v10129_v41  ;;  %v10130_v25 = vld [vmem:[#allocation89_spill] sm:$0xff]  ;;  %10146 = sst [smem:[#allocation39_spill]] %s7706_s1 }
 0x22f   :  { %2521 = vrot.lane.b32.xlu0 %v2519_v46, %s9960_s9  ;;  %v1435_v12 = vadd.f32 %v10130_v25, %v1429_v4  ;;  %v1007_v48 = vadd.f32 %v10131_v38, %v1001_v1  ;;  %v2286_v4 = vmul.f32 %v2285_v26, %v7580_v55  ;;  %v9894_v43 = vstv %s7603_s15 }
 0x230   :  { %v7611_v7 = vpop.permute.xlu1 %1922  ;;  %v1098_v18 = vadd.f32 %v10128_v19, %v1091_v60  ;;  %v1263_v0 = vadd.f32 %v1261_v36, %v1257_v63  ;;  %v10134_v36 = vld [vmem:[#allocation93_spill] sm:$0xff] }
 0x231   :  { %v7622_v46 = vpop.permute.xlu0 %1700  ;;  %v1441_v1 = vadd.f32 %v10134_v36, %v1435_v12  ;;  %v9895_v36 = vstv %s7599_s3 }
 0x232   :  { %2142 = vrot.lane.b32.xlu1 %v2140_v44, %s9960_s9  ;;  %v10132_v44 = vld [vmem:[#allocation55_spill] sm:$0xff]  ;;  %v1105_v61 = vadd.f32 %v10133_v5, %v1098_v18  ;;  %v10135_v18 = vstv %s7487_s30  ;;  %v10138_v5 = vld [vmem:[#allocation82_spill] sm:$0xff] }
 0x233   :  { %2388 = vrot.lane.b32.xlu0 %v2386_v8, %s9960_s9  ;;  %v2392_v60 = vmul.f32 %v2285_v26, %v10132_v44  ;;  %v9893_v8 = vstv %s7583_s7  ;;  %v2040_v25 = vmul.f32 %v10135_v18, %v7580_v55  ;;  %v10137_v26 = vld [vmem:[#allocation64_spill] sm:$0xff]  ;;  %v1009_v18 = vadd.f32 %v1008_v9, %v1007_v48 }
 0x234   :  { %v7650_v33 = vpop.permute.xlu1 %1385  ;;  %v7669_v63 = vmul.f32 %v6967_v45, %v9893_v8  ;;  %v930_v38 = vadd.f32 %v10137_v26, %v923_v37  ;;  %v1112_v12 = vadd.f32 %v10138_v5, %v1105_v61  ;;  %v10140_v45 = vld [vmem:[#allocation72_spill] sm:$0xff]  ;;  %v1454_v37 = vmul.f32 %v6947_v30, %v9895_v36  ;;  %v10149_v30 = vld [vmem:[#allocation110_spill] sm:$0xff] }
 0x235   :  { %v1267_v19 = vpop.permute.xlu0 %1266  ;;  %v10145_v48 = vstv %s7491_s25 }
 0x236   :  { %v1269_v41 = vadd.f32 %v1267_v19, %v1263_v0  ;;  %2394 = vrot.lane.b32.xlu1 %v2392_v60, %s9960_s9  ;;  %v1307_v0 = vadd.f32 %v10140_v45, %v1300_v56  ;;  %v10141_v60 = vld [vmem:[#allocation100_spill] sm:$0xff]  ;;  %v10144_v56 = vstv %s6740_s14  ;;  %v10148_v45 = vld [vmem:[#allocation107_spill] sm:$0xff]  ;;  %s7766_s14 = sld [smem:[#allocation6 + $0x23]] }
 0x237   :  { %2288 = vrot.lane.b32.xlu0 %v2286_v4, %s9960_s9  ;;  %v1447_v19 = vadd.f32 %v10141_v60, %v1441_v1  ;;  %v10143_v4 = vstv %s6736_s28  ;;  %v2632_v9 = vmul.f32 %v10144_v56, %v7580_v55  ;;  %v2778_v1 = vmul.f32 %v10145_v48, %v7580_v55  ;;  %v10150_v56 = vld [vmem:[#allocation83_spill] sm:$0xff]  ;;  %s7730_s28 = sld [smem:[#allocation2 + $0x73]] }
 0x238   :  { %v1274_v8 = vadd.f32 %v9894_v43, %v1269_v41  ;;  %v7688_v28 = vpop.permute.xlu1 %1608  ;;  %v2878_v26 = vmul.f32 %v10143_v4, %v7580_v55  ;;  %v10147_v41 = vld [vmem:[#allocation74_spill] sm:$0xff]  ;;  %v1015_v43 = vadd.f32 %v10149_v30, %v1009_v18  ;;  %v1115_v4 = vadd.f32 %v1114_v52, %v1112_v12  ;;  %v10153_v18 = vld [vmem:[#allocation77_spill] sm:$0xff] }
 0x239   :  { %v7695_v61 = vpop.permute.xlu0 %1484  ;;  %v1314_v5 = vadd.f32 %v10147_v41, %v1307_v0  ;;  %v1453_v60 = vadd.f32 %v10148_v45, %v1447_v19  ;;  %v1645_v6 = vadd.f32 %v10150_v56, %v1639_v2  ;;  %v10151_v48 = vstv %s7487_s30  ;;  %v10155_v52 = vld [vmem:[#allocation86_spill] sm:$0xff]  ;;  %s7773_s30 = sld [smem:[#allocation6 + $0x52]] }
 0x23a   :  { %v7711_v36 = vmax.f32 %v1274_v8, 0.0  ;;  %2042 = vrot.lane.b32.xlu1 %v2040_v25, %s9960_s9  ;;  %v2146_v10 = vmul.f32 %v10151_v48, %v10132_v44  ;;  %v10152_v0 = vstv %s7491_s25  ;;  %v1021_v41 = vadd.f32 %v7291_v50, %v1015_v43  ;;  %s7785_s25 = sld [smem:[#allocation6 + $0xb]] }
 0x23b   :  { %2880 = vrot.lane.b32.xlu0 %v2878_v26, %s9960_s9  ;;  %v2884_v19 = vmul.f32 %v10152_v0, %v10132_v44  ;;  %v1321_v8 = vadd.f32 %v10153_v18, %v1314_v5  ;;  %v10154_v45 = vstv %s7519_s29  ;;  %v9903_v2 = vstv %s7633_s13 }
 0x23c   :  { %v1036_v25 = vadd.f32 %v10154_v45, %v930_v38  ;;  %v7726_v30 = vpop.permute.xlu1 %1392  ;;  %v1651_v12 = vadd.f32 %v10155_v52, %v1645_v6  ;;  %v9904_v56 = vstv %s7646_s26  ;;  %v9902_v48 = vstv %s7655_s18  ;;  %v10158_v38 = vld [vmem:[#allocation91_spill] sm:$0xff] }
 0x23d   :  { %v7732_v26 = vpop.permute.xlu0 %1706  ;;  %v9896_v0 = vstv %s7663_s17  ;;  %v1455_v5 = vadd.f32 %v1454_v37, %v1453_v60  ;;  %v1027_v50 = vadd.f32 %v7326_v57, %v1021_v41  ;;  %v7742_v43 = vmul.f32 %v9903_v2, %v7711_v36 }
 0x23e   :  { %2634 = vrot.lane.b32.xlu1 %v2632_v9, %s9960_s9  ;;  %v7747_v6 = vmul.f32 %v9904_v56, %v7711_v36  ;;  %v1657_v18 = vadd.f32 %v10158_v38, %v1651_v12  ;;  %v1118_v45 = vadd.f32 %v7640_v20, %v1115_v4  ;;  %v7755_v57 = vmul.f32 %v9902_v48, %v7711_v36  ;;  %v10161_v4 = vld [vmem:[#allocation96_spill] sm:$0xff] }
 0x23f   :  { %10156 = vst [vmem:[#allocation113_spill] sm:$0xff] %v7742_v43  ;;  %2148 = vrot.lane.b32.xlu0 %v2146_v10, %s9960_s9  ;;  %v7760_v37 = vmul.f32 %v9896_v0, %v7711_v36  ;;  %v1461_v9 = vadd.f32 %v7319_v14, %v1455_v5  ;;  %v1033_v60 = vadd.f32 %v7381_v40, %v1027_v50  ;;  %v9898_v10 = vstv %s7675_s21  ;;  %10162 = sst [smem:[#allocation17_spill]] %s7773_s30  ;;  %v10164_v50 = vld [vmem:[#allocation99_spill] sm:$0xff]  ;;  %v10171_v48 = vld [vmem:[#allocation105_spill] sm:$0xff] }
 0x240   :  { %10157 = vst [vmem:[#allocation70_spill] sm:$0xff] %v7747_v6  ;;  %10159 = vst [vmem:[#allocation73_spill] sm:$0xff] %v7755_v57  ;;  %v7764_v41 = vpop.permute.xlu1 %1712  ;;  %v9901_v20 = vstv %s7682_s16  ;;  %v1663_v52 = vadd.f32 %v10161_v4, %v1657_v18  ;;  %v9900_v14 = vstv %s7690_s10  ;;  %v9905_v5 = vstv %s7706_s1  ;;  %s7808_s16 = sld [smem:[#allocation2 + $0x82]]  ;;  %v10183_v6 = vld [vmem:[#allocation103_spill] sm:$0xff] }
 0x241   :  { %10160 = vst [vmem:[#allocation76_spill] sm:$0xff] %v7760_v37  ;;  %v7771_v12 = vpop.permute.xlu0 %1490  ;;  %v7780_v40 = vmul.f32 %v9898_v10, %v7711_v36  ;;  %v1125_v38 = vadd.f32 %v10164_v50, %v1118_v45  ;;  %v1467_v0 = vadd.f32 %v7343_v27, %v1461_v9  ;;  %v7790_v18 = vmul.f32 %v9901_v20, %v7711_v36  ;;  %v7800_v10 = vld [vmem:[%s9776_s4 + $0x18] sm:$0xff]  ;;  %s7910_s21 = sld [smem:[#allocation6 + $0x28]] }
 0x242   :  { %2886 = vrot.lane.b32.xlu1 %v2884_v19, %s9960_s9  ;;  %v7795_v4 = vmul.f32 %v9900_v14, %v7711_v36  ;;  %v10167_v45 = vstv %s6628_s0  ;;  %v10168_v19 = vstv %s7593_s11  ;;  %v10169_v50 = vstv %s7514_s19  ;;  %s7828_s0 = sld [smem:[#allocation2 + $0x91]] }
 0x243   :  { %10163 = vst [vmem:[#allocation69_spill] sm:$0xff] %v7780_v40  ;;  %10165 = vst [vmem:[#allocation81_spill] sm:$0xff] %v7790_v18  ;;  %v1326_v27 = vmul.f32 %v7800_v10, %v10167_v45  ;;  %v1875_v9 = vmul.f32 %v7257_v11, %v10168_v19  ;;  %2780 = vrot.lane.b32.xlu0 %v2778_v1, %s9960_s9  ;;  %v2638_v14 = vmul.f32 %v10169_v50, %v10132_v44  ;;  %v7833_v50 = vld [vmem:[%s9776_s4 + $0x30] sm:$0xff]  ;;  %s7926_s10 = sld [smem:[#allocation6 + $0x10]] }
 0x244   :  { %10166 = vst [vmem:[#allocation61_spill] sm:$0xff] %v7795_v4  ;;  %v7817_v20 = vmul.f32 %v9905_v5, %v7711_v36  ;;  %v1132_v2 = vadd.f32 %v10171_v48, %v1125_v38  ;;  %v7820_v56 = vmax.f32 %v1036_v25, 0.0  ;;  %v10172_v45 = vstv %s7519_s29  ;;  %v7825_v18 = vpop.permute.xlu1 %1930  ;;  %s7871_s29 = sld [smem:[#allocation6 + $0x3b]] }
 0x245   :  { %v1038_v4 = vadd.f32 %v10172_v45, %v1033_v60  ;;  %v1473_v19 = vadd.f32 %v7425_v16, %v1467_v0  ;;  %v1324_v1 = vadd.f32 %v7617_v47, %v1321_v8  ;;  %v10173_v5 = vstv %s7498_s5  ;;  %v7839_v60 = vpop.permute.xlu0 %1830  ;;  %v10175_v8 = vld [vmem:[#allocation114_spill] sm:$0xff]  ;;  %s7852_s5 = sld [smem:[#allocation6 + $0x3a]] }
 0x246   :  { %10170 = vst [vmem:[#allocation85_spill] sm:$0xff] %v7817_v20  ;;  %v1141_v25 = vmul.f32 %v7833_v50, %v10173_v5  ;;  %v9906_v48 = vstv %s7730_s28  ;;  %v10174_v16 = vstv %s7514_s19  ;;  %v1665_v47 = vadd.f32 %v7669_v63, %v1663_v52  ;;  %2640 = vrot.lane.b32.xlu1 %v2638_v14, %s9960_s9  ;;  %v10177_v5 = vld [vmem:[#allocation109_spill] sm:$0xff]  ;;  %s7860_s19 = sld [smem:[#allocation6 + $0x53]] }
 0x247   :  { %v2532_v0 = vmul.f32 %v10174_v16, %v7580_v55  ;;  %v1139_v38 = vadd.f32 %v10175_v8, %v1132_v2  ;;  %v1479_v45 = vadd.f32 %v7500_v31, %v1473_v19  ;;  %v1480_v20 = vmul.f32 %v7114_v51, %v9906_v48  ;;  %s7945_s1 = sld [smem:[#allocation6 + $0x40]] }
 0x248   :  { %v1671_v40 = vadd.f32 %v10177_v5, %v1665_v47  ;;  %v7855_v16 = vmax.f32 %v1038_v4, 0.0  ;;  %v1497_v63 = vpop.permute.xlu1 %1496  ;;  %v10178_v52 = vstv %s7549_s6  ;;  %v1327_v31 = vadd.f32 %v1326_v27, %v1324_v1  ;;  %v10181_v5 = vld [vmem:[#allocation98_spill] sm:$0xff]  ;;  %v10182_v27 = vld [vmem:[#allocation87_spill] sm:$0xff] }
 0x249   :  { %2534 = vrot.lane.b32.xlu0 %v2532_v0, %s9960_s9  ;;  %v2154_v2 = vmul.f32 %v10178_v52, %v7820_v56  ;;  %v10179_v19 = vstv %s6953_s23  ;;  %v7865_v0 = vpop.permute.xlu0 %1399  ;;  %v10180_v8 = vstv %s7541_s24  ;;  %v2298_v4 = vstv %s7766_s14  ;;  %s7878_s23 = sld [smem:[#allocation4 + $0x5]] }
 0x24a   :  { %v1144_v14 = vmul.f32 %v7114_v51, %v10179_v19  ;;  %v2400_v47 = vmul.f32 %v10180_v8, %v7820_v56  ;;  %v1881_v48 = vadd.f32 %v10181_v5, %v1875_v9  ;;  %v1142_v37 = vadd.f32 %v1141_v25, %v1139_v38  ;;  %v10184_v9 = vld [vmem:[#allocation119_spill] sm:$0xff]  ;;  %s7885_s14 = sld [smem:[#allocation2 + $0x96]]  ;;  %v10185_v38 = vld [vmem:[#allocation94_spill] sm:$0xff] }
 0x24b   :  { %10176 = sst [smem:[#allocation16_spill]] %s7852_s5  ;;  %v1677_v52 = vadd.f32 %v7278_v35, %v1671_v40  ;;  %v1481_v57 = vadd.f32 %v1480_v20, %v1479_v45  ;;  %2156 = vrot.lane.b32.xlu1 %v2154_v2, %s9960_s9  ;;  %v1334_v51 = vadd.f32 %v10182_v27, %v1327_v31  ;;  %v9911_v1 = vstv %s7808_s16  ;;  %v7896_v31 = vld [vmem:[%s9776_s4 + $0x28] sm:$0xff] }
 0x24c   :  { %v9909_v19 = vstv %s7773_s30  ;;  %v2052_v8 = vstv %s7785_s25  ;;  %v1887_v43 = vadd.f32 %v10183_v6, %v1881_v48  ;;  %v7888_v20 = vpop.permute.xlu1 %1936  ;;  %v2406_v40 = vmul.f32 %v2298_v4, %v7855_v16  ;;  %s7901_s25 = sld [smem:[#allocation2 + $0x87]]  ;;  %v10186_v48 = vld [vmem:[#allocation112_spill] sm:$0xff] }
 0x24d   :  { %2402 = vrot.lane.b32.xlu0 %v2400_v47, %s9960_s9  ;;  %v1683_v25 = vadd.f32 %v10184_v9, %v1677_v52  ;;  %v1487_v35 = vadd.f32 %v7695_v61, %v1481_v57  ;;  %v1341_v45 = vadd.f32 %v10185_v38, %v1334_v51  ;;  %v9910_v2 = vstv %s7828_s0  ;;  %v7903_v61 = vpop.permute.xlu0 %1837  ;;  %v7915_v51 = vld [vmem:[%s9776_s4 + $0x20] sm:$0xff]  ;;  %s8224_s30 = sld [smem:[#allocation6 + $0x46]] }
 0x24e   :  { %v1690_v6 = vmul.f32 %v7896_v31, %v9911_v1  ;;  %v2299_v57 = vmul.f32 %v2298_v4, %v7820_v56  ;;  %v1893_v47 = vadd.f32 %v10186_v48, %v1887_v43  ;;  %v1145_v52 = vadd.f32 %v1144_v14, %v1142_v37  ;;  %v10188_v4 = vld [vmem:[#allocation102_spill] sm:$0xff]  ;;  %v10189_v14 = vld [vmem:[#allocation116_spill] sm:$0xff] }
 0x24f   :  { %v1689_v5 = vadd.f32 %v7368_v3, %v1683_v25  ;;  %v1493_v27 = vadd.f32 %v7771_v12, %v1487_v35  ;;  %2408 = vrot.lane.b32.xlu1 %v2406_v40, %s9960_s9  ;;  %v10187_v9 = vstv %s7599_s3  ;;  %v1348_v3 = vadd.f32 %v10188_v4, %v1341_v45  ;;  %s7933_s3 = sld [smem:[#allocation6 + $0x58]] }
 0x250   :  { %v1350_v43 = vmul.f32 %v7915_v51, %v10187_v9  ;;  %v1900_v37 = vmul.f32 %v7800_v10, %v9910_v2  ;;  %v9912_v12 = vstv %s7852_s5  ;;  %v1899_v25 = vadd.f32 %v10189_v14, %v1893_v47  ;;  %v7930_v38 = vpop.permute.xlu1 %1621  ;;  %s10227_s5 = sld [smem:[#allocation25_spill]] }
 0x251   :  { %2301 = vrot.lane.b32.xlu0 %v2299_v57, %s9960_s9  ;;  %v1152_v35 = vadd.f32 %v7404_v22, %v1145_v52  ;;  %v1499_v40 = vadd.f32 %v1497_v63, %v1493_v27  ;;  %v2053_v48 = vmul.f32 %v2052_v8, %v7820_v56  ;;  %v10190_v45 = vstv %s7554_s12  ;;  %v1503_v57 = vpop.permute.xlu0 %1502  ;;  %s7954_s12 = sld [smem:[#allocation6 + $0x88]] }
 0x252   :  { %v7938_v9 = vmul.f32 %v7251_v59, %v10190_v45  ;;  %v2892_v47 = vmul.f32 %v9909_v19, %v7820_v56  ;;  %v2790_v4 = vstv %s7860_s19  ;;  %v2544_v22 = vstv %s7871_s29  ;;  %s7982_s19 = sld [smem:[#allocation6 + $0xa0]] }
 0x253   :  { %v10191_v63 = vstv %s6512_s27  ;;  %v1159_v27 = vadd.f32 %v7476_v62, %v1152_v35  ;;  %v1691_v14 = vadd.f32 %v1690_v6, %v1689_v5  ;;  %v1505_v59 = vadd.f32 %v1503_v57, %v1499_v40  ;;  %2055 = vrot.lane.b32.xlu1 %v2053_v48, %s9960_s9  ;;  %s7964_s27 = sld [smem:[#allocation6 + $0x70]] }
 0x254   :  { %v7950_v52 = vmul.f32 %v7257_v11, %v10191_v63  ;;  %v1351_v45 = vadd.f32 %v1350_v43, %v1348_v3  ;;  %v10193_v19 = vstv %s6886_s8  ;;  %v1507_v1 = vstv %s7878_s23  ;;  %v7970_v3 = vpop.permute.xlu1 %1844  ;;  %s7972_s8 = sld [smem:[#allocation6 + $0xb8]] }
 0x255   :  { %v1353_v2 = vmul.f32 %v7896_v31, %v10193_v19  ;;  %2894 = vrot.lane.b32.xlu0 %v2892_v47, %s9960_s9  ;;  %v2646_v11 = vmul.f32 %v9912_v12, %v7820_v56  ;;  %v1901_v62 = vadd.f32 %v1900_v37, %v1899_v25  ;;  %v1697_v6 = vadd.f32 %v7529_v53, %v1691_v14  ;;  %v1721_v40 = vpop.permute.xlu0 %1720  ;;  %s8074_s29 = sld [smem:[#allocation4 + $0x6]] }
 0x256   :  { %v1166_v5 = vadd.f32 %v7557_v49, %v1159_v27  ;;  %v1510_v43 = vadd.f32 %v1507_v1, %v1505_v59  ;;  %v10196_v19 = vstv %s7730_s28  ;;  %v2160_v37 = vmul.f32 %v2052_v8, %v7855_v16  ;;  %v7994_v27 = vld [vmem:[%s9776_s4 + $0x38] sm:$0xff]  ;;  %s8060_s28 = sld [smem:[#allocation2 + $0x9b]] }
 0x257   :  { %10192 = sst [smem:[#allocation18_spill]] %s7954_s12  ;;  %v7977_v35 = vmul.f32 %v7833_v50, %v10196_v19  ;;  %v2791_v53 = vmul.f32 %v2790_v4, %v7820_v56  ;;  %v2545_v49 = vmul.f32 %v2544_v22, %v7820_v56  ;;  %v1907_v25 = vadd.f32 %v7386_v54, %v1901_v62  ;;  %2648 = vrot.lane.b32.xlu1 %v2646_v11, %s9960_s9 }
 0x258   :  { %10197 = sst [smem:[#allocation123_spill]] %s7982_s19  ;;  %v1703_v48 = vadd.f32 %v7622_v46, %v1697_v6  ;;  %v9913_v57 = vstv %s7901_s25  ;;  %v7987_v47 = vmax.f32 %v1510_v43, 0.0  ;;  %v1354_v8 = vadd.f32 %v1353_v2, %v1351_v45  ;;  %v8005_v45 = vpop.permute.xlu1 %1628  ;;  %v10199_v6 = vld [vmem:[#allocation117_spill] sm:$0xff] }
 0x259   :  { %10194 = sst [smem:[#allocation121_spill]] %s7964_s27  ;;  %v9914_v63 = vstv %s7885_s14  ;;  %v1716_v54 = vmul.f32 %v7994_v27, %v9913_v57  ;;  %2162 = vrot.lane.b32.xlu0 %v2160_v37, %s9960_s9  ;;  %v9920_v46 = vstv %s7910_s21  ;;  %v1913_v14 = vadd.f32 %v7440_v24, %v1907_v25  ;;  %v8009_v19 = vpop.permute.xlu0 %1942 }
 0x25a   :  { %10195 = sst [smem:[#allocation122_spill]] %s7972_s8  ;;  %v10198_v59 = vstv %s7603_s15  ;;  %v1709_v2 = vadd.f32 %v7732_v26, %v1703_v48  ;;  %v2898_v62 = vmul.f32 %v2790_v4, %v7855_v16  ;;  %v1361_v43 = vadd.f32 %v10199_v6, %v1354_v8 }
 0x25b   :  { %v1272_v11 = vadd.f32 %v10198_v59, %v1166_v5  ;;  %v9940_v37 = vstv %s7926_s10  ;;  %v9919_v12 = vstv %s7933_s3  ;;  %v9915_v57 = vstv %s7945_s1  ;;  %s8017_s15 = sld [smem:[#allocation6 + $0x26]] }
 0x25c   :  { %v1919_v24 = vadd.f32 %v7565_v39, %v1913_v14  ;;  %v1715_v5 = vadd.f32 %v7764_v41, %v1709_v2  ;;  %2900 = vrot.lane.b32.xlu1 %v2898_v62, %s9960_s9  ;;  %v8022_v26 = vmul.f32 %v9920_v46, %v7987_v47  ;;  %v8027_v4 = vmul.f32 %v9940_v37, %v7987_v47  ;;  %v1949_v2 = vpop.permute.xlu1 %1948  ;;  %10202 = sst [smem:[#allocation124_spill]] %s8060_s28 }
 0x25d   :  { %v1926_v39 = vmul.f32 %v7896_v31, %v9914_v63  ;;  %2793 = vrot.lane.b32.xlu0 %v2791_v53, %s9960_s9  ;;  %v8036_v41 = vmul.f32 %v9919_v12, %v7987_v47  ;;  %v8041_v25 = vmul.f32 %v9915_v57, %v7987_v47  ;;  %v9916_v48 = vstv %s7954_s12  ;;  %v1727_v62 = vpop.permute.xlu0 %1726  ;;  %s8147_s12 = sld [smem:[#allocation6 + $0x3e]] }
 0x25e   :  { %v1368_v8 = vadd.f32 %v7347_v58, %v1361_v43  ;;  %v8045_v14 = vmax.f32 %v1272_v11, 0.0  ;;  %v1925_v59 = vadd.f32 %v7611_v7, %v1919_v24  ;;  %v2652_v53 = vmul.f32 %v2544_v22, %v7855_v16  ;;  %s8205_s23 = sld [smem:[#allocation6 + $0x16]] }
 0x25f   :  { %10200 = vst [vmem:[#allocation90_spill] sm:$0xff] %v8041_v25  ;;  %v9918_v6 = vstv %s7964_s27  ;;  %v9917_v63 = vstv %s7972_s8  ;;  %v9921_v57 = vstv %s7982_s19  ;;  %v8057_v58 = vmul.f32 %v9916_v48, %v7987_v47  ;;  %s8117_s19 = sld [smem:[#allocation6 + $0x43]] }
 0x260   :  { %v1375_v11 = vadd.f32 %v7432_v32, %v1368_v8  ;;  %v1717_v7 = vadd.f32 %v1716_v54, %v1715_v5  ;;  %2654 = vrot.lane.b32.xlu1 %v2652_v53, %s9960_s9  ;;  %v8066_v22 = vmul.f32 %v9918_v6, %v7987_v47  ;;  %v8071_v43 = vmul.f32 %v9917_v63, %v7987_v47  ;;  %v1733_v5 = vpop.permute.xlu1 %1732  ;;  %s8165_s8 = sld [smem:[#allocation4 + $0x7]] }
 0x261   :  { %10201 = vst [vmem:[#allocation66_spill] sm:$0xff] %v8057_v58  ;;  %2547 = vrot.lane.b32.xlu0 %v2545_v49, %s9960_s9  ;;  %v8079_v32 = vmul.f32 %v9921_v57, %v7987_v47  ;;  %v1927_v54 = vadd.f32 %v1926_v39, %v1925_v59  ;;  %v10206_v8 = vstv %s7646_s26  ;;  %v1536_v48 = vadd.f32 %v7950_v52, %v7938_v9  ;;  %v8089_v12 = vpop.permute.xlu0 %1635  ;;  %s8098_s26 = sld [smem:[#allocation6 + $0x56]] }
 0x262   :  { %10203 = vst [vmem:[#allocation75_spill] sm:$0xff] %v8066_v22  ;;  %10204 = vst [vmem:[#allocation89_spill] sm:$0xff] %v8071_v43  ;;  %v1723_v24 = vadd.f32 %v1721_v40, %v1717_v7  ;;  %v2168_v53 = vmul.f32 %v10206_v8, %v8045_v14  ;;  %v10207_v63 = vstv %s7093_s20  ;;  %v10208_v49 = vstv %s7633_s13  ;;  %s8101_s20 = sld [smem:[#allocation6 + $0x2b]]  ;;  %v10212_v8 = vld [vmem:[#allocation84_spill] sm:$0xff]  ;;  %v10240_v22 = vld [vmem:[#allocation33_spill] sm:$0xff] }
 0x263   :  { %10205 = vst [vmem:[#allocation97_spill] sm:$0xff] %v8079_v32  ;;  %v1380_v6 = vmul.f32 %v7994_v27, %v10207_v63  ;;  %v2414_v46 = vmul.f32 %v10208_v49, %v8045_v14  ;;  %v1378_v57 = vadd.f32 %v7977_v35, %v1375_v11  ;;  %v1933_v40 = vadd.f32 %v7825_v18, %v1927_v54  ;;  %s8107_s13 = sld [smem:[#allocation6 + $0x13]]  ;;  %v10209_v18 = vld [vmem:[#allocation80_spill] sm:$0xff] }
 0x264   :  { %v1729_v39 = vadd.f32 %v1727_v62, %v1723_v24  ;;  %2170 = vrot.lane.b32.xlu1 %v2168_v53, %s9960_s9  ;;  %v2311_v59 = vstv %s8017_s15  ;;  %v8104_v63 = vpop.permute.xlu1 %1857  ;;  %v1543_v62 = vadd.f32 %v10209_v18, %v1536_v48  ;;  %s8112_s15 = sld [smem:[#allocation6 + $0x5b]]  ;;  %v9939_v53 = vstv %s8074_s29 }
 0x265   :  { %2416 = vrot.lane.b32.xlu0 %v2414_v46, %s9960_s9  ;;  %v1939_v9 = vadd.f32 %v7888_v20, %v1933_v40  ;;  %v2420_v35 = vmul.f32 %v2311_v59, %v7711_v36  ;;  %v1739_v11 = vpop.permute.xlu0 %1738  ;;  %v2312_v7 = vmul.f32 %v2311_v59, %v8045_v14  ;;  %v2065_v46 = vstv %s8049_s22  ;;  %10211 = sst [smem:[#allocation126_spill]] %s8117_s19  ;;  %v8134_v59 = vld [vmem:[%s9776_s4 + $0x10] sm:$0xff] }
 0x266   :  { %v1735_v52 = vadd.f32 %v1733_v5, %v1729_v39  ;;  %v1381_v54 = vadd.f32 %v1380_v6, %v1378_v57  ;;  %v9925_v20 = vstv %s8060_s28  ;;  %v1550_v48 = vadd.f32 %v10212_v8, %v1543_v62  ;;  %s10213_s22 = sld [smem:[#allocation53_spill]] }
 0x267   :  { %v1945_v24 = vadd.f32 %v8009_v19, %v1939_v9  ;;  %v1952_v49 = vmul.f32 %v7994_v27, %v9925_v20  ;;  %v2066_v39 = vmul.f32 %v2065_v46, %v8045_v14  ;;  %v10214_v9 = vstv %s7583_s7  ;;  %s8154_s7 = sld [smem:[#allocation6 + $0x1b]] }
 0x268   :  { %v1741_v5 = vadd.f32 %v1739_v11, %v1735_v52  ;;  %2422 = vrot.lane.b32.xlu1 %v2420_v35, %s9960_s9  ;;  %v1388_v57 = vadd.f32 %v7650_v33, %v1381_v54  ;;  %v8128_v40 = vpop.permute.xlu1 %1864  ;;  %v1559_v52 = vmul.f32 %v8134_v59, %v10214_v9  ;;  %v10215_v35 = vld [vmem:[#allocation88_spill] sm:$0xff]  ;;  %10219 = sst [smem:[#allocation53_spill]] %s8165_s8 }
 0x269   :  { %2314 = vrot.lane.b32.xlu0 %v2312_v7, %s9960_s9  ;;  %v1951_v6 = vadd.f32 %v1949_v2, %v1945_v24  ;;  %v1557_v18 = vadd.f32 %v10215_v35, %v1550_v48  ;;  %v1957_v33 = vpop.permute.xlu0 %1956  ;;  %v10216_v2 = vstv %s7655_s18  ;;  %s8162_s18 = sld [smem:[#allocation6 + $0x3]] }
 0x26a   :  { %10210 = sst [smem:[#allocation125_spill]] %s8112_s15  ;;  %v1746_v19 = vadd.f32 %v9939_v53, %v1741_v5  ;;  %v2906_v62 = vmul.f32 %v10216_v2, %v8045_v14  ;;  %v1395_v11 = vadd.f32 %v7726_v30, %v1388_v57  ;;  %v2803_v5 = vstv %s8098_s26 }
 0x26b   :  { %v1953_v30 = vadd.f32 %v1952_v49, %v1951_v6  ;;  %v10218_v57 = vstv %s7663_s17  ;;  %v1560_v9 = vadd.f32 %v1559_v52, %v1557_v18  ;;  %v9935_v2 = vstv %s8107_s13  ;;  %s8175_s17 = sld [smem:[#allocation6 + $0x4b]] }
 0x26c   :  { %v8144_v7 = vmax.f32 %v1746_v19, 0.0  ;;  %2068 = vrot.lane.b32.xlu1 %v2066_v39, %s9960_s9  ;;  %v10217_v54 = vstv %s10213_s22  ;;  %v1402_v8 = vadd.f32 %v7865_v0, %v1395_v11  ;;  %v8157_v48 = vpop.permute.xlu1 %1871  ;;  %v2660_v19 = vmul.f32 %v10218_v57, %v8045_v14  ;;  %s8198_s26 = sld [smem:[#allocation6 + $0x29]] }
 0x26d   :  { %v1562_v24 = vmul.f32 %v7800_v10, %v10217_v54  ;;  %2908 = vrot.lane.b32.xlu0 %v2906_v62, %s9960_s9  ;;  %v9936_v39 = vstv %s8101_s20  ;;  %v1963_v35 = vpop.permute.xlu0 %1962  ;;  %v2174_v0 = vmul.f32 %v2065_v46, %v7711_v36  ;;  %v1959_v6 = vadd.f32 %v1957_v33, %v1953_v30  ;;  %s10224_s22 = sld [smem:[#allocation21_spill]] }
 0x26e   :  { %v8172_v49 = vmul.f32 %v9936_v39, %v8144_v7  ;;  %v9927_v62 = vstv %s8112_s15  ;;  %v9928_v11 = vstv %s8117_s19  ;;  %v8182_v52 = vmul.f32 %v9935_v2, %v8144_v7  ;;  %s8201_s27 = sld [smem:[#allocation6 + $0x2e]]  ;;  %v10232_v2 = vld [vmem:[#allocation118_spill] sm:$0xff] }
 0x26f   :  { %v8188_v46 = vmul.f32 %v9927_v62, %v8144_v7  ;;  %v8193_v18 = vmul.f32 %v9928_v11, %v8144_v7  ;;  %v1508_v33 = vadd.f32 %v1507_v1, %v1402_v8  ;;  %v1965_v54 = vadd.f32 %v1963_v35, %v1959_v6  ;;  %v10225_v1 = vld [vmem:[#allocation106_spill] sm:$0xff]  ;;  %s10229_s28 = sld [smem:[#allocation22_spill]] }
 0x270   :  { %10220 = vst [vmem:[#allocation55_spill] sm:$0xff] %v8172_v49  ;;  %2662 = vrot.lane.b32.xlu1 %v2660_v19, %s9960_s9  ;;  %10221 = vst [vmem:[#allocation79_spill] sm:$0xff] %v8182_v52  ;;  %v1975_v30 = vpop.permute.xlu1 %1974  ;;  %v2912_v57 = vmul.f32 %v2803_v5, %v7711_v36  ;;  %v1563_v19 = vadd.f32 %v1562_v24, %v1560_v9  ;;  %v2557_v11 = vstv %s8147_s12  ;;  %s8216_s12 = sld [smem:[#allocation6 + $0x11]]  ;;  %v10226_v35 = vld [vmem:[#allocation115_spill] sm:$0xff] }
 0x271   :  { %2176 = vrot.lane.b32.xlu0 %v2174_v0, %s9960_s9  ;;  %10222 = vst [vmem:[#allocation93_spill] sm:$0xff] %v8188_v46  ;;  %10223 = vst [vmem:[#allocation64_spill] sm:$0xff] %v8193_v18  ;;  %v1969_v20 = vpop.permute.xlu0 %1968  ;;  %v2804_v0 = vmul.f32 %v2803_v5, %v8045_v14  ;;  %v8211_v24 = vmax.f32 %v1508_v33, 0.0  ;;  %v2666_v9 = vmul.f32 %v2557_v11, %v7711_v36  ;;  %s10230_s19 = sld [smem:[#allocation28_spill]]  ;;  %v9942_v18 = vstv %s8205_s23  ;;  %v10249_v46 = vld [vmem:[#allocation45_spill] sm:$0xff] }
 0x272   :  { %v1971_v62 = vadd.f32 %v1969_v20, %v1965_v54  ;;  %v1570_v8 = vadd.f32 %v10225_v1, %v1563_v19  ;;  %v9937_v54 = vstv %s8165_s8  ;;  %v2558_v33 = vmul.f32 %v2557_v11, %v8045_v14  ;;  %s8232_s15 = sld [smem:[#allocation6 + $0x8b]] }
 0x273   :  { %v2020_v1 = vstv %s8162_s18  ;;  %s8242_s8 = sld [smem:[#allocation6 + $0x73]] }
 0x274   :  { %2914 = vrot.lane.b32.xlu1 %v2912_v57, %s9960_s9  ;;  %v1977_v5 = vadd.f32 %v1975_v30, %v1971_v62  ;;  %v8213_v20 = vpop.permute.xlu1 %2114  ;;  %v1577_v6 = vadd.f32 %v10226_v35, %v1570_v8  ;;  %v10228_v57 = vstv %s10224_s22  ;;  %v2266_v30 = vstv %s8154_s7  ;;  %s10233_s22 = sld [smem:[#allocation78_spill]] }
 0x275   :  { %2806 = vrot.lane.b32.xlu0 %v2804_v0, %s9960_s9  ;;  %v2357_v19 = vmul.f32 %v10228_v57, %v6231_v15  ;;  %v2361_v0 = vpop.permute.xlu0 %2360  ;;  %v10231_v35 = vstv %s7808_s16  ;;  %v10235_v53 = vstv %s10229_s28  ;;  %s8257_s16 = sld [smem:[#allocation6 + $0xbb]] }
 0x276   :  { %v1982_v62 = vadd.f32 %v9937_v54, %v1977_v5  ;;  %v1586_v57 = vmul.f32 %v7915_v51, %v10231_v35  ;;  %v1584_v11 = vadd.f32 %v10232_v2, %v1577_v6  ;;  %v10234_v5 = vstv %s10227_s5  ;;  %s8264_s5 = sld [smem:[#allocation6 + $0xa3]] }
 0x277   :  { %v2363_v39 = vadd.f32 %v2361_v0, %v2357_v19  ;;  %v3342_v54 = vmul.f32 %v10234_v5, %v6229_v13  ;;  %v2111_v8 = vmul.f32 %v10235_v53, %v6231_v15  ;;  %v10236_v35 = vstv %s7926_s10  ;;  %s8273_s10 = sld [smem:[#allocation6 + $0x8e]] }
 0x278   :  { %2668 = vrot.lane.b32.xlu1 %v2666_v9, %s9960_s9  ;;  %v8244_v9 = vmax.f32 %v1982_v62, 0.0  ;;  %v2367_v37 = vpop.permute.xlu1 %2366  ;;  %v2182_v32 = vmul.f32 %v10236_v35, %v8211_v24  ;;  %v10237_v2 = vstv %s10230_s19  ;;  %v2324_v5 = vstv %s8198_s26  ;;  %s10242_s19 = sld [smem:[#allocation24_spill]] }
 0x279   :  { %2560 = vrot.lane.b32.xlu0 %v2558_v33, %s9960_s9  ;;  %v8255_v6 = vmul.f32 %v10237_v2, %v6229_v13  ;;  %v2263_v19 = vpop.permute.xlu0 %2262  ;;  %v2369_v0 = vadd.f32 %v2367_v37, %v2363_v39  ;;  %v10238_v33 = vstv %s7910_s21  ;;  %v2370_v53 = vmul.f32 %v2266_v30, %v6520_v29  ;;  %s10241_s21 = sld [smem:[#allocation23_spill]] }
 0x27a   :  { %v2428_v62 = vmul.f32 %v10238_v33, %v8211_v24  ;;  %v10239_v43 = vstv %s10233_s22  ;;  %v2267_v2 = vmul.f32 %v2266_v30, %v7423_v21  ;;  %v2265_v58 = vadd.f32 %v2263_v19, %v10240_v22  ;;  %s8280_s28 = sld [smem:[#allocation6 + $0x76]] }
 0x27b   :  { %v1589_v35 = vmul.f32 %v7896_v31, %v10239_v43  ;;  %v9941_v37 = vstv %s8201_s27  ;;  %v1587_v39 = vadd.f32 %v1586_v57, %v1584_v11  ;;  %v8276_v33 = vadd.f32 %v2370_v53, %v2369_v0  ;;  %s8293_s7 = sld [smem:[#allocation6 + $0xbe]] }
 0x27c   :  { %2184 = vrot.lane.b32.xlu1 %v2182_v32, %s9960_s9  ;;  %v9943_v43 = vstv %s8209_s2  ;;  %v2268_v30 = vadd.f32 %v2267_v2, %v2265_v58  ;;  %v2017_v22 = vpop.permute.xlu1 %2016  ;;  %v2325_v32 = vmul.f32 %v2324_v5, %v8211_v24  ;;  %v8286_v19 = vmul.f32 %v9941_v37, %v8244_v9  ;;  %v10245_v58 = vld [vmem:[#allocation34_spill] sm:$0xff]  ;;  %s8303_s18 = sld [smem:[#allocation6 + $0xa6]] }
 0x27d   :  { %2430 = vrot.lane.b32.xlu0 %v2428_v62, %s9960_s9  ;;  %v8291_v57 = vmul.f32 %v9942_v18, %v8244_v9  ;;  %v2853_v11 = vpop.permute.xlu0 %2852  ;;  %v2021_v0 = vmul.f32 %v2020_v1, %v7423_v21  ;;  %v2019_v62 = vadd.f32 %v2017_v22, %v10245_v58  ;;  %v9944_v53 = vstv %s8224_s30  ;;  %s8322_s26 = sld [smem:[#allocation6 + $0x33]] }
 0x27e   :  { %10243 = vst [vmem:[#allocation82_spill] sm:$0xff] %v8286_v19  ;;  %v8301_v2 = vmul.f32 %v9943_v43, %v8244_v9  ;;  %v8313_v52 = vadd.f32 %v10249_v46, %v2268_v30  ;;  %v8318_v22 = vmul.f32 %v9944_v53, %v8244_v9  ;;  %v2078_v43 = vstv %s8216_s12  ;;  %s8370_s12 = sld [smem:[#allocation6 + $0x59]] }
 0x27f   :  { %10244 = vst [vmem:[#allocation72_spill] sm:$0xff] %v8291_v57  ;;  %v10247_v37 = vstv %s10241_s21  ;;  %v10248_v57 = vstv %s10242_s19  ;;  %v2022_v58 = vadd.f32 %v2021_v0, %v2019_v62  ;;  %v1590_v30 = vadd.f32 %v1589_v35, %v1587_v39  ;;  %s8411_s22 = sld [smem:[#allocation6 + $0x62]] }
 0x280   :  { %10246 = vst [vmem:[#allocation100_spill] sm:$0xff] %v8301_v2  ;;  %v2849_v18 = vmul.f32 %v10247_v37, %v6231_v15  ;;  %2327 = vrot.lane.b32.xlu1 %v2325_v32, %s9960_s9  ;;  %v2603_v19 = vmul.f32 %v10248_v57, %v6231_v15  ;;  %10250 = vst [vmem:[#allocation74_spill] sm:$0xff] %v8318_v22  ;;  %v2124_v37 = vmul.f32 %v2020_v1, %v6520_v29  ;;  %v2607_v53 = vpop.permute.xlu1 %2606  ;;  %v10253_v1 = vld [vmem:[#allocation46_spill] sm:$0xff]  ;;  %s8418_s21 = sld [smem:[#allocation6 + $0x6]] }
 0x281   :  { %3344 = vrot.lane.b32.xlu0 %v3342_v54, %s9960_s9  ;;  %v10251_v32 = vstv %s8175_s17  ;;  %v2117_v57 = vadd.f32 %v8213_v20, %v2111_v8  ;;  %v10252_v22 = vstv %s7933_s3  ;;  %v9945_v54 = vstv %s8232_s15  ;;  %v2121_v62 = vpop.permute.xlu0 %2120  ;;  %s8344_s3 = sld [smem:[#allocation6 + $0x7a]] }
 0x282   :  { %v2862_v46 = vmul.f32 %v10251_v32, %v6520_v29  ;;  %v2920_v0 = vmul.f32 %v10252_v22, %v8211_v24  ;;  %v2434_v2 = vmul.f32 %v2324_v5, %v7987_v47  ;;  %v8335_v49 = vadd.f32 %v10253_v1, %v2022_v58  ;;  %s10268_s19 = sld [smem:[#allocation31_spill]] }
 0x283   :  { %v9947_v25 = vstv %s8242_s8  ;;  %v8341_v35 = vmul.f32 %v9945_v54, %v8144_v7  ;;  %v2123_v20 = vadd.f32 %v2121_v62, %v2117_v57  ;;  %v9946_v8 = vstv %s8257_s16 }
 0x284   :  { %2922 = vrot.lane.b32.xlu1 %v2920_v0, %s9960_s9  ;;  %v9948_v39 = vstv %s8264_s5  ;;  %v8351_v5 = vmul.f32 %v9947_v25, %v8144_v7  ;;  %v2855_v22 = vadd.f32 %v2853_v11, %v2849_v18  ;;  %v9949_v58 = vstv %s8273_s10  ;;  %v2859_v0 = vpop.permute.xlu1 %2858 }
 0x285   :  { %2436 = vrot.lane.b32.xlu0 %v2434_v2, %s9960_s9  ;;  %v8358_v32 = vmul.f32 %v9946_v8, %v8144_v7  ;;  %v8363_v57 = vmul.f32 %v9948_v39, %v8144_v7  ;;  %v2079_v62 = vmul.f32 %v2078_v43, %v8211_v24  ;;  %v8366_v1 = vadd.f32 %v2124_v37, %v2123_v20  ;;  %v2755_v2 = vpop.permute.xlu0 %2754 }
 0x286   :  { %10254 = vst [vmem:[#allocation107_spill] sm:$0xff] %v8351_v5  ;;  %v9951_v18 = vstv %s8280_s28  ;;  %v9950_v11 = vstv %s8293_s7  ;;  %v2861_v54 = vadd.f32 %v2859_v0, %v2855_v22  ;;  %v9952_v8 = vstv %s8303_s18 }
 0x287   :  { %10255 = vst [vmem:[#allocation110_spill] sm:$0xff] %v8358_v32  ;;  %10256 = vst [vmem:[#allocation83_spill] sm:$0xff] %v8363_v57  ;;  %v8376_v25 = vmul.f32 %v9949_v58, %v8244_v9  ;;  %v8381_v39 = vmul.f32 %v9951_v18, %v8244_v9  ;;  %v10259_v37 = vstv %s8175_s17  ;;  %v10260_v57 = vld [vmem:[#allocation35_spill] sm:$0xff]  ;;  %v8391_v22 = vmul.f32 %v9950_v11, %v8244_v9  ;;  %s8402_s17 = sld [smem:[#allocation6 + $0x1e]] }
 0x288   :  { %v2759_v20 = vmul.f32 %v10259_v37, %v7423_v21  ;;  %v2757_v32 = vadd.f32 %v2755_v2, %v10260_v57  ;;  %2081 = vrot.lane.b32.xlu1 %v2079_v62, %s9960_s9  ;;  %v8396_v0 = vmul.f32 %v9952_v8, %v8244_v9  ;;  %v1597_v58 = vadd.f32 %v7495_v34, %v1590_v30  ;;  %v2613_v2 = vpop.permute.xlu1 %2612 }
 0x289   :  { %10257 = vst [vmem:[#allocation77_spill] sm:$0xff] %v8376_v25  ;;  %10258 = vst [vmem:[#allocation86_spill] sm:$0xff] %v8381_v39  ;;  %v2609_v25 = vadd.f32 %v2607_v53, %v2603_v19  ;;  %3098 = vrot.lane.b32.xlu0 %v8255_v6, %s9960_s9  ;;  %v2512_v37 = vstv %s8322_s26  ;;  %v8404_v57 = vadd.f32 %v2862_v46, %v2861_v54  ;;  %v10263_v11 = vstv %s7945_s1  ;;  %v10264_v46 = vld [vmem:[#allocation36_spill] sm:$0xff]  ;;  %s10265_s1 = sld [smem:[#allocation101_spill]] }
 0x28a   :  { %10261 = vst [vmem:[#allocation91_spill] sm:$0xff] %v8391_v22  ;;  %10262 = vst [vmem:[#allocation96_spill] sm:$0xff] %v8396_v0  ;;  %v2760_v62 = vadd.f32 %v2759_v20, %v2757_v32  ;;  %v2674_v18 = vmul.f32 %v10263_v11, %v8211_v24  ;;  %v1604_v8 = vadd.f32 %v7586_v17, %v1597_v58  ;;  %v2509_v0 = vpop.permute.xlu0 %2508  ;;  %v3243_v54 = vstv %s8344_s3  ;;  %v10266_v17 = vld [vmem:[#allocation47_spill] sm:$0xff]  ;;  %s8453_s26 = sld [smem:[#allocation6 + $0x41]] }
 0x28b   :  { %v2615_v34 = vadd.f32 %v2613_v2, %v2609_v25  ;;  %v2188_v19 = vmul.f32 %v2078_v43, %v7987_v47  ;;  %v2616_v6 = vmul.f32 %v2512_v37, %v6520_v29  ;;  %v2513_v53 = vmul.f32 %v2512_v37, %v7423_v21  ;;  %s8537_s3 = sld [smem:[#allocation6 + $0x9]] }
 0x28c   :  { %v2511_v30 = vadd.f32 %v2509_v0, %v10264_v46  ;;  %2676 = vrot.lane.b32.xlu1 %v2674_v18, %s9960_s9  ;;  %v8421_v58 = vadd.f32 %v10266_v17, %v2760_v62  ;;  %v10267_v25 = vstv %s7901_s25  ;;  %v1611_v32 = vadd.f32 %v7688_v28, %v1604_v8  ;;  %v2129_v0 = vpop.permute.xlu1 %2128  ;;  %s10271_s25 = sld [smem:[#allocation14_spill]] }
 0x28d   :  { %v1613_v43 = vmul.f32 %v7833_v50, %v10267_v25  ;;  %2190 = vrot.lane.b32.xlu0 %v2188_v19, %s9960_s9  ;;  %v8428_v11 = vadd.f32 %v2616_v6, %v2615_v34  ;;  %v3348_v18 = vmul.f32 %v3243_v54, %v6231_v15  ;;  %v3244_v62 = vmul.f32 %v3243_v54, %v6229_v13  ;;  %v10269_v50 = vld [vmem:[#allocation48_spill] sm:$0xff] }
 0x28e   :  { %v2514_v20 = vadd.f32 %v2513_v53, %v2511_v30  ;;  %v2375_v37 = vpop.permute.xlu0 %2374  ;;  %v2816_v2 = vstv %s8370_s12  ;;  %v2279_v6 = vstv %s8402_s17  ;;  %v10272_v25 = vstv %s10268_s19  ;;  %s8478_s19 = sld [smem:[#allocation6 + $0x36]] }
 0x28f   :  { %v1614_v28 = vadd.f32 %v1613_v43, %v1611_v32  ;;  %v10270_v8 = vstv %s10265_s1  ;;  %v2377_v19 = vadd.f32 %v2375_v37, %v8276_v33  ;;  %v2817_v30 = vmul.f32 %v2816_v2, %v8211_v24  ;;  %s8565_s12 = sld [smem:[#allocation6 + $0x14]] }
 0x290   :  { %3350 = vrot.lane.b32.xlu1 %v3348_v18, %s9960_s9  ;;  %v8435_v46 = vadd.f32 %v10269_v50, %v2514_v20  ;;  %v1616_v34 = vmul.f32 %v7994_v27, %v10270_v8  ;;  %v2381_v53 = vpop.permute.xlu1 %2380  ;;  %v3834_v20 = vmul.f32 %v10272_v25, %v6229_v13  ;;  %v2997_v18 = vstv %s8411_s22  ;;  %s8466_s22 = sld [smem:[#allocation6 + $0x4e]] }
 0x291   :  { %3246 = vrot.lane.b32.xlu0 %v3244_v62, %s9960_s9  ;;  %v2383_v17 = vadd.f32 %v2381_v53, %v2377_v19  ;;  %v2384_v43 = vmul.f32 %v2279_v6, %v10132_v44  ;;  %v2280_v32 = vmul.f32 %v2279_v6, %v7580_v55  ;;  %v2033_v37 = vstv %s8418_s21  ;;  %v5442_v62 = vld [vmem:[%s9776_s4] sm:$0xff]  ;;  %v5443_v19 = vld [vmem:[%s9776_s4 + $0x8] sm:$0xff]  ;;  %s8475_s21 = sld [smem:[#allocation6 + $0xaa]] }
 0x292   :  { %v2276_v54 = vpop.permute.xlu0 %2275  ;;  %v10273_v50 = vstv %s7593_s11  ;;  %v10274_v53 = vstv %s10271_s25  ;;  %v1617_v6 = vadd.f32 %v1616_v34, %v1614_v28  ;;  %v2998_v22 = vmul.f32 %v2997_v18, %v6229_v13  ;;  %s10275_s11 = sld [smem:[#allocation32_spill]]  ;;  %v10276_v34 = vld [vmem:[#allocation58_spill] sm:$0xff] }
 0x293   :  { %v2278_v33 = vadd.f32 %v2276_v54, %v8313_v52  ;;  %v1769_v8 = vmul.f32 %v5442_v62, %v10273_v50  ;;  %v1771_v25 = vmul.f32 %v5443_v19, %v10274_v53  ;;  %v8468_v52 = vadd.f32 %v2384_v43, %v2383_v17  ;;  %s8489_s25 = sld [smem:[#allocation6 + $0x92]]  ;;  %v10278_v53 = vld [vmem:[#allocation59_spill] sm:$0xff] }
 0x294   :  { %2819 = vrot.lane.b32.xlu1 %v2817_v30, %s9960_s9  ;;  %v2030_v54 = vpop.permute.xlu1 %2029  ;;  %v1624_v62 = vadd.f32 %v7930_v38, %v1617_v6  ;;  %v2034_v39 = vmul.f32 %v2033_v37, %v7580_v55  ;;  %v2926_v28 = vmul.f32 %v2816_v2, %v7987_v47  ;;  %s10291_s17 = sld [smem:[#allocation92_spill]] }
 0x295   :  { %3836 = vrot.lane.b32.xlu0 %v3834_v20, %s9960_s9  ;;  %v2281_v30 = vadd.f32 %v2280_v32, %v2278_v33  ;;  %v2032_v5 = vadd.f32 %v2030_v54, %v8335_v49  ;;  %v1772_v20 = vadd.f32 %v1771_v25, %v1769_v8  ;;  %v2131_v49 = vadd.f32 %v2129_v0, %v8366_v1  ;;  %v10279_v0 = vld [vmem:[#allocation95_spill] sm:$0xff]  ;;  %s10294_s1 = sld [smem:[#allocation125_spill]] }
 0x296   :  { %v2867_v50 = vpop.permute.xlu0 %2866  ;;  %v1631_v38 = vadd.f32 %v8005_v45, %v1624_v62  ;;  %v3102_v8 = vmul.f32 %v2997_v18, %v6231_v15  ;;  %v2138_v1 = vmul.f32 %v2033_v37, %v10132_v44  ;;  %v10281_v37 = vstv %s8074_s29  ;;  %s8522_s29 = sld [smem:[#allocation6 + $0x21]] }
 0x297   :  { %v8481_v17 = vadd.f32 %v10276_v34, %v2281_v30  ;;  %v2035_v43 = vadd.f32 %v2034_v39, %v2032_v5  ;;  %v2570_v5 = vstv %s8453_s26  ;;  %v1779_v25 = vadd.f32 %v10279_v0, %v1772_v20  ;;  %s10284_s26 = sld [smem:[#allocation71_spill]] }
 0x298   :  { %3000 = vrot.lane.b32.xlu1 %v2998_v22, %s9960_s9  ;;  %v2621_v2 = vpop.permute.xlu1 %2620  ;;  %v10277_v32 = vstv %s10275_s11  ;;  %v1638_v22 = vadd.f32 %v8089_v12, %v1631_v38  ;;  %v2869_v6 = vadd.f32 %v2867_v50, %v8404_v57  ;;  %v2771_v12 = vstv %s8466_s22  ;;  %s10301_s22 = sld [smem:[#allocation126_spill]] }
 0x299   :  { %2928 = vrot.lane.b32.xlu0 %v2926_v28, %s9960_s9  ;;  %v3588_v33 = vmul.f32 %v10277_v32, %v6229_v13  ;;  %v8494_v45 = vadd.f32 %v10278_v53, %v2035_v43  ;;  %v2680_v30 = vmul.f32 %v2570_v5, %v7987_v47  ;;  %v2876_v62 = vmul.f32 %v2771_v12, %v10132_v44  ;;  %v10280_v28 = vld [vmem:[#allocation104_spill] sm:$0xff]  ;;  %s10303_s11 = sld [smem:[#allocation17_spill]] }
 0x29a   :  { %v2135_v19 = vpop.permute.xlu0 %2134  ;;  %v1786_v34 = vadd.f32 %v10280_v28, %v1779_v25  ;;  %v1744_v38 = vadd.f32 %v10281_v37, %v1638_v22  ;;  %v2571_v57 = vmul.f32 %v2570_v5, %v8211_v24  ;;  %v2772_v50 = vmul.f32 %v2771_v12, %v7580_v55  ;;  %v10283_v53 = vld [vmem:[#allocation108_spill] sm:$0xff] }
 0x29b   :  { %v2137_v39 = vadd.f32 %v2135_v19, %v2131_v49  ;;  %v2525_v32 = vstv %s8478_s19  ;;  %v10282_v19 = vstv %s7828_s0  ;;  %v2623_v22 = vadd.f32 %v2621_v2, %v8428_v11  ;;  %s8531_s0 = sld [smem:[#allocation6 + $0x2c]] }
 0x29c   :  { %3590 = vrot.lane.b32.xlu1 %v3588_v33, %s9960_s9  ;;  %v2873_v18 = vpop.permute.xlu1 %2872  ;;  %v3735_v33 = vstv %s8475_s21  ;;  %v3489_v25 = vstv %s8489_s25  ;;  %v2630_v11 = vmul.f32 %v2525_v32, %v10132_v44  ;;  %v2526_v2 = vmul.f32 %v2525_v32, %v7580_v55  ;;  %s8624_s21 = sld [smem:[#allocation6 + $0x5c]] }
 0x29d   :  { %3104 = vrot.lane.b32.xlu0 %v3102_v8, %s9960_s9  ;;  %v8504_v54 = vadd.f32 %v2138_v1, %v2137_v39  ;;  %v2875_v43 = vadd.f32 %v2873_v18, %v2869_v6  ;;  %v1795_v8 = vmul.f32 %v8134_v59, %v10282_v19  ;;  %v1793_v39 = vadd.f32 %v10283_v53, %v1786_v34  ;;  %s8634_s19 = sld [smem:[#allocation6 + $0x24]] }
 0x29e   :  { %v2768_v20 = vpop.permute.xlu0 %2767  ;;  %v3840_v0 = vmul.f32 %v3735_v33, %v6231_v15  ;;  %v8528_v6 = vmax.f32 %v1744_v38, 0.0  ;;  %v3736_v18 = vmul.f32 %v3735_v33, %v6229_v13  ;;  %v10286_v37 = vstv %s10284_s26  ;;  %v10288_v33 = vld [vmem:[#allocation62_spill] sm:$0xff]  ;;  %s10305_s25 = sld [smem:[#allocation124_spill]] }
 0x29f   :  { %v2770_v49 = vadd.f32 %v2768_v20, %v8421_v58  ;;  %v8524_v5 = vadd.f32 %v2876_v62, %v2875_v43  ;;  %v10285_v62 = vld [vmem:[#allocation60_spill] sm:$0xff]  ;;  %v1796_v34 = vadd.f32 %v1795_v8, %v1793_v39  ;;  %v1798_v38 = vmul.f32 %v7800_v10, %v10286_v37  ;;  %s10307_s26 = sld [smem:[#allocation16_spill]] }
 0x2a0   :  { %2682 = vrot.lane.b32.xlu1 %v2680_v30, %s9960_s9  ;;  %v2627_v58 = vpop.permute.xlu1 %2626  ;;  %v2292_v53 = vstv %s8522_s29  ;;  %s8646_s29 = sld [smem:[#allocation6 + $0x65]] }
 0x2a1   :  { %2573 = vrot.lane.b32.xlu0 %v2571_v57, %s9960_s9  ;;  %v2773_v1 = vadd.f32 %v2772_v50, %v2770_v49  ;;  %v2629_v59 = vadd.f32 %v2627_v58, %v2623_v22  ;;  %v10287_v49 = vstv %s8101_s20  ;;  %v1799_v10 = vadd.f32 %v1798_v38, %v1796_v34  ;;  %s10290_s20 = sld [smem:[#allocation13_spill]] }
 0x2a2   :  { %v2522_v12 = vpop.permute.xlu0 %2521  ;;  %v2442_v32 = vmul.f32 %v10287_v49, %v8528_v6  ;;  %v3594_v22 = vmul.f32 %v3489_v25, %v6231_v15  ;;  %v10293_v38 = vstv %s7541_s24  ;;  %s8595_s24 = sld [smem:[#allocation6 + $0x39]] }
 0x2a3   :  { %v2524_v30 = vadd.f32 %v2522_v12, %v8435_v46  ;;  %v8540_v28 = vadd.f32 %v10285_v62, %v2773_v1  ;;  %v8546_v20 = vadd.f32 %v2630_v11, %v2629_v59  ;;  %v3490_v46 = vmul.f32 %v3489_v25, %v6229_v13 }
 0x2a4   :  { %3842 = vrot.lane.b32.xlu1 %v3840_v0, %s9960_s9  ;;  %v2143_v57 = vpop.permute.xlu1 %2142  ;;  %v10289_v13 = vstv %s8107_s13  ;;  %v1806_v58 = vadd.f32 %v7361_v42, %v1799_v10  ;;  %v2337_v59 = vstv %s8531_s0  ;;  %v2046_v25 = vstv %s8537_s3  ;;  %s8574_s13 = sld [smem:[#allocation6 + $0x51]] }
 0x2a5   :  { %3738 = vrot.lane.b32.xlu0 %v3736_v18, %s9960_s9  ;;  %v2527_v43 = vadd.f32 %v2526_v2, %v2524_v30  ;;  %v2196_v1 = vmul.f32 %v10289_v13, %v8528_v6  ;;  %v2293_v18 = vmul.f32 %v2292_v53, %v7820_v56  ;;  %s8653_s0 = sld [smem:[#allocation6 + $0xc]] }
 0x2a6   :  { %v2389_v50 = vpop.permute.xlu0 %2388  ;;  %v1813_v2 = vadd.f32 %v7445_v23, %v1806_v58  ;;  %v10295_v23 = vstv %s7885_s14  ;;  %s10300_s14 = sld [smem:[#allocation42_spill]] }
 0x2a7   :  { %v8554_v19 = vadd.f32 %v10288_v33, %v2527_v43  ;;  %v2391_v8 = vadd.f32 %v2389_v50, %v8468_v52  ;;  %v2398_v52 = vmul.f32 %v2292_v53, %v7855_v16  ;;  %v10292_v34 = vstv %s10290_s20  ;;  %v10296_v50 = vld [vmem:[#allocation120_spill] sm:$0xff]  ;;  %s8821_s3 = sld [smem:[#allocation6 + $0x57]] }
 0x2a8   :  { %3492 = vrot.lane.b32.xlu1 %v3490_v46, %s9960_s9  ;;  %v2395_v39 = vpop.permute.xlu1 %2394  ;;  %v3356_v37 = vmul.f32 %v10292_v34, %v7423_v21  ;;  %v2296_v43 = vmul.f32 %v10293_v38, %v7855_v16  ;;  %v1822_v46 = vmul.f32 %v7915_v51, %v10295_v23  ;;  %v1820_v49 = vadd.f32 %v10296_v50, %v1813_v2  ;;  %s8831_s20 = sld [smem:[#allocation6 + $0x3f]] }
 0x2a9   :  { %2444 = vrot.lane.b32.xlu0 %v2442_v32, %s9960_s9  ;;  %v2397_v12 = vadd.f32 %v2395_v39, %v2391_v8  ;;  %v2047_v33 = vmul.f32 %v2046_v25, %v7820_v56  ;;  %v10297_v39 = vstv %s7549_s6  ;;  %s8613_s6 = sld [smem:[#allocation6 + $0x7d]] }
 0x2aa   :  { %v2289_v0 = vpop.permute.xlu0 %2288  ;;  %v2050_v51 = vmul.f32 %v10297_v39, %v7855_v16  ;;  %v10304_v39 = vstv %s10301_s22  ;;  %s10328_s22 = sld [smem:[#allocation54_spill]] }
 0x2ab   :  { %v2291_v11 = vadd.f32 %v2289_v0, %v8481_v17  ;;  %v8576_v42 = vadd.f32 %v2398_v52, %v2397_v12  ;;  %v2338_v17 = vmul.f32 %v2337_v59, %v8528_v6  ;;  %v1823_v12 = vadd.f32 %v1822_v46, %v1820_v49 }
 0x2ac   :  { %2198 = vrot.lane.b32.xlu1 %v2196_v1, %s9960_s9  ;;  %v2043_v62 = vpop.permute.xlu1 %2042  ;;  %v2145_v1 = vadd.f32 %v2143_v57, %v8504_v54  ;;  %v2784_v54 = vstv %s8574_s13  ;;  %s10311_s13 = sld [smem:[#allocation43_spill]] }
 0x2ad   :  { %3596 = vrot.lane.b32.xlu0 %v3594_v22, %s9960_s9  ;;  %v2294_v30 = vadd.f32 %v2293_v18, %v2291_v11  ;;  %v2045_v10 = vadd.f32 %v2043_v62, %v8494_v45  ;;  %v10298_v22 = vstv %s10291_s17  ;;  %v10299_v45 = vstv %s10294_s1  ;;  %s8694_s17 = sld [smem:[#allocation6 + $0x54]] }
 0x2ae   :  { %v2881_v32 = vpop.permute.xlu0 %2880  ;;  %v1825_v13 = vmul.f32 %v7896_v31, %v10298_v22  ;;  %v2934_v0 = vmul.f32 %v10299_v45, %v8528_v6  ;;  %v2448_v18 = vmul.f32 %v2337_v59, %v8144_v7  ;;  %v2091_v11 = vstv %s8565_s12  ;;  %s10308_s12 = sld [smem:[#allocation111_spill]] }
 0x2af   :  { %v8592_v8 = vadd.f32 %v2296_v43, %v2294_v30  ;;  %v2048_v53 = vadd.f32 %v2047_v33, %v2045_v10  ;;  %v2152_v62 = vmul.f32 %v2046_v25, %v7855_v16  ;;  %v2883_v31 = vadd.f32 %v2881_v32, %v8524_v5  ;;  %s10314_s1 = sld [smem:[#allocation44_spill]] }
 0x2b0   :  { %2340 = vrot.lane.b32.xlu1 %v2338_v17, %s9960_s9  ;;  %v2635_v58 = vpop.permute.xlu1 %2634  ;;  %v2092_v59 = vmul.f32 %v2091_v11, %v8528_v6  ;;  %v10302_v43 = vstv %s10300_s14  ;;  %v2890_v5 = vmul.f32 %v2784_v54, %v7855_v16  ;;  %v2785_v23 = vmul.f32 %v2784_v54, %v7820_v56  ;;  %s8711_s14 = sld [smem:[#allocation6 + $0x3c]] }
 0x2b1   :  { %3358 = vrot.lane.b32.xlu0 %v3356_v37, %s9960_s9  ;;  %v8609_v2 = vadd.f32 %v2050_v51, %v2048_v53  ;;  %v1826_v37 = vadd.f32 %v1825_v13, %v1823_v12  ;;  %v3110_v25 = vmul.f32 %v10302_v43, %v7423_v21  ;;  %v2637_v49 = vadd.f32 %v2635_v58, %v8546_v20 }
 0x2b2   :  { %v2149_v52 = vpop.permute.xlu0 %2148  ;;  %v2538_v32 = vstv %s8595_s24  ;;  %v10306_v51 = vstv %s10303_s11  ;;  %v3256_v12 = vstv %s8613_s6  ;;  %s8704_s24 = sld [smem:[#allocation6 + $0xad]] }
 0x2b3   :  { %v2151_v30 = vadd.f32 %v2149_v52, %v2145_v1  ;;  %v1833_v50 = vadd.f32 %v7839_v60, %v1826_v37  ;;  %v2788_v22 = vmul.f32 %v10306_v51, %v7855_v16  ;;  %v2202_v1 = vmul.f32 %v2091_v11, %v8144_v7  ;;  %v5444_v52 = vld [vmem:[%s9776_s4 + $0x30] sm:$0xff]  ;;  %s8691_s4 = sld [smem:[#allocation6 + $0x44]] }
 0x2b4   :  { %2936 = vrot.lane.b32.xlu1 %v2934_v0, %s9960_s9  ;;  %v2887_v57 = vpop.permute.xlu1 %2886  ;;  %v2644_v58 = vmul.f32 %v2538_v32, %v7855_v16  ;;  %v2539_v45 = vmul.f32 %v2538_v32, %v7820_v56  ;;  %v3362_v54 = vmul.f32 %v3256_v12, %v6520_v29  ;;  %s8717_s6 = sld [smem:[#allocation6 + $0x95]] }
 0x2b5   :  { %2450 = vrot.lane.b32.xlu0 %v2448_v18, %s9960_s9  ;;  %v8619_v34 = vadd.f32 %v2152_v62, %v2151_v30  ;;  %v2889_v38 = vadd.f32 %v2887_v57, %v2883_v31  ;;  %v1840_v60 = vadd.f32 %v7903_v61, %v1833_v50  ;;  %v10309_v18 = vstv %s10305_s25  ;;  %s10325_s25 = sld [smem:[#allocation15_spill]] }
 0x2b6   :  { %v2781_v17 = vpop.permute.xlu0 %2780  ;;  %v1849_v11 = vmul.f32 %v5444_v52, %v10309_v18  ;;  %v10310_v57 = vstv %s10307_s26  ;;  %v10315_v18 = vld [vmem:[#allocation113_spill] sm:$0xff]  ;;  %s8861_s11 = sld [smem:[#allocation6 + $0x80]] }
 0x2b7   :  { %v2783_v46 = vadd.f32 %v2781_v17, %v8540_v28  ;;  %v8636_v33 = vadd.f32 %v2890_v5, %v2889_v38  ;;  %v2688_v28 = vmul.f32 %v10304_v39, %v8528_v6  ;;  %v1847_v30 = vadd.f32 %v7970_v3, %v1840_v60  ;;  %s9017_s26 = sld [smem:[#allocation6 + $0x63]] }
 0x2b8   :  { %2094 = vrot.lane.b32.xlu1 %v2092_v59, %s9960_s9  ;;  %v2641_v53 = vpop.permute.xlu1 %2640  ;;  %v2542_v59 = vmul.f32 %v10310_v57, %v7855_v16  ;;  %v3257_v17 = vmul.f32 %v3256_v12, %v7423_v21  ;;  %v2829_v38 = vstv %s8624_s21  ;;  %s10317_s21 = sld [smem:[#allocation127_spill]] }
 0x2b9   :  { %3112 = vrot.lane.b32.xlu0 %v3110_v25, %s9960_s9  ;;  %v2786_v10 = vadd.f32 %v2785_v23, %v2783_v46  ;;  %v2643_v13 = vadd.f32 %v2641_v53, %v2637_v49  ;;  %v1850_v43 = vadd.f32 %v1849_v11, %v1847_v30  ;;  %v10312_v25 = vstv %s10308_s12  ;;  %s8756_s12 = sld [smem:[#allocation6 + $0x27]] }
 0x2ba   :  { %v1852_v5 = vmul.f32 %v7994_v27, %v10312_v25  ;;  %v2305_v46 = vstv %s8634_s19  ;;  %v2830_v49 = vmul.f32 %v2829_v38, %v8528_v6  ;;  %v10313_v53 = vstv %s10311_s13  ;;  %s8879_s19 = sld [smem:[#allocation6 + $0x2a]] }
 0x2bb   :  { %v2535_v20 = vpop.permute.xlu0 %2534  ;;  %v8655_v61 = vadd.f32 %v2788_v22, %v2786_v10  ;;  %v3848_v39 = vmul.f32 %v10313_v53, %v7423_v21  ;;  %v2412_v51 = vmul.f32 %v2305_v46, %v7711_v36  ;;  %v2306_v22 = vmul.f32 %v2305_v46, %v8045_v14  ;;  %s10334_s13 = sld [smem:[#allocation57_spill]] }
 0x2bc   :  { %v2537_v0 = vadd.f32 %v2535_v20, %v8554_v19  ;;  %2690 = vrot.lane.b32.xlu1 %v2688_v28, %s9960_s9  ;;  %v8664_v19 = vadd.f32 %v2644_v58, %v2643_v13  ;;  %v3010_v28 = vstv %s8646_s29  ;;  %v1853_v60 = vadd.f32 %v1852_v5, %v1850_v43  ;;  %s10319_s29 = sld [smem:[#allocation53_spill]] }
 0x2bd   :  { %2204 = vrot.lane.b32.xlu0 %v2202_v1, %s9960_s9  ;;  %v2157_v31 = vpop.permute.xlu1 %2156  ;;  %v3011_v58 = vmul.f32 %v3010_v28, %v7423_v21  ;;  %v2940_v52 = vmul.f32 %v2829_v38, %v8144_v7  ;;  %v2583_v25 = vstv %s8691_s4  ;;  %v2797_v46 = vstv %s8694_s17  ;;  %s9064_s4 = sld [smem:[#allocation6 + $0xb2]] }
 0x2be   :  { %v2540_v62 = vadd.f32 %v2539_v45, %v2537_v0  ;;  %v1860_v45 = vadd.f32 %v8104_v63, %v1853_v60  ;;  %v2159_v63 = vadd.f32 %v2157_v31, %v8619_v34  ;;  %v3116_v34 = vmul.f32 %v3010_v28, %v6520_v29  ;;  %v10318_v31 = vld [vmem:[#allocation70_spill] sm:$0xff]  ;;  %s9070_s17 = sld [smem:[#allocation6 + $0x42]] }
 0x2bf   :  { %v2403_v37 = vpop.permute.xlu0 %2402  ;;  %v3748_v60 = vstv %s8704_s24  ;;  %s8771_s24 = sld [smem:[#allocation6 + $0x2f]] }
 0x2c0   :  { %3364 = vrot.lane.b32.xlu1 %v3362_v54, %s9960_s9  ;;  %v8673_v3 = vadd.f32 %v2542_v59, %v2540_v62  ;;  %v2405_v23 = vadd.f32 %v2403_v37, %v8576_v42  ;;  %v2059_v42 = vstv %s8653_s0  ;;  %v1867_v30 = vadd.f32 %v8128_v40, %v1860_v45  ;;  %v5349_v59 = vld [vmem:[%s10317_s21 + $0x78] sm:$0xff]   ;;  %v5353_v45 = vld [vmem:[%s10317_s21 + $0x68] sm:$0xff]   ;;  %s9023_s0 = sld [smem:[#allocation6 + $0x6a]] }
 0x2c1   :  { %3259 = vrot.lane.b32.xlu0 %v3257_v17, %s9960_s9  ;;  %v2409_v50 = vpop.permute.xlu1 %2408  ;;  %v2060_v0 = vmul.f32 %v2059_v42, %v8045_v14  ;;  %v10316_v54 = vstv %s10314_s1  ;;  %v5350_v40 = vld [vmem:[%s10317_s21 + $0x38] sm:$0xff]   ;;  %v2166_v5 = vmul.f32 %v2059_v42, %v7711_v36  ;;  %5227 = vmatprep.subr.bf16.mxu0 %v5349_v59  ;;  %s8907_s1 = sld [smem:[#allocation6 + $0x68]] }
 0x2c2   :  { %v2411_v10 = vadd.f32 %v2409_v50, %v2405_v23  ;;  %v3602_v57 = vmul.f32 %v10316_v54, %v7423_v21  ;;  %v1874_v37 = vadd.f32 %v8157_v48, %v1867_v30  ;;  %5228 = vmatpush3.bf16.msra.mxu0 %v5350_v40  ;;  %v5351_v48 = vld [vmem:[%s10317_s21 + $0x70] sm:$0xff]  }
 0x2c3   :  { %v2302_v32 = vpop.permute.xlu0 %2301  ;;  %v5352_v50 = vld [vmem:[%s10317_s21 + $0x30] sm:$0xff]   ;;  %5229 = vmatprep.subr.bf16.mxu0 %v5351_v48 }
 0x2c4   :  { %v2304_v27 = vadd.f32 %v2302_v32, %v8592_v8  ;;  %2832 = vrot.lane.b32.xlu1 %v2830_v49, %s9960_s9  ;;  %v8696_v20 = vadd.f32 %v2412_v51, %v2411_v10  ;;  %v2694_v32 = vmul.f32 %v2583_v25, %v8144_v7  ;;  %v2584_v51 = vmul.f32 %v2583_v25, %v8528_v6  ;;  %v5355_v25 = vld [vmem:[%s10317_s21 + $0x60] sm:$0xff]  }
 0x2c5   :  { %3850 = vrot.lane.b32.xlu0 %v3848_v39, %s9960_s9  ;;  %v2056_v1 = vpop.permute.xlu1 %2055 }
 0x2c6   :  { %v2307_v13 = vadd.f32 %v2306_v22, %v2304_v27  ;;  %v2058_v12 = vadd.f32 %v2056_v1, %v8609_v2  ;;  %v2904_v22 = vmul.f32 %v2797_v46, %v7711_v36  ;;  %v2798_v27 = vmul.f32 %v2797_v46, %v8045_v14  ;;  %5230 = vmatpush3.bf16.msra.mxu0 %v5352_v50 }
 0x2c7   :  { %v2895_v8 = vpop.permute.xlu0 %2894  ;;  %v2551_v1 = vstv %s8711_s14  ;;  %5231 = vmatprep.subr.bf16.mxu0 %v5353_v45  ;;  %s8777_s14 = sld [smem:[#allocation6 + $0xf]]  ;;  %v2318_v50 = vstv %s8756_s12 }
 0x2c8   :  { %3013 = vrot.lane.b32.xlu1 %v3011_v58, %s9960_s9  ;;  %v8707_v11 = vadd.f32 %v10315_v18, %v2307_v13  ;;  %v2061_v62 = vadd.f32 %v2060_v0, %v2058_v12  ;;  %v2897_v23 = vadd.f32 %v2895_v8, %v8636_v33  ;;  %v10320_v33 = vstv %s10319_s29  ;;  %s8939_s29 = sld [smem:[#allocation6 + $0x12]] }
 0x2c9   :  { %2942 = vrot.lane.b32.xlu0 %v2940_v52, %s9960_s9  ;;  %v2649_v2 = vpop.permute.xlu1 %2648  ;;  %v1980_v53 = vadd.f32 %v10320_v33, %v1874_v37  ;;  %v3502_v12 = vstv %s8717_s6  ;;  %s8997_s6 = sld [smem:[#allocation6 + $0x98]] }
 0x2ca   :  { %v8728_v38 = vadd.f32 %v10318_v31, %v2061_v62  ;;  %v2651_v13 = vadd.f32 %v2649_v2, %v8664_v19  ;;  %v3854_v19 = vmul.f32 %v3748_v60, %v6520_v29  ;;  %v3749_v62 = vmul.f32 %v3748_v60, %v7423_v21  ;;  %v5357_v60 = vld [vmem:[%s10317_s21 + $0x58] sm:$0xff]   ;;  %s9059_s12 = sld [smem:[#allocation6 + $0x6b]] }
 0x2cb   :  { %v2163_v17 = vpop.permute.xlu0 %2162  ;;  %v8768_v52 = vmax.f32 %v1980_v53, 0.0  ;;  %v2552_v2 = vmul.f32 %v2551_v1, %v8045_v14 }
 0x2cc   :  { %v2165_v43 = vadd.f32 %v2163_v17, %v2159_v63  ;;  %3604 = vrot.lane.b32.xlu1 %v3602_v57, %s9960_s9  ;;  %v2658_v63 = vmul.f32 %v2551_v1, %v7711_v36  ;;  %v10321_v57 = vld [vmem:[#allocation73_spill] sm:$0xff] }
 0x2cd   :  { %3118 = vrot.lane.b32.xlu0 %v3116_v34, %s9960_s9  ;;  %v3503_v34 = vmul.f32 %v3502_v12, %v7423_v21 }
 0x2ce   :  { %v2901_v49 = vpop.permute.xlu1 %2900  ;;  %v8743_v10 = vadd.f32 %v2166_v5, %v2165_v43  ;;  %v5356_v5 = vld [vmem:[%s10317_s21 + $0x20] sm:$0xff]  }
 0x2cf   :  { %v2794_v39 = vpop.permute.xlu0 %2793  ;;  %v2903_v28 = vadd.f32 %v2901_v49, %v2897_v23  ;;  %v10323_v23 = vld [vmem:[#allocation76_spill] sm:$0xff] }
 0x2d0   :  { %v2796_v42 = vadd.f32 %v2794_v39, %v8655_v61  ;;  %2696 = vrot.lane.b32.xlu1 %v2694_v32, %s9960_s9  ;;  %v5354_v61 = vld [vmem:[%s10317_s21 + $0x28] sm:$0xff]   ;;  %v10324_v32 = vstv %s8205_s23  ;;  %s10355_s23 = sld [smem:[#allocation20_spill]] }
 0x2d1   :  { %2586 = vrot.lane.b32.xlu0 %v2584_v51, %s9960_s9  ;;  %v8758_v58 = vadd.f32 %v2904_v22, %v2903_v28  ;;  %5232 = vmatpush3.bf16.msra.mxu0 %v5354_v61  ;;  %v2210_v33 = vmul.f32 %v10324_v32, %v8768_v52  ;;  %v3608_v28 = vmul.f32 %v3502_v12, %v6520_v29  ;;  %v2350_v51 = vstv %s8771_s24  ;;  %s8984_s24 = sld [smem:[#allocation6 + $0x7b]] }
 0x2d2   :  { %v2799_v8 = vadd.f32 %v2798_v27, %v2796_v42  ;;  %v2655_v0 = vpop.permute.xlu1 %2654  ;;  %5233 = vmatprep.subr.bf16.mxu0 %v5355_v25  ;;  %v2426_v22 = vmul.f32 %v2318_v50, %v7987_v47  ;;  %v2072_v42 = vstv %s8777_s14  ;;  %v10326_v12 = vstv %s10325_s25  ;;  %s10337_s14 = sld [smem:[#allocation26_spill]] }
 0x2d3   :  { %v2548_v18 = vpop.permute.xlu0 %2547  ;;  %v2657_v30 = vadd.f32 %v2655_v0, %v2651_v13  ;;  %v5358_v13 = vld [vmem:[%s10317_s21 + $0x18] sm:$0xff]   ;;  %v2073_v0 = vmul.f32 %v2072_v42, %v8211_v24  ;;  %s9165_s25 = sld [smem:[#allocation6 + $0x86]] }
 0x2d4   :  { %v2550_v54 = vadd.f32 %v2548_v18, %v8673_v3  ;;  %3856 = vrot.lane.b32.xlu1 %v3854_v19, %s9960_s9  ;;  %v8780_v59 = vadd.f32 %v10321_v57, %v2799_v8  ;;  %v10322_v3 = vstv %s8201_s27  ;;  %s8807_s27 = sld [smem:[#allocation6 + $0x17]]  ;;  %v3370_v18 = vmul.f32 %v10326_v12, %v7580_v55 }
 0x2d5   :  { %3751 = vrot.lane.b32.xlu0 %v3749_v62, %s9960_s9  ;;  %v8783_v40 = vadd.f32 %v2658_v63, %v2657_v30  ;;  %v2456_v43 = vmul.f32 %v10322_v3, %v8768_v52  ;;  %5234 = vmatpush3.bf16.msra.mxu0 %v5356_v5  ;;  %v5359_v30 = vld [vmem:[%s10317_s21 + $0x50] sm:$0xff]   ;;  %v5360_v62 = vld [vmem:[%s10317_s21 + $0xf8] sm:$0xff]  }
 0x2d6   :  { %v2553_v37 = vadd.f32 %v2552_v2, %v2550_v54  ;;  %v2171_v17 = vpop.permute.xlu1 %2170  ;;  %5235 = vmatprep.subr.bf16.mxu0 %v5357_v60  ;;  %v5361_v63 = vld [vmem:[%s10317_s21 + $0x10] sm:$0xff]   ;;  %v5362_v2 = vld [vmem:[%s10317_s21 + $0xb8] sm:$0xff]   ;;  %5249 = vmatprep.subr.bf16.mxu1 %v5360_v62  ;;  %v5370_v62 = vld [vmem:[%s10317_s21 + $0xa8] sm:$0xff]  }
 0x2d7   :  { %v2417_v31 = vpop.permute.xlu0 %2416  ;;  %v2173_v57 = vadd.f32 %v2171_v17, %v8743_v10  ;;  %5250 = vmatpush3.bf16.msra.mxu1 %v5362_v2  ;;  %v2180_v10 = vmul.f32 %v2072_v42, %v7987_v47  ;;  %v5366_v60 = vld [vmem:[%s10317_s21 + $0xb0] sm:$0xff]  }
 0x2d8   :  { %3505 = vrot.lane.b32.xlu1 %v3503_v34, %s9960_s9  ;;  %v8797_v46 = vadd.f32 %v10323_v23, %v2553_v37  ;;  %v2419_v48 = vadd.f32 %v2417_v31, %v8696_v20  ;;  %v2319_v20 = vmul.f32 %v2318_v50, %v8211_v24  ;;  %v10327_v34 = vstv %s8209_s2  ;;  %s8873_s2 = sld [smem:[#allocation6 + $0x5f]] }
 0x2d9   :  { %2458 = vrot.lane.b32.xlu0 %v2456_v43, %s9960_s9  ;;  %5236 = vmatpush3.bf16.msra.mxu0 %v5358_v13  ;;  %v2948_v31 = vmul.f32 %v10327_v34, %v8768_v52  ;;  %v2810_v23 = vstv %s8821_s3  ;;  %v5367_v13 = vld [vmem:[%s10317_s21 + $0x40] sm:$0xff]   ;;  %s9033_s3 = sld [smem:[#allocation6 + $0x82]] }
 0x2da   :  { %v2423_v49 = vpop.permute.xlu1 %2422  ;;  %5237 = vmatprep.subr.bf16.mxu0 %v5359_v30  ;;  %v2104_v43 = vstv %s8807_s27  ;;  %v5369_v30 = vld [vmem:[%s10317_s21] sm:$0xff]   ;;  %s10349_s27 = sld [smem:[#allocation30_spill]] }
 0x2db   :  { %v2315_v53 = vpop.permute.xlu0 %2314  ;;  %v2425_v39 = vadd.f32 %v2423_v49, %v2419_v48  ;;  %v2105_v50 = vmul.f32 %v2104_v43, %v8768_v52  ;;  %v2216_v12 = vmul.f32 %v2104_v43, %v8244_v9 }
 0x2dc   :  { %v2317_v27 = vadd.f32 %v2315_v53, %v8707_v11  ;;  %2212 = vrot.lane.b32.xlu1 %v2210_v33, %s9960_s9  ;;  %v2351_v11 = vmul.f32 %v2350_v51, %v8768_v52  ;;  %v10329_v33 = vstv %s10328_s22  ;;  %s9132_s22 = sld [smem:[#allocation6 + $0x9b]] }
 0x2dd   :  { %3610 = vrot.lane.b32.xlu0 %v3608_v28, %s9960_s9  ;;  %v8823_v1 = vadd.f32 %v2426_v22, %v2425_v39  ;;  %5238 = vmatpush3.bf16.msra.mxu0 %v5361_v63  ;;  %v3124_v53 = vmul.f32 %v10329_v33, %v7580_v55  ;;  %v2564_v39 = vstv %s8831_s20  ;;  %v2918_v28 = vmul.f32 %v2810_v23, %v7987_v47  ;;  %v5363_v22 = vld [vmem:[%s10317_s21 + $0x48] sm:$0xff]   ;;  %s9049_s20 = sld [smem:[#allocation6 + $0x83]] }
 0x2de   :  { %v2320_v45 = vadd.f32 %v2319_v20, %v2317_v27  ;;  %v2069_v61 = vpop.permute.xlu1 %2068  ;;  %v5364_v20 = vld [vmem:[%s10317_s21 + $0xf0] sm:$0xff]   ;;  %v5365_v27 = vld [vmem:[%s10317_s21 + $0x8] sm:$0xff]   ;;  %5239 = vmatprep.subr.bf16.mxu0 %v5363_v22  ;;  %v2565_v63 = vmul.f32 %v2564_v39, %v8211_v24  ;;  %v2842_v43 = vstv %s8873_s2  ;;  %s8957_s2 = sld [smem:[#allocation6 + $0x47]] }
 0x2df   :  { %v2909_v8 = vpop.permute.xlu0 %2908  ;;  %v2071_v19 = vadd.f32 %v2069_v61, %v8728_v38  ;;  %5251 = vmatprep.subr.bf16.mxu1 %v5364_v20  ;;  %v5375_v22 = vld [vmem:[%s10317_s21 + $0xd0] sm:$0xff]  }
 0x2e0   :  { %2353 = vrot.lane.b32.xlu1 %v2351_v11, %s9960_s9  ;;  %v8844_v38 = vadd.f32 %v8022_v26, %v2320_v45  ;;  %v2462_v26 = vmul.f32 %v2350_v51, %v8244_v9  ;;  %v2911_v17 = vadd.f32 %v2909_v8, %v8758_v58  ;;  %v2811_v58 = vmul.f32 %v2810_v23, %v8211_v24  ;;  %v5368_v45 = vld [vmem:[%s10317_s21 + $0xe8] sm:$0xff]  }
 0x2e1   :  { %v2074_v54 = vadd.f32 %v2073_v0, %v2071_v19  ;;  %3372 = vrot.lane.b32.xlu0 %v3370_v18, %s9960_s9  ;;  %v2672_v18 = vmul.f32 %v2564_v39, %v7987_v47  ;;  %5240 = vmatpush3.bf16.msra.mxu0 %v5365_v27 }
 0x2e2   :  { %v2663_v37 = vpop.permute.xlu1 %2662  ;;  %5252 = vmatpush3.bf16.msra.mxu1 %v5366_v60  ;;  %5241 = vmatprep.subr.bf16.mxu0 %v5367_v13  ;;  %v2954_v13 = vmul.f32 %v2842_v43, %v8244_v9 }
 0x2e3   :  { %v2177_v3 = vpop.permute.xlu0 %2176  ;;  %v8857_v25 = vadd.f32 %v8027_v4, %v2074_v54  ;;  %v2665_v42 = vadd.f32 %v2663_v37, %v8783_v40  ;;  %v10330_v40 = vstv %s8224_s30  ;;  %v3269_v54 = vstv %s8861_s11  ;;  %v5371_v37 = vld [vmem:[%s10317_s21 + $0xe0] sm:$0xff]   ;;  %5253 = vmatprep.subr.bf16.mxu1 %v5368_v45  ;;  %s10331_s11 = sld [smem:[#allocation56_spill]] }
 0x2e4   :  { %v2179_v5 = vadd.f32 %v2177_v3, %v2173_v57  ;;  %2950 = vrot.lane.b32.xlu1 %v2948_v31, %s9960_s9  ;;  %v2702_v8 = vmul.f32 %v10330_v40, %v8768_v52  ;;  %v10335_v45 = vld [vmem:[#allocation55_spill] sm:$0xff]  ;;  %s9000_s30 = sld [smem:[#allocation6 + $0x5a]] }
 0x2e5   :  { %2464 = vrot.lane.b32.xlu0 %v2462_v26, %s9960_s9  ;;  %5242 = vmatpush3.bf16.msra.mxu0 %v5369_v30 }
 0x2e6   :  { %v2915_v48 = vpop.permute.xlu1 %2914  ;;  %v8867_v4 = vadd.f32 %v2180_v10, %v2179_v5  ;;  %5254 = vmatpush3.bf16.msra.mxu1 %v5370_v62  ;;  %v5372_v5 = vld [vmem:[%s10317_s21 + $0xa0] sm:$0xff]   ;;  %v2331_v10 = vstv %s8879_s19  ;;  %s10360_s19 = sld [smem:[#allocation12_spill]] }
 0x2e7   :  { %v2807_v49 = vpop.permute.xlu0 %2806  ;;  %v2917_v32 = vadd.f32 %v2915_v48, %v2911_v17  ;;  %v10332_v17 = vld [vmem:[#allocation90_spill] sm:$0xff]  ;;  %5255 = vmatprep.subr.bf16.mxu1 %v5371_v37  ;;  %v2332_v33 = vmul.f32 %v2331_v10, %v8528_v6  ;;  %v5377_v37 = vld [vmem:[%s10317_s21 + $0xc8] sm:$0xff]  }
 0x2e8   :  { %v2809_v51 = vadd.f32 %v2807_v49, %v8780_v59  ;;  %2107 = vrot.lane.b32.xlu1 %v2105_v50, %s9960_s9  ;;  %v5373_v48 = vld [vmem:[%s10317_s21 + $0xd8] sm:$0xff]   ;;  %v2843_v49 = vmul.f32 %v2842_v43, %v8768_v52 }
 0x2e9   :  { %3126 = vrot.lane.b32.xlu0 %v3124_v53, %s9960_s9  ;;  %v8892_v59 = vadd.f32 %v2918_v28, %v2917_v32  ;;  %v10333_v39 = vstv %s10331_s11  ;;  %s9148_s11 = sld [smem:[#allocation6 + $0x2d]] }
 0x2ea   :  { %v2812_v61 = vadd.f32 %v2811_v58, %v2809_v51  ;;  %v2669_v11 = vpop.permute.xlu1 %2668  ;;  %v3862_v28 = vmul.f32 %v10333_v39, %v7580_v55  ;;  %v3023_v58 = vstv %s8907_s1  ;;  %5256 = vmatpush3.bf16.msra.mxu1 %v5372_v5  ;;  %v5374_v51 = vld [vmem:[%s10317_s21 + $0x98] sm:$0xff]   ;;  %s8980_s1 = sld [smem:[#allocation6 + $0xb0]]  ;;  %v10338_v5 = vstv %s10337_s14 }
 0x2eb   :  { %v2561_v0 = vpop.permute.xlu0 %2560  ;;  %v2671_v19 = vadd.f32 %v2669_v11, %v2665_v42  ;;  %5257 = vmatprep.subr.bf16.mxu1 %v5373_v48  ;;  %v3024_v42 = vmul.f32 %v3023_v58, %v7580_v55  ;;  %v5376_v11 = vld [vmem:[%s10317_s21 + $0x90] sm:$0xff]   ;;  %s10346_s14 = sld [smem:[#allocation29_spill]] }
 0x2ec   :  { %v2563_v2 = vadd.f32 %v2561_v0, %v8797_v46  ;;  %2704 = vrot.lane.b32.xlu1 %v2702_v8, %s9960_s9  ;;  %v8921_v57 = vadd.f32 %v8036_v41, %v2812_v61  ;;  %v3376_v46 = vmul.f32 %v3269_v54, %v10132_v44  ;;  %v3270_v41 = vmul.f32 %v3269_v54, %v7580_v55 }
 0x2ed   :  { %2218 = vrot.lane.b32.xlu0 %v2216_v12, %s9960_s9  ;;  %v8927_v34 = vadd.f32 %v2672_v18, %v2671_v19  ;;  %v2440_v8 = vmul.f32 %v2331_v10, %v8144_v7  ;;  %v10336_v19 = vstv %s10334_s13  ;;  %v2596_v54 = vstv %s8957_s2  ;;  %s10341_s13 = sld [smem:[#allocation27_spill]] }
 0x2ee   :  { %v2566_v31 = vadd.f32 %v2565_v63, %v2563_v2  ;;  %v8929_v3 = vpop.permute.xlu1 %2184  ;;  %5258 = vmatpush3.bf16.msra.mxu1 %v5374_v51  ;;  %v3616_v12 = vmul.f32 %v10336_v19, %v7580_v55  ;;  %v3130_v2 = vmul.f32 %v3023_v58, %v10132_v44  ;;  %v2708_v43 = vmul.f32 %v2596_v54, %v8244_v9  ;;  %s9181_s2 = sld [smem:[#allocation6 + $0x15]] }
 0x2ef   :  { %v2431_v26 = vpop.permute.xlu0 %2430  ;;  %5259 = vmatprep.subr.bf16.mxu1 %v5375_v22  ;;  %v3341_v10 = vmul.f32 %v10338_v5, %v6231_v15  ;;  %v2597_v48 = vmul.f32 %v2596_v54, %v8768_v52  ;;  %v3033_v54 = vstv %s9023_s0  ;;  %s5135_s0 = sld [smem:[#allocation6 + $0xb7]] }
 0x2f0   :  { %3378 = vrot.lane.b32.xlu1 %v3376_v46, %s9960_s9  ;;  %v8942_v23 = vadd.f32 %v10332_v17, %v2566_v31  ;;  %v2433_v20 = vadd.f32 %v2431_v26, %v8823_v1  ;;  %v2085_v1 = vstv %s8939_s29  ;;  %v5378_v31 = vld [vmem:[%s10317_s21 + $0x88] sm:$0xff]   ;;  %v2187_v26 = vadd.f32 %v8929_v3, %v8867_v4  ;;  %v5380_v4 = vld [vmem:[%s10317_s21 + $0x80] sm:$0xff]   ;;  %s10356_s29 = sld [smem:[#allocation19_spill]] }
 0x2f1   :  { %3272 = vrot.lane.b32.xlu0 %v3270_v41, %s9960_s9  ;;  %v2086_v62 = vmul.f32 %v2085_v1, %v8528_v6  ;;  %v3138_v5 = vmul.f32 %v3033_v54, %v7820_v56 }
 0x2f2   :  { %v2328_v50 = vpop.permute.xlu1 %2327  ;;  %5260 = vmatpush3.bf16.msra.mxu1 %v5376_v11  ;;  %v2823_v11 = vstv %s9000_s30  ;;  %s9111_s30 = sld [smem:[#allocation6 + $0xb3]] }
 0x2f3   :  { %v8949_v32 = vpop.permute.xlu0 %3344  ;;  %v2330_v53 = vadd.f32 %v2328_v50, %v8844_v38  ;;  %5261 = vmatprep.subr.bf16.mxu1 %v5377_v37  ;;  %v10339_v50 = vld [vmem:[#allocation79_spill] sm:$0xff]  ;;  %v3004_v37 = vstv %s9017_s26  ;;  %s9174_s26 = sld [smem:[#allocation6 + $0x6e]] }
 0x2f4   :  { %2845 = vrot.lane.b32.xlu1 %v2843_v49, %s9960_s9  ;;  %v3347_v39 = vadd.f32 %v8949_v32, %v3341_v10 }
 0x2f5   :  { %v2333_v38 = vadd.f32 %v2332_v33, %v2330_v53  ;;  %3864 = vrot.lane.b32.xlu0 %v3862_v28, %s9960_s9  ;;  %v3761_v33 = vstv %s8980_s1  ;;  %v2194_v53 = vmul.f32 %v2085_v1, %v8144_v7  ;;  %v3250_v28 = vstv %s8984_s24  ;;  %s9082_s1 = sld [smem:[#allocation6 + $0x9a]] }
 0x2f6   :  { %v8968_v27 = vpop.permute.xlu1 %2922  ;;  %5262 = vmatpush3.bf16.msra.mxu1 %v5378_v31  ;;  %v3868_v51 = vmul.f32 %v3761_v33, %v10132_v44  ;;  %v3279_v31 = vstv %s9033_s3  ;;  %s9094_s24 = sld [smem:[#allocation6 + $0xab]] }
 0x2f7   :  { %v2437_v60 = vpop.permute.xlu0 %2436  ;;  %v8973_v61 = vadd.f32 %v10335_v45, %v2333_v38  ;;  %v10340_v45 = vld [vmem:[#allocation37_spill] sm:$0xff] }
 0x2f8   :  { %v2439_v40 = vadd.f32 %v2437_v60, %v2433_v20  ;;  %3026 = vrot.lane.b32.xlu1 %v3024_v42, %s9960_s9  ;;  %v3762_v42 = vmul.f32 %v3761_v33, %v7580_v55  ;;  %v3354_v60 = vmul.f32 %v3250_v28, %v6520_v29 }
 0x2f9   :  { %2956 = vrot.lane.b32.xlu0 %v2954_v13, %s9960_s9  ;;  %v3251_v13 = vmul.f32 %v3250_v28, %v7423_v21  ;;  %v2932_v28 = vmul.f32 %v2823_v11, %v8144_v7 }
 0x2fa   :  { %v2082_v0 = vpop.permute.xlu1 %2081  ;;  %v8989_v18 = vadd.f32 %v2440_v8, %v2439_v40  ;;  %v3515_v40 = vstv %s8997_s6  ;;  %s9104_s6 = sld [smem:[#allocation6 + $0x93]] }
 0x2fb   :  { %v8991_v30 = vpop.permute.xlu0 %3098  ;;  %v2084_v63 = vadd.f32 %v2082_v0, %v8857_v25  ;;  %v5379_v25 = vld [vmem:[%s10317_s21 + $0xc0] sm:$0xff]   ;;  %v3622_v19 = vmul.f32 %v3515_v40, %v10132_v44 }
 0x2fc   :  { %3618 = vrot.lane.b32.xlu1 %v3616_v12, %s9960_s9  ;;  %5263 = vmatprep.subr.bf16.mxu1 %v5379_v25  ;;  %v10342_v25 = vld [vmem:[#allocation49_spill] sm:$0xff] }
 0x2fd   :  { %v2087_v46 = vadd.f32 %v2086_v62, %v2084_v63  ;;  %3132 = vrot.lane.b32.xlu0 %v3130_v2, %s9960_s9  ;;  %5264 = vmatpush3.bf16.msra.mxu1 %v5380_v4  ;;  %v2824_v62 = vmul.f32 %v2823_v11, %v8528_v6  ;;  %v3516_v2 = vmul.f32 %v3515_v40, %v7580_v55  ;;  %v3771_v40 = vstv %s9064_s4  ;;  %s9583_s4 = sld [smem:[#allocation6 + $0x6c]] }
 0x2fe   :  { %v9014_v41 = vpop.permute.xlu1 %2676  ;;  %v3384_v4 = vmul.f32 %v3279_v31, %v7820_v56 }
 0x2ff   :  { %v2191_v17 = vpop.permute.xlu0 %2190  ;;  %v9026_v49 = vadd.f32 %v10339_v50, %v2087_v46 }
 0x300   :  { %v2193_v3 = vadd.f32 %v2191_v17, %v2187_v26  ;;  %2710 = vrot.lane.b32.xlu1 %v2708_v43, %s9960_s9  ;;  %v3005_v17 = vmul.f32 %v3004_v37, %v7423_v21 }
 0x301   :  { %2599 = vrot.lane.b32.xlu0 %v2597_v48, %s9960_s9  ;;  %v10343_v48 = vld [vmem:[#allocation38_spill] sm:$0xff] }
 0x302   :  { %v3351_v58 = vpop.permute.xlu1 %3350  ;;  %v9040_v22 = vadd.f32 %v2194_v53, %v2193_v3  ;;  %v10344_v3 = vld [vmem:[#allocation93_spill] sm:$0xff] }
 0x303   :  { %v3247_v38 = vpop.permute.xlu0 %3246  ;;  %v3353_v20 = vadd.f32 %v3351_v58, %v3347_v39  ;;  %v3282_v39 = vstv %s9049_s20  ;;  %s9209_s20 = sld [smem:[#allocation6 + $0xb6]] }
 0x304   :  { %v3249_v32 = vadd.f32 %v3247_v38, %v10340_v45  ;;  %3870 = vrot.lane.b32.xlu1 %v3868_v51, %s9960_s9  ;;  %v3036_v45 = vstv %s9059_s12  ;;  %s10362_s12 = sld [smem:[#allocation39_spill]] }
 0x305   :  { %3764 = vrot.lane.b32.xlu0 %v3762_v42, %s9960_s9  ;;  %v9052_v1 = vadd.f32 %v3354_v60, %v3353_v20  ;;  %v3390_v20 = vmul.f32 %v3282_v39, %v7855_v16 }
 0x306   :  { %v3252_v8 = vadd.f32 %v3251_v13, %v3249_v32  ;;  %v2820_v0 = vpop.permute.xlu1 %2819  ;;  %v3283_v13 = vmul.f32 %v3282_v39, %v7820_v56  ;;  %v10347_v32 = vld [vmem:[#allocation50_spill] sm:$0xff]  ;;  %v3496_v39 = vstv %s9104_s6  ;;  %s9259_s6 = sld [smem:[#allocation6 + $0x89]] }
 0x307   :  { %v3837_v12 = vpop.permute.xlu0 %3836  ;;  %v2822_v63 = vadd.f32 %v2820_v0, %v8921_v57  ;;  %v2925_v57 = vadd.f32 %v8968_v27, %v8892_v59  ;;  %v10345_v59 = vstv %s10341_s13  ;;  %v2679_v0 = vadd.f32 %v9014_v41, %v8927_v34  ;;  %s9213_s13 = sld [smem:[#allocation6 + $0x7e]] }
 0x308   :  { %3624 = vrot.lane.b32.xlu1 %v3622_v19, %s9960_s9  ;;  %v9067_v46 = vadd.f32 %v10342_v25, %v3252_v8  ;;  %v3095_v27 = vmul.f32 %v10345_v59, %v6231_v15  ;;  %v3108_v8 = vmul.f32 %v3004_v37, %v6520_v29  ;;  %v2577_v19 = vstv %s9070_s17  ;;  %s9225_s17 = sld [smem:[#allocation6 + $0x9e]] }
 0x309   :  { %v2825_v26 = vadd.f32 %v2824_v62, %v2822_v63  ;;  %3518 = vrot.lane.b32.xlu0 %v3516_v2, %s9960_s9  ;;  %v10348_v62 = vstv %s10346_s14  ;;  %v3037_v25 = vmul.f32 %v3036_v45, %v7820_v56  ;;  %v3876_v37 = vmul.f32 %v3771_v40, %v7820_v56  ;;  %s9243_s14 = sld [smem:[#allocation6 + $0x66]] }
 0x30a   :  { %v3001_v43 = vpop.permute.xlu1 %3000  ;;  %v3101_v51 = vadd.f32 %v8991_v30, %v3095_v27  ;;  %v3833_v63 = vmul.f32 %v10348_v62, %v6231_v15  ;;  %v2686_v34 = vmul.f32 %v2577_v19, %v8144_v7  ;;  %v2578_v41 = vmul.f32 %v2577_v19, %v8528_v6  ;;  %v10352_v62 = vld [vmem:[#allocation41_spill] sm:$0xff] }
 0x30b   :  { %v2929_v10 = vpop.permute.xlu0 %2928  ;;  %v3003_v50 = vadd.f32 %v3001_v43, %v10343_v48  ;;  %v9085_v33 = vadd.f32 %v10344_v3, %v2825_v26  ;;  %v3742_v48 = vstv %s9094_s24  ;;  %v3497_v19 = vmul.f32 %v3496_v39, %v7423_v21  ;;  %s9228_s24 = sld [smem:[#allocation6 + $0x5d]] }
 0x30c   :  { %v2931_v53 = vadd.f32 %v2929_v10, %v2925_v57  ;;  %3140 = vrot.lane.b32.xlu1 %v3138_v5, %s9960_s9  ;;  %v3525_v5 = vstv %s9082_s1 }
 0x30d   :  { %v3006_v58 = vadd.f32 %v3005_v17, %v3003_v50  ;;  %3386 = vrot.lane.b32.xlu0 %v3384_v4, %s9960_s9  ;;  %v3839_v17 = vadd.f32 %v3837_v12, %v3833_v63  ;;  %v3630_v59 = vmul.f32 %v3525_v5, %v7820_v56  ;;  %v3743_v12 = vmul.f32 %v3742_v48, %v7423_v21 }
 0x30e   :  { %v9097_v38 = vpop.permute.xlu1 %3590  ;;  %v9100_v42 = vadd.f32 %v2932_v28, %v2931_v53  ;;  %v3846_v28 = vmul.f32 %v3742_v48, %v6520_v29 }
 0x30f   :  { %v3105_v60 = vpop.permute.xlu0 %3104  ;;  %v9107_v11 = vadd.f32 %v10347_v32, %v3006_v58  ;;  %v10350_v58 = vld [vmem:[#allocation40_spill] sm:$0xff] }
 0x310   :  { %v3107_v30 = vadd.f32 %v3105_v60, %v3101_v51  ;;  %3392 = vrot.lane.b32.xlu1 %v3390_v20, %s9960_s9  ;;  %v3774_v20 = vstv %s9111_s30  ;;  %v10351_v60 = vld [vmem:[#allocation64_spill] sm:$0xff]  ;;  %s10366_s30 = sld [smem:[#allocation121_spill]] }
 0x311   :  { %3285 = vrot.lane.b32.xlu0 %v3283_v13, %s9960_s9 }
 0x312   :  { %v2683_v2 = vpop.permute.xlu1 %2682  ;;  %v9122_v26 = vadd.f32 %v3108_v8, %v3107_v30  ;;  %v3882_v8 = vmul.f32 %v3774_v20, %v7855_v16 }
 0x313   :  { %v2574_v57 = vpop.permute.xlu0 %2573  ;;  %v2685_v43 = vadd.f32 %v2683_v2, %v2679_v0  ;;  %v3775_v2 = vmul.f32 %v3774_v20, %v7820_v56 }
 0x314   :  { %v2576_v10 = vadd.f32 %v2574_v57, %v8942_v23  ;;  %3039 = vrot.lane.b32.xlu1 %v3037_v25, %s9960_s9  ;;  %v3144_v23 = vmul.f32 %v3036_v45, %v7855_v16  ;;  %v10353_v25 = vstv %s10349_s27  ;;  %s9268_s27 = sld [smem:[#allocation6 + $0x71]] }
 0x315   :  { %3878 = vrot.lane.b32.xlu0 %v3876_v37, %s9960_s9  ;;  %v9136_v50 = vadd.f32 %v2686_v34, %v2685_v43  ;;  %v3587_v57 = vmul.f32 %v10353_v25, %v6231_v15  ;;  %v3528_v43 = vstv %s9132_s22  ;;  %v10354_v37 = vld [vmem:[#allocation51_spill] sm:$0xff]  ;;  %s10367_s22 = sld [smem:[#allocation18_spill]] }
 0x316   :  { %v2579_v4 = vadd.f32 %v2578_v41, %v2576_v10  ;;  %v3843_v3 = vpop.permute.xlu1 %3842  ;;  %v3529_v15 = vmul.f32 %v3528_v43, %v7820_v56 }
 0x317   :  { %v3739_v27 = vpop.permute.xlu0 %3738  ;;  %v3845_v53 = vadd.f32 %v3843_v3, %v3839_v17  ;;  %v3593_v21 = vadd.f32 %v9097_v38, %v3587_v57  ;;  %v3636_v17 = vmul.f32 %v3528_v43, %v7855_v16  ;;  %v3600_v38 = vmul.f32 %v3496_v39, %v6520_v29 }
 0x318   :  { %v3741_v51 = vadd.f32 %v3739_v27, %v10350_v58  ;;  %3632 = vrot.lane.b32.xlu1 %v3630_v59, %s9960_s9  ;;  %v9151_v13 = vadd.f32 %v10351_v60, %v2579_v4  ;;  %v10357_v4 = vld [vmem:[#allocation52_spill] sm:$0xff]  ;;  %v2344_v27 = vstv %s9148_s11  ;;  %v10359_v60 = vstv %s10356_s29  ;;  %s9277_s11 = sld [smem:[#allocation6 + $0x45]] }
 0x319   :  { %3146 = vrot.lane.b32.xlu0 %v3144_v23, %s9960_s9  ;;  %v9154_v45 = vadd.f32 %v3846_v28, %v3845_v53  ;;  %v10358_v23 = vstv %s10355_s23  ;;  %v3295_v29 = vstv %s9165_s25  ;;  %v2098_v43 = vstv %s9181_s2  ;;  %s9296_s25 = sld [smem:[#allocation6 + $0xae]] }
 0x31a   :  { %v3744_v32 = vadd.f32 %v3743_v12, %v3741_v51  ;;  %v3493_v30 = vpop.permute.xlu1 %3492  ;;  %v3152_v28 = vmul.f32 %v10358_v23, %v8045_v14  ;;  %v2345_v51 = vmul.f32 %v2344_v27, %v8768_v52  ;;  %s10372_s23 = sld [smem:[#allocation122_spill]] }
 0x31b   :  { %v2445_v0 = vpop.permute.xlu0 %2444  ;;  %v3495_v63 = vadd.f32 %v3493_v30, %v10352_v62  ;;  %s9306_s29 = sld [smem:[#allocation6 + $0x96]] }
 0x31c   :  { %3884 = vrot.lane.b32.xlu1 %v3882_v8, %s9960_s9  ;;  %v9168_v34 = vadd.f32 %v10354_v37, %v3744_v32  ;;  %v3398_v32 = vmul.f32 %v10359_v60, %v8045_v14  ;;  %v2447_v30 = vadd.f32 %v2445_v0, %v8989_v18  ;;  %v2454_v18 = vmul.f32 %v2344_v27, %v8244_v9  ;;  %s10374_s2 = sld [smem:[#allocation123_spill]] }
 0x31d   :  { %v3498_v41 = vadd.f32 %v3497_v19, %v3495_v63  ;;  %3777 = vrot.lane.b32.xlu0 %v3775_v2, %s9960_s9  ;;  %v3404_v19 = vmul.f32 %v3295_v29, %v7711_v36  ;;  %v3296_v63 = vmul.f32 %v3295_v29, %v8045_v14  ;;  %v10361_v2 = vld [vmem:[#allocation82_spill] sm:$0xff]  ;;  %v3263_v29 = vstv %s9213_s13  ;;  %s9367_s13 = sld [smem:[#allocation6 + $0x74]] }
 0x31e   :  { %v2199_v10 = vpop.permute.xlu1 %2198 }
 0x31f   :  { %v3597_v48 = vpop.permute.xlu0 %3596  ;;  %v9177_v3 = vadd.f32 %v10357_v4, %v3498_v41  ;;  %v2201_v27 = vadd.f32 %v2199_v10, %v9040_v22  ;;  %v2208_v22 = vmul.f32 %v2098_v43, %v8244_v9 }
 0x320   :  { %v3599_v59 = vadd.f32 %v3597_v48, %v3593_v21  ;;  %3638 = vrot.lane.b32.xlu1 %v3636_v17, %s9960_s9  ;;  %v2099_v17 = vmul.f32 %v2098_v43, %v8768_v52 }
 0x321   :  { %3531 = vrot.lane.b32.xlu0 %v3529_v15, %s9960_s9  ;;  %v10363_v15 = vstv %s10360_s19  ;;  %s9329_s19 = sld [smem:[#allocation6 + $0xa1]] }
 0x322   :  { %v2341_v53 = vpop.permute.xlu1 %2340  ;;  %v9188_v12 = vadd.f32 %v3600_v38, %v3599_v59  ;;  %v3890_v4 = vmul.f32 %v10363_v15, %v8045_v14 }
 0x323   :  { %v3359_v58 = vpop.permute.xlu0 %3358  ;;  %v2343_v20 = vadd.f32 %v2341_v53, %v8973_v61  ;;  %v3049_v61 = vstv %s9174_s26  ;;  %v10364_v53 = vstv %s10362_s12  ;;  %s9312_s26 = sld [smem:[#allocation6 + $0xb9]] }
 0x324   :  { %3154 = vrot.lane.b32.xlu1 %v3152_v28, %s9960_s9  ;;  %v3050_v37 = vmul.f32 %v3049_v61, %v8045_v14  ;;  %v3158_v28 = vmul.f32 %v3049_v61, %v7711_v36  ;;  %v3361_v10 = vadd.f32 %v3359_v58, %v9052_v1  ;;  %v2836_v1 = vstv %s9228_s24  ;;  %s9363_s12 = sld [smem:[#allocation7 + $0x1]] }
 0x325   :  { %v2346_v39 = vadd.f32 %v2345_v51, %v2343_v20  ;;  %3400 = vrot.lane.b32.xlu0 %v3398_v32, %s9960_s9  ;;  %v10365_v51 = vld [vmem:[#allocation72_spill] sm:$0xff]  ;;  %v3787_v32 = vstv %s9209_s20  ;;  %v3541_v58 = vstv %s9225_s17  ;;  %v2837_v15 = vmul.f32 %v2836_v1, %v8768_v52  ;;  %s9357_s20 = sld [smem:[#allocation6 + $0x8c]] }
 0x326   :  { %v9199_v8 = vpop.permute.xlu1 %2936  ;;  %v3788_v61 = vmul.f32 %v3787_v32, %v8045_v14  ;;  %s9515_s17 = sld [smem:[#allocation6 + $0xbf]] }
 0x327   :  { %v2451_v62 = vpop.permute.xlu0 %2450  ;;  %v9205_v25 = vadd.f32 %v10361_v2, %v2346_v39  ;;  %v3368_v2 = vmul.f32 %v3263_v29, %v10132_v44  ;;  %s9695_s24 = sld [smem:[#allocation6 + $0x72]] }
 0x328   :  { %v2453_v57 = vadd.f32 %v2451_v62, %v2447_v30  ;;  %3406 = vrot.lane.b32.xlu1 %v3404_v19, %s9960_s9  ;;  %v3896_v30 = vmul.f32 %v3787_v32, %v7711_v36 }
 0x329   :  { %3298 = vrot.lane.b32.xlu0 %v3296_v63, %s9960_s9 }
 0x32a   :  { %v2095_v0 = vpop.permute.xlu1 %2094  ;;  %v9216_v41 = vadd.f32 %v2454_v18, %v2453_v57  ;;  %v3264_v57 = vmul.f32 %v3263_v29, %v7580_v55 }
 0x32b   :  { %v9218_v21 = vpop.permute.xlu0 %3112  ;;  %v2097_v48 = vadd.f32 %v2095_v0, %v9026_v49  ;;  %v3644_v49 = vmul.f32 %v10364_v53, %v8045_v14  ;;  %v10368_v53 = vld [vmem:[#allocation63_spill] sm:$0xff] }
 0x32c   :  { %3052 = vrot.lane.b32.xlu1 %v3050_v37, %s9960_s9 }
 0x32d   :  { %v2100_v59 = vadd.f32 %v2099_v17, %v2097_v48  ;;  %3892 = vrot.lane.b32.xlu0 %v3890_v4, %s9960_s9  ;;  %v3650_v17 = vmul.f32 %v3541_v58, %v7711_v36  ;;  %v3542_v4 = vmul.f32 %v3541_v58, %v8045_v14 }
 0x32e   :  { %v9232_v38 = vpop.permute.xlu1 %2690 }
 0x32f   :  { %v2205_v23 = vpop.permute.xlu0 %2204  ;;  %v9239_v20 = vadd.f32 %v10365_v51, %v2100_v59  ;;  %v10369_v51 = vstv %s10366_s30  ;;  %s5094_s30 = sld [smem:[#allocation7 + $0x5]] }
 0x330   :  { %v2207_v60 = vadd.f32 %v2205_v23, %v2201_v27  ;;  %3646 = vrot.lane.b32.xlu1 %v3644_v49, %s9960_s9  ;;  %v3017_v27 = vstv %s9243_s14  ;;  %s9403_s14 = sld [smem:[#allocation6 + $0xbc]] }
 0x331   :  { %3160 = vrot.lane.b32.xlu0 %v3158_v28, %s9960_s9  ;;  %v3018_v32 = vmul.f32 %v3017_v27, %v7580_v55 }
 0x332   :  { %v3365_v39 = vpop.permute.xlu1 %3364  ;;  %v9250_v19 = vadd.f32 %v2208_v22, %v2207_v60  ;;  %v3166_v60 = vmul.f32 %v10369_v51, %v8211_v24 }
 0x333   :  { %v3260_v62 = vpop.permute.xlu0 %3259  ;;  %v3367_v63 = vadd.f32 %v3365_v39, %v3361_v10  ;;  %v10370_v10 = vstv %s10367_s22  ;;  %v10371_v39 = vld [vmem:[#allocation100_spill] sm:$0xff]  ;;  %s9430_s22 = sld [smem:[#allocation6 + $0x69]] }
 0x334   :  { %v3262_v43 = vadd.f32 %v3260_v62, %v9067_v46  ;;  %3898 = vrot.lane.b32.xlu1 %v3896_v30, %s9960_s9  ;;  %v3412_v29 = vmul.f32 %v10370_v10, %v8211_v24 }
 0x335   :  { %3790 = vrot.lane.b32.xlu0 %v3788_v61, %s9960_s9  ;;  %v9262_v18 = vadd.f32 %v3368_v2, %v3367_v63 }
 0x336   :  { %v3265_v0 = vadd.f32 %v3264_v57, %v3262_v43  ;;  %v2833_v37 = vpop.permute.xlu1 %2832 }
 0x337   :  { %v3851_v48 = vpop.permute.xlu0 %3850  ;;  %v2835_v46 = vadd.f32 %v2833_v37, %v9085_v33  ;;  %v2939_v33 = vadd.f32 %v9199_v8, %v9100_v42  ;;  %v3308_v42 = vstv %s9259_s6  ;;  %v2946_v8 = vmul.f32 %v2836_v1, %v8244_v9  ;;  %v10373_v37 = vld [vmem:[#allocation65_spill] sm:$0xff]  ;;  %s9415_s6 = sld [smem:[#allocation6 + $0xa4]] }
 0x338   :  { %v3853_v59 = vadd.f32 %v3851_v48, %v9154_v45  ;;  %3652 = vrot.lane.b32.xlu1 %v3650_v17, %s9960_s9  ;;  %v9274_v49 = vadd.f32 %v10368_v53, %v3265_v0  ;;  %v3418_v2 = vmul.f32 %v3308_v42, %v7987_v47  ;;  %v3309_v0 = vmul.f32 %v3308_v42, %v8211_v24 }
 0x339   :  { %v2838_v23 = vadd.f32 %v2837_v15, %v2835_v46  ;;  %3544 = vrot.lane.b32.xlu0 %v3542_v4, %s9960_s9  ;;  %v3062_v1 = vstv %s9268_s27  ;;  %s9445_s27 = sld [smem:[#allocation6 + $0x8f]] }
 0x33a   :  { %v3014_v28 = vpop.permute.xlu1 %3013  ;;  %v3063_v46 = vmul.f32 %v3062_v1, %v8211_v24 }
 0x33b   :  { %v2943_v45 = vpop.permute.xlu0 %2942  ;;  %v3016_v22 = vadd.f32 %v3014_v28, %v9107_v11  ;;  %v9290_v30 = vadd.f32 %v10371_v39, %v2838_v23  ;;  %v3115_v11 = vadd.f32 %v9218_v21, %v9122_v26  ;;  %v3122_v26 = vmul.f32 %v3017_v27, %v10132_v44 }
 0x33c   :  { %v2945_v62 = vadd.f32 %v2943_v45, %v2939_v33  ;;  %3168 = vrot.lane.b32.xlu1 %v3166_v60, %s9960_s9  ;;  %v2590_v21 = vstv %s9277_s11  ;;  %v10375_v33 = vstv %s10372_s23  ;;  %s9456_s11 = sld [smem:[#allocation6 + $0x77]] }
 0x33d   :  { %v3019_v63 = vadd.f32 %v3018_v32, %v3016_v22  ;;  %3414 = vrot.lane.b32.xlu0 %v3412_v29, %s9960_s9  ;;  %v3904_v28 = vmul.f32 %v10375_v33, %v8211_v24  ;;  %v2700_v27 = vmul.f32 %v2590_v21, %v8244_v9  ;;  %v2591_v51 = vmul.f32 %v2590_v21, %v8768_v52  ;;  %v10378_v21 = vld [vmem:[#allocation67_spill] sm:$0xff]  ;;  %v10379_v33 = vld [vmem:[#allocation68_spill] sm:$0xff] }
 0x33e   :  { %v3605_v61 = vpop.permute.xlu1 %3604  ;;  %v9301_v57 = vadd.f32 %v2946_v8, %v2945_v62  ;;  %v10376_v22 = vstv %s10374_s2  ;;  %v3172_v62 = vmul.f32 %v3062_v1, %v7987_v47  ;;  %s9665_s2 = sld [smem:[#allocation6 + $0x87]] }
 0x33f   :  { %v3119_v43 = vpop.permute.xlu0 %3118  ;;  %v3607_v58 = vadd.f32 %v3605_v61, %v9188_v12  ;;  %v9309_v17 = vadd.f32 %v10373_v37, %v3019_v63  ;;  %v2693_v12 = vadd.f32 %v9232_v38, %v9136_v50  ;;  %v3755_v38 = vstv %s9296_s25  ;;  %v10377_v61 = vld [vmem:[#allocation74_spill] sm:$0xff] }
 0x340   :  { %v3121_v48 = vadd.f32 %v3119_v43, %v3115_v11  ;;  %3420 = vrot.lane.b32.xlu1 %v3418_v2, %s9960_s9  ;;  %v3658_v10 = vmul.f32 %v10376_v22, %v8211_v24  ;;  %v3860_v42 = vmul.f32 %v3755_v38, %v10132_v44  ;;  %v3756_v8 = vmul.f32 %v3755_v38, %v7580_v55 }
 0x341   :  { %3311 = vrot.lane.b32.xlu0 %v3309_v0, %s9960_s9  ;;  %v3800_v11 = vstv %s9312_s26  ;;  %v10380_v38 = vstv %s8242_s8  ;;  %s9392_s8 = sld [smem:[#allocation7]] }
 0x342   :  { %v2697_v15 = vpop.permute.xlu1 %2696  ;;  %v9320_v4 = vadd.f32 %v3122_v26, %v3121_v48  ;;  %v3910_v1 = vmul.f32 %v3800_v11, %v7987_v47  ;;  %s9479_s26 = sld [smem:[#allocation7 + $0x2]] }
 0x343   :  { %v2587_v53 = vpop.permute.xlu0 %2586  ;;  %v2699_v23 = vadd.f32 %v2697_v15, %v2693_v12  ;;  %v3554_v12 = vstv %s9329_s19 }
 0x344   :  { %v2589_v50 = vadd.f32 %v2587_v53, %v9151_v13  ;;  %3065 = vrot.lane.b32.xlu1 %v3063_v46, %s9960_s9  ;;  %v3509_v13 = vstv %s9306_s29 }
 0x345   :  { %3906 = vrot.lane.b32.xlu0 %v3904_v28, %s9960_s9  ;;  %v9333_v60 = vadd.f32 %v2700_v27, %v2699_v23  ;;  %v3510_v48 = vmul.f32 %v3509_v13, %v7580_v55  ;;  %v3555_v23 = vmul.f32 %v3554_v12, %v8211_v24 }
 0x346   :  { %v2592_v45 = vadd.f32 %v2591_v51, %v2589_v50  ;;  %v3857_v32 = vpop.permute.xlu1 %3856  ;;  %v3614_v51 = vmul.f32 %v3509_v13, %v10132_v44  ;;  %v3321_v44 = vstv %s9357_s20  ;;  %v2469_v13 = vstv %s9363_s12  ;;  %s9501_s12 = sld [smem:[#allocation6 + $0x99]] }
 0x347   :  { %v3752_v29 = vpop.permute.xlu0 %3751  ;;  %v3859_v39 = vadd.f32 %v3857_v32, %v3853_v59  ;;  %s9673_s20 = sld [smem:[#allocation6 + $0x6f]] }
 0x348   :  { %v3754_v63 = vadd.f32 %v3752_v29, %v9168_v34  ;;  %3660 = vrot.lane.b32.xlu1 %v3658_v10, %s9960_s9  ;;  %v9346_v2 = vadd.f32 %v10377_v61, %v2592_v45  ;;  %v3801_v34 = vmul.f32 %v3800_v11, %v8211_v24  ;;  %v3180_v45 = vmul.f32 %v10380_v38, %v8528_v6 }
 0x349   :  { %3174 = vrot.lane.b32.xlu0 %v3172_v62, %s9960_s9  ;;  %v9349_v43 = vadd.f32 %v3860_v42, %v3859_v39  ;;  %v10381_v10 = vstv %s8232_s15  ;;  %v5381_v62 = vld [vmem:[%s10317_s21 + $0x178] sm:$0xff]   ;;  %v3075_v11 = vstv %s9367_s13  ;;  %s9400_s15 = sld [smem:[#allocation6 + $0x81]] }
 0x34a   :  { %v3757_v59 = vadd.f32 %v3756_v8, %v3754_v63  ;;  %v3506_v0 = vpop.permute.xlu1 %3505  ;;  %v3426_v29 = vmul.f32 %v10381_v10, %v8528_v6  ;;  %5271 = vmatprep.subr.bf16.mxu0 %v5381_v62  ;;  %v3322_v63 = vmul.f32 %v3321_v44, %v8528_v6 }
 0x34b   :  { %v2459_v37 = vpop.permute.xlu0 %2458  ;;  %v3508_v26 = vadd.f32 %v3506_v0, %v9177_v3  ;;  %v3664_v3 = vmul.f32 %v3554_v12, %v7987_v47 }
 0x34c   :  { %3912 = vrot.lane.b32.xlu1 %v3910_v1, %s9960_s9  ;;  %v9360_v15 = vadd.f32 %v10378_v21, %v3757_v59  ;;  %v2461_v42 = vadd.f32 %v2459_v37, %v9216_v41  ;;  %v3076_v1 = vmul.f32 %v3075_v11, %v8528_v6 }
 0x34d   :  { %v3511_v46 = vadd.f32 %v3510_v48, %v3508_v26  ;;  %3803 = vrot.lane.b32.xlu0 %v3801_v34, %s9960_s9  ;;  %v10382_v48 = vstv %s8257_s16  ;;  %s9632_s16 = sld [smem:[#allocation6 + $0xb4]] }
 0x34e   :  { %v2213_v55 = vpop.permute.xlu1 %2212  ;;  %v3918_v26 = vmul.f32 %v10382_v48, %v8528_v6 }
 0x34f   :  { %v3611_v53 = vpop.permute.xlu0 %3610  ;;  %v9370_v28 = vadd.f32 %v10379_v33, %v3511_v46  ;;  %v10383_v33 = vstv %s8264_s5  ;;  %v3276_v38 = vstv %s9400_s15  ;;  %s9435_s5 = sld [smem:[#allocation7 + $0x3]] }
 0x350   :  { %v3613_v27 = vadd.f32 %v3611_v53, %v3607_v58  ;;  %3666 = vrot.lane.b32.xlu1 %v3664_v3, %s9960_s9  ;;  %v2223_v3 = vstv %s9392_s8  ;;  %v2215_v53 = vadd.f32 %v2213_v55, %v9250_v19  ;;  %v3813_v55 = vstv %s9403_s14  ;;  %s5138_s8 = sld [smem:[#allocation6 + $0xba]] }
 0x351   :  { %3557 = vrot.lane.b32.xlu0 %v3555_v23, %s9960_s9  ;;  %s5113_s15 = sld [smem:[#allocation6 + $0xa2]] }
 0x352   :  { %v2354_v50 = vpop.permute.xlu1 %2353  ;;  %v9378_v32 = vadd.f32 %v3614_v51, %v3613_v27  ;;  %v3672_v27 = vmul.f32 %v10383_v33, %v8528_v6  ;;  %s5091_s14 = sld [smem:[#allocation6 + $0x8d]] }
 0x353   :  { %v3373_v22 = vpop.permute.xlu0 %3372  ;;  %v2356_v58 = vadd.f32 %v2354_v50, %v9205_v25  ;;  %v3186_v50 = vmul.f32 %v3075_v11, %v8144_v7 }
 0x354   :  { %v3375_v39 = vadd.f32 %v3373_v22, %v9262_v18  ;;  %3182 = vrot.lane.b32.xlu1 %v3180_v45, %s9960_s9  ;;  %v3432_v18 = vmul.f32 %v3321_v44, %v8144_v7  ;;  %v3277_v44 = vmul.f32 %v3276_v38, %v7820_v56 }
 0x355   :  { %3428 = vrot.lane.b32.xlu0 %v3426_v29, %s9960_s9  ;;  %v2470_v61 = vadd.f32 %v2469_v13, %v2356_v58  ;;  %v3924_v58 = vmul.f32 %v3813_v55, %v8144_v7  ;;  %v2961_v33 = vstv %s9435_s5  ;;  %s9644_s5 = sld [smem:[#allocation6 + $0x9c]] }
 0x356   :  { %v9395_v8 = vpop.permute.xlu1 %2950 }
 0x357   :  { %v2465_v25 = vpop.permute.xlu0 %2464  ;;  %v2471_v34 = vmax.f32 %v2470_v61, 0.0  ;;  %v3567_v61 = vstv %s9415_s6  ;;  %s9536_s6 = sld [smem:[#allocation6 + $0xa7]] }
 0x358   :  { %v2467_v59 = vadd.f32 %v2465_v25, %v2461_v42  ;;  %3434 = vrot.lane.b32.xlu1 %v3432_v18, %s9960_s9  ;;  %v3814_v42 = vmul.f32 %v3813_v55, %v8528_v6  ;;  %v3382_v18 = vmul.f32 %v3276_v38, %v7855_v16  ;;  %v10385_v38 = vstv %s8273_s10  ;;  %v5385_v55 = vld [vmem:[%s10317_s21 + $0x168] sm:$0xff]   ;;  %s9495_s10 = sld [smem:[#allocation6 + $0xb1]] }
 0x359   :  { %3324 = vrot.lane.b32.xlu0 %v3322_v63, %s9960_s9 }
 0x35a   :  { %v2472_v41 = vadd.f32 %v2469_v13, %v2467_v59  ;;  %v2108_v0 = vpop.permute.xlu1 %2107 }
 0x35b   :  { %v3127_v37 = vpop.permute.xlu0 %3126  ;;  %v2110_v46 = vadd.f32 %v2108_v0, %v9239_v20  ;;  %v5386_v20 = vld [vmem:[%s10317_s21 + $0x1f8] sm:$0xff]  }
 0x35c   :  { %v2473_v12 = vmax.f32 %v2472_v41, 0.0  ;;  %v9411_v21 = vadd.f32 %v3127_v37, %v9320_v4  ;;  %3078 = vrot.lane.b32.xlu1 %v3076_v1, %s9960_s9  ;;  %5293 = vmatprep.subr.bf16.mxu1 %v5386_v20  ;;  %v3678_v1 = vmul.f32 %v3567_v61, %v8144_v7  ;;  %v3280_v37 = vmul.f32 %v3279_v31, %v7855_v16 }
 0x35d   :  { %3920 = vrot.lane.b32.xlu0 %v3918_v26, %s9960_s9  ;;  %v2224_v45 = vadd.f32 %v2223_v3, %v2110_v46  ;;  %v3030_v26 = vstv %s9430_s22  ;;  %s5144_s22 = sld [smem:[#allocation7 + $0x7]] }
 0x35e   :  { %v9420_v23 = vpop.permute.xlu1 %2704  ;;  %v2474_v51 = vmax.f32 %v2471_v34, %v2473_v12  ;;  %v5382_v34 = vld [vmem:[%s10317_s21 + $0x138] sm:$0xff]  }
 0x35f   :  { %v2219_v4 = vpop.permute.xlu0 %2218  ;;  %v2225_v25 = vmax.f32 %v2224_v45, 0.0  ;;  %v3440_v45 = vmul.f32 %v10385_v38, %v8768_v52 }
 0x360   :  { %v2221_v22 = vadd.f32 %v2219_v4, %v2215_v53  ;;  %3674 = vrot.lane.b32.xlu1 %v3672_v27, %s9960_s9  ;;  %v2475_v19 = vpack.c.bf16 %v2474_v51, %v2474_v51  ;;  %v5383_v53 = vld [vmem:[%s10317_s21 + $0x170] sm:$0xff]   ;;  %v2953_v27 = vadd.f32 %v9395_v8, %v9301_v57  ;;  %v3031_v4 = vmul.f32 %v3030_v26, %v7820_v56 }
 0x361   :  { %3188 = vrot.lane.b32.xlu0 %v3186_v50, %s9960_s9  ;;  %v5384_v57 = vld [vmem:[%s10317_s21 + $0x130] sm:$0xff]  }
 0x362   :  { %v2226_v10 = vadd.f32 %v2223_v3, %v2221_v22  ;;  %5210 = vmatprep.mubr.msk.bf16.mxu0 %vm3952_vm0, %v2475_v19  ;;  %v3379_v29 = vpop.permute.xlu1 %3378  ;;  %v3334_v19 = vstv %s9445_s27  ;;  %s9562_s27 = sld [smem:[#allocation6 + $0x84]] }
 0x363   :  { %v3273_v62 = vpop.permute.xlu0 %3272  ;;  %v3381_v13 = vadd.f32 %v3379_v29, %v3375_v39 }
 0x364   :  { %v2227_v63 = vmax.f32 %v2226_v10, 0.0  ;;  %v3275_v11 = vadd.f32 %v3273_v62, %v9274_v49  ;;  %3926 = vrot.lane.b32.xlu1 %v3924_v58, %s9960_s9  ;;  %v3568_v49 = vmul.f32 %v3567_v61, %v8528_v6  ;;  %v3034_v10 = vmul.f32 %v3033_v54, %v7855_v16  ;;  %v5388_v54 = vld [vmem:[%s10317_s21 + $0x128] sm:$0xff]  }
 0x365   :  { %3816 = vrot.lane.b32.xlu0 %v3814_v42, %s9960_s9  ;;  %v9448_v59 = vadd.f32 %v3382_v18, %v3381_v13  ;;  %v3335_v42 = vmul.f32 %v3334_v19, %v8768_v52  ;;  %v3088_v18 = vstv %s9456_s11  ;;  %s10403_s11 = sld [smem:[#allocation129_spill]] }
 0x366   :  { %v2228_v41 = vmax.f32 %v2225_v25, %v2227_v63  ;;  %v3278_v39 = vadd.f32 %v3277_v44, %v3275_v11  ;;  %v2846_v0 = vpop.permute.xlu1 %2845  ;;  %v3446_v44 = vmul.f32 %v3334_v19, %v8244_v9 }
 0x367   :  { %v3865_v48 = vpop.permute.xlu0 %3864  ;;  %v2848_v3 = vadd.f32 %v2846_v0, %v9290_v30  ;;  %v10384_v30 = vstv %s8280_s28  ;;  %v2715_v0 = vstv %s9479_s26  ;;  %s10404_s28 = sld [smem:[#allocation128_spill]] }
 0x368   :  { %v2229_v12 = vpack.c.bf16 %v2228_v41, %v2228_v41  ;;  %v9462_v46 = vadd.f32 %v3865_v48, %v9349_v43  ;;  %3680 = vrot.lane.b32.xlu1 %v3678_v1, %s9960_s9  ;;  %v9466_v31 = vadd.f32 %v3280_v37, %v3278_v39  ;;  %v3194_v51 = vmul.f32 %v10384_v30, %v8768_v52  ;;  %v5389_v41 = vld [vmem:[%s10317_s21 + $0x160] sm:$0xff]  }
 0x369   :  { %3570 = vrot.lane.b32.xlu0 %v3568_v49, %s9960_s9  ;;  %v2962_v8 = vadd.f32 %v2961_v33, %v2848_v3  ;;  %v2707_v39 = vadd.f32 %v9420_v23, %v9333_v60  ;;  %v5392_v60 = vld [vmem:[%s10317_s21 + $0x120] sm:$0xff]  }
 0x36a   :  { %5211 = vmatmul.mubr.msk.bf16.vlgmr.msra.gmra.mxu0 %vm3952_vm0, %v2229_v12  ;;  %v3027_v43 = vpop.permute.xlu1 %3026 }
 0x36b   :  { %v2957_v20 = vpop.permute.xlu0 %2956  ;;  %v3029_v50 = vadd.f32 %v3027_v43, %v9309_v17  ;;  %5272 = vmatpush3.bf16.msra.mxu0 %v5382_v34  ;;  %v2963_v63 = vmax.f32 %v2962_v8, 0.0  ;;  %v10386_v34 = vstv %s8293_s7  ;;  %v5396_v8 = vld [vmem:[%s10317_s21 + $0x118] sm:$0xff]   ;;  %s5069_s7 = sld [smem:[#allocation7 + $0x4]] }
 0x36c   :  { %v2959_v22 = vadd.f32 %v2957_v20, %v2953_v27  ;;  %3196 = vrot.lane.b32.xlu1 %v3194_v51, %s9960_s9  ;;  %5273 = vmatprep.subr.bf16.mxu0 %v5383_v53  ;;  %v3932_v12 = vmul.f32 %v10386_v34, %v8768_v52  ;;  %v5393_v53 = vld [vmem:[%s10317_s21 + $0x158] sm:$0xff]   ;;  %v3768_v27 = vstv %s9495_s10  ;;  %v3522_v20 = vstv %s9501_s12 }
 0x36d   :  { %v3032_v17 = vadd.f32 %v3031_v4, %v3029_v50  ;;  %3442 = vrot.lane.b32.xlu0 %v3440_v45, %s9960_s9  ;;  %v3200_v45 = vmul.f32 %v3088_v18, %v8244_v9  ;;  %v3769_v19 = vmul.f32 %v3768_v27, %v7820_v56 }
 0x36e   :  { %v2964_v29 = vadd.f32 %v2961_v33, %v2959_v22  ;;  %v3619_v58 = vpop.permute.xlu1 %3618 }
 0x36f   :  { %v3133_v62 = vpop.permute.xlu0 %3132  ;;  %v9504_v13 = vadd.f32 %v3619_v58, %v9378_v32  ;;  %v9508_v25 = vadd.f32 %v3034_v10, %v3032_v17  ;;  %5274 = vmatpush3.bf16.msra.mxu0 %v5384_v57  ;;  %v3136_v32 = vmul.f32 %v3030_v26, %v7855_v16  ;;  %v3874_v57 = vmul.f32 %v3768_v27, %v7855_v16 }
 0x370   :  { %v2965_v11 = vmax.f32 %v2964_v29, 0.0  ;;  %v3135_v61 = vadd.f32 %v3133_v62, %v9411_v21  ;;  %3448 = vrot.lane.b32.xlu1 %v3446_v44, %s9960_s9  ;;  %5275 = vmatprep.subr.bf16.mxu0 %v5385_v55  ;;  %v3089_v21 = vmul.f32 %v3088_v18, %v8768_v52  ;;  %v3826_v17 = vstv %s9515_s17  ;;  %s5088_s17 = sld [smem:[#allocation6 + $0x8a]] }
 0x371   :  { %3337 = vrot.lane.b32.xlu0 %v3335_v42, %s9960_s9  ;;  %v3772_v62 = vmul.f32 %v3771_v40, %v7855_v16  ;;  %v3523_v42 = vmul.f32 %v3522_v20, %v7820_v56 }
 0x372   :  { %v2711_v1 = vpop.permute.xlu1 %2710  ;;  %v2966_v37 = vmax.f32 %v2963_v63, %v2965_v11  ;;  %v9526_v48 = vadd.f32 %v3136_v32, %v3135_v61  ;;  %v3827_v63 = vmul.f32 %v3826_v17, %v8768_v52  ;;  %v3628_v11 = vmul.f32 %v3522_v20, %v7855_v16  ;;  %v5387_v61 = vld [vmem:[%s10317_s21 + $0x1b8] sm:$0xff]   ;;  %v5400_v32 = vld [vmem:[%s10317_s21 + $0x110] sm:$0xff]  }
 0x373   :  { %v2600_v49 = vpop.permute.xlu0 %2599  ;;  %v2713_v26 = vadd.f32 %v2711_v1, %v2707_v39  ;;  %5276 = vmatpush3.bf16.msra.mxu0 %v5388_v54  ;;  %v5390_v39 = vld [vmem:[%s10317_s21 + $0x1f0] sm:$0xff]   ;;  %v5401_v1 = vld [vmem:[%s10317_s21 + $0x148] sm:$0xff]  }
 0x374   :  { %v2602_v23 = vadd.f32 %v2600_v49, %v9346_v2  ;;  %3091 = vrot.lane.b32.xlu1 %v3089_v21, %s9960_s9  ;;  %v2967_v3 = vpack.c.bf16 %v2966_v37, %v2966_v37  ;;  %5277 = vmatprep.subr.bf16.mxu0 %v5389_v41  ;;  %v10387_v2 = vstv %s8303_s18  ;;  %v3526_v49 = vmul.f32 %v3525_v5, %v7855_v16  ;;  %v5394_v5 = vld [vmem:[%s10317_s21 + $0x1e8] sm:$0xff]   ;;  %s9728_s18 = sld [smem:[#allocation7 + $0x6]] }
 0x375   :  { %v2718_v33 = vadd.f32 %v2715_v0, %v2713_v26  ;;  %3934 = vrot.lane.b32.xlu0 %v3932_v12, %s9960_s9  ;;  %v3686_v51 = vmul.f32 %v10387_v2, %v8768_v52  ;;  %v5408_v2 = vld [vmem:[%s10317_s21 + $0x100] sm:$0xff]  }
 0x376   :  { %v2716_v43 = vadd.f32 %v2715_v0, %v2602_v23  ;;  %5212 = vmatprep.mubr.msk.bf16.mxu1 %vm3952_vm0, %v2967_v3  ;;  %v3871_v30 = vpop.permute.xlu1 %3870  ;;  %v5404_v23 = vld [vmem:[%s10317_s21 + $0x108] sm:$0xff]  }
 0x377   :  { %v2719_v4 = vmax.f32 %v2718_v33, 0.0  ;;  %v3765_v50 = vpop.permute.xlu0 %3764  ;;  %v3873_v38 = vadd.f32 %v3871_v30, %v9462_v46  ;;  %5278 = vmatpush3.bf16.msra.mxu0 %v5392_v60  ;;  %v5397_v46 = vld [vmem:[%s10317_s21 + $0x150] sm:$0xff]   ;;  %v5395_v30 = vld [vmem:[%s10317_s21 + $0x1a8] sm:$0xff]  }
 0x378   :  { %v2717_v22 = vmax.f32 %v2716_v43, 0.0  ;;  %v3767_v55 = vadd.f32 %v3765_v50, %v9360_v15  ;;  %3688 = vrot.lane.b32.xlu1 %v3686_v51, %s9960_s9  ;;  %5279 = vmatprep.subr.bf16.mxu0 %v5393_v53  ;;  %v3938_v15 = vmul.f32 %v3826_v17, %v8244_v9  ;;  %v5391_v60 = vld [vmem:[%s10317_s21 + $0x1b0] sm:$0xff]   ;;  %v3289_v53 = vstv %s9562_s27  ;;  %v5398_v50 = vld [vmem:[%s10317_s21 + $0x1e0] sm:$0xff]  }
 0x379   :  { %3202 = vrot.lane.b32.xlu0 %v3200_v45, %s9960_s9  ;;  %v9564_v10 = vadd.f32 %v3874_v57, %v3873_v38  ;;  %v3396_v43 = vmul.f32 %v3289_v53, %v7711_v36  ;;  %v3290_v51 = vmul.f32 %v3289_v53, %v8045_v14  ;;  %v10388_v17 = vld [vmem:[#allocation69_spill] sm:$0xff] }
 0x37a   :  { %v2720_v29 = vmax.f32 %v2717_v22, %v2719_v4  ;;  %v3770_v58 = vadd.f32 %v3769_v19, %v3767_v55  ;;  %v3625_v44 = vpop.permute.xlu1 %3624  ;;  %v3043_v4 = vstv %s9583_s4  ;;  %v5411_v53 = vld [vmem:[%s10317_s21 + $0x1c0] sm:$0xff]  }
 0x37b   :  { %v3519_v18 = vpop.permute.xlu0 %3518  ;;  %v3627_v54 = vadd.f32 %v3625_v44, %v9504_v13  ;;  %5280 = vmatpush3.bf16.msra.mxu0 %v5396_v8  ;;  %v3580_v13 = vstv %s9536_s6  ;;  %v3044_v22 = vmul.f32 %v3043_v4, %v8045_v14  ;;  %s5141_s6 = sld [smem:[#allocation6 + $0xbd]] }
 0x37c   :  { %v2721_v40 = vpack.c.bf16 %v2720_v29, %v2720_v29  ;;  %v3521_v56 = vadd.f32 %v3519_v18, %v9370_v28  ;;  %3940 = vrot.lane.b32.xlu1 %v3938_v15, %s9960_s9  ;;  %v9585_v41 = vadd.f32 %v3772_v62, %v3770_v58  ;;  %5281 = vmatprep.subr.bf16.mxu0 %v5397_v46  ;;  %v5402_v29 = vld [vmem:[%s10317_s21 + $0x1d8] sm:$0xff]   ;;  %v10389_v62 = vld [vmem:[#allocation81_spill] sm:$0xff] }
 0x37d   :  { %3829 = vrot.lane.b32.xlu0 %v3827_v63, %s9960_s9  ;;  %v3629_v0 = vadd.f32 %v3628_v11, %v3627_v54  ;;  %v3692_v37 = vmul.f32 %v3580_v13, %v8244_v9  ;;  %v3581_v12 = vmul.f32 %v3580_v13, %v8768_v52  ;;  %v3150_v54 = vmul.f32 %v3043_v4, %v7711_v36  ;;  %v5406_v63 = vld [vmem:[%s10317_s21 + $0x1d0] sm:$0xff]  }
 0x37e   :  { %v3524_v28 = vadd.f32 %v3523_v42, %v3521_v56  ;;  %5213 = vmatmul.mubr.msk.bf16.vlgmr.msra.gmra.mxu1 %vm3952_vm0, %v2721_v40  ;;  %v3141_v21 = vpop.permute.xlu1 %3140  ;;  %v3781_v11 = vstv %s9632_s16  ;;  %s5116_s16 = sld [smem:[#allocation6 + $0xa5]] }
 0x37f   :  { %v3387_v26 = vpop.permute.xlu0 %3386  ;;  %v3143_v34 = vadd.f32 %v3141_v21, %v9526_v48  ;;  %5294 = vmatpush3.bf16.msra.mxu1 %v5387_v61  ;;  %5282 = vmatpush3.bf16.msra.mxu0 %v5400_v32  ;;  %v5405_v48 = vld [vmem:[%s10317_s21 + $0x140] sm:$0xff]   ;;  %v3888_v13 = vmul.f32 %v3781_v11, %v7711_v36  ;;  %v3535_v21 = vstv %s9644_s5 }
 0x380   :  { %v3389_v3 = vadd.f32 %v3387_v26, %v9448_v59  ;;  %3694 = vrot.lane.b32.xlu1 %v3692_v37, %s9960_s9  ;;  %v9609_v16 = vadd.f32 %v3526_v49, %v3524_v28  ;;  %5295 = vmatprep.subr.bf16.mxu1 %v5390_v39  ;;  %v5407_v39 = vld [vmem:[%s10317_s21 + $0x190] sm:$0xff]   ;;  %v5409_v28 = vld [vmem:[%s10317_s21 + $0x1c8] sm:$0xff]  }
 0x381   :  { %3583 = vrot.lane.b32.xlu0 %v3581_v12, %s9960_s9  ;;  %5283 = vmatprep.subr.bf16.mxu0 %v5401_v1  ;;  %s9710_s9 = sld [smem:[#allocation6 + $0x75]] }
 0x382   :  { %v3393_v33 = vpop.permute.xlu1 %3392 }
 0x383   :  { %v3286_v59 = vpop.permute.xlu0 %3285  ;;  %v3395_v27 = vadd.f32 %v3393_v33, %v3389_v3  ;;  %5296 = vmatpush3.bf16.msra.mxu1 %v5391_v60  ;;  %5284 = vmatpush3.bf16.msra.mxu0 %v5404_v23  ;;  %v3642_v60 = vmul.f32 %v3535_v21, %v7711_v36  ;;  %v3536_v23 = vmul.f32 %v3535_v21, %v8045_v14 }
 0x384   :  { %v3288_v20 = vadd.f32 %v3286_v59, %v9466_v31  ;;  %5297 = vmatprep.subr.bf16.mxu1 %v5394_v5  ;;  %5285 = vmatprep.subr.bf16.mxu0 %v5405_v48  ;;  %v5399_v31 = vld [vmem:[%s10317_s21 + $0x1a0] sm:$0xff]  }
 0x385   :  { %v3397_v38 = vadd.f32 %v3396_v43, %v3395_v27  ;;  %v10390_v5 = vld [vmem:[#allocation61_spill] sm:$0xff] }
 0x386   :  { %v3291_v45 = vadd.f32 %v3290_v51, %v3288_v20  ;;  %v3040_v57 = vpop.permute.xlu1 %3039  ;;  %v3302_v51 = vstv %s9665_s2 }
 0x387   :  { %v3879_v8 = vpop.permute.xlu0 %3878  ;;  %v3042_v19 = vadd.f32 %v3040_v57, %v9508_v25  ;;  %5298 = vmatpush3.bf16.msra.mxu1 %v5395_v30  ;;  %5286 = vmatpush3.bf16.msra.mxu0 %v5408_v2  ;;  %v3303_v57 = vmul.f32 %v3302_v51, %v8211_v24 }
 0x388   :  { %v3881_v55 = vadd.f32 %v3879_v8, %v9564_v10  ;;  %v3294_v46 = vadd.f32 %v10388_v17, %v3291_v45  ;;  %5299 = vmatprep.subr.bf16.mxu1 %v5398_v50  ;;  %v5403_v10 = vld [vmem:[%s10317_s21 + $0x198] sm:$0xff]   ;;  %v3410_v45 = vmul.f32 %v3302_v51, %v7987_v47 }
 0x389   :  { %v3045_v58 = vadd.f32 %v3044_v22, %v3042_v19  ;;  %v3056_v22 = vstv %s9673_s20 }
 0x38a   :  { %v3633_v25 = vpop.permute.xlu1 %3632 }
 0x38b   :  { %v3147_v44 = vpop.permute.xlu0 %3146  ;;  %v3635_v15 = vadd.f32 %v3633_v25, %v3629_v0  ;;  %v3048_v42 = vadd.f32 %v10389_v62, %v3045_v58  ;;  %5300 = vmatpush3.bf16.msra.mxu1 %v5399_v31  ;;  %v3782_v0 = vmul.f32 %v3781_v11, %v8045_v14  ;;  %v5412_v14 = vld [vmem:[%s10317_s21 + $0x180] sm:$0xff]   ;;  %v3794_v11 = vstv %s5135_s0 }
 0x38c   :  { %v3149_v18 = vadd.f32 %v3147_v44, %v3143_v34  ;;  %5301 = vmatprep.subr.bf16.mxu1 %v5402_v29  ;;  %v3057_v29 = vmul.f32 %v3056_v22, %v8211_v24 }
 0x38e   :  { %v3885_v61 = vpop.permute.xlu1 %3884  ;;  %v3151_v32 = vadd.f32 %v3150_v54, %v3149_v18 }
 0x38f   :  { %v3778_v40 = vpop.permute.xlu0 %3777  ;;  %v3887_v56 = vadd.f32 %v3885_v61, %v3881_v55  ;;  %5302 = vmatpush3.bf16.msra.mxu1 %v5403_v10  ;;  %v10393_v10 = vld [vmem:[#allocation75_spill] sm:$0xff] }
 0x390   :  { %v3780_v1 = vadd.f32 %v3778_v40, %v9585_v41  ;;  %5303 = vmatprep.subr.bf16.mxu1 %v5406_v63  ;;  %v5410_v41 = vld [vmem:[%s10317_s21 + $0x188] sm:$0xff]   ;;  %s5110_s21 = sld [smem:[#allocation6 + $0x9f]] }
 0x391   :  { %v3889_v37 = vadd.f32 %v3888_v13, %v3887_v56  ;;  %v3902_v13 = vmul.f32 %v3794_v11, %v7987_v47 }
 0x392   :  { %v3783_v49 = vadd.f32 %v3782_v0, %v3780_v1  ;;  %v3639_v26 = vpop.permute.xlu1 %3638 }
 0x393   :  { %v3532_v34 = vpop.permute.xlu0 %3531  ;;  %v3641_v12 = vadd.f32 %v3639_v26, %v3635_v15  ;;  %5304 = vmatpush3.bf16.msra.mxu1 %v5407_v39 }
 0x394   :  { %v3534_v3 = vadd.f32 %v3532_v34, %v9609_v16  ;;  %v3786_v48 = vadd.f32 %v10390_v5, %v3783_v49  ;;  %5305 = vmatprep.subr.bf16.mxu1 %v5409_v28  ;;  %v10391_v16 = vld [vmem:[#allocation85_spill] sm:$0xff] }
 0x395   :  { %v3643_v36 = vadd.f32 %v3642_v60, %v3641_v12 }
 0x396   :  { %v3537_v33 = vadd.f32 %v3536_v23, %v3534_v3  ;;  %v3155_v59 = vpop.permute.xlu1 %3154  ;;  %v3548_v1 = vstv %s5110_s21 }
 0x397   :  { %v3401_v27 = vpop.permute.xlu0 %3400  ;;  %v3157_v43 = vadd.f32 %v3155_v59, %v3151_v32  ;;  %5306 = vmatpush3.bf16.msra.mxu1 %v5410_v41  ;;  %v3549_v12 = vmul.f32 %v3548_v1, %v8211_v24  ;;  %v10394_v41 = vld [vmem:[#allocation89_spill] sm:$0xff] }
 0x398   :  { %v3540_v30 = vadd.f32 %v10391_v16, %v3537_v33  ;;  %5307 = vmatprep.subr.bf16.mxu1 %v5411_v53  ;;  %v3403_v2 = vadd.f32 %v3401_v27, %v3397_v38  ;;  %v10392_v38 = vld [vmem:[#allocation66_spill] sm:$0xff]  ;;  %v3315_v27 = vstv %s5088_s17 }
 0x39a   :  { %v3407_v20 = vpop.permute.xlu1 %3406 }
 0x39b   :  { %v3299_v4 = vpop.permute.xlu0 %3298  ;;  %v3409_v50 = vadd.f32 %v3407_v20, %v3403_v2  ;;  %5308 = vmatpush3.bf16.msra.mxu1 %v5412_v14  ;;  %v3069_v2 = vstv %s9695_s24  ;;  %s10405_s24 = sld [smem:[#allocation130_spill]] }
 0x39c   :  { %v3301_v8 = vadd.f32 %v3299_v4, %v3294_v46  ;;  %v3164_v46 = vmul.f32 %v3056_v22, %v7987_v47 }
 0x39d   :  { %v3411_v19 = vadd.f32 %v3410_v45, %v3409_v50  ;;  %v3070_v45 = vmul.f32 %v3069_v2, %v8528_v6 }
 0x39e   :  { %v3304_v31 = vadd.f32 %v3303_v57, %v3301_v8  ;;  %v3053_v55 = vpop.permute.xlu1 %3052 }
 0x39f   :  { %v3893_v17 = vpop.permute.xlu0 %3892  ;;  %v3055_v58 = vadd.f32 %v3053_v55, %v3048_v42  ;;  %v3795_v42 = vmul.f32 %v3794_v11, %v8211_v24  ;;  %v3316_v24 = vmul.f32 %v3315_v27, %v8528_v6  ;;  %v3561_v11 = vstv %s5113_s15 }
 0x3a0   :  { %v3307_v25 = vadd.f32 %v10392_v38, %v3304_v31  ;;  %v3895_v63 = vadd.f32 %v3893_v17, %v3889_v37  ;;  %v3656_v37 = vmul.f32 %v3548_v1, %v7987_v47  ;;  %v3424_v47 = vmul.f32 %v3315_v27, %v8144_v7  ;;  %v10396_v17 = vld [vmem:[#allocation107_spill] sm:$0xff]  ;;  %v10397_v1 = vld [vmem:[#allocation110_spill] sm:$0xff] }
 0x3a1   :  { %v3058_v44 = vadd.f32 %v3057_v29, %v3055_v58  ;;  %v3178_v38 = vmul.f32 %v3069_v2, %v8144_v7 }
 0x3a2   :  { %v3647_v15 = vpop.permute.xlu1 %3646 }
 0x3a3   :  { %v3161_v62 = vpop.permute.xlu0 %3160  ;;  %v3061_v18 = vadd.f32 %v10393_v10, %v3058_v44  ;;  %v3649_v0 = vadd.f32 %v3647_v15, %v3643_v36  ;;  %v10395_v36 = vld [vmem:[#allocation97_spill] sm:$0xff]  ;;  %v3807_v44 = vstv %s5138_s8 }
 0x3a4   :  { %v3163_v54 = vadd.f32 %v3161_v62, %v3157_v43 }
 0x3a6   :  { %v3899_v61 = vpop.permute.xlu1 %3898  ;;  %v3165_v32 = vadd.f32 %v3164_v46, %v3163_v54 }
 0x3a7   :  { %v3791_v40 = vpop.permute.xlu0 %3790  ;;  %v3901_v56 = vadd.f32 %v3899_v61, %v3895_v63 }
 0x3a8   :  { %v3793_v39 = vadd.f32 %v3791_v40, %v3786_v48 }
 0x3a9   :  { %v3903_v28 = vadd.f32 %v3902_v13, %v3901_v56 }
 0x3aa   :  { %v3796_v21 = vadd.f32 %v3795_v42, %v3793_v39  ;;  %v3653_v49 = vpop.permute.xlu1 %3652  ;;  %v3670_v42 = vmul.f32 %v3561_v11, %v8144_v7  ;;  %v3562_v39 = vmul.f32 %v3561_v11, %v8528_v6  ;;  %v10401_v11 = vld [vmem:[#allocation91_spill] sm:$0xff] }
 0x3ab   :  { %v3545_v26 = vpop.permute.xlu0 %3544  ;;  %v3655_v34 = vadd.f32 %v3653_v49, %v3649_v0  ;;  %v5505_v49 = vmov 0.0  }
 0x3ac   :  { %v3547_v60 = vadd.f32 %v3545_v26, %v3540_v30  ;;  %v3799_v23 = vadd.f32 %v10394_v41, %v3796_v21  ;;  %5323 = vmatprep.subr.bf16.mxu0 %v5505_v49 }
 0x3ad   :  { %v3657_v3 = vadd.f32 %v3656_v37, %v3655_v34 }
 0x3ae   :  { %v3550_v5 = vadd.f32 %v3549_v12, %v3547_v60  ;;  %v3169_v48 = vpop.permute.xlu1 %3168  ;;  %v10398_v12 = vld [vmem:[#allocation83_spill] sm:$0xff] }
 0x3af   :  { %v3415_v53 = vpop.permute.xlu0 %3414 }
 0x3b0   :  { %v3553_v33 = vadd.f32 %v10395_v36, %v3550_v5  ;;  %v3417_v59 = vadd.f32 %v3415_v53, %v3411_v19  ;;  %v3171_v19 = vadd.f32 %v3169_v48, %v3165_v32  ;;  %v3082_v36 = vstv %s9710_s9 }
 0x3b2   :  { %v3421_v43 = vpop.permute.xlu1 %3420 }
 0x3b3   :  { %v3312_v14 = vpop.permute.xlu0 %3311  ;;  %v3423_v16 = vadd.f32 %v3421_v43, %v3417_v59 }
 0x3b4   :  { %v3314_v30 = vadd.f32 %v3312_v14, %v3307_v25  ;;  %v3083_v14 = vmul.f32 %v3082_v36, %v8768_v52 }
 0x3b5   :  { %v3425_v51 = vadd.f32 %v3424_v47, %v3423_v16  ;;  %v10399_v47 = vld [vmem:[#allocation77_spill] sm:$0xff] }
 0x3b6   :  { %v3317_v20 = vadd.f32 %v3316_v24, %v3314_v30  ;;  %v3066_v4 = vpop.permute.xlu1 %3065 }
 0x3b7   :  { %v3907_v50 = vpop.permute.xlu0 %3906  ;;  %v3068_v57 = vadd.f32 %v3066_v4, %v3061_v18  ;;  %v3916_v18 = vmul.f32 %v3807_v44, %v8144_v7  ;;  %v10400_v4 = vld [vmem:[#allocation86_spill] sm:$0xff] }
 0x3b8   :  { %v3320_v8 = vadd.f32 %v8341_v35, %v3317_v20  ;;  %v3909_v25 = vadd.f32 %v3907_v50, %v3903_v28  ;;  %v3808_v35 = vmul.f32 %v3807_v44, %v8528_v6  ;;  %v3574_v44 = vstv %s5116_s16 }
 0x3b9   :  { %v3071_v22 = vadd.f32 %v3070_v45, %v3068_v57  ;;  %v3192_v57 = vmul.f32 %v3082_v36, %v8244_v9 }
 0x3ba   :  { %v3661_v31 = vpop.permute.xlu1 %3660 }
 0x3bb   :  { %v3175_v55 = vpop.permute.xlu0 %3174  ;;  %v3074_v29 = vadd.f32 %v10396_v17, %v3071_v22  ;;  %v3663_v63 = vadd.f32 %v3661_v31, %v3657_v3  ;;  %v3820_v22 = vstv %s5141_s6 }
 0x3bc   :  { %v3177_v58 = vadd.f32 %v3175_v55, %v3171_v19 }
 0x3be   :  { %v3913_v15 = vpop.permute.xlu1 %3912  ;;  %v3179_v62 = vadd.f32 %v3178_v38, %v3177_v58  ;;  %v3821_v58 = vmul.f32 %v3820_v22, %v8768_v52 }
 0x3bf   :  { %v3804_v10 = vpop.permute.xlu0 %3803  ;;  %v3915_v54 = vadd.f32 %v3913_v15, %v3909_v25 }
 0x3c0   :  { %v3806_v46 = vadd.f32 %v3804_v10, %v3799_v23  ;;  %v3328_v23 = vstv %s5091_s14  ;;  %s10406_s14 = sld [smem:[#allocation131_spill]] }
 0x3c1   :  { %v3917_v61 = vadd.f32 %v3916_v18, %v3915_v54  ;;  %v3438_v5 = vmul.f32 %v3328_v23, %v8244_v9  ;;  %v3329_v48 = vmul.f32 %v3328_v23, %v8768_v52 }
 0x3c2   :  { %v3809_v32 = vadd.f32 %v3808_v35, %v3806_v46  ;;  %v3667_v40 = vpop.permute.xlu1 %3666  ;;  %v3684_v35 = vmul.f32 %v3574_v44, %v8244_v9  ;;  %v3575_v46 = vmul.f32 %v3574_v44, %v8768_v52 }
 0x3c3   :  { %v3558_v56 = vpop.permute.xlu0 %3557  ;;  %v3669_v13 = vadd.f32 %v3667_v40, %v3663_v63 }
 0x3c4   :  { %v3560_v0 = vadd.f32 %v3558_v56, %v3553_v33  ;;  %v3812_v28 = vadd.f32 %v10397_v1, %v3809_v32  ;;  %v3453_v1 = vstv %s5094_s30 }
 0x3c5   :  { %v3671_v21 = vadd.f32 %v3670_v42, %v3669_v13  ;;  %v10402_v42 = vld [vmem:[#allocation96_spill] sm:$0xff] }
 0x3c6   :  { %v3563_v26 = vadd.f32 %v3562_v39, %v3560_v0  ;;  %v3183_v34 = vpop.permute.xlu1 %3182 }
 0x3c7   :  { %v3429_v37 = vpop.permute.xlu0 %3428  ;;  %v3185_v2 = vadd.f32 %v3183_v34, %v3179_v62 }
 0x3c8   :  { %v3566_v60 = vadd.f32 %v10398_v12, %v3563_v26  ;;  %v3431_v41 = vadd.f32 %v3429_v37, %v3425_v51 }
 0x3ca   :  { %v3435_v7 = vpop.permute.xlu1 %3434 }
 0x3cb   :  { %v3325_v3 = vpop.permute.xlu0 %3324  ;;  %v3437_v6 = vadd.f32 %v3435_v7, %v3431_v41  ;;  %v3207_v7 = vstv %s5069_s7 }
 0x3cc   :  { %v3327_v53 = vadd.f32 %v3325_v3, %v3320_v8 }
 0x3cd   :  { %v3439_v33 = vadd.f32 %v3438_v5, %v3437_v6 }
 0x3ce   :  { %v3330_v59 = vadd.f32 %v3329_v48, %v3327_v53  ;;  %v3079_v27 = vpop.permute.xlu1 %3078 }
 0x3cf   :  { %v3921_v43 = vpop.permute.xlu0 %3920  ;;  %v3081_v16 = vadd.f32 %v3079_v27, %v3074_v29  ;;  %v3930_v29 = vmul.f32 %v3820_v22, %v8244_v9 }
 0x3d0   :  { %v3333_v24 = vadd.f32 %v10399_v47, %v3330_v59  ;;  %v3923_v8 = vadd.f32 %v3921_v43, %v3917_v61  ;;  %v3945_v43 = vstv %s5144_s22 }
 0x3d1   :  { %v3084_v30 = vadd.f32 %v3083_v14, %v3081_v16 }
 0x3d2   :  { %v3675_v51 = vpop.permute.xlu1 %3674 }
 0x3d3   :  { %v3189_v20 = vpop.permute.xlu0 %3188  ;;  %v3087_v50 = vadd.f32 %v10400_v4, %v3084_v30  ;;  %v3677_v25 = vadd.f32 %v3675_v51, %v3671_v21  ;;  %v5413_v51 = vld [vmem:[%s10403_s11 + $0x30] ss:$0 sps:$4 sm:$0x33]  }
 0x3d4   :  { %v3191_v45 = vadd.f32 %v3189_v20, %v3185_v2 }
 0x3d6   :  { %v3927_v19 = vpop.permute.xlu1 %3926  ;;  %v3193_v31 = vadd.f32 %v3192_v57, %v3191_v45  ;;  %v3699_v57 = vstv %s9728_s18 }
 0x3d7   :  { %v3817_v55 = vpop.permute.xlu0 %3816  ;;  %v3929_v17 = vadd.f32 %v3927_v19, %v3923_v8 }
 0x3d8   :  { %v3819_v38 = vadd.f32 %v3817_v55, %v3812_v28 }
 0x3d9   :  { %v3931_v15 = vadd.f32 %v3930_v29, %v3929_v17 }
 0x3da   :  { %v3822_v62 = vadd.f32 %v3821_v58, %v3819_v38  ;;  %v3681_v10 = vpop.permute.xlu1 %3680  ;;  %v4724_v58 = vsel %vm4722_vm1, %v5413_v51, 0 }
 0x3db   :  { %v3571_v54 = vpop.permute.xlu0 %3570  ;;  %v3683_v18 = vadd.f32 %v3681_v10, %v3677_v25 }
 0x3dc   :  { %v3573_v63 = vadd.f32 %v3571_v54, %v3566_v60  ;;  %v3825_v61 = vadd.f32 %v10401_v11, %v3822_v62  ;;  %v5414_v62 = vld [vmem:[%s10403_s11 + $0x28] sm:$0xff]  }
 0x3dd   :  { %v3685_v32 = vadd.f32 %v3684_v35, %v3683_v18 }
 0x3de   :  { %v3576_v40 = vadd.f32 %v3575_v46, %v3573_v63  ;;  %v3197_v56 = vpop.permute.xlu1 %3196 }
 0x3df   :  { %v3443_v13 = vpop.permute.xlu0 %3442  ;;  %v3199_v3 = vadd.f32 %v3197_v56, %v3193_v31  ;;  %v5416_v56 = vld [vmem:[%s10403_s11 + $0x18] sm:$0xff]  }
 0x3e0   :  { %v3579_v39 = vadd.f32 %v10402_v42, %v3576_v40  ;;  %v3445_v0 = vadd.f32 %v3443_v13, %v3439_v33  ;;  %v5415_v40 = vld [vmem:[%s10403_s11 + $0x20] sm:$0xff]  }
 0x3e1   :  { %v5145_v13 = vld [vmem:[%s10404_s28] ss:$0 sm:$0xff] }
 0x3e2   :  { %v3449_v28 = vpop.permute.xlu1 %3448 }
 0x3e3   :  { %v3338_v21 = vpop.permute.xlu0 %3337  ;;  %v3451_v26 = vadd.f32 %v3449_v28, %v3445_v0 }
 0x3e4   :  { %v3340_v34 = vadd.f32 %v3338_v21, %v3333_v24 }
 0x3e5   :  { %v3456_v37 = vadd.f32 %v3453_v1, %v3451_v26 }
 0x3e6   :  { %v3454_v9 = vadd.f32 %v3453_v1, %v3340_v34  ;;  %v3092_v12 = vpop.permute.xlu1 %3091 }
 0x3e7   :  { %v3457_v52 = vmax.f32 %v3456_v37, 0.0  ;;  %v3935_v60 = vpop.permute.xlu0 %3934  ;;  %v3094_v23 = vadd.f32 %v3092_v12, %v3087_v50  ;;  %v5418_v37 = vld [vmem:[%s10403_s11 + $0x8] sm:$0xff]  }
 0x3e8   :  { %v3455_v41 = vmax.f32 %v3454_v9, 0.0  ;;  %v3937_v59 = vadd.f32 %v3935_v60, %v3931_v15  ;;  %v5419_v9 = vld [vmem:[%s10403_s11] sm:$0xff]  }
 0x3e9   :  { %v3208_v36 = vadd.f32 %v3207_v7, %v3094_v23 }
 0x3ea   :  { %v3458_v6 = vmax.f32 %v3455_v41, %v3457_v52  ;;  %v3689_v5 = vpop.permute.xlu1 %3688 }
 0x3eb   :  { %v3203_v48 = vpop.permute.xlu0 %3202  ;;  %v3209_v24 = vmax.f32 %v3208_v36, 0.0  ;;  %v3691_v20 = vadd.f32 %v3689_v5, %v3685_v32 }
 0x3ec   :  { %v3459_v53 = vpack.c.bf16 %v3458_v6, %v3458_v6  ;;  %v3205_v33 = vadd.f32 %v3203_v48, %v3199_v3 }
 0x3ee   :  { %v3210_v27 = vadd.f32 %v3207_v7, %v3205_v33  ;;  %5214 = vmatprep.mubr.msk.bf16.mxu0 %vm3952_vm0, %v3459_v53  ;;  %v3941_v14 = vpop.permute.xlu1 %3940 }
 0x3ef   :  { %v3830_v16 = vpop.permute.xlu0 %3829  ;;  %v3943_v47 = vadd.f32 %v3941_v14, %v3937_v59 }
 0x3f0   :  { %v3211_v30 = vmax.f32 %v3210_v27, 0.0  ;;  %v3832_v2 = vadd.f32 %v3830_v16, %v3825_v61 }
 0x3f1   :  { %v3948_v4 = vadd.f32 %v3945_v43, %v3943_v47 }
 0x3f2   :  { %v3212_v50 = vmax.f32 %v3209_v24, %v3211_v30  ;;  %v3946_v45 = vadd.f32 %v3945_v43, %v3832_v2  ;;  %v3695_v8 = vpop.permute.xlu1 %3694 }
 0x3f3   :  { %v3949_v22 = vmax.f32 %v3948_v4, 0.0  ;;  %v3584_v19 = vpop.permute.xlu0 %3583  ;;  %v3697_v31 = vadd.f32 %v3695_v8, %v3691_v20 }
 0x3f4   :  { %v3213_v55 = vpack.c.bf16 %v3212_v50, %v3212_v50  ;;  %v3947_v17 = vmax.f32 %v3946_v45, 0.0  ;;  %v3586_v29 = vadd.f32 %v3584_v19, %v3579_v39  ;;  %v5417_v39 = vld [vmem:[%s10403_s11 + $0x10] sm:$0xff]  }
 0x3f5   :  { %v3702_v38 = vadd.f32 %v3699_v57, %v3697_v31 }
 0x3f6   :  { %v3950_v25 = vmax.f32 %v3947_v17, %v3949_v22  ;;  %v3700_v44 = vadd.f32 %v3699_v57, %v3586_v29  ;;  %5215 = vmatmul.mubr.msk.bf16.vlgmr.msra.gmra.mxu0 %vm3952_vm0, %v3213_v55 }
 0x3f7   :  { %v3703_v15 = vmax.f32 %v3702_v38, 0.0  ;;  %5324 = vmatpush3.bf16.msra.mxu0 %v4724_v58  ;;  %5337 = vmatprep.mubr.msk.bf16.mxu0 %vm5506_vm2, %v5505_v49 }
 0x3f8   :  { %v3951_v10 = vpack.c.bf16 %v3950_v25, %v3950_v25  ;;  %v3701_v54 = vmax.f32 %v3700_v44, 0.0  ;;  %5325 = vmatprep.subr.bf16.mxu0 %v5505_v49 }
 0x3fa   :  { %v3704_v18 = vmax.f32 %v3701_v54, %v3703_v15  ;;  %5216 = vmatprep.mubr.msk.bf16.mxu1 %vm3952_vm0, %v3951_v10 }
 0x3fb   :  { %5326 = vmatpush3.bf16.msra.mxu0 %v5414_v62 }
 0x3fc   :  { %v3705_v35 = vpack.c.bf16 %v3704_v18, %v3704_v18  ;;  %5327 = vmatprep.subr.bf16.mxu0 %v5505_v49 }
 0x3fe   :  { %5217 = vmatmul.mubr.msk.bf16.vlgmr.msra.gmra.mxu1 %vm3952_vm0, %v3705_v35 }
 0x3ff   :  { %5328 = vmatpush3.bf16.msra.mxu0 %v5415_v40 }
 0x400   :  { %5329 = vmatprep.subr.bf16.mxu0 %v5505_v49 }
 0x403   :  { %5330 = vmatpush3.bf16.msra.mxu0 %v5416_v56 }
 0x404   :  { %5331 = vmatprep.subr.bf16.mxu0 %v5505_v49 }
 0x407   :  { %5332 = vmatpush3.bf16.msra.mxu0 %v5417_v39 }
 0x408   :  { %5333 = vmatprep.subr.bf16.mxu0 %v5505_v49 }
 0x40b   :  { %5334 = vmatpush3.bf16.msra.mxu0 %v5418_v37 }
 0x40c   :  { %5335 = vmatprep.subr.bf16.mxu0 %v5505_v49  ;;  %v5218_v49 = vld [vmem:[%s10405_s24] ss:$0 sm:$0xff] }
 0x40f   :  { %5336 = vmatpush3.bf16.msra.mxu0 %v5419_v9 }
 0x42a   :  { %v5243_v46 = vpop.f32.mrf.mxu0 }
 0x42c   :  { %v5244_v63 = vpop.f32.mrf.mxu0 }
 0x42d   :  { %v5245_v11 = vadd.f32 %v5244_v63, %v5243_v46 }
 0x42e   :  { %v5246_v61 = vpop.f32.mrf.mxu0 }
 0x42f   :  { %v4532_v1 = vadd.f32 %v5245_v11, %v5145_v13 }
 0x430   :  { %v5247_v32 = vpop.f32.mrf.mxu0 }
 0x43e   :  { %v5265_v42 = vpop.f32.mrf.mxu1 }
 0x440   :  { %v5266_v0 = vpop.f32.mrf.mxu1 }
 0x441   :  { %v5267_v28 = vadd.f32 %v5266_v0, %v5265_v42 }
 0x442   :  { %v5268_v21 = vpop.f32.mrf.mxu1 }
 0x443   :  { %v4572_v26 = vadd.f32 %v5267_v28, %v4532_v1 }
 0x444   :  { %v5269_v34 = vpop.f32.mrf.mxu1 }
 0x4b6   :  { %v5287_v12 = vpop.f32.mrf.mxu0 }
 0x4b8   :  { %v5288_v52 = vpop.f32.mrf.mxu0 }
 0x4b9   :  { %v5289_v23 = vadd.f32 %v5288_v52, %v5287_v12 }
 0x4ba   :  { %v5290_v60 = vpop.f32.mrf.mxu0 }
 0x4bb   :  { %v4612_v6 = vadd.f32 %v5289_v23, %v4572_v26 }
 0x4bc   :  { %v5291_v41 = vpop.f32.mrf.mxu0 }
 0x4be   :  { %v5309_v7 = vpop.f32.mrf.mxu1 }
 0x4c0   :  { %v5310_v3 = vpop.f32.mrf.mxu1 }
 0x4c1   :  { %v5311_v5 = vadd.f32 %v5310_v3, %v5309_v7 }
 0x4c2   :  { %v5312_v48 = vpop.f32.mrf.mxu1 }
 0x4c3   :  { %v4652_v53 = vadd.f32 %v5311_v5, %v4612_v6 }
 0x4c4   :  { %v5313_v36 = vpop.f32.mrf.mxu1 }
 0x4c5   :  { %v4657_v33 = vmax.f32 %v4652_v53, 0.0 }
 0x4c7   :  { %v4658_v59 = vpack.c.bf16 %v4657_v33, %v4657_v33 }
 0x4c9   :  { %5338 = vmatmul.mubr.msk.bf16.vlgmr.msra.gmra.mxu0 %vm4718_vm3, %v4658_v59 }
 0x589   :  { %v4760_v27 = vpop.f32.mrf.mxu0 }
 0x58a   :  { %v4761_v43 = vadd.f32 %v5218_v49, %v4760_v27 }
 0x58b   :  { %v5339_v14 = vpop.f32.mrf.mxu0 }
 0x58c   :  { %4766 = vst [vmem:[%s10406_s14] sm:$0xff] %v4761_v43 }
 0x58d   :  { %v4763_v16 = vpop.f32.mrf.mxu0 }
 0x58f   :  { %v5340_v47 = vpop.f32.mrf.mxu0 }
 0x590   :  { %4771 = vsyncpa [#allocation3], 1 }
 0x591   :  { %4772 = vsyncpa [#allocation5], 1 }
 0x592   :  { %4773 = vsyncpa [#allocation8], 1 }

</bundles_post_ra>
